<compile_context>
chip_gen: v6e
topology: v6e:2x2x1
jax: 0.10.0
libtpu: 0.0.40
codegen_flags: <defaults>
</compile_context>

<pallas_src>
import math

import numpy as np
import jax
import jax.numpy as jnp
from jax.experimental import pallas as pl
from jax.experimental.pallas import tpu as pltpu

EPS = 1e-5        # torch.nn.LayerNorm default eps
LANE = 128        # TPU lane width
NEG_INF = -1e30   # finite "-inf" for the key padding mask (no NaN if a row is fully masked)


def _round_up(n, m):
    return ((n + m - 1) // m) * m


def _pad(a, shape):
    return jnp.pad(a, [(0, t - s) for s, t in zip(a.shape, shape)])


def build_sincos_tables(seq_len, d_model, kp):
    """Fused table [S | C], S[i,k]=sin(i*w_k), C[i,k]=cos(i*w_k), zero-padded to kp lanes each."""
    half = d_model // 2
    k = np.arange(half, dtype=np.float64)
    inv_freq = np.exp(-(math.log(10000.0) / d_model) * (2.0 * k))
    ang = np.arange(seq_len, dtype=np.float64)[:, None] * inv_freq[None, :]
    tab = np.zeros((seq_len, 2 * kp), np.float32)
    tab[:, :half] = np.sin(ang)
    tab[:, kp:kp + half] = np.cos(ang)
    return jnp.asarray(tab)


# ----------------------------------------------------------------------------------
# Parameters: generated in "math layout" (y = x @ W + b, W is (in, out)) and packed /
# zero-padded into lane-dense kernel layouts, stacked over layers.
# ----------------------------------------------------------------------------------
SMALL_NAMES = ["lnw", "lnb", "bias_d", "bias_f", "in_b", "bias_u", "bias_v", "dw_w"]
BIG_NAMES = ["ffm_w1", "ffm_w2", "in_w", "posw", "out_w", "pw1_w", "pw2_w", "ff_w1", "ff_w2"]


def make_params(key, vocabs, d_model, num_heads, dim_ff, kernel_size, num_layers,
                mxu_dtype=jnp.bfloat16):
    D, H, F, K, L = d_model, num_heads, dim_ff, kernel_size, num_layers
    assert D % H == 0 and D % 2 == 0
    dh = D // H
    DP = _round_up(D, LANE)
    FP = _round_up(F, LANE)
    DHP = _round_up(dh, LANE)
    KP = _round_up(D // 2, LANE)

    cnt = [0]

    def nxt():
        cnt[0] += 1
        return jax.random.fold_in(key, cnt[0])

    def w(shape, fan_in):
        return jax.random.normal(nxt(), shape, jnp.float32) / np.sqrt(fan_in)

    def bvec(n):
        return jax.random.normal(nxt(), (n,), jnp.float32) * 0.01

    ones_d = _pad(jnp.ones((D,), jnp.float32), (DP,))   # padded gamma (pads = 0)
    zeros_d = jnp.zeros((DP,), jnp.float32)

    per_layer = {n: [] for n in SMALL_NAMES + BIG_NAMES}

    for _ in range(L):
        ffm_w1 = w((D, F), D); ffm_b1 = bvec(F)
        ffm_w2 = w((F, D), F); ffm_b2 = bvec(D)
        in_w_m = w((D, 3 * D), D); in_b_m = bvec(3 * D)
        out_w_m = w((D, D), D); out_b_m = bvec(D)
        pos_w_m = w((D, D), D)                       # linear_pos (no bias), math layout
        pbu = w((H, dh), dh); pbv = w((H, dh), dh)   # pos_bias_u / pos_bias_v
        pw1_m = w((D, 2 * D), D); pw1_b = bvec(2 * D)
        dw_m = w((K, D), K); dw_b = bvec(D)          # dw_m[k, c] == torch depthwise W[c, 0, k]
        pw2_m = w((D, D), D); pw2_b = bvec(D)
        ff_w1 = w((D, F), D); ff_b1 = bvec(F)
        ff_w2 = w((F, D), F); ff_b2 = bvec(D)

        # LayerNorm params: [ff_macaron, mha, conv, conv-inner, ff, final]
        per_layer["lnw"].append(jnp.stack([ones_d] * 6))
        per_layer["lnb"].append(jnp.stack([zeros_d] * 6))
        # D-sized biases: [ffm_b2, out_proj_b, pw1_bA, pw1_bB, dw_b, pw2_b, ff_b2]
        per_layer["bias_d"].append(jnp.stack([
            _pad(ffm_b2, (DP,)), _pad(out_b_m, (DP,)),
            _pad(pw1_b[:D], (DP,)), _pad(pw1_b[D:], (DP,)),
            _pad(dw_b, (DP,)), _pad(pw2_b, (DP,)), _pad(ff_b2, (DP,))]))
        per_layer["bias_f"].append(jnp.stack([_pad(ffm_b1, (FP,)), _pad(ff_b1, (FP,))]))
        per_layer["ffm_w1"].append(_pad(ffm_w1, (DP, FP)))
        per_layer["ffm_w2"].append(_pad(ffm_w2, (FP, DP)))

        # in_proj packed per head: column blocks [q_0..q_{H-1}, k_0.., v_0..], each DHP wide
        in_blocks, inb_blocks = [], []
        for part in range(3):
            for hh in range(H):
                c0 = part * D + hh * dh
                in_blocks.append(_pad(in_w_m[:, c0:c0 + dh], (DP, DHP)))
                inb_blocks.append(_pad(in_b_m[c0:c0 + dh], (DHP,)))
        per_layer["in_w"].append(jnp.concatenate(in_blocks, axis=1))
        per_layer["in_b"].append(jnp.concatenate(inb_blocks)[None, :])
        per_layer["bias_u"].append(_pad(pbu, (H, DHP)))
        per_layer["bias_v"].append(_pad(pbv, (H, DHP)))
        # fused rel-pos weight per head: [we_h | wo_h], even/odd input rows of linear_pos
        posw_blocks = []
        for hh in range(H):
            we_h = _pad(pos_w_m[0::2, hh * dh:(hh + 1) * dh].T, (DHP, KP))
            wo_h = _pad(pos_w_m[1::2, hh * dh:(hh + 1) * dh].T, (DHP, KP))
            posw_blocks.append(jnp.concatenate([we_h, wo_h], axis=1))
        per_layer["posw"].append(jnp.concatenate(posw_blocks, axis=1))      # (DHP, H*2*KP)
        per_layer["out_w"].append(jnp.concatenate(
            [_pad(out_w_m[hh * dh:(hh + 1) * dh, :], (DHP, DP)) for hh in range(H)],
            axis=0))                                                         # (H*DHP, DP)
        per_layer["pw1_w"].append(jnp.concatenate(
            [_pad(pw1_m[:, :D], (DP, DP)), _pad(pw1_m[:, D:], (DP, DP))], axis=1))
        per_layer["dw_w"].append(_pad(dw_m, (K, DP)))
        per_layer["pw2_w"].append(_pad(pw2_m, (DP, DP)))
        per_layer["ff_w1"].append(_pad(ff_w1, (DP, FP)))
        per_layer["ff_w2"].append(_pad(ff_w2, (FP, DP)))

    big_set = set(BIG_NAMES)
    stack = {}
    for n in SMALL_NAMES + BIG_NAMES:
        arr = jnp.stack(per_layer[n], axis=0)
        stack[n] = arr.astype(mxu_dtype) if n in big_set else arr

    emb = jax.random.normal(nxt(), (vocabs, D), jnp.float32) * (D ** -0.5)

    proj_w_m = w((D, 2 * D), D)
    proj_b_m = bvec(2 * D)
    proj_w = jnp.concatenate([_pad(proj_w_m[:, :D], (DP, DP)),
                              _pad(proj_w_m[:, D:], (DP, DP))], axis=1).astype(mxu_dtype)
    proj_b = jnp.concatenate([_pad(proj_b_m[:D], (DP,)), _pad(proj_b_m[D:], (DP,))])[None, :]

    return {
        "cfg": dict(d_model=D, num_heads=H, dim_ff=F, kernel_size=K, num_layers=L,
                    DP=DP, FP=FP, DHP=DHP, KP=KP, mxu_dtype=mxu_dtype),
        "emb": _pad(emb, (vocabs, DP)),
        "stack": stack,
        "an_w": ones_d[None, :],
        "an_b": zeros_d[None, :],
        "proj_w": proj_w,
        "proj_b": proj_b,
    }


# ----------------------------------------------------------------------------------
# Fused encoder kernel: grid = (batch_tiles, layer); batch "parallel", layer "arbitrary".
# Big weight stacks are constant blocks -> DMA'd into VMEM once for the whole grid.
# ----------------------------------------------------------------------------------
def _encoder_pallas(params, x, kpneg, pos_col, sc_tab, T_valid, NB, T_pad):
    cfg = params["cfg"]
    D = cfg["d_model"]; H = cfg["num_heads"]; K = cfg["kernel_size"]; L = cfg["num_layers"]
    DP = cfg["DP"]; DHP = cfg["DHP"]; KP = cfg["KP"]
    mxu_dtype = cfg["mxu_dtype"]
    dh = D // H
    nbt = x.shape[0]                 # number of batch tiles (parallel grid axis)
    R = NB * T_pad                   # flattened rows per grid step
    pad_k = (K - 1) // 2
    inv_d = 1.0 / float(D)
    att_scale = float(dh) ** (-0.5)
    st = params["stack"]

    def _dot(a, b):
        return jnp.dot(a.astype(mxu_dtype), b.astype(mxu_dtype),
                       preferred_element_type=jnp.float32)

    def _dot_nt(a, b):  # contract the last dim of both operands (a @ b^T) without transpose
        return jax.lax.dot_general(
            a.astype(mxu_dtype), b.astype(mxu_dtype),
            dimension_numbers=(((1,), (1,)), ((), ())),
            preferred_element_type=jnp.float32)

    def _swish(v):
        return v * jax.nn.sigmoid(v)

    def kernel(x_ref, kpneg_ref, pos_ref, sc_ref,
               lnw, lnb, bias_d, bias_f, in_b, bias_u, bias_v, dw_w,
               ffm_w1, ffm_w2, in_w, posw, out_w, pw1_w, pw2_w, ff_w1, ff_w2,
               an_w, an_b, proj_w, proj_b,
               y_ref, stats_ref, xcur):
        l = pl.program_id(1)
        last = pl.num_programs(1) - 1

        @pl.when(l == 0)
        def _():
            xcur[...] = x_ref[...]

        x_c = xcur[...]  # (R, DP) f32, running activation for this batch tile

        # lane-validity mask: only the first D lanes are real features
        col_valid = (jax.lax.broadcasted_iota(jnp.int32, (1, DP), 1) < D).astype(jnp.float32)

        def _ln(v, w_, b_):
            # Centered two-pass LayerNorm over the true D features (padded lanes masked).
            mu = jnp.sum(v, axis=-1, keepdims=True) * inv_d
            diff = (v - mu) * col_valid
            var = jnp.sum(diff * diff, axis=-1, keepdims=True) * inv_d
            return diff * jax.lax.rsqrt(var + EPS) * w_ + b_

        def ln_i(v, i):
            return _ln(v, lnw[i:i + 1, :], lnb[i:i + 1, :])

        # ---- macaron feed-forward (residual scale 0.5) ----
        h = ln_i(x_c, 0)
        h = _swish(_dot(h, ffm_w1[l]) + bias_f[0:1, :])
        h = _dot(h, ffm_w2[l]) + bias_d[0:1, :]
        x_c = x_c + 0.5 * h

        # ---- relative-position multi-head self-attention ----
        hm = ln_i(x_c, 1)
        qkv = _dot(hm, in_w[l]) + in_b[...]                # (R, 3*H*DHP)
        tab = sc_ref[...]                                  # (T_pad, 2*KP) = [S | C]
        s_tab = tab[:, :KP]
        c_tab = tab[:, KP:]
        posw_l = posw[l]                                   # (DHP, H*2*KP) bf16
        outw_l = out_w[l]                                  # (H*DHP, DP)   bf16
        kp_all = kpneg_ref[...]                            # (NB, T_pad): 0 keep / -1e30 pad
        att_rows = []
        for nb in range(NB):                               # static unroll over sequences
            r0 = nb * T_pad
            neg = kp_all[nb:nb + 1, :]
            att_acc = jnp.zeros((T_pad, DP), jnp.float32)
            for hh in range(H):                            # H == 2: statically unrolled
                q = qkv[r0:r0 + T_pad, hh * DHP:(hh + 1) * DHP]
                k = qkv[r0:r0 + T_pad, (H + hh) * DHP:(H + hh + 1) * DHP]
                v = qkv[r0:r0 + T_pad, (2 * H + hh) * DHP:(2 * H + hh + 1) * DHP]
                qu = q + bias_u[hh:hh + 1, :]
                qv_ = q + bias_v[hh:hh + 1, :]
                ac = _dot_nt(qu, k)                        # (T, T) content scores
                # rel_shift replaced by the exact sinusoidal decomposition, fused to one
                # 256-wide matmul for [ge|go] and one 256-deep dot_nt for bd:
                geo = _dot(qv_, posw_l[:, hh * 2 * KP:(hh + 1) * 2 * KP])   # (T, 2*KP)
                ge = geo[:, :KP]
                go = geo[:, KP:]
                lc = ge * s_tab + go * c_tab
                ls = go * s_tab - ge * c_tab
                bd = _dot_nt(jnp.concatenate([ls, lc], axis=-1), tab)       # ls@S^T + lc@C^T
                w_att = (ac + bd) * att_scale + neg
                w_max = jnp.max(w_att, axis=-1, keepdims=True)
                e = jnp.exp(w_att - w_max)
                den = jnp.sum(e, axis=-1, keepdims=True)
                aw = e * (1.0 / den)                       # exact softmax normalization
                head = _dot(aw, v)                         # (T, DHP)
                # per-head output projection accumulation (no concatenated-heads temp)
                att_acc = att_acc + _dot(head, outw_l[hh * DHP:(hh + 1) * DHP, :])
            att_rows.append(att_acc)
        att = att_rows[0] if NB == 1 else jnp.concatenate(att_rows, axis=0)
        x_c = x_c + att + bias_d[1:2, :]

        # ---- conformer convolution module ----
        h = ln_i(x_c, 2)
        h2 = _dot(h, pw1_w[l])                             # (R, 2*DP)
        g = (h2[:, :DP] + bias_d[2:3, :]) * jax.nn.sigmoid(h2[:, DP:] + bias_d[3:4, :])
        # depthwise conv along time: XLU rolls + static edge masks (no VMEM round-trip).
        # pos = within-sequence position; taps outside [0, T_valid) are zero-padded, so
        # extra (lane-dense) padding frames never bleed into real frames and sequences
        # never bleed into each other.
        pos = pos_ref[...]                                 # (R, 1) f32
        acc = jnp.zeros((R, DP), jnp.float32)
        for kk in range(K):
            s = kk - pad_k
            sh = (-s) % R
            rolled = g if sh == 0 else pltpu.roll(g, shift=sh, axis=0)
            msk = jnp.logical_and(pos + s >= 0, pos + s < T_valid).astype(jnp.float32)
            acc = acc + rolled * msk * dw_w[kk:kk + 1, :]
        h = acc + bias_d[4:5, :]
        h = _swish(ln_i(h, 3))                             # LayerNorm over channels, Swish
        h = _dot(h, pw2_w[l]) + bias_d[5:6, :]
        x_c = x_c + h

        # ---- feed-forward (no 0.5 scale, matching the reference) ----
        h = ln_i(x_c, 4)
        h = _swish(_dot(h, ff_w1[l]) + bias_f[1:2, :])
        h = _dot(h, ff_w2[l]) + bias_d[6:7, :]
        x_c = x_c + h

        # ---- final LayerNorm of the layer ----
        x_c = ln_i(x_c, 5)
        xcur[...] = x_c

        # ---- after_norm + 1x1 conv projection, fused into the last layer step ----
        @pl.when(l == last)
        def _():
            xf = _ln(x_c, an_w[...], an_b[...])
            y_ref[...] = xf
            stats_ref[...] = _dot(xf, proj_w[...]) + proj_b[...]

    def _bspec(a):   # per-batch-tile blocks (index depends on grid axis 0 only)
        tail = a.shape[1:]
        nd = len(tail)
        return pl.BlockSpec((None,) + tail, lambda b, l, _n=nd: (b,) + (0,) * _n)

    def _lspec(a):   # small per-layer params, streamed per layer (few KB each)
        tail = a.shape[1:]
        nd = len(tail)
        return pl.BlockSpec((None,) + tail, lambda b, l, _n=nd: (l,) + (0,) * _n)

    def _cspec(a):   # constant blocks: fetched once for the whole grid, stay VMEM-resident
        nd = a.ndim
        return pl.BlockSpec(a.shape, lambda b, l, _n=nd: (0,) * _n)

    inputs = ([x, kpneg, pos_col, sc_tab]
              + [st[n] for n in SMALL_NAMES]
              + [st[n] for n in BIG_NAMES]
              + [params["an_w"], params["an_b"], params["proj_w"], params["proj_b"]])
    in_specs = ([_bspec(x), _bspec(kpneg), _cspec(pos_col), _cspec(sc_tab)]
                + [_lspec(st[n]) for n in SMALL_NAMES]
                + [_cspec(st[n]) for n in BIG_NAMES]
                + [_cspec(params["an_w"]), _cspec(params["an_b"]),
                   _cspec(params["proj_w"]), _cspec(params["proj_b"])])

    out_shape = (jax.ShapeDtypeStruct((nbt, R, DP), jnp.float32),
                 jax.ShapeDtypeStruct((nbt, R, 2 * DP), jnp.float32))
    out_specs = (pl.BlockSpec((None, R, DP), lambda b, l: (b, 0, 0)),
                 pl.BlockSpec((None, R, 2 * DP), lambda b, l: (b, 0, 0)))

    # TODO(synk): for very large L*weights stacks the resident-weight choice should fall back
    #             to per-layer streaming and the VMEM limit be budgeted per TPU generation.
    return pl.pallas_call(
        kernel,
        out_shape=out_shape,
        grid=(nbt, L),
        in_specs=in_specs,
        out_specs=out_specs,
        scratch_shapes=[pltpu.VMEM((R, DP), jnp.float32)],   # running activation
        compiler_params=pltpu.CompilerParams(
            dimension_semantics=("parallel", "arbitrary"),
            vmem_limit_bytes=32 * 1024 * 1024),              # safe on v5e/v6e/v7x
    )(*inputs)


# ----------------------------------------------------------------------------------
# Full TextEncoder forward
# ----------------------------------------------------------------------------------
def text_encoder_forward(params, x_ids, x_lengths, seq_pad_multiple=128, batch_tile=None):
    cfg = params["cfg"]
    D, DP, KP = cfg["d_model"], cfg["DP"], cfg["KP"]
    B, T = x_ids.shape
    T_pad = _round_up(T, seq_pad_multiple)     # lane-dense scores / stores

    if batch_tile is None:
        # heuristic: enlarge the per-step batch tile only while keeping >= 2 parallel grid
        # steps (megacore / 2 TCs on v7x) and a modest flattened row count.
        NB = 1
        for cand in range(2, B + 1):
            if B % cand == 0 and (B // cand) >= 2 and cand * T_pad <= 512:
                NB = cand
    else:
        NB = batch_tile
    assert B % NB == 0
    nbt = B // NB
    R = NB * T_pad

    # TODO(synk): the embedding lookup is a pure gather; kept as JAX glue outside the kernel.
    x = params["emb"][x_ids].astype(jnp.float32) * math.sqrt(D)   # emb(x) * sqrt(d_model)
    # NOTE: the reference multiplies by sqrt(d_model) AGAIN inside RelPositionalEncoding
    # (xscale). The double scaling is intentional and matches icefall -- do not "fix" it.
    x = x * math.sqrt(D)
    x = jnp.pad(x, ((0, 0), (0, T_pad - T), (0, 0)))              # (B, T_pad, DP)
    x = x.reshape(nbt, R, DP)

    pad_bool_full = jnp.arange(T_pad)[None, :] >= x_lengths[:, None]      # True = padding
    kpneg = jnp.where(pad_bool_full, NEG_INF, 0.0).astype(jnp.float32)
    kpneg = kpneg.reshape(nbt, NB, T_pad)

    pos_col = jnp.asarray((np.arange(R) % T_pad).astype(np.float32)).reshape(R, 1)
    sc_tab = build_sincos_tables(T_pad, D, KP)                            # (T_pad, 2*KP)

    y, stats = _encoder_pallas(params, x, kpneg, pos_col, sc_tab,
                               T_valid=T, NB=NB, T_pad=T_pad)

    y = y.reshape(B, T_pad, DP)
    stats = stats.reshape(B, T_pad, 2 * DP)
    pad_bool = pad_bool_full[:, :T]
    keep = (~pad_bool).astype(jnp.float32)[:, :, None]                    # (B, T, 1)

    x_out = jnp.transpose(y[:, :T, :D], (0, 2, 1))                        # (B, D, T)
    m = jnp.transpose(stats[:, :T, :D] * keep, (0, 2, 1))                 # masked, (B, D, T)
    logs = jnp.transpose(stats[:, :T, DP:DP + D] * keep, (0, 2, 1))       # masked, (B, D, T)
    non_pad_mask = (~pad_bool)[:, None, :]                                # (B, 1, T) bool
    return x_out, m, logs, non_pad_mask


# ----------------------------------------------------------------------------------
# Demo
# ----------------------------------------------------------------------------------
if __name__ == "__main__":
    vocabs, d_model, num_heads, dim_ff, cnn_kernel, num_layers = 50, 32, 2, 64, 5, 2
    B, T = 2, 16

    key = jax.random.PRNGKey(0)
    params = make_params(key, vocabs, d_model, num_heads, dim_ff, cnn_kernel, num_layers)

    x_ids = jax.random.randint(jax.random.fold_in(key, 1000), (B, T), 0, vocabs,
                               dtype=jnp.int32)
    x_lengths = jnp.array([T, 11], dtype=jnp.int32)   # max(x_lengths) == T, as the module asserts

    outs = text_encoder_forward(params, x_ids, x_lengths)
    outs = jax.block_until_ready(outs)
    x_out, m, logs, non_pad = outs

    assert x_out.shape == (B, d_model, T)
    assert m.shape == (B, d_model, T) and logs.shape == (B, d_model, T)
    assert non_pad.shape == (B, 1, T) and non_pad.dtype == jnp.bool_
    assert bool(jnp.all(jnp.isfinite(x_out)))
    assert bool(jnp.all(jnp.isfinite(m))) and bool(jnp.all(jnp.isfinite(logs)))
    print("KERNEL_OK")
</pallas_src>

<mosaic_0001>
module attributes {stable_mosaic.version = 11 : i64} {
  func.func @kernel(%arg0: i32, %arg1: i32, %arg2: memref<1x128x128xf32, #tpu.memory_space<vmem>>, %arg3: memref<1x1x128xf32, #tpu.memory_space<vmem>>, %arg4: memref<128x1xf32, #tpu.memory_space<vmem>>, %arg5: memref<128x256xf32, #tpu.memory_space<vmem>>, %arg6: memref<1x6x128xf32, #tpu.memory_space<vmem>>, %arg7: memref<1x6x128xf32, #tpu.memory_space<vmem>>, %arg8: memref<1x7x128xf32, #tpu.memory_space<vmem>>, %arg9: memref<1x2x128xf32, #tpu.memory_space<vmem>>, %arg10: memref<1x1x768xf32, #tpu.memory_space<vmem>>, %arg11: memref<1x2x128xf32, #tpu.memory_space<vmem>>, %arg12: memref<1x2x128xf32, #tpu.memory_space<vmem>>, %arg13: memref<1x5x128xf32, #tpu.memory_space<vmem>>, %arg14: memref<2x128x128xbf16, #tpu.memory_space<vmem>>, %arg15: memref<2x128x128xbf16, #tpu.memory_space<vmem>>, %arg16: memref<2x128x768xbf16, #tpu.memory_space<vmem>>, %arg17: memref<2x128x512xbf16, #tpu.memory_space<vmem>>, %arg18: memref<2x256x128xbf16, #tpu.memory_space<vmem>>, %arg19: memref<2x128x256xbf16, #tpu.memory_space<vmem>>, %arg20: memref<2x128x128xbf16, #tpu.memory_space<vmem>>, %arg21: memref<2x128x128xbf16, #tpu.memory_space<vmem>>, %arg22: memref<2x128x128xbf16, #tpu.memory_space<vmem>>, %arg23: memref<1x128xf32, #tpu.memory_space<vmem>>, %arg24: memref<1x128xf32, #tpu.memory_space<vmem>>, %arg25: memref<128x256xbf16, #tpu.memory_space<vmem>>, %arg26: memref<1x256xf32, #tpu.memory_space<vmem>>, %arg27: memref<1x128x128xf32, #tpu.memory_space<vmem>>, %arg28: memref<1x128x256xf32, #tpu.memory_space<vmem>>, %arg29: memref<128x128xf32, #tpu.memory_space<vmem>>) attributes {dimension_semantics = [#tpu.dimension_semantics<parallel>, #tpu.dimension_semantics<arbitrary>], iteration_bounds = array<i64: 2, 2>, scalar_prefetch = 0 : i64, scratch_operands = 1 : i64, tpu.core_type = #tpu.core_type<tc>, window_params = [{transform_indices = @transform_0, window_bounds = array<i64: 1, 128, 128>}, {transform_indices = @transform_1, window_bounds = array<i64: 1, 1, 128>}, {pipeline_mode = #tpu.pipeline_mode<synchronous>, transform_indices = @transform_2, window_bounds = array<i64: 128, 1>}, {pipeline_mode = #tpu.pipeline_mode<synchronous>, transform_indices = @transform_3, window_bounds = array<i64: 128, 256>}, {transform_indices = @transform_4, window_bounds = array<i64: 1, 6, 128>}, {transform_indices = @transform_5, window_bounds = array<i64: 1, 6, 128>}, {transform_indices = @transform_6, window_bounds = array<i64: 1, 7, 128>}, {transform_indices = @transform_7, window_bounds = array<i64: 1, 2, 128>}, {transform_indices = @transform_8, window_bounds = array<i64: 1, 1, 768>}, {transform_indices = @transform_9, window_bounds = array<i64: 1, 2, 128>}, {transform_indices = @transform_10, window_bounds = array<i64: 1, 2, 128>}, {transform_indices = @transform_11, window_bounds = array<i64: 1, 5, 128>}, {pipeline_mode = #tpu.pipeline_mode<synchronous>, transform_indices = @transform_12, window_bounds = array<i64: 2, 128, 128>}, {pipeline_mode = #tpu.pipeline_mode<synchronous>, transform_indices = @transform_13, window_bounds = array<i64: 2, 128, 128>}, {pipeline_mode = #tpu.pipeline_mode<synchronous>, transform_indices = @transform_14, window_bounds = array<i64: 2, 128, 768>}, {pipeline_mode = #tpu.pipeline_mode<synchronous>, transform_indices = @transform_15, window_bounds = array<i64: 2, 128, 512>}, {pipeline_mode = #tpu.pipeline_mode<synchronous>, transform_indices = @transform_16, window_bounds = array<i64: 2, 256, 128>}, {pipeline_mode = #tpu.pipeline_mode<synchronous>, transform_indices = @transform_17, window_bounds = array<i64: 2, 128, 256>}, {pipeline_mode = #tpu.pipeline_mode<synchronous>, transform_indices = @transform_18, window_bounds = array<i64: 2, 128, 128>}, {pipeline_mode = #tpu.pipeline_mode<synchronous>, transform_indices = @transform_19, window_bounds = array<i64: 2, 128, 128>}, {pipeline_mode = #tpu.pipeline_mode<synchronous>, transform_indices = @transform_20, window_bounds = array<i64: 2, 128, 128>}, {pipeline_mode = #tpu.pipeline_mode<synchronous>, transform_indices = @transform_21, window_bounds = array<i64: 1, 128>}, {pipeline_mode = #tpu.pipeline_mode<synchronous>, transform_indices = @transform_22, window_bounds = array<i64: 1, 128>}, {pipeline_mode = #tpu.pipeline_mode<synchronous>, transform_indices = @transform_23, window_bounds = array<i64: 128, 256>}, {pipeline_mode = #tpu.pipeline_mode<synchronous>, transform_indices = @transform_24, window_bounds = array<i64: 1, 256>}, {transform_indices = @transform_25, window_bounds = array<i64: 1, 128, 128>}, {transform_indices = @transform_26, window_bounds = array<i64: 1, 128, 256>}]} {
    %c0_i32 = arith.constant 0 : i32
    %0 = arith.cmpi eq, %arg1, %c0_i32 : i32
    %1 = arith.extui %0 : i1 to i32
    %c0_i32_0 = arith.constant 0 : i32
    %2 = arith.cmpi ne, %1, %c0_i32_0 : i32
    scf.if %2 {
      %c0_199 = arith.constant 0 : index
      %c0_200 = arith.constant 0 : index
      %c0_201 = arith.constant 0 : index
      %488 = vector.load %arg2[%c0_199, %c0_200, %c0_201] : memref<1x128x128xf32, #tpu.memory_space<vmem>>, vector<1x128x128xf32>
      %489 = vector.shape_cast %488 : vector<1x128x128xf32> to vector<128x128xf32>
      %c0_202 = arith.constant 0 : index
      %c0_203 = arith.constant 0 : index
      %490 = vector.load %arg29[%c0_202, %c0_203] : memref<128x128xf32, #tpu.memory_space<vmem>>, vector<128x128xf32>
      tpu.vector_store %arg29[%c0_202, %c0_203], %489 {strides = array<i32>} : memref<128x128xf32, #tpu.memory_space<vmem>>, vector<128x128xf32>,
    } else {
    }
    %c0 = arith.constant 0 : index
    %c0_1 = arith.constant 0 : index
    %3 = vector.load %arg29[%c0, %c0_1] : memref<128x128xf32, #tpu.memory_space<vmem>>, vector<128x128xf32>
    %4 = tpu.iota {dimensions = array<i32: 1>} : vector<1x128xi32>
    %c32_i32 = arith.constant 32 : i32
    %5 = vector.broadcast %c32_i32 : i32 to vector<1x128xi32>
    %6 = arith.cmpi slt, %4, %5 : vector<1x128xi32>
    %7 = arith.extui %6 : vector<1x128xi1> to vector<1x128xi32>
    %8 = arith.sitofp %7 : vector<1x128xi32> to vector<1x128xf32>
    %c0_2 = arith.constant 0 : index
    %c0_3 = arith.constant 0 : index
    %c0_4 = arith.constant 0 : index
    %9 = vector.load %arg6[%c0_2, %c0_3, %c0_4] : memref<1x6x128xf32, #tpu.memory_space<vmem>>, vector<1x1x128xf32>
    %10 = vector.shape_cast %9 : vector<1x1x128xf32> to vector<1x128xf32>
    %c0_5 = arith.constant 0 : index
    %c0_6 = arith.constant 0 : index
    %c0_7 = arith.constant 0 : index
    %11 = vector.load %arg7[%c0_5, %c0_6, %c0_7] : memref<1x6x128xf32, #tpu.memory_space<vmem>>, vector<1x1x128xf32>
    %12 = vector.shape_cast %11 : vector<1x1x128xf32> to vector<1x128xf32>
    %cst = arith.constant dense<0.000000e+00> : vector<128xf32>
    %13 = vector.multi_reduction <add>, %3, %cst [1] : vector<128x128xf32> to vector<128xf32>
    %14 = vector.shape_cast %13 : vector<128xf32> to vector<128x1xf32>
    %cst_8 = arith.constant 3.125000e-02 : f32
    %15 = vector.broadcast %cst_8 : f32 to vector<128x1xf32>
    %16 = arith.mulf %14, %15 : vector<128x1xf32>
    %17 = vector.broadcast %16 : vector<128x1xf32> to vector<128x128xf32>
    %18 = arith.subf %3, %17 : vector<128x128xf32>
    %19 = vector.broadcast %8 : vector<1x128xf32> to vector<128x128xf32>
    %20 = arith.mulf %18, %19 : vector<128x128xf32>
    %21 = arith.mulf %20, %20 : vector<128x128xf32>
    %cst_9 = arith.constant dense<0.000000e+00> : vector<128xf32>
    %22 = vector.multi_reduction <add>, %21, %cst_9 [1] : vector<128x128xf32> to vector<128xf32>
    %23 = vector.shape_cast %22 : vector<128xf32> to vector<128x1xf32>
    %cst_10 = arith.constant 3.125000e-02 : f32
    %24 = vector.broadcast %cst_10 : f32 to vector<128x1xf32>
    %25 = arith.mulf %23, %24 : vector<128x1xf32>
    %cst_11 = arith.constant 9.99999974E-6 : f32
    %26 = vector.broadcast %cst_11 : f32 to vector<128x1xf32>
    %27 = arith.addf %25, %26 : vector<128x1xf32>
    %28 = math.rsqrt %27 : vector<128x1xf32>
    %29 = vector.broadcast %28 : vector<128x1xf32> to vector<128x128xf32>
    %30 = arith.mulf %20, %29 : vector<128x128xf32>
    %31 = vector.broadcast %10 : vector<1x128xf32> to vector<128x128xf32>
    %32 = arith.mulf %30, %31 : vector<128x128xf32>
    %33 = vector.broadcast %12 : vector<1x128xf32> to vector<128x128xf32>
    %34 = arith.addf %32, %33 : vector<128x128xf32>
    %35 = arith.index_cast %arg1 : i32 to index
    %c0_12 = arith.constant 0 : index
    %c0_13 = arith.constant 0 : index
    %36 = vector.load %arg14[%35, %c0_12, %c0_13] : memref<2x128x128xbf16, #tpu.memory_space<vmem>>, vector<1x128x128xbf16>
    %37 = vector.shape_cast %36 : vector<1x128x128xbf16> to vector<128x128xbf16>
    %38 = arith.truncf %34 : vector<128x128xf32> to vector<128x128xbf16>
    %cst_14 = arith.constant dense<0.000000e+00> : vector<128x128xf32>
    %39 = tpu.matmul %38, %37, %cst_14 {dimension_numbers = #tpu.dot_dimension_numbers<[1], [0], [0], [1], [0, 0, 1, 1], [], []>} : vector<128x128xbf16>, vector<128x128xbf16>, vector<128x128xf32> -> vector<128x128xf32>
    %c0_15 = arith.constant 0 : index
    %c0_16 = arith.constant 0 : index
    %c0_17 = arith.constant 0 : index
    %40 = vector.load %arg9[%c0_15, %c0_16, %c0_17] : memref<1x2x128xf32, #tpu.memory_space<vmem>>, vector<1x1x128xf32>
    %41 = vector.shape_cast %40 : vector<1x1x128xf32> to vector<1x128xf32>
    %42 = vector.broadcast %41 : vector<1x128xf32> to vector<128x128xf32>
    %43 = arith.addf %39, %42 : vector<128x128xf32>
    %44 = arith.negf %43 : vector<128x128xf32>
    %45 = math.exp %44 : vector<128x128xf32>
    %cst_18 = arith.constant 1.000000e+00 : f32
    %46 = vector.broadcast %cst_18 : f32 to vector<128x128xf32>
    %47 = arith.addf %46, %45 : vector<128x128xf32>
    %48 = arith.divf %46, %47 : vector<128x128xf32>
    %49 = arith.mulf %43, %48 : vector<128x128xf32>
    %50 = arith.index_cast %arg1 : i32 to index
    %c0_19 = arith.constant 0 : index
    %c0_20 = arith.constant 0 : index
    %51 = vector.load %arg15[%50, %c0_19, %c0_20] : memref<2x128x128xbf16, #tpu.memory_space<vmem>>, vector<1x128x128xbf16>
    %52 = vector.shape_cast %51 : vector<1x128x128xbf16> to vector<128x128xbf16>
    %53 = arith.truncf %49 : vector<128x128xf32> to vector<128x128xbf16>
    %cst_21 = arith.constant dense<0.000000e+00> : vector<128x128xf32>
    %54 = tpu.matmul %53, %52, %cst_21 {dimension_numbers = #tpu.dot_dimension_numbers<[1], [0], [0], [1], [0, 0, 1, 1], [], []>} : vector<128x128xbf16>, vector<128x128xbf16>, vector<128x128xf32> -> vector<128x128xf32>
    %c0_22 = arith.constant 0 : index
    %c0_23 = arith.constant 0 : index
    %c0_24 = arith.constant 0 : index
    %55 = vector.load %arg8[%c0_22, %c0_23, %c0_24] : memref<1x7x128xf32, #tpu.memory_space<vmem>>, vector<1x1x128xf32>
    %56 = vector.shape_cast %55 : vector<1x1x128xf32> to vector<1x128xf32>
    %57 = vector.broadcast %56 : vector<1x128xf32> to vector<128x128xf32>
    %58 = arith.addf %54, %57 : vector<128x128xf32>
    %cst_25 = arith.constant 5.000000e-01 : f32
    %59 = vector.broadcast %cst_25 : f32 to vector<128x128xf32>
    %60 = arith.mulf %59, %58 : vector<128x128xf32>
    %61 = arith.addf %3, %60 : vector<128x128xf32>
    %c0_26 = arith.constant 0 : index
    %c1 = arith.constant 1 : index
    %c0_27 = arith.constant 0 : index
    %62 = vector.load %arg6[%c0_26, %c1, %c0_27] : memref<1x6x128xf32, #tpu.memory_space<vmem>>, vector<1x1x128xf32>
    %63 = vector.shape_cast %62 : vector<1x1x128xf32> to vector<1x128xf32>
    %c0_28 = arith.constant 0 : index
    %c1_29 = arith.constant 1 : index
    %c0_30 = arith.constant 0 : index
    %64 = vector.load %arg7[%c0_28, %c1_29, %c0_30] : memref<1x6x128xf32, #tpu.memory_space<vmem>>, vector<1x1x128xf32>
    %65 = vector.shape_cast %64 : vector<1x1x128xf32> to vector<1x128xf32>
    %cst_31 = arith.constant dense<0.000000e+00> : vector<128xf32>
    %66 = vector.multi_reduction <add>, %61, %cst_31 [1] : vector<128x128xf32> to vector<128xf32>
    %67 = vector.shape_cast %66 : vector<128xf32> to vector<128x1xf32>
    %cst_32 = arith.constant 3.125000e-02 : f32
    %68 = vector.broadcast %cst_32 : f32 to vector<128x1xf32>
    %69 = arith.mulf %67, %68 : vector<128x1xf32>
    %70 = vector.broadcast %69 : vector<128x1xf32> to vector<128x128xf32>
    %71 = arith.subf %61, %70 : vector<128x128xf32>
    %72 = vector.broadcast %8 : vector<1x128xf32> to vector<128x128xf32>
    %73 = arith.mulf %71, %72 : vector<128x128xf32>
    %74 = arith.mulf %73, %73 : vector<128x128xf32>
    %cst_33 = arith.constant dense<0.000000e+00> : vector<128xf32>
    %75 = vector.multi_reduction <add>, %74, %cst_33 [1] : vector<128x128xf32> to vector<128xf32>
    %76 = vector.shape_cast %75 : vector<128xf32> to vector<128x1xf32>
    %cst_34 = arith.constant 3.125000e-02 : f32
    %77 = vector.broadcast %cst_34 : f32 to vector<128x1xf32>
    %78 = arith.mulf %76, %77 : vector<128x1xf32>
    %cst_35 = arith.constant 9.99999974E-6 : f32
    %79 = vector.broadcast %cst_35 : f32 to vector<128x1xf32>
    %80 = arith.addf %78, %79 : vector<128x1xf32>
    %81 = math.rsqrt %80 : vector<128x1xf32>
    %82 = vector.broadcast %81 : vector<128x1xf32> to vector<128x128xf32>
    %83 = arith.mulf %73, %82 : vector<128x128xf32>
    %84 = vector.broadcast %63 : vector<1x128xf32> to vector<128x128xf32>
    %85 = arith.mulf %83, %84 : vector<128x128xf32>
    %86 = vector.broadcast %65 : vector<1x128xf32> to vector<128x128xf32>
    %87 = arith.addf %85, %86 : vector<128x128xf32>
    %88 = arith.index_cast %arg1 : i32 to index
    %c0_36 = arith.constant 0 : index
    %c0_37 = arith.constant 0 : index
    %89 = vector.load %arg16[%88, %c0_36, %c0_37] : memref<2x128x768xbf16, #tpu.memory_space<vmem>>, vector<1x128x768xbf16>
    %90 = vector.shape_cast %89 : vector<1x128x768xbf16> to vector<128x768xbf16>
    %91 = arith.truncf %87 : vector<128x128xf32> to vector<128x128xbf16>
    %cst_38 = arith.constant dense<0.000000e+00> : vector<128x768xf32>
    %92 = tpu.matmul %91, %90, %cst_38 {dimension_numbers = #tpu.dot_dimension_numbers<[1], [0], [0], [1], [0, 0, 1, 1], [], []>} : vector<128x128xbf16>, vector<128x768xbf16>, vector<128x768xf32> -> vector<128x768xf32>
    %c0_39 = arith.constant 0 : index
    %c0_40 = arith.constant 0 : index
    %c0_41 = arith.constant 0 : index
    %93 = vector.load %arg10[%c0_39, %c0_40, %c0_41] : memref<1x1x768xf32, #tpu.memory_space<vmem>>, vector<1x1x768xf32>
    %94 = vector.shape_cast %93 : vector<1x1x768xf32> to vector<1x768xf32>
    %95 = vector.broadcast %94 : vector<1x768xf32> to vector<128x768xf32>
    %96 = arith.addf %92, %95 : vector<128x768xf32>
    %c0_42 = arith.constant 0 : index
    %c0_43 = arith.constant 0 : index
    %97 = vector.load %arg5[%c0_42, %c0_43] : memref<128x256xf32, #tpu.memory_space<vmem>>, vector<128x256xf32>
    %98 = vector.extract_strided_slice %97 {offsets = [0, 0], sizes = [128, 128], strides = [1, 1]} : vector<128x256xf32> to vector<128x128xf32>
    %99 = vector.extract_strided_slice %97 {offsets = [0, 128], sizes = [128, 128], strides = [1, 1]} : vector<128x256xf32> to vector<128x128xf32>
    %100 = arith.index_cast %arg1 : i32 to index
    %c0_44 = arith.constant 0 : index
    %c0_45 = arith.constant 0 : index
    %101 = vector.load %arg17[%100, %c0_44, %c0_45] : memref<2x128x512xbf16, #tpu.memory_space<vmem>>, vector<1x128x512xbf16>
    %102 = vector.shape_cast %101 : vector<1x128x512xbf16> to vector<128x512xbf16>
    %103 = arith.index_cast %arg1 : i32 to index
    %c0_46 = arith.constant 0 : index
    %c0_47 = arith.constant 0 : index
    %104 = vector.load %arg18[%103, %c0_46, %c0_47] : memref<2x256x128xbf16, #tpu.memory_space<vmem>>, vector<1x256x128xbf16>
    %105 = vector.shape_cast %104 : vector<1x256x128xbf16> to vector<256x128xbf16>
    %c0_48 = arith.constant 0 : index
    %c0_49 = arith.constant 0 : index
    %c0_50 = arith.constant 0 : index
    %106 = vector.load %arg3[%c0_48, %c0_49, %c0_50] : memref<1x1x128xf32, #tpu.memory_space<vmem>>, vector<1x1x128xf32>
    %107 = vector.shape_cast %106 : vector<1x1x128xf32> to vector<1x128xf32>
    %cst_51 = arith.constant 0.000000e+00 : f32
    %108 = vector.broadcast %cst_51 : f32 to vector<128x128xf32>
    %109 = vector.extract_strided_slice %96 {offsets = [0, 0], sizes = [128, 128], strides = [1, 1]} : vector<128x768xf32> to vector<128x128xf32>
    %110 = vector.extract_strided_slice %96 {offsets = [0, 256], sizes = [128, 128], strides = [1, 1]} : vector<128x768xf32> to vector<128x128xf32>
    %111 = vector.extract_strided_slice %96 {offsets = [0, 512], sizes = [128, 128], strides = [1, 1]} : vector<128x768xf32> to vector<128x128xf32>
    %c0_52 = arith.constant 0 : index
    %c0_53 = arith.constant 0 : index
    %c0_54 = arith.constant 0 : index
    %112 = vector.load %arg11[%c0_52, %c0_53, %c0_54] : memref<1x2x128xf32, #tpu.memory_space<vmem>>, vector<1x1x128xf32>
    %113 = vector.shape_cast %112 : vector<1x1x128xf32> to vector<1x128xf32>
    %114 = vector.broadcast %113 : vector<1x128xf32> to vector<128x128xf32>
    %115 = arith.addf %109, %114 : vector<128x128xf32>
    %c0_55 = arith.constant 0 : index
    %c0_56 = arith.constant 0 : index
    %c0_57 = arith.constant 0 : index
    %116 = vector.load %arg12[%c0_55, %c0_56, %c0_57] : memref<1x2x128xf32, #tpu.memory_space<vmem>>, vector<1x1x128xf32>
    %117 = vector.shape_cast %116 : vector<1x1x128xf32> to vector<1x128xf32>
    %118 = vector.broadcast %117 : vector<1x128xf32> to vector<128x128xf32>
    %119 = arith.addf %109, %118 : vector<128x128xf32>
    %120 = arith.truncf %115 : vector<128x128xf32> to vector<128x128xbf16>
    %121 = arith.truncf %110 : vector<128x128xf32> to vector<128x128xbf16>
    %cst_58 = arith.constant dense<0.000000e+00> : vector<128x128xf32>
    %122 = tpu.matmul %120, %121, %cst_58 {dimension_numbers = #tpu.dot_dimension_numbers<[1], [1], [0], [0], [0, 0, 1, 0], [], []>} : vector<128x128xbf16>, vector<128x128xbf16>, vector<128x128xf32> -> vector<128x128xf32>
    %123 = vector.extract_strided_slice %102 {offsets = [0, 0], sizes = [128, 256], strides = [1, 1]} : vector<128x512xbf16> to vector<128x256xbf16>
    %124 = arith.truncf %119 : vector<128x128xf32> to vector<128x128xbf16>
    %cst_59 = arith.constant dense<0.000000e+00> : vector<128x256xf32>
    %125 = tpu.matmul %124, %123, %cst_59 {dimension_numbers = #tpu.dot_dimension_numbers<[1], [0], [0], [1], [0, 0, 1, 1], [], []>} : vector<128x128xbf16>, vector<128x256xbf16>, vector<128x256xf32> -> vector<128x256xf32>
    %126 = vector.extract_strided_slice %125 {offsets = [0, 0], sizes = [128, 128], strides = [1, 1]} : vector<128x256xf32> to vector<128x128xf32>
    %127 = vector.extract_strided_slice %125 {offsets = [0, 128], sizes = [128, 128], strides = [1, 1]} : vector<128x256xf32> to vector<128x128xf32>
    %128 = arith.mulf %126, %98 : vector<128x128xf32>
    %129 = arith.mulf %127, %99 : vector<128x128xf32>
    %130 = arith.addf %128, %129 : vector<128x128xf32>
    %131 = arith.mulf %127, %98 : vector<128x128xf32>
    %132 = arith.mulf %126, %99 : vector<128x128xf32>
    %133 = arith.subf %131, %132 : vector<128x128xf32>
    %134 = tpu.concatenate %133, %130 in 1 : vector<128x128xf32>, vector<128x128xf32> -> vector<128x256xf32>
    %135 = arith.truncf %134 : vector<128x256xf32> to vector<128x256xbf16>
    %136 = arith.truncf %97 : vector<128x256xf32> to vector<128x256xbf16>
    %cst_60 = arith.constant dense<0.000000e+00> : vector<128x128xf32>
    %137 = tpu.matmul %135, %136, %cst_60 {dimension_numbers = #tpu.dot_dimension_numbers<[1], [1], [0], [0], [0, 0, 1, 0], [], []>} : vector<128x256xbf16>, vector<128x256xbf16>, vector<128x128xf32> -> vector<128x128xf32>
    %138 = arith.addf %122, %137 : vector<128x128xf32>
    %cst_61 = arith.constant 2.500000e-01 : f32
    %139 = vector.broadcast %cst_61 : f32 to vector<128x128xf32>
    %140 = arith.mulf %138, %139 : vector<128x128xf32>
    %141 = vector.broadcast %107 : vector<1x128xf32> to vector<128x128xf32>
    %142 = arith.addf %140, %141 : vector<128x128xf32>
    %cst_62 = arith.constant dense<0xFF800000> : vector<128xf32>
    %143 = vector.multi_reduction <maximumf>, %142, %cst_62 [1] : vector<128x128xf32> to vector<128xf32>
    %144 = vector.shape_cast %143 : vector<128xf32> to vector<128x1xf32>
    %145 = vector.broadcast %144 : vector<128x1xf32> to vector<128x128xf32>
    %146 = arith.subf %142, %145 : vector<128x128xf32>
    %147 = math.exp %146 : vector<128x128xf32>
    %cst_63 = arith.constant dense<0.000000e+00> : vector<128xf32>
    %148 = vector.multi_reduction <add>, %147, %cst_63 [1] : vector<128x128xf32> to vector<128xf32>
    %149 = vector.shape_cast %148 : vector<128xf32> to vector<128x1xf32>
    %cst_64 = arith.constant 1.000000e+00 : f32
    %150 = vector.broadcast %cst_64 : f32 to vector<128x1xf32>
    %151 = arith.divf %150, %149 : vector<128x1xf32>
    %152 = vector.broadcast %151 : vector<128x1xf32> to vector<128x128xf32>
    %153 = arith.mulf %147, %152 : vector<128x128xf32>
    %154 = arith.truncf %153 : vector<128x128xf32> to vector<128x128xbf16>
    %155 = arith.truncf %111 : vector<128x128xf32> to vector<128x128xbf16>
    %cst_65 = arith.constant dense<0.000000e+00> : vector<128x128xf32>
    %156 = tpu.matmul %154, %155, %cst_65 {dimension_numbers = #tpu.dot_dimension_numbers<[1], [0], [0], [1], [0, 0, 1, 1], [], []>} : vector<128x128xbf16>, vector<128x128xbf16>, vector<128x128xf32> -> vector<128x128xf32>
    %157 = vector.extract_strided_slice %105 {offsets = [0, 0], sizes = [128, 128], strides = [1, 1]} : vector<256x128xbf16> to vector<128x128xbf16>
    %158 = arith.truncf %156 : vector<128x128xf32> to vector<128x128xbf16>
    %cst_66 = arith.constant dense<0.000000e+00> : vector<128x128xf32>
    %159 = tpu.matmul %158, %157, %cst_66 {dimension_numbers = #tpu.dot_dimension_numbers<[1], [0], [0], [1], [0, 0, 1, 1], [], []>} : vector<128x128xbf16>, vector<128x128xbf16>, vector<128x128xf32> -> vector<128x128xf32>
    %160 = arith.addf %108, %159 : vector<128x128xf32>
    %161 = vector.extract_strided_slice %96 {offsets = [0, 128], sizes = [128, 128], strides = [1, 1]} : vector<128x768xf32> to vector<128x128xf32>
    %162 = vector.extract_strided_slice %96 {offsets = [0, 384], sizes = [128, 128], strides = [1, 1]} : vector<128x768xf32> to vector<128x128xf32>
    %163 = vector.extract_strided_slice %96 {offsets = [0, 640], sizes = [128, 128], strides = [1, 1]} : vector<128x768xf32> to vector<128x128xf32>
    %c0_67 = arith.constant 0 : index
    %c1_68 = arith.constant 1 : index
    %c0_69 = arith.constant 0 : index
    %164 = vector.load %arg11[%c0_67, %c1_68, %c0_69] : memref<1x2x128xf32, #tpu.memory_space<vmem>>, vector<1x1x128xf32>
    %165 = vector.shape_cast %164 : vector<1x1x128xf32> to vector<1x128xf32>
    %166 = vector.broadcast %165 : vector<1x128xf32> to vector<128x128xf32>
    %167 = arith.addf %161, %166 : vector<128x128xf32>
    %c0_70 = arith.constant 0 : index
    %c1_71 = arith.constant 1 : index
    %c0_72 = arith.constant 0 : index
    %168 = vector.load %arg12[%c0_70, %c1_71, %c0_72] : memref<1x2x128xf32, #tpu.memory_space<vmem>>, vector<1x1x128xf32>
    %169 = vector.shape_cast %168 : vector<1x1x128xf32> to vector<1x128xf32>
    %170 = vector.broadcast %169 : vector<1x128xf32> to vector<128x128xf32>
    %171 = arith.addf %161, %170 : vector<128x128xf32>
    %172 = arith.truncf %167 : vector<128x128xf32> to vector<128x128xbf16>
    %173 = arith.truncf %162 : vector<128x128xf32> to vector<128x128xbf16>
    %cst_73 = arith.constant dense<0.000000e+00> : vector<128x128xf32>
    %174 = tpu.matmul %172, %173, %cst_73 {dimension_numbers = #tpu.dot_dimension_numbers<[1], [1], [0], [0], [0, 0, 1, 0], [], []>} : vector<128x128xbf16>, vector<128x128xbf16>, vector<128x128xf32> -> vector<128x128xf32>
    %175 = vector.extract_strided_slice %102 {offsets = [0, 256], sizes = [128, 256], strides = [1, 1]} : vector<128x512xbf16> to vector<128x256xbf16>
    %176 = arith.truncf %171 : vector<128x128xf32> to vector<128x128xbf16>
    %cst_74 = arith.constant dense<0.000000e+00> : vector<128x256xf32>
    %177 = tpu.matmul %176, %175, %cst_74 {dimension_numbers = #tpu.dot_dimension_numbers<[1], [0], [0], [1], [0, 0, 1, 1], [], []>} : vector<128x128xbf16>, vector<128x256xbf16>, vector<128x256xf32> -> vector<128x256xf32>
    %178 = vector.extract_strided_slice %177 {offsets = [0, 0], sizes = [128, 128], strides = [1, 1]} : vector<128x256xf32> to vector<128x128xf32>
    %179 = vector.extract_strided_slice %177 {offsets = [0, 128], sizes = [128, 128], strides = [1, 1]} : vector<128x256xf32> to vector<128x128xf32>
    %180 = arith.mulf %178, %98 : vector<128x128xf32>
    %181 = arith.mulf %179, %99 : vector<128x128xf32>
    %182 = arith.addf %180, %181 : vector<128x128xf32>
    %183 = arith.mulf %179, %98 : vector<128x128xf32>
    %184 = arith.mulf %178, %99 : vector<128x128xf32>
    %185 = arith.subf %183, %184 : vector<128x128xf32>
    %186 = tpu.concatenate %185, %182 in 1 : vector<128x128xf32>, vector<128x128xf32> -> vector<128x256xf32>
    %187 = arith.truncf %186 : vector<128x256xf32> to vector<128x256xbf16>
    %188 = arith.truncf %97 : vector<128x256xf32> to vector<128x256xbf16>
    %cst_75 = arith.constant dense<0.000000e+00> : vector<128x128xf32>
    %189 = tpu.matmul %187, %188, %cst_75 {dimension_numbers = #tpu.dot_dimension_numbers<[1], [1], [0], [0], [0, 0, 1, 0], [], []>} : vector<128x256xbf16>, vector<128x256xbf16>, vector<128x128xf32> -> vector<128x128xf32>
    %190 = arith.addf %174, %189 : vector<128x128xf32>
    %cst_76 = arith.constant 2.500000e-01 : f32
    %191 = vector.broadcast %cst_76 : f32 to vector<128x128xf32>
    %192 = arith.mulf %190, %191 : vector<128x128xf32>
    %193 = vector.broadcast %107 : vector<1x128xf32> to vector<128x128xf32>
    %194 = arith.addf %192, %193 : vector<128x128xf32>
    %cst_77 = arith.constant dense<0xFF800000> : vector<128xf32>
    %195 = vector.multi_reduction <maximumf>, %194, %cst_77 [1] : vector<128x128xf32> to vector<128xf32>
    %196 = vector.shape_cast %195 : vector<128xf32> to vector<128x1xf32>
    %197 = vector.broadcast %196 : vector<128x1xf32> to vector<128x128xf32>
    %198 = arith.subf %194, %197 : vector<128x128xf32>
    %199 = math.exp %198 : vector<128x128xf32>
    %cst_78 = arith.constant dense<0.000000e+00> : vector<128xf32>
    %200 = vector.multi_reduction <add>, %199, %cst_78 [1] : vector<128x128xf32> to vector<128xf32>
    %201 = vector.shape_cast %200 : vector<128xf32> to vector<128x1xf32>
    %cst_79 = arith.constant 1.000000e+00 : f32
    %202 = vector.broadcast %cst_79 : f32 to vector<128x1xf32>
    %203 = arith.divf %202, %201 : vector<128x1xf32>
    %204 = vector.broadcast %203 : vector<128x1xf32> to vector<128x128xf32>
    %205 = arith.mulf %199, %204 : vector<128x128xf32>
    %206 = arith.truncf %205 : vector<128x128xf32> to vector<128x128xbf16>
    %207 = arith.truncf %163 : vector<128x128xf32> to vector<128x128xbf16>
    %cst_80 = arith.constant dense<0.000000e+00> : vector<128x128xf32>
    %208 = tpu.matmul %206, %207, %cst_80 {dimension_numbers = #tpu.dot_dimension_numbers<[1], [0], [0], [1], [0, 0, 1, 1], [], []>} : vector<128x128xbf16>, vector<128x128xbf16>, vector<128x128xf32> -> vector<128x128xf32>
    %209 = vector.extract_strided_slice %105 {offsets = [128, 0], sizes = [128, 128], strides = [1, 1]} : vector<256x128xbf16> to vector<128x128xbf16>
    %210 = arith.truncf %208 : vector<128x128xf32> to vector<128x128xbf16>
    %cst_81 = arith.constant dense<0.000000e+00> : vector<128x128xf32>
    %211 = tpu.matmul %210, %209, %cst_81 {dimension_numbers = #tpu.dot_dimension_numbers<[1], [0], [0], [1], [0, 0, 1, 1], [], []>} : vector<128x128xbf16>, vector<128x128xbf16>, vector<128x128xf32> -> vector<128x128xf32>
    %212 = arith.addf %160, %211 : vector<128x128xf32>
    %213 = arith.addf %61, %212 : vector<128x128xf32>
    %c0_82 = arith.constant 0 : index
    %c1_83 = arith.constant 1 : index
    %c0_84 = arith.constant 0 : index
    %214 = vector.load %arg8[%c0_82, %c1_83, %c0_84] : memref<1x7x128xf32, #tpu.memory_space<vmem>>, vector<1x1x128xf32>
    %215 = vector.shape_cast %214 : vector<1x1x128xf32> to vector<1x128xf32>
    %216 = vector.broadcast %215 : vector<1x128xf32> to vector<128x128xf32>
    %217 = arith.addf %213, %216 : vector<128x128xf32>
    %c0_85 = arith.constant 0 : index
    %c2 = arith.constant 2 : index
    %c0_86 = arith.constant 0 : index
    %218 = vector.load %arg6[%c0_85, %c2, %c0_86] : memref<1x6x128xf32, #tpu.memory_space<vmem>>, vector<1x1x128xf32>
    %219 = vector.shape_cast %218 : vector<1x1x128xf32> to vector<1x128xf32>
    %c0_87 = arith.constant 0 : index
    %c2_88 = arith.constant 2 : index
    %c0_89 = arith.constant 0 : index
    %220 = vector.load %arg7[%c0_87, %c2_88, %c0_89] : memref<1x6x128xf32, #tpu.memory_space<vmem>>, vector<1x1x128xf32>
    %221 = vector.shape_cast %220 : vector<1x1x128xf32> to vector<1x128xf32>
    %cst_90 = arith.constant dense<0.000000e+00> : vector<128xf32>
    %222 = vector.multi_reduction <add>, %217, %cst_90 [1] : vector<128x128xf32> to vector<128xf32>
    %223 = vector.shape_cast %222 : vector<128xf32> to vector<128x1xf32>
    %cst_91 = arith.constant 3.125000e-02 : f32
    %224 = vector.broadcast %cst_91 : f32 to vector<128x1xf32>
    %225 = arith.mulf %223, %224 : vector<128x1xf32>
    %226 = vector.broadcast %225 : vector<128x1xf32> to vector<128x128xf32>
    %227 = arith.subf %217, %226 : vector<128x128xf32>
    %228 = vector.broadcast %8 : vector<1x128xf32> to vector<128x128xf32>
    %229 = arith.mulf %227, %228 : vector<128x128xf32>
    %230 = arith.mulf %229, %229 : vector<128x128xf32>
    %cst_92 = arith.constant dense<0.000000e+00> : vector<128xf32>
    %231 = vector.multi_reduction <add>, %230, %cst_92 [1] : vector<128x128xf32> to vector<128xf32>
    %232 = vector.shape_cast %231 : vector<128xf32> to vector<128x1xf32>
    %cst_93 = arith.constant 3.125000e-02 : f32
    %233 = vector.broadcast %cst_93 : f32 to vector<128x1xf32>
    %234 = arith.mulf %232, %233 : vector<128x1xf32>
    %cst_94 = arith.constant 9.99999974E-6 : f32
    %235 = vector.broadcast %cst_94 : f32 to vector<128x1xf32>
    %236 = arith.addf %234, %235 : vector<128x1xf32>
    %237 = math.rsqrt %236 : vector<128x1xf32>
    %238 = vector.broadcast %237 : vector<128x1xf32> to vector<128x128xf32>
    %239 = arith.mulf %229, %238 : vector<128x128xf32>
    %240 = vector.broadcast %219 : vector<1x128xf32> to vector<128x128xf32>
    %241 = arith.mulf %239, %240 : vector<128x128xf32>
    %242 = vector.broadcast %221 : vector<1x128xf32> to vector<128x128xf32>
    %243 = arith.addf %241, %242 : vector<128x128xf32>
    %244 = arith.index_cast %arg1 : i32 to index
    %c0_95 = arith.constant 0 : index
    %c0_96 = arith.constant 0 : index
    %245 = vector.load %arg19[%244, %c0_95, %c0_96] : memref<2x128x256xbf16, #tpu.memory_space<vmem>>, vector<1x128x256xbf16>
    %246 = vector.shape_cast %245 : vector<1x128x256xbf16> to vector<128x256xbf16>
    %247 = arith.truncf %243 : vector<128x128xf32> to vector<128x128xbf16>
    %cst_97 = arith.constant dense<0.000000e+00> : vector<128x256xf32>
    %248 = tpu.matmul %247, %246, %cst_97 {dimension_numbers = #tpu.dot_dimension_numbers<[1], [0], [0], [1], [0, 0, 1, 1], [], []>} : vector<128x128xbf16>, vector<128x256xbf16>, vector<128x256xf32> -> vector<128x256xf32>
    %249 = vector.extract_strided_slice %248 {offsets = [0, 0], sizes = [128, 128], strides = [1, 1]} : vector<128x256xf32> to vector<128x128xf32>
    %c0_98 = arith.constant 0 : index
    %c2_99 = arith.constant 2 : index
    %c0_100 = arith.constant 0 : index
    %250 = vector.load %arg8[%c0_98, %c2_99, %c0_100] : memref<1x7x128xf32, #tpu.memory_space<vmem>>, vector<1x1x128xf32>
    %251 = vector.shape_cast %250 : vector<1x1x128xf32> to vector<1x128xf32>
    %252 = vector.broadcast %251 : vector<1x128xf32> to vector<128x128xf32>
    %253 = arith.addf %249, %252 : vector<128x128xf32>
    %254 = vector.extract_strided_slice %248 {offsets = [0, 128], sizes = [128, 128], strides = [1, 1]} : vector<128x256xf32> to vector<128x128xf32>
    %c0_101 = arith.constant 0 : index
    %c3 = arith.constant 3 : index
    %c0_102 = arith.constant 0 : index
    %255 = vector.load %arg8[%c0_101, %c3, %c0_102] : memref<1x7x128xf32, #tpu.memory_space<vmem>>, vector<1x1x128xf32>
    %256 = vector.shape_cast %255 : vector<1x1x128xf32> to vector<1x128xf32>
    %257 = vector.broadcast %256 : vector<1x128xf32> to vector<128x128xf32>
    %258 = arith.addf %254, %257 : vector<128x128xf32>
    %259 = arith.negf %258 : vector<128x128xf32>
    %260 = math.exp %259 : vector<128x128xf32>
    %cst_103 = arith.constant 1.000000e+00 : f32
    %261 = vector.broadcast %cst_103 : f32 to vector<128x128xf32>
    %262 = arith.addf %261, %260 : vector<128x128xf32>
    %263 = arith.divf %261, %262 : vector<128x128xf32>
    %264 = arith.mulf %253, %263 : vector<128x128xf32>
    %c0_104 = arith.constant 0 : index
    %c0_105 = arith.constant 0 : index
    %265 = vector.load %arg4[%c0_104, %c0_105] : memref<128x1xf32, #tpu.memory_space<vmem>>, vector<128x1xf32>
    %cst_106 = arith.constant 0.000000e+00 : f32
    %266 = vector.broadcast %cst_106 : f32 to vector<128x128xf32>
    %c2_i32 = arith.constant 2 : i32
    %267 = tpu.dynamic_rotate %264 by %c2_i32 dim 0 : vector<128x128xf32>, i32 -> vector<128x128xf32>
    %cst_107 = arith.constant -2.000000e+00 : f32
    %268 = vector.broadcast %cst_107 : f32 to vector<128x1xf32>
    %269 = arith.addf %265, %268 : vector<128x1xf32>
    %cst_108 = arith.constant 0.000000e+00 : f32
    %270 = vector.broadcast %cst_108 : f32 to vector<128x1xf32>
    %271 = arith.cmpf oge, %269, %270 : vector<128x1xf32>
    %cst_109 = arith.constant -2.000000e+00 : f32
    %272 = vector.broadcast %cst_109 : f32 to vector<128x1xf32>
    %273 = arith.addf %265, %272 : vector<128x1xf32>
    %cst_110 = arith.constant 1.600000e+01 : f32
    %274 = vector.broadcast %cst_110 : f32 to vector<128x1xf32>
    %275 = arith.cmpf olt, %273, %274 : vector<128x1xf32>
    %276 = arith.andi %271, %275 : vector<128x1xi1>
    %277 = arith.extui %276 : vector<128x1xi1> to vector<128x1xi32>
    %278 = arith.sitofp %277 : vector<128x1xi32> to vector<128x1xf32>
    %279 = vector.broadcast %278 : vector<128x1xf32> to vector<128x128xf32>
    %280 = arith.mulf %267, %279 : vector<128x128xf32>
    %c0_111 = arith.constant 0 : index
    %c0_112 = arith.constant 0 : index
    %c0_113 = arith.constant 0 : index
    %281 = vector.load %arg13[%c0_111, %c0_112, %c0_113] : memref<1x5x128xf32, #tpu.memory_space<vmem>>, vector<1x1x128xf32>
    %282 = vector.shape_cast %281 : vector<1x1x128xf32> to vector<1x128xf32>
    %283 = vector.broadcast %282 : vector<1x128xf32> to vector<128x128xf32>
    %284 = arith.mulf %280, %283 : vector<128x128xf32>
    %285 = arith.addf %266, %284 : vector<128x128xf32>
    %c1_i32 = arith.constant 1 : i32
    %286 = tpu.dynamic_rotate %264 by %c1_i32 dim 0 : vector<128x128xf32>, i32 -> vector<128x128xf32>
    %cst_114 = arith.constant -1.000000e+00 : f32
    %287 = vector.broadcast %cst_114 : f32 to vector<128x1xf32>
    %288 = arith.addf %265, %287 : vector<128x1xf32>
    %cst_115 = arith.constant 0.000000e+00 : f32
    %289 = vector.broadcast %cst_115 : f32 to vector<128x1xf32>
    %290 = arith.cmpf oge, %288, %289 : vector<128x1xf32>
    %cst_116 = arith.constant -1.000000e+00 : f32
    %291 = vector.broadcast %cst_116 : f32 to vector<128x1xf32>
    %292 = arith.addf %265, %291 : vector<128x1xf32>
    %cst_117 = arith.constant 1.600000e+01 : f32
    %293 = vector.broadcast %cst_117 : f32 to vector<128x1xf32>
    %294 = arith.cmpf olt, %292, %293 : vector<128x1xf32>
    %295 = arith.andi %290, %294 : vector<128x1xi1>
    %296 = arith.extui %295 : vector<128x1xi1> to vector<128x1xi32>
    %297 = arith.sitofp %296 : vector<128x1xi32> to vector<128x1xf32>
    %298 = vector.broadcast %297 : vector<128x1xf32> to vector<128x128xf32>
    %299 = arith.mulf %286, %298 : vector<128x128xf32>
    %c0_118 = arith.constant 0 : index
    %c1_119 = arith.constant 1 : index
    %c0_120 = arith.constant 0 : index
    %300 = vector.load %arg13[%c0_118, %c1_119, %c0_120] : memref<1x5x128xf32, #tpu.memory_space<vmem>>, vector<1x1x128xf32>
    %301 = vector.shape_cast %300 : vector<1x1x128xf32> to vector<1x128xf32>
    %302 = vector.broadcast %301 : vector<1x128xf32> to vector<128x128xf32>
    %303 = arith.mulf %299, %302 : vector<128x128xf32>
    %304 = arith.addf %285, %303 : vector<128x128xf32>
    %cst_121 = arith.constant 0.000000e+00 : f32
    %305 = vector.broadcast %cst_121 : f32 to vector<128x1xf32>
    %306 = arith.addf %265, %305 : vector<128x1xf32>
    %cst_122 = arith.constant 0.000000e+00 : f32
    %307 = vector.broadcast %cst_122 : f32 to vector<128x1xf32>
    %308 = arith.cmpf oge, %306, %307 : vector<128x1xf32>
    %cst_123 = arith.constant 0.000000e+00 : f32
    %309 = vector.broadcast %cst_123 : f32 to vector<128x1xf32>
    %310 = arith.addf %265, %309 : vector<128x1xf32>
    %cst_124 = arith.constant 1.600000e+01 : f32
    %311 = vector.broadcast %cst_124 : f32 to vector<128x1xf32>
    %312 = arith.cmpf olt, %310, %311 : vector<128x1xf32>
    %313 = arith.andi %308, %312 : vector<128x1xi1>
    %314 = arith.extui %313 : vector<128x1xi1> to vector<128x1xi32>
    %315 = arith.sitofp %314 : vector<128x1xi32> to vector<128x1xf32>
    %316 = vector.broadcast %315 : vector<128x1xf32> to vector<128x128xf32>
    %317 = arith.mulf %264, %316 : vector<128x128xf32>
    %c0_125 = arith.constant 0 : index
    %c2_126 = arith.constant 2 : index
    %c0_127 = arith.constant 0 : index
    %318 = vector.load %arg13[%c0_125, %c2_126, %c0_127] : memref<1x5x128xf32, #tpu.memory_space<vmem>>, vector<1x1x128xf32>
    %319 = vector.shape_cast %318 : vector<1x1x128xf32> to vector<1x128xf32>
    %320 = vector.broadcast %319 : vector<1x128xf32> to vector<128x128xf32>
    %321 = arith.mulf %317, %320 : vector<128x128xf32>
    %322 = arith.addf %304, %321 : vector<128x128xf32>
    %c127_i32 = arith.constant 127 : i32
    %323 = tpu.dynamic_rotate %264 by %c127_i32 dim 0 : vector<128x128xf32>, i32 -> vector<128x128xf32>
    %cst_128 = arith.constant 1.000000e+00 : f32
    %324 = vector.broadcast %cst_128 : f32 to vector<128x1xf32>
    %325 = arith.addf %265, %324 : vector<128x1xf32>
    %cst_129 = arith.constant 0.000000e+00 : f32
    %326 = vector.broadcast %cst_129 : f32 to vector<128x1xf32>
    %327 = arith.cmpf oge, %325, %326 : vector<128x1xf32>
    %cst_130 = arith.constant 1.000000e+00 : f32
    %328 = vector.broadcast %cst_130 : f32 to vector<128x1xf32>
    %329 = arith.addf %265, %328 : vector<128x1xf32>
    %cst_131 = arith.constant 1.600000e+01 : f32
    %330 = vector.broadcast %cst_131 : f32 to vector<128x1xf32>
    %331 = arith.cmpf olt, %329, %330 : vector<128x1xf32>
    %332 = arith.andi %327, %331 : vector<128x1xi1>
    %333 = arith.extui %332 : vector<128x1xi1> to vector<128x1xi32>
    %334 = arith.sitofp %333 : vector<128x1xi32> to vector<128x1xf32>
    %335 = vector.broadcast %334 : vector<128x1xf32> to vector<128x128xf32>
    %336 = arith.mulf %323, %335 : vector<128x128xf32>
    %c0_132 = arith.constant 0 : index
    %c3_133 = arith.constant 3 : index
    %c0_134 = arith.constant 0 : index
    %337 = vector.load %arg13[%c0_132, %c3_133, %c0_134] : memref<1x5x128xf32, #tpu.memory_space<vmem>>, vector<1x1x128xf32>
    %338 = vector.shape_cast %337 : vector<1x1x128xf32> to vector<1x128xf32>
    %339 = vector.broadcast %338 : vector<1x128xf32> to vector<128x128xf32>
    %340 = arith.mulf %336, %339 : vector<128x128xf32>
    %341 = arith.addf %322, %340 : vector<128x128xf32>
    %c126_i32 = arith.constant 126 : i32
    %342 = tpu.dynamic_rotate %264 by %c126_i32 dim 0 : vector<128x128xf32>, i32 -> vector<128x128xf32>
    %cst_135 = arith.constant 2.000000e+00 : f32
    %343 = vector.broadcast %cst_135 : f32 to vector<128x1xf32>
    %344 = arith.addf %265, %343 : vector<128x1xf32>
    %cst_136 = arith.constant 0.000000e+00 : f32
    %345 = vector.broadcast %cst_136 : f32 to vector<128x1xf32>
    %346 = arith.cmpf oge, %344, %345 : vector<128x1xf32>
    %cst_137 = arith.constant 2.000000e+00 : f32
    %347 = vector.broadcast %cst_137 : f32 to vector<128x1xf32>
    %348 = arith.addf %265, %347 : vector<128x1xf32>
    %cst_138 = arith.constant 1.600000e+01 : f32
    %349 = vector.broadcast %cst_138 : f32 to vector<128x1xf32>
    %350 = arith.cmpf olt, %348, %349 : vector<128x1xf32>
    %351 = arith.andi %346, %350 : vector<128x1xi1>
    %352 = arith.extui %351 : vector<128x1xi1> to vector<128x1xi32>
    %353 = arith.sitofp %352 : vector<128x1xi32> to vector<128x1xf32>
    %354 = vector.broadcast %353 : vector<128x1xf32> to vector<128x128xf32>
    %355 = arith.mulf %342, %354 : vector<128x128xf32>
    %c0_139 = arith.constant 0 : index
    %c4 = arith.constant 4 : index
    %c0_140 = arith.constant 0 : index
    %356 = vector.load %arg13[%c0_139, %c4, %c0_140] : memref<1x5x128xf32, #tpu.memory_space<vmem>>, vector<1x1x128xf32>
    %357 = vector.shape_cast %356 : vector<1x1x128xf32> to vector<1x128xf32>
    %358 = vector.broadcast %357 : vector<1x128xf32> to vector<128x128xf32>
    %359 = arith.mulf %355, %358 : vector<128x128xf32>
    %360 = arith.addf %341, %359 : vector<128x128xf32>
    %c0_141 = arith.constant 0 : index
    %c4_142 = arith.constant 4 : index
    %c0_143 = arith.constant 0 : index
    %361 = vector.load %arg8[%c0_141, %c4_142, %c0_143] : memref<1x7x128xf32, #tpu.memory_space<vmem>>, vector<1x1x128xf32>
    %362 = vector.shape_cast %361 : vector<1x1x128xf32> to vector<1x128xf32>
    %363 = vector.broadcast %362 : vector<1x128xf32> to vector<128x128xf32>
    %364 = arith.addf %360, %363 : vector<128x128xf32>
    %c0_144 = arith.constant 0 : index
    %c3_145 = arith.constant 3 : index
    %c0_146 = arith.constant 0 : index
    %365 = vector.load %arg6[%c0_144, %c3_145, %c0_146] : memref<1x6x128xf32, #tpu.memory_space<vmem>>, vector<1x1x128xf32>
    %366 = vector.shape_cast %365 : vector<1x1x128xf32> to vector<1x128xf32>
    %c0_147 = arith.constant 0 : index
    %c3_148 = arith.constant 3 : index
    %c0_149 = arith.constant 0 : index
    %367 = vector.load %arg7[%c0_147, %c3_148, %c0_149] : memref<1x6x128xf32, #tpu.memory_space<vmem>>, vector<1x1x128xf32>
    %368 = vector.shape_cast %367 : vector<1x1x128xf32> to vector<1x128xf32>
    %cst_150 = arith.constant dense<0.000000e+00> : vector<128xf32>
    %369 = vector.multi_reduction <add>, %364, %cst_150 [1] : vector<128x128xf32> to vector<128xf32>
    %370 = vector.shape_cast %369 : vector<128xf32> to vector<128x1xf32>
    %cst_151 = arith.constant 3.125000e-02 : f32
    %371 = vector.broadcast %cst_151 : f32 to vector<128x1xf32>
    %372 = arith.mulf %370, %371 : vector<128x1xf32>
    %373 = vector.broadcast %372 : vector<128x1xf32> to vector<128x128xf32>
    %374 = arith.subf %364, %373 : vector<128x128xf32>
    %375 = vector.broadcast %8 : vector<1x128xf32> to vector<128x128xf32>
    %376 = arith.mulf %374, %375 : vector<128x128xf32>
    %377 = arith.mulf %376, %376 : vector<128x128xf32>
    %cst_152 = arith.constant dense<0.000000e+00> : vector<128xf32>
    %378 = vector.multi_reduction <add>, %377, %cst_152 [1] : vector<128x128xf32> to vector<128xf32>
    %379 = vector.shape_cast %378 : vector<128xf32> to vector<128x1xf32>
    %cst_153 = arith.constant 3.125000e-02 : f32
    %380 = vector.broadcast %cst_153 : f32 to vector<128x1xf32>
    %381 = arith.mulf %379, %380 : vector<128x1xf32>
    %cst_154 = arith.constant 9.99999974E-6 : f32
    %382 = vector.broadcast %cst_154 : f32 to vector<128x1xf32>
    %383 = arith.addf %381, %382 : vector<128x1xf32>
    %384 = math.rsqrt %383 : vector<128x1xf32>
    %385 = vector.broadcast %384 : vector<128x1xf32> to vector<128x128xf32>
    %386 = arith.mulf %376, %385 : vector<128x128xf32>
    %387 = vector.broadcast %366 : vector<1x128xf32> to vector<128x128xf32>
    %388 = arith.mulf %386, %387 : vector<128x128xf32>
    %389 = vector.broadcast %368 : vector<1x128xf32> to vector<128x128xf32>
    %390 = arith.addf %388, %389 : vector<128x128xf32>
    %391 = arith.negf %390 : vector<128x128xf32>
    %392 = math.exp %391 : vector<128x128xf32>
    %cst_155 = arith.constant 1.000000e+00 : f32
    %393 = vector.broadcast %cst_155 : f32 to vector<128x128xf32>
    %394 = arith.addf %393, %392 : vector<128x128xf32>
    %395 = arith.divf %393, %394 : vector<128x128xf32>
    %396 = arith.mulf %390, %395 : vector<128x128xf32>
    %397 = arith.index_cast %arg1 : i32 to index
    %c0_156 = arith.constant 0 : index
    %c0_157 = arith.constant 0 : index
    %398 = vector.load %arg20[%397, %c0_156, %c0_157] : memref<2x128x128xbf16, #tpu.memory_space<vmem>>, vector<1x128x128xbf16>
    %399 = vector.shape_cast %398 : vector<1x128x128xbf16> to vector<128x128xbf16>
    %400 = arith.truncf %396 : vector<128x128xf32> to vector<128x128xbf16>
    %cst_158 = arith.constant dense<0.000000e+00> : vector<128x128xf32>
    %401 = tpu.matmul %400, %399, %cst_158 {dimension_numbers = #tpu.dot_dimension_numbers<[1], [0], [0], [1], [0, 0, 1, 1], [], []>} : vector<128x128xbf16>, vector<128x128xbf16>, vector<128x128xf32> -> vector<128x128xf32>
    %c0_159 = arith.constant 0 : index
    %c5 = arith.constant 5 : index
    %c0_160 = arith.constant 0 : index
    %402 = vector.load %arg8[%c0_159, %c5, %c0_160] : memref<1x7x128xf32, #tpu.memory_space<vmem>>, vector<1x1x128xf32>
    %403 = vector.shape_cast %402 : vector<1x1x128xf32> to vector<1x128xf32>
    %404 = vector.broadcast %403 : vector<1x128xf32> to vector<128x128xf32>
    %405 = arith.addf %401, %404 : vector<128x128xf32>
    %406 = arith.addf %217, %405 : vector<128x128xf32>
    %c0_161 = arith.constant 0 : index
    %c4_162 = arith.constant 4 : index
    %c0_163 = arith.constant 0 : index
    %407 = vector.load %arg6[%c0_161, %c4_162, %c0_163] : memref<1x6x128xf32, #tpu.memory_space<vmem>>, vector<1x1x128xf32>
    %408 = vector.shape_cast %407 : vector<1x1x128xf32> to vector<1x128xf32>
    %c0_164 = arith.constant 0 : index
    %c4_165 = arith.constant 4 : index
    %c0_166 = arith.constant 0 : index
    %409 = vector.load %arg7[%c0_164, %c4_165, %c0_166] : memref<1x6x128xf32, #tpu.memory_space<vmem>>, vector<1x1x128xf32>
    %410 = vector.shape_cast %409 : vector<1x1x128xf32> to vector<1x128xf32>
    %cst_167 = arith.constant dense<0.000000e+00> : vector<128xf32>
    %411 = vector.multi_reduction <add>, %406, %cst_167 [1] : vector<128x128xf32> to vector<128xf32>
    %412 = vector.shape_cast %411 : vector<128xf32> to vector<128x1xf32>
    %cst_168 = arith.constant 3.125000e-02 : f32
    %413 = vector.broadcast %cst_168 : f32 to vector<128x1xf32>
    %414 = arith.mulf %412, %413 : vector<128x1xf32>
    %415 = vector.broadcast %414 : vector<128x1xf32> to vector<128x128xf32>
    %416 = arith.subf %406, %415 : vector<128x128xf32>
    %417 = vector.broadcast %8 : vector<1x128xf32> to vector<128x128xf32>
    %418 = arith.mulf %416, %417 : vector<128x128xf32>
    %419 = arith.mulf %418, %418 : vector<128x128xf32>
    %cst_169 = arith.constant dense<0.000000e+00> : vector<128xf32>
    %420 = vector.multi_reduction <add>, %419, %cst_169 [1] : vector<128x128xf32> to vector<128xf32>
    %421 = vector.shape_cast %420 : vector<128xf32> to vector<128x1xf32>
    %cst_170 = arith.constant 3.125000e-02 : f32
    %422 = vector.broadcast %cst_170 : f32 to vector<128x1xf32>
    %423 = arith.mulf %421, %422 : vector<128x1xf32>
    %cst_171 = arith.constant 9.99999974E-6 : f32
    %424 = vector.broadcast %cst_171 : f32 to vector<128x1xf32>
    %425 = arith.addf %423, %424 : vector<128x1xf32>
    %426 = math.rsqrt %425 : vector<128x1xf32>
    %427 = vector.broadcast %426 : vector<128x1xf32> to vector<128x128xf32>
    %428 = arith.mulf %418, %427 : vector<128x128xf32>
    %429 = vector.broadcast %408 : vector<1x128xf32> to vector<128x128xf32>
    %430 = arith.mulf %428, %429 : vector<128x128xf32>
    %431 = vector.broadcast %410 : vector<1x128xf32> to vector<128x128xf32>
    %432 = arith.addf %430, %431 : vector<128x128xf32>
    %433 = arith.index_cast %arg1 : i32 to index
    %c0_172 = arith.constant 0 : index
    %c0_173 = arith.constant 0 : index
    %434 = vector.load %arg21[%433, %c0_172, %c0_173] : memref<2x128x128xbf16, #tpu.memory_space<vmem>>, vector<1x128x128xbf16>
    %435 = vector.shape_cast %434 : vector<1x128x128xbf16> to vector<128x128xbf16>
    %436 = arith.truncf %432 : vector<128x128xf32> to vector<128x128xbf16>
    %cst_174 = arith.constant dense<0.000000e+00> : vector<128x128xf32>
    %437 = tpu.matmul %436, %435, %cst_174 {dimension_numbers = #tpu.dot_dimension_numbers<[1], [0], [0], [1], [0, 0, 1, 1], [], []>} : vector<128x128xbf16>, vector<128x128xbf16>, vector<128x128xf32> -> vector<128x128xf32>
    %c0_175 = arith.constant 0 : index
    %c1_176 = arith.constant 1 : index
    %c0_177 = arith.constant 0 : index
    %438 = vector.load %arg9[%c0_175, %c1_176, %c0_177] : memref<1x2x128xf32, #tpu.memory_space<vmem>>, vector<1x1x128xf32>
    %439 = vector.shape_cast %438 : vector<1x1x128xf32> to vector<1x128xf32>
    %440 = vector.broadcast %439 : vector<1x128xf32> to vector<128x128xf32>
    %441 = arith.addf %437, %440 : vector<128x128xf32>
    %442 = arith.negf %441 : vector<128x128xf32>
    %443 = math.exp %442 : vector<128x128xf32>
    %cst_178 = arith.constant 1.000000e+00 : f32
    %444 = vector.broadcast %cst_178 : f32 to vector<128x128xf32>
    %445 = arith.addf %444, %443 : vector<128x128xf32>
    %446 = arith.divf %444, %445 : vector<128x128xf32>
    %447 = arith.mulf %441, %446 : vector<128x128xf32>
    %448 = arith.index_cast %arg1 : i32 to index
    %c0_179 = arith.constant 0 : index
    %c0_180 = arith.constant 0 : index
    %449 = vector.load %arg22[%448, %c0_179, %c0_180] : memref<2x128x128xbf16, #tpu.memory_space<vmem>>, vector<1x128x128xbf16>
    %450 = vector.shape_cast %449 : vector<1x128x128xbf16> to vector<128x128xbf16>
    %451 = arith.truncf %447 : vector<128x128xf32> to vector<128x128xbf16>
    %cst_181 = arith.constant dense<0.000000e+00> : vector<128x128xf32>
    %452 = tpu.matmul %451, %450, %cst_181 {dimension_numbers = #tpu.dot_dimension_numbers<[1], [0], [0], [1], [0, 0, 1, 1], [], []>} : vector<128x128xbf16>, vector<128x128xbf16>, vector<128x128xf32> -> vector<128x128xf32>
    %c0_182 = arith.constant 0 : index
    %c6 = arith.constant 6 : index
    %c0_183 = arith.constant 0 : index
    %453 = vector.load %arg8[%c0_182, %c6, %c0_183] : memref<1x7x128xf32, #tpu.memory_space<vmem>>, vector<1x1x128xf32>
    %454 = vector.shape_cast %453 : vector<1x1x128xf32> to vector<1x128xf32>
    %455 = vector.broadcast %454 : vector<1x128xf32> to vector<128x128xf32>
    %456 = arith.addf %452, %455 : vector<128x128xf32>
    %457 = arith.addf %406, %456 : vector<128x128xf32>
    %c0_184 = arith.constant 0 : index
    %c5_185 = arith.constant 5 : index
    %c0_186 = arith.constant 0 : index
    %458 = vector.load %arg6[%c0_184, %c5_185, %c0_186] : memref<1x6x128xf32, #tpu.memory_space<vmem>>, vector<1x1x128xf32>
    %459 = vector.shape_cast %458 : vector<1x1x128xf32> to vector<1x128xf32>
    %c0_187 = arith.constant 0 : index
    %c5_188 = arith.constant 5 : index
    %c0_189 = arith.constant 0 : index
    %460 = vector.load %arg7[%c0_187, %c5_188, %c0_189] : memref<1x6x128xf32, #tpu.memory_space<vmem>>, vector<1x1x128xf32>
    %461 = vector.shape_cast %460 : vector<1x1x128xf32> to vector<1x128xf32>
    %cst_190 = arith.constant dense<0.000000e+00> : vector<128xf32>
    %462 = vector.multi_reduction <add>, %457, %cst_190 [1] : vector<128x128xf32> to vector<128xf32>
    %463 = vector.shape_cast %462 : vector<128xf32> to vector<128x1xf32>
    %cst_191 = arith.constant 3.125000e-02 : f32
    %464 = vector.broadcast %cst_191 : f32 to vector<128x1xf32>
    %465 = arith.mulf %463, %464 : vector<128x1xf32>
    %466 = vector.broadcast %465 : vector<128x1xf32> to vector<128x128xf32>
    %467 = arith.subf %457, %466 : vector<128x128xf32>
    %468 = vector.broadcast %8 : vector<1x128xf32> to vector<128x128xf32>
    %469 = arith.mulf %467, %468 : vector<128x128xf32>
    %470 = arith.mulf %469, %469 : vector<128x128xf32>
    %cst_192 = arith.constant dense<0.000000e+00> : vector<128xf32>
    %471 = vector.multi_reduction <add>, %470, %cst_192 [1] : vector<128x128xf32> to vector<128xf32>
    %472 = vector.shape_cast %471 : vector<128xf32> to vector<128x1xf32>
    %cst_193 = arith.constant 3.125000e-02 : f32
    %473 = vector.broadcast %cst_193 : f32 to vector<128x1xf32>
    %474 = arith.mulf %472, %473 : vector<128x1xf32>
    %cst_194 = arith.constant 9.99999974E-6 : f32
    %475 = vector.broadcast %cst_194 : f32 to vector<128x1xf32>
    %476 = arith.addf %474, %475 : vector<128x1xf32>
    %477 = math.rsqrt %476 : vector<128x1xf32>
    %478 = vector.broadcast %477 : vector<128x1xf32> to vector<128x128xf32>
    %479 = arith.mulf %469, %478 : vector<128x128xf32>
    %480 = vector.broadcast %459 : vector<1x128xf32> to vector<128x128xf32>
    %481 = arith.mulf %479, %480 : vector<128x128xf32>
    %482 = vector.broadcast %461 : vector<1x128xf32> to vector<128x128xf32>
    %483 = arith.addf %481, %482 : vector<128x128xf32>
    %c0_195 = arith.constant 0 : index
    %c0_196 = arith.constant 0 : index
    %484 = vector.load %arg29[%c0_195, %c0_196] : memref<128x128xf32, #tpu.memory_space<vmem>>, vector<128x128xf32>
    tpu.vector_store %arg29[%c0_195, %c0_196], %483 {strides = array<i32>} : memref<128x128xf32, #tpu.memory_space<vmem>>, vector<128x128xf32>,
    %c1_i32_197 = arith.constant 1 : i32
    %485 = arith.cmpi eq, %arg1, %c1_i32_197 : i32
    %486 = arith.extui %485 : i1 to i32
    %c0_i32_198 = arith.constant 0 : i32
    %487 = arith.cmpi ne, %486, %c0_i32_198 : i32
    scf.if %487 {
      %c0_199 = arith.constant 0 : index
      %c0_200 = arith.constant 0 : index
      %488 = vector.load %arg23[%c0_199, %c0_200] : memref<1x128xf32, #tpu.memory_space<vmem>>, vector<1x128xf32>
      %c0_201 = arith.constant 0 : index
      %c0_202 = arith.constant 0 : index
      %489 = vector.load %arg24[%c0_201, %c0_202] : memref<1x128xf32, #tpu.memory_space<vmem>>, vector<1x128xf32>
      %cst_203 = arith.constant dense<0.000000e+00> : vector<128xf32>
      %490 = vector.multi_reduction <add>, %483, %cst_203 [1] : vector<128x128xf32> to vector<128xf32>
      %491 = vector.shape_cast %490 : vector<128xf32> to vector<128x1xf32>
      %cst_204 = arith.constant 3.125000e-02 : f32
      %492 = vector.broadcast %cst_204 : f32 to vector<128x1xf32>
      %493 = arith.mulf %491, %492 : vector<128x1xf32>
      %494 = vector.broadcast %493 : vector<128x1xf32> to vector<128x128xf32>
      %495 = arith.subf %483, %494 : vector<128x128xf32>
      %496 = vector.broadcast %8 : vector<1x128xf32> to vector<128x128xf32>
      %497 = arith.mulf %495, %496 : vector<128x128xf32>
      %498 = arith.mulf %497, %497 : vector<128x128xf32>
      %cst_205 = arith.constant dense<0.000000e+00> : vector<128xf32>
      %499 = vector.multi_reduction <add>, %498, %cst_205 [1] : vector<128x128xf32> to vector<128xf32>
      %500 = vector.shape_cast %499 : vector<128xf32> to vector<128x1xf32>
      %cst_206 = arith.constant 3.125000e-02 : f32
      %501 = vector.broadcast %cst_206 : f32 to vector<128x1xf32>
      %502 = arith.mulf %500, %501 : vector<128x1xf32>
      %cst_207 = arith.constant 9.99999974E-6 : f32
      %503 = vector.broadcast %cst_207 : f32 to vector<128x1xf32>
      %504 = arith.addf %502, %503 : vector<128x1xf32>
      %505 = math.rsqrt %504 : vector<128x1xf32>
      %506 = vector.broadcast %505 : vector<128x1xf32> to vector<128x128xf32>
      %507 = arith.mulf %497, %506 : vector<128x128xf32>
      %508 = vector.broadcast %488 : vector<1x128xf32> to vector<128x128xf32>
      %509 = arith.mulf %507, %508 : vector<128x128xf32>
      %510 = vector.broadcast %489 : vector<1x128xf32> to vector<128x128xf32>
      %511 = arith.addf %509, %510 : vector<128x128xf32>
      %c0_208 = arith.constant 0 : index
      %c0_209 = arith.constant 0 : index
      %c0_210 = arith.constant 0 : index
      %512 = vector.load %arg27[%c0_208, %c0_209, %c0_210] : memref<1x128x128xf32, #tpu.memory_space<vmem>>, vector<1x128x128xf32>
      %513 = vector.shape_cast %512 : vector<1x128x128xf32> to vector<128x128xf32>
      %514 = vector.shape_cast %511 : vector<128x128xf32> to vector<1x128x128xf32>
      tpu.vector_store %arg27[%c0_208, %c0_209, %c0_210], %514 {strides = array<i32>} : memref<1x128x128xf32, #tpu.memory_space<vmem>>, vector<1x128x128xf32>,
      %c0_211 = arith.constant 0 : index
      %c0_212 = arith.constant 0 : index
      %515 = vector.load %arg25[%c0_211, %c0_212] : memref<128x256xbf16, #tpu.memory_space<vmem>>, vector<128x256xbf16>
      %516 = arith.truncf %511 : vector<128x128xf32> to vector<128x128xbf16>
      %cst_213 = arith.constant dense<0.000000e+00> : vector<128x256xf32>
      %517 = tpu.matmul %516, %515, %cst_213 {dimension_numbers = #tpu.dot_dimension_numbers<[1], [0], [0], [1], [0, 0, 1, 1], [], []>} : vector<128x128xbf16>, vector<128x256xbf16>, vector<128x256xf32> -> vector<128x256xf32>
      %c0_214 = arith.constant 0 : index
      %c0_215 = arith.constant 0 : index
      %518 = vector.load %arg26[%c0_214, %c0_215] : memref<1x256xf32, #tpu.memory_space<vmem>>, vector<1x256xf32>
      %519 = vector.broadcast %518 : vector<1x256xf32> to vector<128x256xf32>
      %520 = arith.addf %517, %519 : vector<128x256xf32>
      %c0_216 = arith.constant 0 : index
      %c0_217 = arith.constant 0 : index
      %c0_218 = arith.constant 0 : index
      %521 = vector.load %arg28[%c0_216, %c0_217, %c0_218] : memref<1x128x256xf32, #tpu.memory_space<vmem>>, vector<1x128x256xf32>
      %522 = vector.shape_cast %521 : vector<1x128x256xf32> to vector<128x256xf32>
      %523 = vector.shape_cast %520 : vector<128x256xf32> to vector<1x128x256xf32>
      tpu.vector_store %arg28[%c0_216, %c0_217, %c0_218], %523 {strides = array<i32>} : memref<1x128x256xf32, #tpu.memory_space<vmem>>, vector<1x128x256xf32>,
    } else {
    }
    return
  }
  func.func @transform_0(%arg0: i32, %arg1: i32) -> (i32, i32, i32) {
    %c0_i32 = arith.constant 0 : i32
    %c0_i32_0 = arith.constant 0 : i32
    %c0_i32_1 = arith.constant 0 : i32
    return %arg0, %c0_i32, %c0_i32_0 : i32, i32, i32
  }
  func.func @transform_1(%arg0: i32, %arg1: i32) -> (i32, i32, i32) {
    %c0_i32 = arith.constant 0 : i32
    %c0_i32_0 = arith.constant 0 : i32
    %c0_i32_1 = arith.constant 0 : i32
    return %arg0, %c0_i32, %c0_i32_0 : i32, i32, i32
  }
  func.func @transform_2(%arg0: i32, %arg1: i32) -> (i32, i32) {
    %c0_i32 = arith.constant 0 : i32
    %c0_i32_0 = arith.constant 0 : i32
    %c0_i32_1 = arith.constant 0 : i32
    return %c0_i32, %c0_i32_0 : i32, i32
  }
  func.func @transform_3(%arg0: i32, %arg1: i32) -> (i32, i32) {
    %c0_i32 = arith.constant 0 : i32
    %c0_i32_0 = arith.constant 0 : i32
    %c0_i32_1 = arith.constant 0 : i32
    return %c0_i32, %c0_i32_0 : i32, i32
  }
  func.func @transform_4(%arg0: i32, %arg1: i32) -> (i32, i32, i32) {
    %c0_i32 = arith.constant 0 : i32
    %c0_i32_0 = arith.constant 0 : i32
    %c0_i32_1 = arith.constant 0 : i32
    return %arg1, %c0_i32, %c0_i32_0 : i32, i32, i32
  }
  func.func @transform_5(%arg0: i32, %arg1: i32) -> (i32, i32, i32) {
    %c0_i32 = arith.constant 0 : i32
    %c0_i32_0 = arith.constant 0 : i32
    %c0_i32_1 = arith.constant 0 : i32
    return %arg1, %c0_i32, %c0_i32_0 : i32, i32, i32
  }
  func.func @transform_6(%arg0: i32, %arg1: i32) -> (i32, i32, i32) {
    %c0_i32 = arith.constant 0 : i32
    %c0_i32_0 = arith.constant 0 : i32
    %c0_i32_1 = arith.constant 0 : i32
    return %arg1, %c0_i32, %c0_i32_0 : i32, i32, i32
  }
  func.func @transform_7(%arg0: i32, %arg1: i32) -> (i32, i32, i32) {
    %c0_i32 = arith.constant 0 : i32
    %c0_i32_0 = arith.constant 0 : i32
    %c0_i32_1 = arith.constant 0 : i32
    return %arg1, %c0_i32, %c0_i32_0 : i32, i32, i32
  }
  func.func @transform_8(%arg0: i32, %arg1: i32) -> (i32, i32, i32) {
    %c0_i32 = arith.constant 0 : i32
    %c0_i32_0 = arith.constant 0 : i32
    %c0_i32_1 = arith.constant 0 : i32
    return %arg1, %c0_i32, %c0_i32_0 : i32, i32, i32
  }
  func.func @transform_9(%arg0: i32, %arg1: i32) -> (i32, i32, i32) {
    %c0_i32 = arith.constant 0 : i32
    %c0_i32_0 = arith.constant 0 : i32
    %c0_i32_1 = arith.constant 0 : i32
    return %arg1, %c0_i32, %c0_i32_0 : i32, i32, i32
  }
  func.func @transform_10(%arg0: i32, %arg1: i32) -> (i32, i32, i32) {
    %c0_i32 = arith.constant 0 : i32
    %c0_i32_0 = arith.constant 0 : i32
    %c0_i32_1 = arith.constant 0 : i32
    return %arg1, %c0_i32, %c0_i32_0 : i32, i32, i32
  }
  func.func @transform_11(%arg0: i32, %arg1: i32) -> (i32, i32, i32) {
    %c0_i32 = arith.constant 0 : i32
    %c0_i32_0 = arith.constant 0 : i32
    %c0_i32_1 = arith.constant 0 : i32
    return %arg1, %c0_i32, %c0_i32_0 : i32, i32, i32
  }
  func.func @transform_12(%arg0: i32, %arg1: i32) -> (i32, i32, i32) {
    %c0_i32 = arith.constant 0 : i32
    %c0_i32_0 = arith.constant 0 : i32
    %c0_i32_1 = arith.constant 0 : i32
    %c0_i32_2 = arith.constant 0 : i32
    return %c0_i32, %c0_i32_0, %c0_i32_1 : i32, i32, i32
  }
  func.func @transform_13(%arg0: i32, %arg1: i32) -> (i32, i32, i32) {
    %c0_i32 = arith.constant 0 : i32
    %c0_i32_0 = arith.constant 0 : i32
    %c0_i32_1 = arith.constant 0 : i32
    %c0_i32_2 = arith.constant 0 : i32
    return %c0_i32, %c0_i32_0, %c0_i32_1 : i32, i32, i32
  }
  func.func @transform_14(%arg0: i32, %arg1: i32) -> (i32, i32, i32) {
    %c0_i32 = arith.constant 0 : i32
    %c0_i32_0 = arith.constant 0 : i32
    %c0_i32_1 = arith.constant 0 : i32
    %c0_i32_2 = arith.constant 0 : i32
    return %c0_i32, %c0_i32_0, %c0_i32_1 : i32, i32, i32
  }
  func.func @transform_15(%arg0: i32, %arg1: i32) -> (i32, i32, i32) {
    %c0_i32 = arith.constant 0 : i32
    %c0_i32_0 = arith.constant 0 : i32
    %c0_i32_1 = arith.constant 0 : i32
    %c0_i32_2 = arith.constant 0 : i32
    return %c0_i32, %c0_i32_0, %c0_i32_1 : i32, i32, i32
  }
  func.func @transform_16(%arg0: i32, %arg1: i32) -> (i32, i32, i32) {
    %c0_i32 = arith.constant 0 : i32
    %c0_i32_0 = arith.constant 0 : i32
    %c0_i32_1 = arith.constant 0 : i32
    %c0_i32_2 = arith.constant 0 : i32
    return %c0_i32, %c0_i32_0, %c0_i32_1 : i32, i32, i32
  }
  func.func @transform_17(%arg0: i32, %arg1: i32) -> (i32, i32, i32) {
    %c0_i32 = arith.constant 0 : i32
    %c0_i32_0 = arith.constant 0 : i32
    %c0_i32_1 = arith.constant 0 : i32
    %c0_i32_2 = arith.constant 0 : i32
    return %c0_i32, %c0_i32_0, %c0_i32_1 : i32, i32, i32
  }
  func.func @transform_18(%arg0: i32, %arg1: i32) -> (i32, i32, i32) {
    %c0_i32 = arith.constant 0 : i32
    %c0_i32_0 = arith.constant 0 : i32
    %c0_i32_1 = arith.constant 0 : i32
    %c0_i32_2 = arith.constant 0 : i32
    return %c0_i32, %c0_i32_0, %c0_i32_1 : i32, i32, i32
  }
  func.func @transform_19(%arg0: i32, %arg1: i32) -> (i32, i32, i32) {
    %c0_i32 = arith.constant 0 : i32
    %c0_i32_0 = arith.constant 0 : i32
    %c0_i32_1 = arith.constant 0 : i32
    %c0_i32_2 = arith.constant 0 : i32
    return %c0_i32, %c0_i32_0, %c0_i32_1 : i32, i32, i32
  }
  func.func @transform_20(%arg0: i32, %arg1: i32) -> (i32, i32, i32) {
    %c0_i32 = arith.constant 0 : i32
    %c0_i32_0 = arith.constant 0 : i32
    %c0_i32_1 = arith.constant 0 : i32
    %c0_i32_2 = arith.constant 0 : i32
    return %c0_i32, %c0_i32_0, %c0_i32_1 : i32, i32, i32
  }
  func.func @transform_21(%arg0: i32, %arg1: i32) -> (i32, i32) {
    %c0_i32 = arith.constant 0 : i32
    %c0_i32_0 = arith.constant 0 : i32
    %c0_i32_1 = arith.constant 0 : i32
    return %c0_i32, %c0_i32_0 : i32, i32
  }
  func.func @transform_22(%arg0: i32, %arg1: i32) -> (i32, i32) {
    %c0_i32 = arith.constant 0 : i32
    %c0_i32_0 = arith.constant 0 : i32
    %c0_i32_1 = arith.constant 0 : i32
    return %c0_i32, %c0_i32_0 : i32, i32
  }
  func.func @transform_23(%arg0: i32, %arg1: i32) -> (i32, i32) {
    %c0_i32 = arith.constant 0 : i32
    %c0_i32_0 = arith.constant 0 : i32
    %c0_i32_1 = arith.constant 0 : i32
    return %c0_i32, %c0_i32_0 : i32, i32
  }
  func.func @transform_24(%arg0: i32, %arg1: i32) -> (i32, i32) {
    %c0_i32 = arith.constant 0 : i32
    %c0_i32_0 = arith.constant 0 : i32
    %c0_i32_1 = arith.constant 0 : i32
    return %c0_i32, %c0_i32_0 : i32, i32
  }
  func.func @transform_25(%arg0: i32, %arg1: i32) -> (i32, i32, i32) {
    %c0_i32 = arith.constant 0 : i32
    %c0_i32_0 = arith.constant 0 : i32
    %c0_i32_1 = arith.constant 0 : i32
    return %arg0, %c0_i32, %c0_i32_0 : i32, i32, i32
  }
  func.func @transform_26(%arg0: i32, %arg1: i32) -> (i32, i32, i32) {
    %c0_i32 = arith.constant 0 : i32
    %c0_i32_0 = arith.constant 0 : i32
    %c0_i32_1 = arith.constant 0 : i32
    return %arg0, %c0_i32, %c0_i32_0 : i32, i32, i32
  }
}

</mosaic_0001>

<bundles_post_ra>
// kernel: tpu_custom_call.1
= control target key start
LH: loop header
LB: loop body
LE: loop exit
PB: predicated region body
PF: predicated region fallthrough
CT: control target
= control target key end

     0   :  { %s17649_s0 = inlined_call_operand.hbm [shape: f32[2,128,128], index: 0, kind: input, shape index: {}]   ;;  %s17650_s1 = inlined_call_operand.vmem [shape: f32[2,1,128], index: 1, kind: input, shape index: {}]   ;;  %s17651_s2 = inlined_call_operand.vmem [shape: f32[128,1], index: 2, kind: input, shape index: {}]   ;;  %s17652_s3 = inlined_call_operand.hbm [shape: f32[128,256], index: 3, kind: input, shape index: {}]   ;;  %s17653_s4 = inlined_call_operand.vmem [shape: f32[2,6,128], index: 4, kind: input, shape index: {}]   ;;  %s17654_s5 = inlined_call_operand.vmem [shape: f32[2,6,128], index: 5, kind: input, shape index: {}]   ;;  %s17655_s6 = inlined_call_operand.vmem [shape: f32[2,7,128], index: 6, kind: input, shape index: {}]   ;;  %s17656_s7 = inlined_call_operand.hbm [shape: f32[2,2,128], index: 7, kind: input, shape index: {}]   ;;  %s17657_s8 = inlined_call_operand.vmem [shape: f32[2,1,768], index: 8, kind: input, shape index: {}]   ;;  %s17658_s9 = inlined_call_operand.hbm [shape: f32[2,2,128], index: 9, kind: input, shape index: {}]   ;;  %s17659_s10 = inlined_call_operand.hbm [shape: f32[2,2,128], index: 10, kind: input, shape index: {}]   ;;  %s17660_s11 = inlined_call_operand.vmem [shape: f32[2,5,128], index: 11, kind: input, shape index: {}]   ;;  %s17661_s12 = inlined_call_operand.hbm [shape: bf16[2,128,128], index: 12, kind: input, shape index: {}]   ;;  %s17662_s13 = inlined_call_operand.hbm [shape: bf16[2,128,128], index: 13, kind: input, shape index: {}]   ;;  %s17663_s14 = inlined_call_operand.hbm [shape: bf16[2,128,768], index: 14, kind: input, shape index: {}]   ;;  %s17664_s15 = inlined_call_operand.hbm [shape: bf16[2,128,512], index: 15, kind: input, shape index: {}]   ;;  %s17665_s16 = inlined_call_operand.vmem [shape: bf16[2,256,128], index: 16, kind: input, shape index: {}]   ;;  %s17666_s17 = inlined_call_operand.hbm [shape: bf16[2,128,256], index: 17, kind: input, shape index: {}]   ;;  %s17667_s18 = inlined_call_operand.hbm [shape: bf16[2,128,128], index: 18, kind: input, shape index: {}]   ;;  %s17668_s19 = inlined_call_operand.hbm [shape: bf16[2,128,128], index: 19, kind: input, shape index: {}]   ;;  %s17669_s20 = inlined_call_operand.hbm [shape: bf16[2,128,128], index: 20, kind: input, shape index: {}]   ;;  %s17670_s21 = inlined_call_operand.vmem [shape: f32[1,128], index: 21, kind: input, shape index: {}]   ;;  %s17671_s22 = inlined_call_operand.vmem [shape: f32[1,128], index: 22, kind: input, shape index: {}]   ;;  %s17672_s23 = inlined_call_operand.hbm [shape: bf16[128,256], index: 23, kind: input, shape index: {}]   ;;  %s17673_s24 = inlined_call_operand.vmem [shape: f32[1,256], index: 24, kind: input, shape index: {}]   ;;  %s17674_s25 = inlined_call_operand.hbm [shape: f32[2,128,128], index: 25, kind: output, shape index: {0}]   ;;  %s17675_s26 = inlined_call_operand.hbm [shape: f32[2,128,256], index: 26, kind: output, shape index: {1}]  }
   0x1   :  { %17893 = sst [smem:[#allocation137_spill]] %s17649_s0 }
   0x2   :  { %17894 = sst [smem:[#allocation138_spill]] %s17650_s1 }
   0x3   :  { %17895 = sst [smem:[#allocation139_spill]] %s17651_s2 }
   0x4   :  { %17896 = sst [smem:[#allocation140_spill]] %s17652_s3 }
   0x5   :  { %17897 = sst [smem:[#allocation141_spill]] %s17653_s4 }
   0x6   :  { %17898 = sst [smem:[#allocation142_spill]] %s17654_s5 }
   0x7   :  { %17899 = sst [smem:[#allocation143_spill]] %s17655_s6 }
   0x8   :  { %17900 = sst [smem:[#allocation144_spill]] %s17656_s7 }
   0x9   :  { %17901 = sst [smem:[#allocation145_spill]] %s17657_s8 }
   0xa   :  { %17902 = sst [smem:[#allocation146_spill]] %s17658_s9 }
   0xb   :  { %17903 = sst [smem:[#allocation147_spill]] %s17659_s10 }
   0xc   :  { %17904 = sst [smem:[#allocation148_spill]] %s17660_s11 }
   0xd   :  { %17905 = sst [smem:[#allocation149_spill]] %s17661_s12 }
   0xe   :  { %17906 = sst [smem:[#allocation150_spill]] %s17662_s13 }
   0xf   :  { %17907 = sst [smem:[#allocation151_spill]] %s17663_s14 }
  0x10   :  { %17908 = sst [smem:[#allocation152_spill]] %s17664_s15 }
  0x11   :  { %17909 = sst [smem:[#allocation153_spill]] %s17665_s16 }
  0x12   :  { %17910 = sst [smem:[#allocation154_spill]] %s17666_s17 }
  0x13   :  { %17911 = sst [smem:[#allocation155_spill]] %s17667_s18 }
  0x14   :  { %17912 = sst [smem:[#allocation156_spill]] %s17668_s19 }
  0x15   :  { %17913 = sst [smem:[#allocation157_spill]] %s17669_s20 }
  0x16   :  { %17914 = sst [smem:[#allocation158_spill]] %s17670_s21 }
  0x17   :  { %17915 = sst [smem:[#allocation159_spill]] %s17671_s22 }
  0x18   :  { %17916 = sst [smem:[#allocation160_spill]] %s17672_s23 }
  0x19   :  { %17917 = sst [smem:[#allocation161_spill]] %s17673_s24 }
  0x1a   :  { %17918 = sst [smem:[#allocation162_spill]] %s17674_s25 }
  0x1b   :  { %17919 = sst [smem:[#allocation163_spill]] %s17675_s26 }
  0x1c   :  { %32 = vsyncpa [#allocation4], 0 }
  0x1d   :  { %34 = vsyncpa [#allocation4 + $0x1], 0 }
  0x1e   :  { %35 = vsyncpa [#allocation7], 0 }
  0x1f   :  { %36 = vsyncpa [#allocation13], 0 }
  0x20   :  { %37 = vsyncpa [#allocation16], 0 }
  0x21   :  { %38 = vsyncpa [#allocation19], 0 }
  0x22   :  { %39 = vsyncpa [#allocation22], 0 }
  0x23   :  { %40 = vsyncpa [#allocation5], 0 }
  0x24   :  { %42 = vsyncpa [#allocation5 + $0x1], 0 }
  0x25   :  { %43 = vsyncpa [#allocation26], 0 }
  0x26   :  { %45 = vsyncpa [#allocation26 + $0x1], 0  ;;  %s12426_s27 = smov 0   ;;  %s12428_s3 = smov 0  }
  0x27   :  { %s12430_s7 = smov 0   ;;  %s12432_s28 = smov 0  }
  0x28   :  { %s12434_s8 = smov 0   ;;  %s12436_s4 = smov 0  }
  0x29   :  { %s12438_s29 = smov 0   ;;  %s12440_s0 = smov 0  }
  0x2a   :  { %s12442_s9 = smov 0   ;;  %s12444_s30 = smov 0  }
  0x2b   :  { %s12446_s2 = smov 0  }
  0x2c LB: > { %17920 = sst [smem:[#allocation37_spill]] %s12222_s3  ;;  %s12482_s5 = sadd.s32 4294967295, %s12258_s2   ;;  %s12258_s2 = sphi %s12446_s2, %s51_s2   ;;  %s12254_s30 = sphi %s12444_s30, %s18485_s30   ;;  %s12250_s9 = sphi %s12442_s9, %s18484_s9   ;;  %s12246_s0 = sphi %s12440_s0, %s18490_s0   ;;  %s12242_s29 = sphi %s12438_s29, %s18482_s29   ;;  %s12238_s4 = sphi %s12436_s4, %s18489_s4   ;;  %s12234_s8 = sphi %s12434_s8, %s18488_s8   ;;  %s12230_s28 = sphi %s12432_s28, %s18480_s28   ;;  %s12226_s7 = sphi %s12430_s7, %s18487_s7   ;;  %s12222_s3 = sphi %s12428_s3, %s18486_s3   ;;  %s12218_s27 = sphi %s12426_s27, %s18479_s27  }
  0x2d   : > { %17921 = sst [smem:[#allocation38_spill]] %s12230_s28  ;;  %s9418_s10 = sadd.s32 4294967294, %s12258_s2  }
  0x2e   : > { %17922 = sst [smem:[#allocation39_spill]] %s12234_s8  ;;  %p77_p0 = scmp.ne.s32.totalorder %s12238_s4, %s12234_s8 }
  0x2f   : > { %17923 = sst [smem:[#allocation40_spill]] %s12242_s29  ;;  %p17681_p1 = scmp.eq.s32.totalorder %s12258_s2, 0 }
  0x30   : > { %17924 = sst [smem:[#allocation41_spill]] %s12246_s0  ;;  %p83_p2 = scmp.ne.s32.totalorder %s12234_s8, %s12230_s28 }
  0x31   : > { %17925 = sst [smem:[#allocation42_spill]] %s12250_s9  ;;  %p17693_p3 = scmp.eq.s32.totalorder %s12482_s5, 0 }
  0x32   : > { %17926 = sst [smem:[#allocation43_spill]] %s12254_s30  ;;  %p12495_p4 = por %p17681_p1, %p77_p0 }
  0x33   : > { %17927 = sst [smem:[#allocation44_spill]] %s12482_s5  ;;  %p656_p5 = scmp.eq.s32.totalorder %s12482_s5, 3 }
  0x34   : > { %p12502_p6 = por %p17693_p3, %p83_p2  ;;  %p662_p7 = scmp.eq.s32.totalorder %s9418_s10, 3 }
  0x35   : > { %p12506_p8 = por %p656_p5, %p77_p0  ;;  %p9419_p9 = scmp.ge.s32.totalorder %s12258_s2, 1 }
  0x36   : > { %s17929_s25 = scalar_select %p12502_p6, 1, 0 }
  0x37   : > { %s17931_s1 = scalar_select %p12506_p8, 1, 0 }
  0x38   : > { %17930 = sst [smem:[#allocation45_spill]] %s17929_s25  ;;  %p12511_p10 = por %p662_p7, %p83_p2 }
  0x39   : > { %17932 = sst [smem:[#allocation46_spill]] %s17931_s1  ;;  %p695_p11 = scmp.lt.s32.totalorder %s12258_s2, 5 }
  0x3a   : > { %s17933_s6 = scalar_select %p12511_p10, 1, 0 }
  0x3b   : > { %p12516_p12 = pnand %p9419_p9, %p695_p11  ;;  %p17694_p13 = scmp.lt.s32.totalorder %s12258_s2, 4 }
  0x3c   : > { %17934 = sst [smem:[#allocation47_spill]] %s17933_s6  ;;  %s853_s10 = sand.u32 1, %s12258_s2  }
  0x3d   : > { %s17935_s28 = scalar_select %p12516_p12, 1, 0 }
  0x3e   : > { %p10438_p1 = pneg %p12516_p12  ;;  %s855_s24 = sand.u32 1, %s12238_s4  }
  0x3f   : > { %17936 = sst [smem:[#allocation48_spill]] %s17935_s28  ;;  %s9431_s1 = sshll.u32 %s855_s24, 7 }
  0x40   : > { %p12527_p0 = pnand %p10438_p1, %p17693_p3  ;;  %s9829_s21 = sshll.u32 %s12254_s30, 11 }
  0x41   : > { %s17938_s11 = sld [smem:[#allocation137_spill]]  ;;  %s857_s0 = scalar_lea.vmem [#allocation3], %s9431_s1 }
  0x42   : > { %s17937_s22 = scalar_select %p12527_p0, 1, 0 }
  0x43   : > { %s864_s25 = sshll.u32 %s857_s0, 4  ;;  %p12539_p2 = pnand %p17694_p13, %p12495_p4  ;;  %s865_s25 = int_to_ptr.vmem [resolvable:$true] %s864_s25 }
  0x44   : > { %s12543_s28 = scalar_lea.sflag [#allocation4], %s853_s10  ;;  %s11721_s24 = scalar_lea.vmem %s865_s25, 2048 }
  0x45   : > { %p11710_p1 = pneg %p12539_p2  ;;  %p11722_p5 = scmp.ne.s32.totalorder %s865_s25, %s11721_s24 }
  0x46   : > { %s12260_s16 = smov [#allocation3]  }
  0x47   : > { %s863_s29 = scalar_lea.hbm %s17938_s11, %s9829_s21  ;;  %p11724_p7 = pnand %p11722_p5, %p11710_p1 }
  0x48   : > { %s11726_s11 = sshll.u32 %s12260_s16, 4  ;;  %s11727_s11 = int_to_ptr.vmem [resolvable:$false] %s11726_s11 }
  0x49   : > { %p11725_p9 = pneg %p11724_p7  ;;  %s11728_s21 = scalar_lea.vmem %s11727_s11, 4096 }
  0x4a   : > { %p11729_p11 = scmp.lt.s32.totalorder %s865_s25, %s11727_s11  ;;  %p11730_p3 = scmp.lt.s32.totalorder %s11728_s21, %s11721_s24 }
  0x4c   : > { %p11731_p4 = por %p11730_p3, %p11729_p11 }
  0x4e   : > { %p11732_p13 = pnand %p11731_p4, %p11725_p9 }
  0x50   : > { %11735 = shalt.err (!%p11732_p13)
}
  0x51   : > { %s17695_s26 = smov 128   ;;  %s17697_s0 = smov 8  }
  0x52   : > { %10472 = dma.hbm_to_vmem [thread:$0]  (!%p12539_p2), %s863_s29, 2048, %s865_s25, %s12543_s28, %s17695_s26, %s17695_s26, %s17697_s0  }
  0x53   : > { %s60_s6 = sadd.s32 1, %s12250_s9  ;;  %s242_s1 = sadd.s32 1, %s12226_s7 }
  0x54   : > { %p61_p3 = scmp.ge.s32.totalorder %s60_s6, 2  ;;  %p249_p13 = scmp.ne.s32.totalorder %s12226_s7, %s12222_s3 }
  0x55   : > { %p255_p1 = scmp.ne.s32.totalorder %s12222_s3, %s12218_s27  ;;  %s903_s10 = sand.u32 1, %s12226_s7  }
  0x56   : > { %s18492_s6 = smov (%p61_p3, %s60_s6), 0  ;;  %s17941_s24 = sadd.s32 1, %s12254_s30 }
  0x57   : > { %17940 = sst [smem:[#allocation49_spill]] %s18492_s6  ;;  %s18494_s24 = smov (!%p61_p3, %s17941_s24), %s12254_s30 }
  0x58   : > { %s239_s8 = ssub.s32 %s12250_s9, %s18492_s6  ;;  %p17942_p5 = scmp.eq.s32.totalorder %s12258_s2, 0 }
  0x59   : > { %p65_p7 = scmp.ge.s32.totalorder %s18494_s24, 2  ;;  %p240_p9 = scmp.eq.s32.totalorder %s239_s8, 0 }
  0x5a   : > { %p12569_p2 = por %p249_p13, %p17942_p5  ;;  %p17944_p11 = scmp.eq.s32.totalorder %s12482_s5, 0 }
  0x5b   : > { %s12579_s29 = sshll.u32 %s903_s10, 1  ;;  %s18496_s24 = smov (%p65_p7, %s18494_s24), 0 }
  0x5c   : > { %p12575_p4 = por %p255_p1, %p17944_p11  ;;  %17947 = sst [smem:[#allocation51_spill]] %s18496_s24 }
  0x5d   : > { %s12584_s16 = scalar_select %p240_p9, %s12226_s7, %s242_s1  }
  0x5e   : > { %s17945_s27 = scalar_select %p12575_p4, 1, 0 }
  0x5f   : > { %s67_s11 = ssub.s32 %s12254_s30, %s18496_s24  ;;  %s12589_s21 = sshll.u32 %s12250_s9, 5 }
  0x60   : > { %17946 = sst [smem:[#allocation50_spill]] %s17945_s27  ;;  %p68_p3 = scmp.eq.s32.totalorder %s67_s11, 0 }
  0x61   : > { %s17948_s0 = sld [smem:[#allocation144_spill]]  ;;  %s905_s3 = scalar_lea.vmem [#allocation8], %s12579_s29 }
  0x62   : > { %s912_s5 = sshll.u32 %s905_s3, 4  ;;  %s17949_s27 = sadd.s32 1, %s12238_s4  ;;  %s913_s5 = int_to_ptr.vmem [resolvable:$true] %s912_s5 }
  0x63   : > { %s12599_s10 = scalar_select %p68_p3, %s12238_s4, %s17949_s27  }
  0x64   : > { %p17951_p13 = scmp.lt.s32.totalorder %s12258_s2, 4  ;;  %s11749_s11 = scalar_lea.vmem %s913_s5, 32 }
  0x65   : > { %17950 = sst [smem:[#allocation52_spill]] %s12599_s10  ;;  %p11750_p7 = scmp.ne.s32.totalorder %s913_s5, %s11749_s11 }
  0x66   : > { %p12605_p1 = pnand %p17951_p13, %p12569_p2  ;;  %s12263_s3 = smov [#allocation8]  }
  0x67   : > { %s910_s6 = scalar_lea.hbm %s17948_s0, %s12589_s21  ;;  %s11754_s26 = sshll.u32 %s12263_s3, 4  ;;  %s11755_s26 = int_to_ptr.vmem [resolvable:$false] %s11754_s26 }
  0x68   : > { %p17705_p5 = pneg %p12605_p1  ;;  %s11756_s0 = scalar_lea.vmem %s11755_s26, 64 }
  0x69   : > { %p11757_p3 = scmp.lt.s32.totalorder %s913_s5, %s11755_s26  ;;  %p11758_p10 = scmp.lt.s32.totalorder %s11756_s0, %s11749_s11 }
  0x6a   : > { %p11752_p9 = pnand %p11750_p7, %p17705_p5 }
  0x6b   : > { %p11759_p2 = por %p11758_p10, %p11757_p3 }
  0x6c   : > { %p11753_p11 = pneg %p11752_p9 }
  0x6e   : > { %p11760_p13 = pnand %p11759_p2, %p11753_p11 }
  0x70   : > { %11763 = shalt.err (!%p11760_p13)
}
  0x71   : > { %10475 = dma.hbm_to_vmem [thread:$0]  (!%p12605_p1), %s910_s6, 32, %s913_s5, %s12543_s28  }
  0x72   : > { %s12264_s25 = smov [#allocation6]   ;;  %p12619_p7 = pneg %p12527_p0 }
  0x73   : > { %s710_s27 = sshll.u32 %s12264_s25, 4  ;;  %s711_s27 = int_to_ptr.vmem [resolvable:$true] %s710_s27 }
  0x74   : > { %s11775_s3 = scalar_lea.vmem %s711_s27, 4096  ;;  %p11783_p3 = scmp.lt.s32.totalorder %s711_s27, %s711_s27 }
  0x75   : > { %p11776_p9 = scmp.ne.s32.totalorder %s711_s27, %s11775_s3  ;;  %p11784_p2 = scmp.lt.s32.totalorder %s11775_s3, %s11775_s3 }
  0x77   : > { %p11778_p10 = pnand %p11776_p9, %p12619_p7  ;;  %p11785_p13 = por %p11784_p2, %p11783_p3 }
  0x79   : > { %p11779_p11 = pneg %p11778_p10 }
  0x7b   : > { %p11786_p5 = pnand %p11785_p13, %p11779_p11 }
  0x7d   : > { %11789 = shalt.err (!%p11786_p5)
}
  0x7e   : > { %s12265_s5 = smov 256   ;;  %s12266_s6 = smov 16  }
  0x7f   : > { %s17954_s0 = sld [smem:[#allocation140_spill]]  ;;  %s12267_s25 = smov [#allocation12]  }
  0x80   : > { %s736_s24 = sshll.u32 %s12267_s25, 4  ;;  %s12268_s30 = smov [#allocation15]   ;;  %s737_s24 = int_to_ptr.vmem [resolvable:$true] %s736_s24 }
  0x81   : > { %s762_s9 = sshll.u32 %s12268_s30, 4  ;;  %s11801_s3 = scalar_lea.vmem %s737_s24, 2048  ;;  %s763_s9 = int_to_ptr.vmem [resolvable:$true] %s762_s9 }
  0x82   : > { %p11802_p5 = scmp.ne.s32.totalorder %s737_s24, %s11801_s3  ;;  %p11809_p11 = scmp.lt.s32.totalorder %s737_s24, %s737_s24 }
  0x83   : > { %p11810_p3 = scmp.lt.s32.totalorder %s11801_s3, %s11801_s3 }
  0x84   : > { %p11804_p9 = pnand %p11802_p5, %p12619_p7 }
  0x85   : > { %10441 = dma.hbm_to_vmem [thread:$0]  (!%p12527_p0), %s17954_s0, 4096, %s711_s27, [#allocation7], %s12265_s5, %s12265_s5, %s12266_s6  }
  0x86   : > { %p11805_p10 = pneg %p11804_p9  ;;  %p11811_p2 = por %p11810_p3, %p11809_p11 }
  0x88   : > { %p11812_p13 = pnand %p11811_p2, %p11805_p10 }
  0x8a   : > { %11815 = shalt.err (!%p11812_p13)
}
  0x8b   : > { %s12269_s10 = smov 64   ;;  %s12270_s27 = smov 4  }
  0x8c   : > { %s17955_s13 = sld [smem:[#allocation150_spill]]  ;;  %s11827_s26 = scalar_lea.vmem %s763_s9, 8192 }
  0x8d   : > { %p11828_p5 = scmp.ne.s32.totalorder %s763_s9, %s11827_s26  ;;  %p11835_p11 = scmp.lt.s32.totalorder %s763_s9, %s763_s9 }
  0x8e   : > { %p11836_p10 = scmp.lt.s32.totalorder %s11827_s26, %s11827_s26 }
  0x8f   : > { %p11830_p9 = pnand %p11828_p5, %p12619_p7 }
  0x90   : > { %p11837_p3 = por %p11836_p10, %p11835_p11 }
  0x91   : > { %p11831_p8 = pneg %p11830_p9 }
  0x92   : > { %10447 = dma.hbm_to_vmem [thread:$0]  (!%p12527_p0), %s17955_s13, 2048, %s737_s24, [#allocation13], %s12269_s10, %s12269_s10, %s12270_s27  }
  0x93   : > { %p11838_p2 = pnand %p11837_p3, %p11831_p8 }
  0x95   : > { %11841 = shalt.err (!%p11838_p2)
}
  0x96   : > { %s17956_s15 = sld [smem:[#allocation152_spill]]  ;;  %s12271_s24 = smov [#allocation18]  }
  0x97   : > { %s791_s3 = sshll.u32 %s12271_s24, 4  ;;  %s12272_s30 = smov [#allocation21]   ;;  %s792_s3 = int_to_ptr.vmem [resolvable:$true] %s791_s3 }
  0x98   : > { %s817_s11 = sshll.u32 %s12272_s30, 4  ;;  %s11853_s26 = scalar_lea.vmem %s792_s3, 2048  ;;  %s818_s11 = int_to_ptr.vmem [resolvable:$true] %s817_s11 }
  0x99   : > { %p11854_p13 = scmp.ne.s32.totalorder %s792_s3, %s11853_s26  ;;  %p11861_p9 = scmp.lt.s32.totalorder %s792_s3, %s792_s3 }
  0x9a   : > { %p11862_p11 = scmp.lt.s32.totalorder %s11853_s26, %s11853_s26 }
  0x9b   : > { %p11856_p8 = pnand %p11854_p13, %p12619_p7 }
  0x9c   : > { %10453 = dma.hbm_to_vmem [thread:$0]  (!%p12527_p0), %s17956_s15, 8192, %s763_s9, [#allocation16], %s12265_s5, %s12265_s5, %s12266_s6  }
  0x9d   : > { %p11857_p5 = pneg %p11856_p8  ;;  %p11863_p10 = por %p11862_p11, %p11861_p9 }
  0x9f   : > { %p11864_p3 = pnand %p11863_p10, %p11857_p5 }
  0xa1   : > { %11867 = shalt.err (!%p11864_p3)
}
  0xa2   : > { %s17957_s18 = sld [smem:[#allocation155_spill]]  ;;  %s11879_s6 = scalar_lea.vmem %s818_s11, 2048 }
  0xa3   : > { %p11880_p2 = scmp.ne.s32.totalorder %s818_s11, %s11879_s6  ;;  %p11887_p4 = scmp.lt.s32.totalorder %s818_s11, %s818_s11 }
  0xa4   : > { %p11888_p6 = scmp.lt.s32.totalorder %s11879_s6, %s11879_s6 }
  0xa5   : > { %p11882_p13 = pnand %p11880_p2, %p12619_p7 }
  0xa6   : > { %p11889_p9 = por %p11888_p6, %p11887_p4 }
  0xa7   : > { %p11883_p8 = pneg %p11882_p13 }
  0xa8   : > { %10459 = dma.hbm_to_vmem [thread:$0]  (!%p12527_p0), %s17957_s18, 2048, %s792_s3, [#allocation19], %s12269_s10, %s12269_s10, %s12270_s27  }
  0xa9   : > { %p11890_p5 = pnand %p11889_p9, %p11883_p8 }
  0xab   : > { %11893 = shalt.err (!%p11890_p5)
}
  0xac   : > { %s17958_s20 = sld [smem:[#allocation157_spill]]  ;;  %s930_s9 = scalar_lea.vmem [#allocation9], %s12579_s29 }
  0xad   : > { %s17959_s30 = sld [smem:[#allocation146_spill]]  ;;  %s937_s5 = sshll.u32 %s930_s9, 4  ;;  %s938_s5 = int_to_ptr.vmem [resolvable:$true] %s937_s5 }
  0xae   : > { %s12273_s6 = smov [#allocation11]   ;;  %s11907_s15 = scalar_lea.vmem %s938_s5, 32 }
  0xaf   : > { %s723_s13 = sshll.u32 %s12273_s6, 4  ;;  %p11908_p6 = scmp.ne.s32.totalorder %s938_s5, %s11907_s15  ;;  %s724_s13 = int_to_ptr.vmem [resolvable:$true] %s723_s13 }
  0xb0   : > { %p17960_p4 = pneg %p12605_p1  ;;  %s12274_s0 = smov [#allocation9]  }
  0xb1   : > { %s11912_s25 = sshll.u32 %s12274_s0, 4  ;;  %s11913_s25 = int_to_ptr.vmem [resolvable:$false] %s11912_s25 }
  0xb2   : > { %10465 = dma.hbm_to_vmem [thread:$0]  (!%p12527_p0), %s17958_s20, 2048, %s818_s11, [#allocation22], %s12269_s10, %s12269_s10, %s12270_s27  }
  0xb3   : > { %s935_s26 = scalar_lea.hbm %s17959_s30, %s12589_s21  ;;  %p11910_p11 = pnand %p11908_p6, %p17960_p4 }
  0xb4   : > { %s11914_s18 = scalar_lea.vmem %s11913_s25, 64  ;;  %p11915_p3 = scmp.lt.s32.totalorder %s938_s5, %s11913_s25 }
  0xb5   : > { %p11911_p10 = pneg %p11910_p11  ;;  %p11916_p2 = scmp.lt.s32.totalorder %s11914_s18, %s11907_s15 }
  0xb7   : > { %p11917_p13 = por %p11916_p2, %p11915_p3 }
  0xb9   : > { %p11918_p8 = pnand %p11917_p13, %p11911_p10 }
  0xbb   : > { %11921 = shalt.err (!%p11918_p8)
}
  0xbc   : > { %10478 = dma.hbm_to_vmem [thread:$0]  (!%p12605_p1), %s935_s26, 32, %s938_s5, %s12543_s28  }
  0xbd   : > { %s11933_s11 = scalar_lea.vmem %s724_s13, 2048  ;;  %p11941_p4 = scmp.lt.s32.totalorder %s724_s13, %s724_s13 }
  0xbe   : > { %p11934_p9 = scmp.ne.s32.totalorder %s724_s13, %s11933_s11  ;;  %p11942_p11 = scmp.lt.s32.totalorder %s11933_s11, %s11933_s11 }
  0xc0   : > { %p11936_p5 = pnand %p11934_p9, %p12619_p7  ;;  %p11943_p12 = por %p11942_p11, %p11941_p4 }
  0xc2   : > { %p11937_p6 = pneg %p11936_p5 }
  0xc4   : > { %p11944_p0 = pnand %p11943_p12, %p11937_p6 }
  0xc6   : > { %11947 = shalt.err (!%p11944_p0)
}
  0xc7   : > { %p17961_p3 = scmp.ne.s32.totalorder %s17937_s22, 0  ;;  %s17962_s12 = sld [smem:[#allocation149_spill]] }
  0xc8   : > { %s12275_s24 = smov [#allocation14]  }
  0xc9   : > { %s749_s3 = sshll.u32 %s12275_s24, 4  ;;  %s750_s3 = int_to_ptr.vmem [resolvable:$true] %s749_s3 }
  0xca   : > { %s11959_s30 = scalar_lea.vmem %s750_s3, 12288  ;;  %p11967_p12 = scmp.lt.s32.totalorder %s750_s3, %s750_s3 }
  0xcb   : > { %p11960_p10 = scmp.ne.s32.totalorder %s750_s3, %s11959_s30  ;;  %p11968_p0 = scmp.lt.s32.totalorder %s11959_s30, %s11959_s30 }
  0xcd   : > { %10444 = dma.hbm_to_vmem [thread:$0]  (!%p17961_p3), %s17962_s12, 2048, %s724_s13, [#allocation7], %s12269_s10, %s12269_s10, %s12270_s27  }
  0xce   : > { %p11962_p2 = pnand %p11960_p10, %p12619_p7  ;;  %p11969_p8 = por %p11968_p0, %p11967_p12 }
  0xd0   : > { %p11963_p13 = pneg %p11962_p2 }
  0xd2   : > { %p11970_p9 = pnand %p11969_p8, %p11963_p13 }
  0xd4   : > { %11973 = shalt.err (!%p11970_p9)
}
  0xd5   : > { %s12276_s26 = smov 384   ;;  %s12277_s9 = smov 24  }
  0xd6   : > { %s17963_s14 = sld [smem:[#allocation151_spill]]  ;;  %s12278_s6 = smov [#allocation17]  }
  0xd7   : > { %s778_s0 = sshll.u32 %s12278_s6, 4  ;;  %s12279_s25 = smov [#allocation20]   ;;  %s779_s0 = int_to_ptr.vmem [resolvable:$true] %s778_s0 }
  0xd8   : > { %s804_s11 = sshll.u32 %s12279_s25, 4  ;;  %s11985_s15 = scalar_lea.vmem %s779_s0, 4096  ;;  %s805_s11 = int_to_ptr.vmem [resolvable:$true] %s804_s11 }
  0xd9   : > { %p11986_p5 = scmp.ne.s32.totalorder %s779_s0, %s11985_s15  ;;  %p11993_p11 = scmp.lt.s32.totalorder %s779_s0, %s779_s0 }
  0xda   : > { %p11994_p10 = scmp.lt.s32.totalorder %s11985_s15, %s11985_s15 }
  0xdb   : > { %p11988_p6 = pnand %p11986_p5, %p12619_p7 }
  0xdc   : > { %10450 = dma.hbm_to_vmem [thread:$0]  (!%p17961_p3), %s17963_s14, 12288, %s750_s3, [#allocation13], %s12276_s26, %s12276_s26, %s12277_s9  }
  0xdd   : > { %p11989_p4 = pneg %p11988_p6  ;;  %p11995_p2 = por %p11994_p10, %p11993_p11 }
  0xdf   : > { %p11996_p13 = pnand %p11995_p2, %p11989_p4 }
  0xe1   : > { %11999 = shalt.err (!%p11996_p13)
}
  0xe2   : > { %s17964_s18 = smov 8   ;;  %s17965_s24 = smov 128  }
  0xe3   : > { %s17966_s17 = sld [smem:[#allocation154_spill]]  ;;  %s12011_s26 = scalar_lea.vmem %s805_s11, 2048 }
  0xe4   : > { %p12012_p12 = scmp.ne.s32.totalorder %s805_s11, %s12011_s26  ;;  %p12019_p9 = scmp.lt.s32.totalorder %s805_s11, %s805_s11 }
  0xe5   : > { %p12020_p5 = scmp.lt.s32.totalorder %s12011_s26, %s12011_s26 }
  0xe6   : > { %p12014_p0 = pnand %p12012_p12, %p12619_p7 }
  0xe7   : > { %p12021_p6 = por %p12020_p5, %p12019_p9 }
  0xe8   : > { %p12015_p8 = pneg %p12014_p0 }
  0xe9   : > { %10456 = dma.hbm_to_vmem [thread:$0]  (!%p17961_p3), %s17966_s17, 4096, %s779_s0, [#allocation16], %s17965_s24, %s17965_s24, %s17964_s18  }
  0xea   : > { %p12022_p4 = pnand %p12021_p6, %p12015_p8 }
  0xec   : > { %12025 = shalt.err (!%p12022_p4)
}
  0xed   : > { %s17967_s19 = sld [smem:[#allocation156_spill]]  ;;  %s12280_s13 = smov [#allocation23]  }
  0xee   : > { %s836_s6 = sshll.u32 %s12280_s13, 4  ;;  %s17968_s15 = sld [smem:[#allocation147_spill]]  ;;  %s837_s6 = int_to_ptr.vmem [resolvable:$true] %s836_s6 }
  0xef   : > { %s948_s30 = scalar_lea.vmem [#allocation10], %s12579_s29  ;;  %s12037_s12 = scalar_lea.vmem %s837_s6, 2048 }
  0xf0   : > { %s955_s26 = sshll.u32 %s948_s30, 4  ;;  %p12038_p11 = scmp.ne.s32.totalorder %s837_s6, %s12037_s12  ;;  %s956_s26 = int_to_ptr.vmem [resolvable:$true] %s955_s26 }
  0xf1   : > { %p12045_p13 = scmp.lt.s32.totalorder %s837_s6, %s837_s6  ;;  %p12046_p12 = scmp.lt.s32.totalorder %s12037_s12, %s12037_s12 }
  0xf2   : > { %p12040_p10 = pnand %p12038_p11, %p12619_p7 }
  0xf3   : > { %10462 = dma.hbm_to_vmem [thread:$0]  (!%p17961_p3), %s17967_s19, 2048, %s805_s11, [#allocation19], %s12269_s10, %s12269_s10, %s12270_s27  }
  0xf4   : > { %s953_s3 = scalar_lea.hbm %s17968_s15, %s12589_s21  ;;  %p12041_p2 = pneg %p12040_p10 }
  0xf5   : > { %p12047_p0 = por %p12046_p12, %p12045_p13 }
  0xf7   : > { %p12048_p8 = pnand %p12047_p0, %p12041_p2 }
  0xf9   : > { %12051 = shalt.err (!%p12048_p8)
}
  0xfa   : > { %s17969_s23 = sld [smem:[#allocation160_spill]]  ;;  %s12065_s29 = scalar_lea.vmem %s956_s26, 32 }
  0xfb   : > { %p12066_p9 = scmp.ne.s32.totalorder %s956_s26, %s12065_s29  ;;  %p17970_p7 = pneg %p12605_p1 }
  0xfc   : > { %s12281_s12 = smov [#allocation10]  }
  0xfd   : > { %p12068_p5 = pnand %p12066_p9, %p17970_p7  ;;  %s12070_s8 = sshll.u32 %s12281_s12, 4  ;;  %s12071_s8 = int_to_ptr.vmem [resolvable:$false] %s12070_s8 }
  0xfe   : > { %s12072_s11 = scalar_lea.vmem %s12071_s8, 64  ;;  %p12073_p4 = scmp.lt.s32.totalorder %s956_s26, %s12071_s8 }
  0xff   : > { %p12069_p6 = pneg %p12068_p5  ;;  %p12074_p11 = scmp.lt.s32.totalorder %s12072_s11, %s12065_s29 }
 0x100   : > { %10468 = dma.hbm_to_vmem [thread:$0]  (!%p17961_p3), %s17969_s23, 2048, %s837_s6, [#allocation22], %s17965_s24, %s17965_s24, %s17964_s18  }
 0x101   : > { %p12075_p10 = por %p12074_p11, %p12073_p4 }
 0x103   : > { %p12076_p2 = pnand %p12075_p10, %p12069_p6 }
 0x105   : > { %12079 = shalt.err (!%p12076_p2)
}
 0x106   : > { %10481 = dma.hbm_to_vmem [thread:$0]  (!%p12605_p1), %s953_s3, 32, %s956_s26, %s12543_s28  }
 0x107   : > { %s17971_s24 = sld [smem:[#allocation48_spill]] }
 0x10d   : > { %p17972_p3 = scmp.ne.s32.totalorder %s17971_s24, 0 }
 0x10f   : > { %971 = sbr.rel (%p17972_p3) target bundleno = 6255 (0x186f), region = 120 }
 0x114   : > { %s17973_s9 = sld [smem:[#allocation44_spill]] }
 0x115   : > { %s17974_s5 = sld [smem:[#allocation39_spill]] }
 0x116   : > { %s17975_s13 = sld [smem:[#allocation45_spill]] }
 0x11a   : > { %s973_s6 = sand.u32 1, %s17973_s9  }
 0x11b   : > { %s12751_s0 = sand.u32 1, %s17974_s5   ;;  %s974_s1 = scalar_lea.sflag [#allocation4], %s973_s6 }
 0x11c   : > { %s17715_s25 = sshll.u32 %s12751_s0, 7  ;;  %p17976_p13 = scmp.ne.s32.totalorder %s17975_s13, 0 }
 0x11d   : > { %s12756_s30 = scalar_lea.vmem [#allocation3], %s17715_s25 }
 0x11e   : > { %12177 = dma.done.wait (%p17976_p13), %s974_s1, 2048  }
 0x11f   : > { %12179 = vsyncadd (%p17976_p13), %s974_s1, 4294965248  ;;  %p17977_p1 = scmp.eq.s32.totalorder %s17973_s9, 0 }
 0x121   : > { %12181 = dma.done.wait (%p17977_p1), [#allocation7], 4096   ;;  %p17978_p12 = pmov %p17977_p1 }
 0x122   : > { %s17979_s28 = sld [smem:[#allocation37_spill]] }
 0x123   : > { %12183 = vsyncadd (%p17978_p12), [#allocation7], 4294963200  ;;  %s17980_s21 = sld [smem:[#allocation50_spill]] }
 0x128   : > { %s988_s3 = sand.u32 1, %s17979_s28  }
 0x129   : > { %s12767_s26 = sshll.u32 %s988_s3, 1  ;;  %p17981_p0 = scmp.ne.s32.totalorder %s17980_s21, 0 }
 0x12b   : > { %12185 = dma.done.wait (%p17981_p0), %s974_s1, 96  }
 0x12c   : > { %12187 = vsyncadd (%p17981_p0), %s974_s1, 4294967200  ;;  %p17982_p8 = pmov %p17977_p1 }
 0x12d   : > { %p17983_p9 = pmov %p17977_p1 }
 0x12e   : > { %12189 = dma.done.wait (%p17982_p8), [#allocation7], 2048  }
 0x12f   : > { %12191 = vsyncadd (%p17983_p9), [#allocation7], 4294965248  ;;  %p17984_p7 = pmov %p17977_p1 }
 0x130   : > { %p17985_p5 = pmov %p17977_p1 }
 0x131   : > { %12193 = dma.done.wait (%p17984_p7), [#allocation13], 14336  }
 0x132   : > { %12195 = vsyncadd (%p17985_p5), [#allocation13], 4294952960  ;;  %p17986_p6 = pmov %p17977_p1 }
 0x133   : > { %p17987_p4 = pmov %p17977_p1 }
 0x134   : > { %12197 = dma.done.wait (%p17986_p6), [#allocation16], 12288  }
 0x135   : > { %12199 = vsyncadd (%p17987_p4), [#allocation16], 4294955008  ;;  %p17988_p11 = pmov %p17977_p1 }
 0x136   : > { %p17989_p10 = pmov %p17977_p1 }
 0x137   : > { %12201 = dma.done.wait (%p17988_p11), [#allocation19], 4096  }
 0x138   : > { %12203 = vsyncadd (%p17989_p10), [#allocation19], 4294963200  ;;  %p17990_p2 = pmov %p17977_p1 }
 0x139   : > { %p17991_p3 = pmov %p17977_p1 }
 0x13a   : > { %12205 = dma.done.wait (%p17990_p2), [#allocation22], 4096  }
 0x13b   : > { %12207 = vsyncadd (%p17991_p3), [#allocation22], 4294963200  ;;  %s17992_s12 = sld [smem:[#allocation41_spill]]  ;;  %s9456_s11 = sshll.u32 %s12751_s0, 8 }
 0x13c   : > { %s17993_s8 = sld [smem:[#allocation40_spill]] }
 0x13d   : > { %s17994_s5 = sld [smem:[#allocation138_spill]] }
 0x13e   : > { %s17995_s21 = sld [smem:[#allocation141_spill]] }
 0x13f   : > { %s17996_s10 = sld [smem:[#allocation142_spill]] }
 0x140   : > { %s17997_s17 = sld [smem:[#allocation143_spill]] }
 0x141   : > { %p1156_p13 = scmp.lt.s32.totalorder %s17992_s12, 1  ;;  %s17998_s24 = sld [smem:[#allocation145_spill]] }
 0x142   : > { %p1159_p1 = scmp.lt.s32.totalorder %s17993_s8, 1  ;;  %s17999_s9 = sld [smem:[#allocation148_spill]] }
 0x143   : > { %s18498_s12 = smov (!%p1156_p13, %s17992_s12), 1  ;;  %p9461_p12 = scmp.ne.s32.totalorder %s17993_s8, 0 }
 0x144   : > { %s1160_s22 = scalar_select %p1159_p1, %s17993_s8, 1 }
 0x145   : > { %s12804_s13 = scalar_lea.vmem %s17994_s5, %s18498_s12 }
 0x146   : > { %s9457_s6 = sshll.u32 %s1160_s22, 3  ;;  %s10385_s1 = smul.u32 6, %s1160_s22 }
 0x147   : > { %s12809_s3 = scalar_lea.vmem %s17995_s21, %s9457_s6  ;;  %s12814_s25 = scalar_lea.vmem %s17996_s10, %s9457_s6 }
 0x148   : > { %s12819_s19 = scalar_lea.vmem %s17997_s17, %s9457_s6  ;;  %s12824_s5 = scalar_lea.vmem %s17998_s24, %s10385_s1 }
 0x149   : > { %s12829_s28 = scalar_lea.vmem %s17999_s9, %s9457_s6  ;;  %s18000_s21 = sshll.u32 %s12751_s0, 7 }
 0x14a   : > { %s12833_s23 = scalar_lea.vmem [#allocation24], %s18000_s21  ;;  %s12835_s10 = scalar_lea.vmem [#allocation25], %s9456_s11 }
 0x14b   : > { %1183 = sbr.rel (%p9461_p12) target bundleno = 345 (0x159), region = 180 }
 0x150   : > { %v1184_v0 = vld [vmem:[%s12756_s30] sm:$0xff]  ;;  %v1185_v1 = vld [vmem:[%s12756_s30 + $0x8] sm:$0xff]  ;;  %v1186_v2 = vld [vmem:[%s12756_s30 + $0x10] sm:$0xff] }
 0x151   : > { %1200 = vst [vmem:[#allocation2 + $0x30] sm:$0xff] %v1184_v0  ;;  %1201 = vst [vmem:[#allocation2] sm:$0xff] %v1185_v1  ;;  %v1187_v3 = vld [vmem:[%s12756_s30 + $0x18] sm:$0xff]  ;;  %v1188_v4 = vld [vmem:[%s12756_s30 + $0x20] sm:$0xff] }
 0x152   : > { %1202 = vst [vmem:[#allocation2 + $0x58] sm:$0xff] %v1186_v2  ;;  %v1189_v5 = vld [vmem:[%s12756_s30 + $0x28] sm:$0xff]  ;;  %1203 = vst [vmem:[#allocation2 + $0x18] sm:$0xff] %v1187_v3  ;;  %v1190_v6 = vld [vmem:[%s12756_s30 + $0x30] sm:$0xff] }
 0x153   : > { %1204 = vst [vmem:[#allocation2 + $0x50] sm:$0xff] %v1188_v4  ;;  %1205 = vst [vmem:[#allocation2 + $0x68] sm:$0xff] %v1189_v5  ;;  %v1191_v7 = vld [vmem:[%s12756_s30 + $0x38] sm:$0xff]  ;;  %v1192_v8 = vld [vmem:[%s12756_s30 + $0x40] sm:$0xff] }
 0x154   : > { %1206 = vst [vmem:[#allocation2 + $0x8] sm:$0xff] %v1190_v6  ;;  %1207 = vst [vmem:[#allocation2 + $0x48] sm:$0xff] %v1191_v7  ;;  %v1193_v9 = vld [vmem:[%s12756_s30 + $0x48] sm:$0xff]  ;;  %v1194_v10 = vld [vmem:[%s12756_s30 + $0x50] sm:$0xff] }
 0x155   : > { %1208 = vst [vmem:[#allocation2 + $0x40] sm:$0xff] %v1192_v8  ;;  %v1195_v11 = vld [vmem:[%s12756_s30 + $0x58] sm:$0xff]  ;;  %1209 = vst [vmem:[#allocation2 + $0x20] sm:$0xff] %v1193_v9  ;;  %v1196_v12 = vld [vmem:[%s12756_s30 + $0x60] sm:$0xff] }
 0x156   : > { %1210 = vst [vmem:[#allocation2 + $0x10] sm:$0xff] %v1194_v10  ;;  %1211 = vst [vmem:[#allocation2 + $0x38] sm:$0xff] %v1195_v11  ;;  %v1197_v13 = vld [vmem:[%s12756_s30 + $0x68] sm:$0xff]  ;;  %v1198_v14 = vld [vmem:[%s12756_s30 + $0x70] sm:$0xff] }
 0x157   : > { %1212 = vst [vmem:[#allocation2 + $0x60] sm:$0xff] %v1196_v12  ;;  %1213 = vst [vmem:[#allocation2 + $0x70] sm:$0xff] %v1197_v13  ;;  %v1199_v15 = vld [vmem:[%s12756_s30 + $0x78] sm:$0xff] }
 0x158   : > { %1214 = vst [vmem:[#allocation2 + $0x78] sm:$0xff] %v1198_v14  ;;  %1215 = vst [vmem:[#allocation2 + $0x28] sm:$0xff] %v1199_v15 }
 0x159 PF: > { %v1216_v16 = vld [vmem:[#allocation2 + $0x30] sm:$0xff]  ;;  %v1218_v17 = vld [vmem:[#allocation2 + $0x58] sm:$0xff]  ;;  %v1217_v18 = vld [vmem:[#allocation2] sm:$0xff]  ;;  %v1232_v32 = vlaneseq  ;;  %v17718_v38 = vmov 0.0   ;;  %s18002_s14 = sld [smem:[#allocation40_spill]]  ;;  %s18003_s30 = scalar_lea.vmem [#allocation8], %s12767_s26 }
 0x15a   : > { %1239 = vadd.xlane.f32.xlu0 %v1216_v16  ;;  %1243 = vadd.xlane.f32.xlu1 %v1218_v17  ;;  %v1219_v19 = vld [vmem:[#allocation2 + $0x18] sm:$0xff]  ;;  %v12854_v20 = vld [vmem:[#allocation2 + $0x50] sm:$0xff]  ;;  %v12856_v21 = vld [vmem:[#allocation2 + $0x68] sm:$0xff]  ;;  %s18022_s6 = scalar_lea.vmem [#allocation10], %s12767_s26  ;;  %s18026_s1 = scalar_lea.vmem [#allocation9], %s12767_s26 }
 0x15b   : > { %v12860_v22 = vld [vmem:[#allocation2 + $0x8] sm:$0xff]  ;;  %v1233_v33 = vand.u32 127, %v1232_v32  ;;  %s18110_s18 = smov %s18022_s6  ;;  %s18136_s12 = smov %s18026_s1 }
 0x15c   : > { %v12862_v23 = vld [vmem:[#allocation2 + $0x48] sm:$0xff]  ;;  %v12866_v24 = vld [vmem:[#allocation2 + $0x40] sm:$0xff]  ;;  %s18167_s22 = sld [smem:[#allocation153_spill]] }
 0x15d   : > { %v12868_v25 = vld [vmem:[#allocation2 + $0x20] sm:$0xff]  ;;  %v12872_v26 = vld [vmem:[#allocation2 + $0x10] sm:$0xff]  ;;  %v12874_v27 = vld [vmem:[#allocation2 + $0x38] sm:$0xff]  ;;  %vm1234_vm0 = vcmp.lt.s32.totalorder %v1233_v33, 32 }
 0x15e   : > { %1241 = vadd.xlane.f32.xlu0 %v1217_v18  ;;  %1245 = vadd.xlane.f32.xlu1 %v1219_v19  ;;  %v12878_v28 = vld [vmem:[#allocation2 + $0x60] sm:$0xff]  ;;  %v12880_v29 = vld [vmem:[#allocation2 + $0x70] sm:$0xff]  ;;  %v12892_v39 = vsel %vm1234_vm0, 1.0, %v17718_v38  ;;  %v13611_v38 = vld [vmem:[#allocation6 + $0xd8] sm:$0xff] }
 0x15f   : > { %v12884_v30 = vld [vmem:[#allocation2 + $0x78] sm:$0xff]  ;;  %v12886_v31 = vld [vmem:[#allocation2 + $0x28] sm:$0xff]  ;;  %18001 = vst [vmem:[#allocation53_spill] sm:$0xff] %v12892_v39  ;;  %s12935_s17 = sshll.u32 %s18002_s14, 6  ;;  %s9832_s27 = smul.u32 384, %s18002_s14  ;;  %18042 = vst [vmem:[#allocation90_spill] sm:$0xff] %v13611_v38 }
 0x160   : > { %s12942_s20 = scalar_lea.vmem [#allocation11], %s12935_s17  ;;  %s1761_s15 = scalar_lea.vmem [#allocation12], %s12935_s17 }
 0x161   : > { %s13207_s29 = scalar_lea.vmem [#allocation14], %s9832_s27  ;;  %s9833_s8 = sshll.u32 %s18002_s14, 8 }
 0x162   : > { %1247 = vadd.xlane.f32.xlu0 %v12854_v20  ;;  %1249 = vadd.xlane.f32.xlu1 %v12856_v21  ;;  %s13353_s11 = scalar_lea.vmem [#allocation15], %s9833_s8  ;;  %p9802_p0 = scmp.ne.s32.totalorder %s18002_s14, 1 }
 0x163   : > { %s18466_s27 = sld [smem:[#allocation159_spill]] (!%p9802_p0) }
 0x166   : > { %1251 = vadd.xlane.f32.xlu0 %v12860_v22  ;;  %1253 = vadd.xlane.f32.xlu1 %v12862_v23 }
 0x16a   : > { %1255 = vadd.xlane.f32.xlu0 %v12866_v24  ;;  %1257 = vadd.xlane.f32.xlu1 %v12868_v25 }
 0x16e   : > { %1259 = vadd.xlane.f32.xlu0 %v12872_v26  ;;  %1261 = vadd.xlane.f32.xlu1 %v12874_v27 }
 0x172   : > { %1263 = vadd.xlane.f32.xlu0 %v12878_v28  ;;  %1265 = vadd.xlane.f32.xlu1 %v12880_v29 }
 0x176   : > { %1267 = vadd.xlane.f32.xlu0 %v12884_v30  ;;  %1269 = vadd.xlane.f32.xlu1 %v12886_v31 }
 0x1e3   : > { %v1240_v34 = vpop.xlane.xlu0 %1239  ;;  %v1244_v35 = vpop.xlane.xlu1 %1243 }
 0x1e4   : > { %v1271_v36 = vmul.f32 0.03125, %v1240_v34  ;;  %v1273_v37 = vmul.f32 0.03125, %v1244_v35 }
 0x1e6   : > { %v1287_v40 = vsub.f32 %v1216_v16, %v1271_v36  ;;  %v1289_v41 = vsub.f32 %v1218_v17, %v1273_v37  ;;  %v10826_v17 = vld [vmem:[%s12942_s20 + $0x38] sm:$0xff]  }
 0x1e7   : > { %v1242_v42 = vpop.xlane.xlu0 %1241  ;;  %v1246_v43 = vpop.xlane.xlu1 %1245  ;;  %10017 = vmatprep.subr.bf16.mxu0 %v10826_v17 }
 0x1e8   : > { %v1272_v44 = vmul.f32 0.03125, %v1242_v42  ;;  %v1274_v45 = vmul.f32 0.03125, %v1246_v43  ;;  %v12895_v46 = vmul.f32 %v12892_v39, %v1287_v40  ;;  %v12898_v47 = vmul.f32 %v12892_v39, %v1289_v41  ;;  %10018 = vmatpush3.bf16.msra.mxu0 %v10826_v17  ;;  %v10827_v40 = vld [vmem:[%s12942_s20 + $0x30] sm:$0xff]  }
 0x1e9   : > { %10019 = vmatprep.subr.bf16.mxu0 %v10827_v40 }
 0x1ea   : > { %v1288_v48 = vsub.f32 %v1217_v18, %v1272_v44  ;;  %v1290_v49 = vsub.f32 %v1219_v19, %v1274_v45  ;;  %v1319_v50 = vmul.f32 %v12895_v46, %v12895_v46  ;;  %v1321_v53 = vmul.f32 %v12898_v47, %v12898_v47 }
 0x1eb   : > { %v1248_v51 = vpop.xlane.xlu0 %1247  ;;  %v1250_v52 = vpop.xlane.xlu1 %1249 }
 0x1ec   : > { %v1275_v54 = vmul.f32 0.03125, %v1248_v51  ;;  %1335 = vadd.xlane.f32.xlu0 %v1319_v50  ;;  %v1276_v55 = vmul.f32 0.03125, %v1250_v52  ;;  %v12905_v56 = vmul.f32 %v12892_v39, %v1288_v48  ;;  %v12908_v57 = vmul.f32 %v12892_v39, %v1290_v49  ;;  %10020 = vmatpush3.bf16.msra.mxu0 %v10827_v40  ;;  %v10828_v51 = vld [vmem:[%s12942_s20 + $0x28] sm:$0xff]  }
 0x1ed   : > { %10021 = vmatprep.subr.bf16.mxu0 %v10828_v51 }
 0x1ee   : > { %v1291_v58 = vsub.f32 %v12854_v20, %v1275_v54  ;;  %v1292_v59 = vsub.f32 %v12856_v21, %v1276_v55  ;;  %v1320_v60 = vmul.f32 %v12905_v56, %v12905_v56  ;;  %v1322_v63 = vmul.f32 %v12908_v57, %v12908_v57 }
 0x1ef   : > { %v1252_v61 = vpop.xlane.xlu0 %1251  ;;  %v1254_v62 = vpop.xlane.xlu1 %1253 }
 0x1f0   : > { %v1277_v0 = vmul.f32 0.03125, %v1252_v61  ;;  %1339 = vadd.xlane.f32.xlu0 %v1321_v53  ;;  %1337 = vadd.xlane.f32.xlu1 %v1320_v60  ;;  %v1278_v1 = vmul.f32 0.03125, %v1254_v62  ;;  %v12917_v2 = vmul.f32 %v12892_v39, %v1291_v58  ;;  %v12920_v3 = vmul.f32 %v12892_v39, %v1292_v59  ;;  %v10829_v59 = vld [vmem:[%s12942_s20 + $0x20] sm:$0xff]  }
 0x1f1   : > { %10022 = vmatpush3.bf16.msra.mxu0 %v10828_v51 }
 0x1f2   : > { %v1293_v4 = vsub.f32 %v12860_v22, %v1277_v0  ;;  %v1294_v5 = vsub.f32 %v12862_v23, %v1278_v1  ;;  %v1323_v6 = vmul.f32 %v12917_v2, %v12917_v2  ;;  %v1324_v9 = vmul.f32 %v12920_v3, %v12920_v3  ;;  %10023 = vmatprep.subr.bf16.mxu0 %v10829_v59  ;;  %v10831_v0 = vld [vmem:[%s12942_s20 + $0x10] sm:$0xff]   ;;  %v10832_v1 = vld [vmem:[%s12942_s20 + $0x8] sm:$0xff]  }
 0x1f3   : > { %v1256_v7 = vpop.xlane.xlu0 %1255  ;;  %v1258_v8 = vpop.xlane.xlu1 %1257 }
 0x1f4   : > { %v1279_v10 = vmul.f32 0.03125, %v1256_v7  ;;  %1341 = vadd.xlane.f32.xlu1 %v1322_v63  ;;  %1343 = vadd.xlane.f32.xlu0 %v1323_v6  ;;  %v1280_v11 = vmul.f32 0.03125, %v1258_v8  ;;  %v12929_v12 = vmul.f32 %v12892_v39, %v1293_v4  ;;  %v12932_v13 = vmul.f32 %v12892_v39, %v1294_v5  ;;  %v10833_v4 = vld [vmem:[%s12942_s20] sm:$0xff]  }
 0x1f5   : > { %10024 = vmatpush3.bf16.msra.mxu0 %v10829_v59 }
 0x1f6   : > { %v1295_v14 = vsub.f32 %v12866_v24, %v1279_v10  ;;  %v1296_v15 = vsub.f32 %v12868_v25, %v1280_v11  ;;  %v1325_v16 = vmul.f32 %v12929_v12, %v12929_v12  ;;  %v1326_v20 = vmul.f32 %v12932_v13, %v12932_v13 }
 0x1f7   : > { %v1260_v18 = vpop.xlane.xlu0 %1259  ;;  %v1262_v19 = vpop.xlane.xlu1 %1261 }
 0x1f8   : > { %v1281_v21 = vmul.f32 0.03125, %v1260_v18  ;;  %1345 = vadd.xlane.f32.xlu1 %v1324_v9  ;;  %1347 = vadd.xlane.f32.xlu0 %v1325_v16  ;;  %v1282_v22 = vmul.f32 0.03125, %v1262_v19  ;;  %v12948_v23 = vmul.f32 %v12892_v39, %v1295_v14  ;;  %v12951_v24 = vmul.f32 %v12892_v39, %v1296_v15 }
 0x1fa   : > { %v1297_v25 = vsub.f32 %v12872_v26, %v1281_v21  ;;  %v1298_v33 = vsub.f32 %v12874_v27, %v1282_v22  ;;  %v1327_v34 = vmul.f32 %v12948_v23, %v12948_v23  ;;  %v1328_v37 = vmul.f32 %v12951_v24, %v12951_v24 }
 0x1fb   : > { %v1264_v35 = vpop.xlane.xlu0 %1263  ;;  %v1266_v36 = vpop.xlane.xlu1 %1265 }
 0x1fc   : > { %v1283_v41 = vmul.f32 0.03125, %v1264_v35  ;;  %1349 = vadd.xlane.f32.xlu1 %v1326_v20  ;;  %1351 = vadd.xlane.f32.xlu0 %v1327_v34  ;;  %v1284_v42 = vmul.f32 0.03125, %v1266_v36  ;;  %v12961_v43 = vmul.f32 %v12892_v39, %v1297_v25  ;;  %v12964_v26 = vmul.f32 %v12892_v39, %v1298_v33 }
 0x1fe   : > { %v1299_v27 = vsub.f32 %v12878_v28, %v1283_v41  ;;  %v1300_v44 = vsub.f32 %v12880_v29, %v1284_v42  ;;  %v1329_v45 = vmul.f32 %v12961_v43, %v12961_v43  ;;  %v1330_v50 = vmul.f32 %v12964_v26, %v12964_v26 }
 0x1ff   : > { %v1268_v48 = vpop.xlane.xlu0 %1267  ;;  %v1270_v49 = vpop.xlane.xlu1 %1269 }
 0x200   : > { %v1285_v52 = vmul.f32 0.03125, %v1268_v48  ;;  %1353 = vadd.xlane.f32.xlu1 %v1328_v37  ;;  %1355 = vadd.xlane.f32.xlu0 %v1329_v45  ;;  %v1286_v53 = vmul.f32 0.03125, %v1270_v49  ;;  %v12974_v54 = vmul.f32 %v12892_v39, %v1299_v27  ;;  %v12977_v28 = vmul.f32 %v12892_v39, %v1300_v44  ;;  %v13001_v48 = vld [vmem:[%s12809_s3] ss:$0 sm:$0xff] }
 0x202   : > { %v1301_v29 = vsub.f32 %v12884_v30, %v1285_v52  ;;  %v1302_v55 = vsub.f32 %v12886_v31, %v1286_v53  ;;  %v1331_v58 = vmul.f32 %v12974_v54, %v12974_v54  ;;  %v1332_v60 = vmul.f32 %v12977_v28, %v12977_v28  ;;  %v10830_v31 = vld [vmem:[%s12942_s20 + $0x18] sm:$0xff]  }
 0x203   : > { %10025 = vmatprep.subr.bf16.mxu0 %v10830_v31 }
 0x204   : > { %1357 = vadd.xlane.f32.xlu1 %v1330_v50  ;;  %1359 = vadd.xlane.f32.xlu0 %v1331_v58  ;;  %v12987_v61 = vmul.f32 %v12892_v39, %v1301_v29  ;;  %v12990_v62 = vmul.f32 %v12892_v39, %v1302_v55 }
 0x205   : > { %10026 = vmatpush3.bf16.msra.mxu0 %v10830_v31 }
 0x206   : > { %v1333_v30 = vmul.f32 %v12987_v61, %v12987_v61  ;;  %v1334_v63 = vmul.f32 %v12990_v62, %v12990_v62  ;;  %10027 = vmatprep.subr.bf16.mxu0 %v10831_v0 }
 0x208   : > { %1361 = vadd.xlane.f32.xlu1 %v1332_v60  ;;  %1363 = vadd.xlane.f32.xlu0 %v1333_v30  ;;  %v13006_v30 = vld [vmem:[%s12814_s25] ss:$0 sm:$0xff] }
 0x209   : > { %10028 = vmatpush3.bf16.msra.mxu0 %v10831_v0 }
 0x20a   : > { %10029 = vmatprep.subr.bf16.mxu0 %v10832_v1 }
 0x20c   : > { %1365 = vadd.xlane.f32.xlu1 %v1334_v63 }
 0x20d   : > { %10030 = vmatpush3.bf16.msra.mxu0 %v10832_v1 }
 0x20e   : > { %10031 = vmatprep.subr.bf16.mxu0 %v10833_v4 }
 0x211   : > { %10032 = vmatpush3.bf16.msra.mxu0 %v10833_v4 }
 0x275   : > { %v1336_v5 = vpop.xlane.xlu0 %1335 }
 0x276   : > { %v1367_v6 = vmul.f32 0.03125, %v1336_v5 }
 0x278   : > { %v1383_v7 = vadd.f32 1e-05, %v1367_v6 }
 0x279   : > { %v1338_v8 = vpop.xlane.xlu1 %1337  ;;  %v1340_v9 = vpop.xlane.xlu0 %1339 }
 0x27a   : > { %11026 = vrsqrt.f32 %v1383_v7  ;;  %v1368_v10 = vmul.f32 0.03125, %v1338_v8  ;;  %v1369_v11 = vmul.f32 0.03125, %v1340_v9 }
 0x27c   : > { %v1384_v14 = vadd.f32 1e-05, %v1368_v10  ;;  %v1385_v15 = vadd.f32 1e-05, %v1369_v11 }
 0x27d   : > { %v1342_v16 = vpop.xlane.xlu1 %1341  ;;  %v1344_v17 = vpop.xlane.xlu0 %1343 }
 0x27e   : > { %11028 = vrsqrt.f32 %v1384_v14  ;;  %v1370_v18 = vmul.f32 0.03125, %v1342_v16  ;;  %v1371_v19 = vmul.f32 0.03125, %v1344_v17 }
 0x27f   : > { %11030 = vrsqrt.f32 %v1385_v15 }
 0x280   : > { %v1386_v20 = vadd.f32 1e-05, %v1370_v18  ;;  %v1387_v21 = vadd.f32 1e-05, %v1371_v19 }
 0x281   : > { %v1346_v22 = vpop.xlane.xlu1 %1345  ;;  %v1348_v25 = vpop.xlane.xlu0 %1347 }
 0x282   : > { %11032 = vrsqrt.f32 %v1386_v20  ;;  %v1372_v33 = vmul.f32 0.03125, %v1346_v22  ;;  %v1373_v34 = vmul.f32 0.03125, %v1348_v25 }
 0x283   : > { %11034 = vrsqrt.f32 %v1387_v21 }
 0x284   : > { %v1388_v35 = vadd.f32 1e-05, %v1372_v33  ;;  %v1389_v36 = vadd.f32 1e-05, %v1373_v34 }
 0x285   : > { %v1350_v37 = vpop.xlane.xlu1 %1349  ;;  %v1352_v40 = vpop.xlane.xlu0 %1351 }
 0x286   : > { %11036 = vrsqrt.f32 %v1388_v35  ;;  %v1374_v41 = vmul.f32 0.03125, %v1350_v37  ;;  %v1375_v42 = vmul.f32 0.03125, %v1352_v40 }
 0x287   : > { %v11027_v27 = vpop.eup %11026  ;;  %11038 = vrsqrt.f32 %v1389_v36 }
 0x288   : > { %v1390_v44 = vadd.f32 1e-05, %v1374_v41  ;;  %v1391_v45 = vadd.f32 1e-05, %v1375_v42  ;;  %v1415_v49 = vmul.f32 %v11027_v27, %v12895_v46 }
 0x289   : > { %v1354_v50 = vpop.xlane.xlu1 %1353  ;;  %v1356_v51 = vpop.xlane.xlu0 %1355 }
 0x28a   : > { %11040 = vrsqrt.f32 %v1390_v44  ;;  %v1376_v52 = vmul.f32 0.03125, %v1354_v50  ;;  %v1377_v53 = vmul.f32 0.03125, %v1356_v51  ;;  %v1435_v55 = vmul.f32 %v13001_v48, %v1415_v49 }
 0x28b   : > { %v11029_v29 = vpop.eup %11028  ;;  %11042 = vrsqrt.f32 %v1391_v45 }
 0x28c   : > { %v11031_v58 = vpop.eup %11030  ;;  %v1392_v59 = vadd.f32 1e-05, %v1376_v52  ;;  %v1393_v60 = vadd.f32 1e-05, %v1377_v53  ;;  %v1416_v31 = vmul.f32 %v11029_v29, %v12905_v56  ;;  %v1455_v7 = vadd.f32 %v13006_v30, %v1435_v55 }
 0x28d   : > { %v1358_v63 = vpop.xlane.xlu1 %1357  ;;  %v1360_v0 = vpop.xlane.xlu0 %1359  ;;  %v1417_v46 = vmul.f32 %v11031_v58, %v12898_v47 }
 0x28e   : > { %11044 = vrsqrt.f32 %v1392_v59  ;;  %v1378_v1 = vmul.f32 0.03125, %v1358_v63  ;;  %v1379_v4 = vmul.f32 0.03125, %v1360_v0  ;;  %v1436_v5 = vmul.f32 %v13001_v48, %v1416_v31 }
 0x28f   : > { %v11033_v6 = vpop.eup %11032  ;;  %11046 = vrsqrt.f32 %v1393_v60  ;;  %v1437_v47 = vmul.f32 %v13001_v48, %v1417_v46 }
 0x290   : > { %v11035_v8 = vpop.eup %11034  ;;  %v1394_v9 = vadd.f32 1e-05, %v1378_v1  ;;  %v1395_v10 = vadd.f32 1e-05, %v1379_v4  ;;  %v1456_v11 = vadd.f32 %v13006_v30, %v1436_v5  ;;  %v1418_v56 = vmul.f32 %v11033_v6, %v12908_v57 }
 0x291   : > { %v1362_v14 = vpop.xlane.xlu1 %1361  ;;  %v1364_v15 = vpop.xlane.xlu0 %1363  ;;  %v1419_v16 = vmul.f32 %v11035_v8, %v12917_v2  ;;  %v1457_v36 = vadd.f32 %v13006_v30, %v1437_v47 }
 0x292   : > { %11048 = vrsqrt.f32 %v1394_v9  ;;  %v1380_v17 = vmul.f32 0.03125, %v1362_v14  ;;  %v1381_v18 = vmul.f32 0.03125, %v1364_v15  ;;  %v1490_v19 = vpack.c.bf16 %v1456_v11, %v1455_v7 }
 0x293   : > { %v11037_v20 = vpop.eup %11036  ;;  %11050 = vrsqrt.f32 %v1395_v10  ;;  %v1438_v21 = vmul.f32 %v13001_v48, %v1418_v56  ;;  %v1439_v22 = vmul.f32 %v13001_v48, %v1419_v16 }
 0x294   : > { %v11039_v25 = vpop.eup %11038  ;;  %v1396_v33 = vadd.f32 1e-05, %v1380_v17  ;;  %v1397_v34 = vadd.f32 1e-05, %v1381_v18  ;;  %10033 = vmatprep.mubr.bf16.mxu0 %v1490_v19  ;;  %v1420_v57 = vmul.f32 %v11037_v20, %v12920_v3 }
 0x295   : > { %v1366_v35 = vpop.xlane.xlu1 %1365  ;;  %v1458_v2 = vadd.f32 %v13006_v30, %v1438_v21  ;;  %v1421_v37 = vmul.f32 %v11039_v25, %v12929_v12  ;;  %v1459_v44 = vadd.f32 %v13006_v30, %v1439_v22  ;;  %v10834_v25 = vld [vmem:[%s1761_s15 + $0x38] sm:$0xff]  }
 0x296   : > { %11052 = vrsqrt.f32 %v1396_v33  ;;  %v1382_v40 = vmul.f32 0.03125, %v1366_v35  ;;  %v1440_v41 = vmul.f32 %v13001_v48, %v1420_v57  ;;  %10049 = vmatprep.subr.bf16.mxu1 %v10834_v25  ;;  %v10835_v33 = vld [vmem:[%s1761_s15 + $0x30] sm:$0xff]   ;;  %v10840_v57 = vld [vmem:[%s1761_s15 + $0x8] sm:$0xff]   ;;  %v10841_v35 = vld [vmem:[%s1761_s15] sm:$0xff]  }
 0x297   : > { %v11041_v42 = vpop.eup %11040  ;;  %11054 = vrsqrt.f32 %v1397_v34  ;;  %v1491_v27 = vpack.c.bf16 %v1458_v2, %v1457_v36  ;;  %v1441_v51 = vmul.f32 %v13001_v48, %v1421_v37  ;;  %10050 = vmatpush3.bf16.msra.mxu1 %v10834_v25  ;;  %v10837_v34 = vld [vmem:[%s1761_s15 + $0x20] sm:$0xff]  }
 0x298   : > { %v11043_v45 = vpop.eup %11042  ;;  %v1398_v49 = vadd.f32 1e-05, %v1382_v40  ;;  %v1460_v3 = vadd.f32 %v13006_v30, %v1440_v41  ;;  %v1422_v50 = vmul.f32 %v11041_v42, %v12932_v13  ;;  %10051 = vmatprep.subr.bf16.mxu1 %v10835_v33  ;;  %v13057_v36 = vld [vmem:[%s18003_s30] ss:$0 sm:$0xff]  ;;  %s18201_s30 = sld [smem:[#allocation139_spill]] }
 0x299   : > { %10034 = vmatmul.mubr.bf16.vlgmr.msra.gmra.mxu0 %v1491_v27  ;;  %v1423_v12 = vmul.f32 %v11043_v45, %v12948_v23  ;;  %v1461_v58 = vadd.f32 %v13006_v30, %v1441_v51 }
 0x29a   : > { %11056 = vrsqrt.f32 %v1398_v49  ;;  %v1492_v52 = vpack.c.bf16 %v1460_v3, %v1459_v44  ;;  %v1442_v53 = vmul.f32 %v13001_v48, %v1422_v50 }
 0x29b   : > { %v11045_v29 = vpop.eup %11044  ;;  %v1443_v13 = vmul.f32 %v13001_v48, %v1423_v12  ;;  %10052 = vmatpush3.bf16.msra.mxu1 %v10835_v33 }
 0x29c   : > { %v11047_v55 = vpop.eup %11046  ;;  %10037 = vmatprep.mubr.bf16.mxu0 %v1492_v52  ;;  %v1462_v59 = vadd.f32 %v13006_v30, %v1442_v53  ;;  %v1424_v60 = vmul.f32 %v11045_v29, %v12951_v24 }
 0x29d   : > { %v1425_v31 = vmul.f32 %v11047_v55, %v12961_v43  ;;  %v1463_v1 = vadd.f32 %v13006_v30, %v1443_v13 }
 0x29e   : > { %v1493_v63 = vpack.c.bf16 %v1462_v59, %v1461_v58  ;;  %v1444_v23 = vmul.f32 %v13001_v48, %v1424_v60 }
 0x29f   : > { %v11049_v0 = vpop.eup %11048  ;;  %v1445_v6 = vmul.f32 %v13001_v48, %v1425_v31 }
 0x2a0   : > { %v11051_v46 = vpop.eup %11050  ;;  %v1464_v4 = vadd.f32 %v13006_v30, %v1444_v23  ;;  %v1426_v5 = vmul.f32 %v11049_v0, %v12964_v26 }
 0x2a1   : > { %10038 = vmatmul.mubr.bf16.gmra.mxu0 %v1493_v63  ;;  %v1427_v24 = vmul.f32 %v11051_v46, %v12974_v54  ;;  %v1465_v10 = vadd.f32 %v13006_v30, %v1445_v6 }
 0x2a2   : > { %v1494_v7 = vpack.c.bf16 %v1464_v4, %v1463_v1  ;;  %v1446_v8 = vmul.f32 %v13001_v48, %v1426_v5 }
 0x2a3   : > { %v11053_v43 = vpop.eup %11052  ;;  %v1447_v14 = vmul.f32 %v13001_v48, %v1427_v24 }
 0x2a4   : > { %v11055_v9 = vpop.eup %11054  ;;  %10041 = vmatprep.mubr.bf16.mxu0 %v1494_v7  ;;  %v1466_v11 = vadd.f32 %v13006_v30, %v1446_v8  ;;  %v1428_v56 = vmul.f32 %v11053_v43, %v12977_v28 }
 0x2a5   : > { %v1429_v26 = vmul.f32 %v11055_v9, %v12987_v61  ;;  %v1467_v16 = vadd.f32 %v13006_v30, %v1447_v14 }
 0x2a6   : > { %v1495_v15 = vpack.c.bf16 %v1466_v11, %v1465_v10  ;;  %v1448_v54 = vmul.f32 %v13001_v48, %v1428_v56 }
 0x2a7   : > { %v11057_v47 = vpop.eup %11056  ;;  %v1449_v19 = vmul.f32 %v13001_v48, %v1429_v26 }
 0x2a8   : > { %v1468_v17 = vadd.f32 %v13006_v30, %v1448_v54  ;;  %v1430_v18 = vmul.f32 %v11057_v47, %v12990_v62  ;;  %v10836_v62 = vld [vmem:[%s1761_s15 + $0x28] sm:$0xff]  }
 0x2a9   : > { %10042 = vmatmul.mubr.bf16.gmra.mxu0 %v1495_v15  ;;  %v1469_v61 = vadd.f32 %v13006_v30, %v1449_v19  ;;  %10053 = vmatprep.subr.bf16.mxu1 %v10836_v62 }
 0x2aa   : > { %v1496_v20 = vpack.c.bf16 %v1468_v17, %v1467_v16  ;;  %v1450_v28 = vmul.f32 %v13001_v48, %v1430_v18  ;;  %10054 = vmatpush3.bf16.msra.mxu1 %v10836_v62  ;;  %v10838_v48 = vld [vmem:[%s1761_s15 + $0x18] sm:$0xff]  }
 0x2ab   : > { %10055 = vmatprep.subr.bf16.mxu1 %v10837_v34 }
 0x2ac   : > { %10045 = vmatprep.mubr.bf16.mxu0 %v1496_v20  ;;  %v1470_v21 = vadd.f32 %v13006_v30, %v1450_v28  ;;  %v10839_v30 = vld [vmem:[%s1761_s15 + $0x10] sm:$0xff]   ;;  %s16822_s15 = scalar_lea.vmem [#allocation20], %s12935_s17 }
 0x2ae   : > { %v1497_v22 = vpack.c.bf16 %v1470_v21, %v1469_v61  ;;  %10056 = vmatpush3.bf16.msra.mxu1 %v10837_v34 }
 0x2af   : > { %10057 = vmatprep.subr.bf16.mxu1 %v10838_v48 }
 0x2b1   : > { %10046 = vmatmul.mubr.bf16.gmra.mxu0 %v1497_v22 }
 0x2b2   : > { %10058 = vmatpush3.bf16.msra.mxu1 %v10838_v48 }
 0x2b3   : > { %10059 = vmatprep.subr.bf16.mxu1 %v10839_v30 }
 0x2b6   : > { %10060 = vmatpush3.bf16.msra.mxu1 %v10839_v30 }
 0x2b7   : > { %10061 = vmatprep.subr.bf16.mxu1 %v10840_v57 }
 0x2ba   : > { %10062 = vmatpush3.bf16.msra.mxu1 %v10840_v57 }
 0x2bb   : > { %10063 = vmatprep.subr.bf16.mxu1 %v10841_v35 }
 0x2be   : > { %10064 = vmatpush3.bf16.msra.mxu1 %v10841_v35 }
 0x359   : > { %v10035_v2 = vpop.f32.mrf.mxu0 }
 0x35a   : > { %v13060_v37 = vadd.f32 %v10035_v2, %v13057_v36 }
 0x35b   : > { %v1585_v40 = vpop.f32.mrf.mxu0 }
 0x35c   : > { %v9478_v41 = vmul.f32 -1.442695, %v13060_v37  ;;  %v13064_v42 = vadd.f32 %v13057_v36, %v1585_v40 }
 0x35d   : > { %v10036_v27 = vpop.f32.mrf.mxu0 }
 0x35e   : > { %11058 = vpow2.f32 %v9478_v41  ;;  %v9476_v44 = vmul.f32 -1.442695, %v13064_v42  ;;  %v13068_v45 = vadd.f32 %v10036_v27, %v13057_v36 }
 0x35f   : > { %v1588_v49 = vpop.f32.mrf.mxu0 }
 0x360   : > { %11060 = vpow2.f32 %v9476_v44  ;;  %v9479_v3 = vmul.f32 -1.442695, %v13068_v45  ;;  %v13072_v50 = vadd.f32 %v13057_v36, %v1588_v49 }
 0x361   : > { %v10039_v51 = vpop.f32.mrf.mxu0 }
 0x362   : > { %11062 = vpow2.f32 %v9479_v3  ;;  %v9477_v12 = vmul.f32 -1.442695, %v13072_v50  ;;  %v13076_v52 = vadd.f32 %v10039_v51, %v13057_v36 }
 0x363   : > { %v1601_v53 = vpop.f32.mrf.mxu0 }
 0x364   : > { %11064 = vpow2.f32 %v9477_v12  ;;  %v9482_v29 = vmul.f32 -1.442695, %v13076_v52  ;;  %v13080_v55 = vadd.f32 %v13057_v36, %v1601_v53 }
 0x365   : > { %v10040_v58 = vpop.f32.mrf.mxu0 }
 0x366   : > { %11066 = vpow2.f32 %v9482_v29  ;;  %v9480_v59 = vmul.f32 -1.442695, %v13080_v55  ;;  %v13084_v60 = vadd.f32 %v10040_v58, %v13057_v36 }
 0x367   : > { %v1604_v13 = vpop.f32.mrf.mxu0 }
 0x368   : > { %11068 = vpow2.f32 %v9480_v59  ;;  %v9483_v31 = vmul.f32 -1.442695, %v13084_v60  ;;  %v13088_v63 = vadd.f32 %v13057_v36, %v1604_v13 }
 0x369   : > { %v10043_v23 = vpop.f32.mrf.mxu0 }
 0x36a   : > { %11070 = vpow2.f32 %v9483_v31  ;;  %v9481_v0 = vmul.f32 -1.442695, %v13088_v63  ;;  %v13092_v46 = vadd.f32 %v10043_v23, %v13057_v36 }
 0x36b   : > { %v11059_v1 = vpop.eup %11058  ;;  %v1617_v4 = vpop.f32.mrf.mxu0 }
 0x36c   : > { %v1698_v5 = vadd.f32 1.0, %v11059_v1  ;;  %11072 = vpow2.f32 %v9481_v0  ;;  %v9486_v6 = vmul.f32 -1.442695, %v13092_v46  ;;  %v13096_v24 = vadd.f32 %v13057_v36, %v1617_v4 }
 0x36d   : > { %v11061_v7 = vpop.eup %11060  ;;  %v10044_v8 = vpop.f32.mrf.mxu0 }
 0x36e   : > { %11074 = vrcp.f32 %v1698_v5  ;;  %v1696_v43 = vadd.f32 1.0, %v11061_v7  ;;  %v9484_v9 = vmul.f32 -1.442695, %v13096_v24  ;;  %v13100_v10 = vadd.f32 %v10044_v8, %v13057_v36 }
 0x36f   : > { %v11063_v11 = vpop.eup %11062  ;;  %11076 = vpow2.f32 %v9486_v6  ;;  %v1620_v56 = vpop.f32.mrf.mxu0 }
 0x370   : > { %11078 = vrcp.f32 %v1696_v43  ;;  %v1699_v14 = vadd.f32 1.0, %v11063_v11  ;;  %v9487_v26 = vmul.f32 -1.442695, %v13100_v10  ;;  %v13104_v15 = vadd.f32 %v13057_v36, %v1620_v56 }
 0x371   : > { %v11065_v54 = vpop.eup %11064  ;;  %11080 = vpow2.f32 %v9484_v9  ;;  %v10047_v47 = vpop.f32.mrf.mxu0 }
 0x372   : > { %11082 = vrcp.f32 %v1699_v14  ;;  %v1697_v16 = vadd.f32 1.0, %v11065_v54  ;;  %v9485_v17 = vmul.f32 -1.442695, %v13104_v15  ;;  %v13108_v18 = vadd.f32 %v10047_v47, %v13057_v36 }
 0x373   : > { %v11067_v19 = vpop.eup %11066  ;;  %11084 = vpow2.f32 %v9487_v26  ;;  %v1633_v20 = vpop.f32.mrf.mxu0 }
 0x374   : > { %11086 = vrcp.f32 %v1697_v16  ;;  %v1702_v28 = vadd.f32 1.0, %v11067_v19  ;;  %v9490_v61 = vmul.f32 -1.442695, %v13108_v18  ;;  %v13112_v21 = vadd.f32 %v13057_v36, %v1633_v20 }
 0x375   : > { %v11069_v22 = vpop.eup %11068  ;;  %11088 = vpow2.f32 %v9485_v17  ;;  %v10048_v25 = vpop.f32.mrf.mxu0 }
 0x376   : > { %11090 = vrcp.f32 %v1702_v28  ;;  %v1700_v33 = vadd.f32 1.0, %v11069_v22  ;;  %v9488_v62 = vmul.f32 -1.442695, %v13112_v21  ;;  %v13116_v34 = vadd.f32 %v10048_v25, %v13057_v36 }
 0x377   : > { %v11071_v48 = vpop.eup %11070  ;;  %11092 = vpow2.f32 %v9490_v61  ;;  %v1636_v30 = vpop.f32.mrf.mxu0 }
 0x378   : > { %11094 = vrcp.f32 %v1700_v33  ;;  %v1703_v57 = vadd.f32 1.0, %v11071_v48  ;;  %v9491_v35 = vmul.f32 -1.442695, %v13116_v34  ;;  %v13120_v2 = vadd.f32 %v13057_v36, %v1636_v30 }
 0x379   : > { %v11073_v40 = vpop.eup %11072  ;;  %11096 = vpow2.f32 %v9488_v62 }
 0x37a   : > { %11098 = vrcp.f32 %v1703_v57  ;;  %v1701_v41 = vadd.f32 1.0, %v11073_v40  ;;  %v9489_v27 = vmul.f32 -1.442695, %v13120_v2 }
 0x37b   : > { %v11075_v44 = vpop.eup %11074  ;;  %11100 = vpow2.f32 %v9491_v35 }
 0x37c   : > { %v11077_v49 = vpop.eup %11076  ;;  %11102 = vrcp.f32 %v1701_v41  ;;  %v1746_v4 = vmul.f32 %v11075_v44, %v13060_v37  ;;  %v13140_v44 = vld [vmem:[%s12819_s19] ss:$0 sm:$0xff] }
 0x37d   : > { %v11079_v3 = vpop.eup %11078  ;;  %11104 = vpow2.f32 %v9489_v27  ;;  %v1706_v58 = vadd.f32 1.0, %v11077_v49 }
 0x37e   : > { %v11081_v51 = vpop.eup %11080  ;;  %v1744_v23 = vmul.f32 %v11079_v3, %v13064_v42 }
 0x37f   : > { %v11083_v12 = vpop.eup %11082  ;;  %v1704_v53 = vadd.f32 1.0, %v11081_v51 }
 0x380   : > { %v11085_v29 = vpop.eup %11084  ;;  %v1747_v36 = vmul.f32 %v11083_v12, %v13068_v45 }
 0x381   : > { %v11087_v59 = vpop.eup %11086  ;;  %v1707_v13 = vadd.f32 1.0, %v11085_v29  ;;  %11106 = vrcp.f32 %v1704_v53  ;;  %v11602_v29 = vld [vmem:[#allocation2 + $0x30] sm:$0xff] }
 0x382   : > { %v11089_v31 = vpop.eup %11088  ;;  %v1745_v0 = vmul.f32 %v11087_v59, %v13072_v50  ;;  %v1779_v43 = vpack.c.bf16 %v1747_v36, %v1746_v4 }
 0x383   : > { %v11091_v1 = vpop.eup %11090  ;;  %11108 = vrcp.f32 %v1707_v13  ;;  %v1705_v5 = vadd.f32 1.0, %v11089_v31 }
 0x384   : > { %v11093_v6 = vpop.eup %11092  ;;  %11110 = vrcp.f32 %v1706_v58  ;;  %v1778_v7 = vpack.c.bf16 %v1745_v0, %v1744_v23  ;;  %v1750_v16 = vmul.f32 %v11091_v1, %v13076_v52  ;;  %v11603_v23 = vld [vmem:[#allocation2 + $0x58] sm:$0xff] }
 0x385   : > { %v11095_v8 = vpop.eup %11094  ;;  %11112 = vrcp.f32 %v1705_v5  ;;  %v1710_v42 = vadd.f32 1.0, %v11093_v6  ;;  %v11604_v5 = vld [vmem:[#allocation2] sm:$0xff] }
 0x386   : > { %v11097_v9 = vpop.eup %11096  ;;  %10065 = vmatprep.mubr.bf16.mxu1 %v1778_v7  ;;  %v1748_v54 = vmul.f32 %v11095_v8, %v13080_v55 }
 0x387   : > { %v11099_v45 = vpop.eup %11098  ;;  %v1708_v11 = vadd.f32 1.0, %v11097_v9  ;;  %10066 = vmatmul.mubr.bf16.vlgmr.msra.gmra.mxu1 %v1779_v43  ;;  %v11605_v43 = vld [vmem:[#allocation2 + $0x18] sm:$0xff] }
 0x388   : > { %v11101_v56 = vpop.eup %11100  ;;  %v1751_v50 = vmul.f32 %v11099_v45, %v13084_v60 }
 0x389   : > { %v11103_v14 = vpop.eup %11102  ;;  %v1711_v26 = vadd.f32 1.0, %v11101_v56  ;;  %11114 = vrcp.f32 %v1708_v11  ;;  %v11606_v56 = vld [vmem:[#allocation2 + $0x50] sm:$0xff] }
 0x38a   : > { %v11105_v37 = vpop.eup %11104  ;;  %v1749_v47 = vmul.f32 %v11103_v14, %v13088_v63  ;;  %v1781_v20 = vpack.c.bf16 %v1751_v50, %v1750_v16 }
 0x38b   : > { %11116 = vrcp.f32 %v1711_v26  ;;  %v1709_v17 = vadd.f32 1.0, %v11105_v37 }
 0x38c   : > { %11118 = vrcp.f32 %v1710_v42  ;;  %v1780_v19 = vpack.c.bf16 %v1749_v47, %v1748_v54  ;;  %v11607_v54 = vld [vmem:[#allocation2 + $0x8] sm:$0xff] }
 0x38d   : > { %11120 = vrcp.f32 %v1709_v17 }
 0x38e   : > { %10069 = vmatprep.mubr.bf16.mxu1 %v1780_v19  ;;  %v11107_v28 = vpop.eup %11106  ;;  %v11608_v19 = vld [vmem:[#allocation2 + $0x68] sm:$0xff] }
 0x38f   : > { %10070 = vmatmul.mubr.bf16.gmra.mxu1 %v1781_v20  ;;  %v1752_v55 = vmul.f32 %v11107_v28, %v13096_v24 }
 0x390   : > { %v11109_v61 = vpop.eup %11108 }
 0x391   : > { %v11111_v60 = vpop.eup %11110  ;;  %v1755_v25 = vmul.f32 %v11109_v61, %v13100_v10 }
 0x392   : > { %v11113_v22 = vpop.eup %11112  ;;  %v1754_v52 = vmul.f32 %v11111_v60, %v13092_v46 }
 0x393   : > { %v1753_v63 = vmul.f32 %v11113_v22, %v13104_v15 }
 0x394   : > { %v1783_v62 = vpack.c.bf16 %v1755_v25, %v1754_v52  ;;  %v11609_v25 = vld [vmem:[#allocation2 + $0x48] sm:$0xff] }
 0x395   : > { %v1782_v33 = vpack.c.bf16 %v1753_v63, %v1752_v55 }
 0x396   : > { %v11115_v48 = vpop.eup %11114 }
 0x397   : > { %10073 = vmatprep.mubr.bf16.mxu1 %v1782_v33  ;;  %v1756_v41 = vmul.f32 %v11115_v48, %v13112_v21 }
 0x398   : > { %v11117_v30 = vpop.eup %11116  ;;  %10074 = vmatmul.mubr.bf16.gmra.mxu1 %v1783_v62  ;;  %v11610_v62 = vld [vmem:[#allocation2 + $0x40] sm:$0xff] }
 0x399   : > { %v11119_v57 = vpop.eup %11118  ;;  %v1759_v40 = vmul.f32 %v11117_v30, %v13116_v34 }
 0x39a   : > { %v11121_v35 = vpop.eup %11120  ;;  %v1758_v24 = vmul.f32 %v11119_v57, %v13108_v18 }
 0x39b   : > { %v1757_v10 = vmul.f32 %v11121_v35, %v13120_v2 }
 0x39c   : > { %v1785_v27 = vpack.c.bf16 %v1759_v40, %v1758_v24 }
 0x39d   : > { %v1784_v15 = vpack.c.bf16 %v1757_v10, %v1756_v41  ;;  %v11611_v10 = vld [vmem:[#allocation2 + $0x10] sm:$0xff] }
 0x39f   : > { %10077 = vmatprep.mubr.bf16.mxu1 %v1784_v15 }
 0x3a0   : > { %10078 = vmatmul.mubr.bf16.gmra.mxu1 %v1785_v27 }
 0x447   : > { %v10067_v46 = vpop.f32.mrf.mxu1 }
 0x448   : > { %v1882_v3 = vadd.f32 %v10067_v46, %v13140_v44  ;;  %v11612_v46 = vld [vmem:[#allocation2 + $0x20] sm:$0xff] }
 0x449   : > { %v1873_v49 = vpop.f32.mrf.mxu1 }
 0x44a   : > { %v1874_v51 = vadd.f32 %v13140_v44, %v1873_v49  ;;  %v1938_v2 = vmul.f32 0.5, %v1882_v3 }
 0x44b   : > { %v10068_v12 = vpop.f32.mrf.mxu1 }
 0x44c   : > { %v1936_v34 = vmul.f32 0.5, %v1874_v51  ;;  %v1885_v21 = vadd.f32 %v10068_v12, %v13140_v44  ;;  %v13149_v0 = vadd.f32 %v11603_v23, %v1938_v2  ;;  %v11613_v12 = vld [vmem:[#allocation2 + $0x38] sm:$0xff]  ;;  %v11614_v2 = vld [vmem:[#allocation2 + $0x60] sm:$0xff] }
 0x44d   : > { %v1876_v53 = vpop.f32.mrf.mxu1 }
 0x44e   : > { %v13145_v18 = vadd.f32 %v11602_v29, %v1936_v34  ;;  %v1877_v58 = vadd.f32 %v13140_v44, %v1876_v53  ;;  %v1939_v13 = vmul.f32 0.5, %v1885_v21  ;;  %18005 = vst [vmem:[#allocation55_spill] sm:$0xff] %v13149_v0 }
 0x44f   : > { %v10071_v59 = vpop.f32.mrf.mxu1 }
 0x450   : > { %18004 = vst [vmem:[#allocation54_spill] sm:$0xff] %v13145_v18  ;;  %v1937_v36 = vmul.f32 0.5, %v1877_v58  ;;  %1970 = vadd.xlane.f32.xlu0 %v13145_v18  ;;  %v1898_v1 = vadd.f32 %v10071_v59, %v13140_v44  ;;  %v13157_v9 = vadd.f32 %v11605_v43, %v1939_v13  ;;  %v11615_v13 = vld [vmem:[#allocation2 + $0x78] sm:$0xff] }
 0x451   : > { %v1889_v31 = vpop.f32.mrf.mxu1  ;;  %v10845_v43 = vld [vmem:[%s13207_s29 + $0x158] ss:$24 sps:$4 sm:$0xff]  }
 0x452   : > { %v1890_v4 = vadd.f32 %v13140_v44, %v1889_v31  ;;  %v13153_v6 = vadd.f32 %v11604_v5, %v1937_v36  ;;  %18007 = vst [vmem:[#allocation57_spill] sm:$0xff] %v13157_v9  ;;  %v1942_v11 = vmul.f32 0.5, %v1898_v1  ;;  %v11616_v1 = vld [vmem:[#allocation2 + $0x70] sm:$0xff]  ;;  %v11617_v5 = vld [vmem:[#allocation2 + $0x28] sm:$0xff] }
 0x453   : > { %v10072_v7 = vpop.f32.mrf.mxu1 }
 0x454   : > { %18006 = vst [vmem:[#allocation56_spill] sm:$0xff] %v13153_v6  ;;  %v1940_v8 = vmul.f32 0.5, %v1890_v4  ;;  %1972 = vadd.xlane.f32.xlu1 %v13153_v6  ;;  %1974 = vadd.xlane.f32.xlu0 %v13149_v0  ;;  %v1901_v14 = vadd.f32 %v10072_v7, %v13140_v44  ;;  %v13165_v47 = vadd.f32 %v11607_v54, %v1942_v11 }
 0x455   : > { %v1892_v45 = vpop.f32.mrf.mxu1 }
 0x456   : > { %v13159_v42 = vadd.f32 %v11606_v56, %v1940_v8  ;;  %v1893_v50 = vadd.f32 %v13140_v44, %v1892_v45  ;;  %18009 = vst [vmem:[#allocation59_spill] sm:$0xff] %v13165_v47  ;;  %v1943_v16 = vmul.f32 0.5, %v1901_v14  ;;  %v10844_v8 = vld [vmem:[%s13207_s29 + $0x154] ss:$24 sps:$4 sm:$0xff]  }
 0x457   : > { %v10847_v45 = vld [vmem:[%s13207_s29 + $0x15c] ss:$24 sps:$4 sm:$0xff]   ;;  %2533 = vmatprep.subr.bf16.mxu0 %v10844_v8  ;;  %v10853_v8 = vld [vmem:[%s13207_s29 + $0x12c] ss:$24 sps:$4 sm:$0xff]  }
 0x458   : > { %18008 = vst [vmem:[#allocation58_spill] sm:$0xff] %v13159_v42  ;;  %v1941_v26 = vmul.f32 0.5, %v1893_v50  ;;  %v10075_v37 = vpop.f32.mrf.mxu1  ;;  %1976 = vadd.xlane.f32.xlu1 %v13157_v9  ;;  %1978 = vadd.xlane.f32.xlu0 %v13159_v42  ;;  %v13173_v55 = vadd.f32 %v11609_v25, %v1943_v16 }
 0x459   : > { %v1914_v28 = vadd.f32 %v10075_v37, %v13140_v44  ;;  %2646 = vmatprep.subr.bf16.mxu1 %v10847_v45 }
 0x45a   : > { %v1905_v17 = vpop.f32.mrf.mxu1  ;;  %v13167_v20 = vadd.f32 %v11608_v19, %v1941_v26  ;;  %18011 = vst [vmem:[#allocation61_spill] sm:$0xff] %v13173_v55  ;;  %2647 = vmatpush1.bf16.msra.mxu1 %v10845_v43 }
 0x45b   : > { %v1906_v61 = vadd.f32 %v13140_v44, %v1905_v17  ;;  %v1946_v33 = vmul.f32 0.5, %v1914_v28  ;;  %2648 = vmatprep.subr.bf16.mxu1 %v10853_v8 }
 0x45c   : > { %18010 = vst [vmem:[#allocation60_spill] sm:$0xff] %v13167_v20  ;;  %v10076_v60 = vpop.f32.mrf.mxu1  ;;  %1980 = vadd.xlane.f32.xlu1 %v13167_v20  ;;  %1982 = vadd.xlane.f32.xlu0 %v13165_v47 }
 0x45d   : > { %v1944_v22 = vmul.f32 0.5, %v1906_v61  ;;  %v1917_v63 = vadd.f32 %v10076_v60, %v13140_v44  ;;  %v13181_v24 = vadd.f32 %v11611_v10, %v1946_v33 }
 0x45e   : > { %v1908_v52 = vpop.f32.mrf.mxu1 }
 0x45f   : > { %v13176_v48 = vadd.f32 %v11610_v62, %v1944_v22  ;;  %v1909_v30 = vadd.f32 %v13140_v44, %v1908_v52  ;;  %v1947_v40 = vmul.f32 0.5, %v1917_v63  ;;  %18013 = vst [vmem:[#allocation63_spill] sm:$0xff] %v13181_v24 }
 0x460   : > { %v10079_v57 = vpop.f32.mrf.mxu1  ;;  %1984 = vadd.xlane.f32.xlu1 %v13173_v55 }
 0x461   : > { %18012 = vst [vmem:[#allocation62_spill] sm:$0xff] %v13176_v48  ;;  %v1945_v35 = vmul.f32 0.5, %v1909_v30  ;;  %1986 = vadd.xlane.f32.xlu0 %v13176_v48  ;;  %v1930_v15 = vadd.f32 %v10079_v57, %v13140_v44  ;;  %v13189_v34 = vadd.f32 %v11613_v12, %v1947_v40 }
 0x462   : > { %v1921_v41 = vpop.f32.mrf.mxu1 }
 0x463   : > { %v1922_v27 = vadd.f32 %v13140_v44, %v1921_v41  ;;  %v13185_v49 = vadd.f32 %v11612_v46, %v1945_v35  ;;  %18015 = vst [vmem:[#allocation65_spill] sm:$0xff] %v13189_v34  ;;  %v1950_v53 = vmul.f32 0.5, %v1930_v15 }
 0x464   : > { %v10080_v3 = vpop.f32.mrf.mxu1 }
 0x465   : > { %18014 = vst [vmem:[#allocation64_spill] sm:$0xff] %v13185_v49  ;;  %v1948_v51 = vmul.f32 0.5, %v1922_v27  ;;  %1988 = vadd.xlane.f32.xlu1 %v13185_v49  ;;  %1990 = vadd.xlane.f32.xlu0 %v13181_v24  ;;  %v1933_v58 = vadd.f32 %v10080_v3, %v13140_v44  ;;  %v13197_v31 = vadd.f32 %v11615_v13, %v1950_v53 }
 0x466   : > { %v1924_v21 = vpop.f32.mrf.mxu1 }
 0x467   : > { %v13191_v29 = vadd.f32 %v11614_v2, %v1948_v51  ;;  %v1925_v59 = vadd.f32 %v13140_v44, %v1924_v21  ;;  %18017 = vst [vmem:[#allocation67_spill] sm:$0xff] %v13197_v31  ;;  %v1951_v23 = vmul.f32 0.5, %v1933_v58  ;;  %v10842_v44 = vld [vmem:[%s13207_s29 + $0x150] ss:$24 sps:$4 sm:$0xff]  }
 0x468   : > { %2534 = vmatpush1.bf16.msra.mxu0 %v10842_v44  ;;  %v10850_v44 = vld [vmem:[%s13207_s29 + $0x124] ss:$24 sps:$4 sm:$0xff]  }
 0x469   : > { %18016 = vst [vmem:[#allocation66_spill] sm:$0xff] %v13191_v29  ;;  %v1949_v36 = vmul.f32 0.5, %v1925_v59  ;;  %1992 = vadd.xlane.f32.xlu1 %v13189_v34  ;;  %1994 = vadd.xlane.f32.xlu0 %v13191_v29  ;;  %v13203_v7 = vadd.f32 %v11617_v5, %v1951_v23 }
 0x46a   : > { %2535 = vmatprep.subr.bf16.mxu0 %v10850_v44 }
 0x46b   : > { %v13199_v4 = vadd.f32 %v11616_v1, %v1949_v36  ;;  %18019 = vst [vmem:[#allocation69_spill] sm:$0xff] %v13203_v7 }
 0x46d   : > { %18018 = vst [vmem:[#allocation68_spill] sm:$0xff] %v13199_v4  ;;  %1996 = vadd.xlane.f32.xlu1 %v13199_v4  ;;  %1998 = vadd.xlane.f32.xlu0 %v13197_v31 }
 0x471   : > { %2000 = vadd.xlane.f32.xlu1 %v13203_v7 }
 0x4d9   : > { %v1971_v11 = vpop.xlane.xlu0 %1970 }
 0x4da   : > { %v2002_v56 = vmul.f32 0.03125, %v1971_v11 }
 0x4dc   : > { %v2018_v14 = vsub.f32 %v13145_v18, %v2002_v56  ;;  %v10848_v56 = vld [vmem:[%s13207_s29 + $0x120] ss:$24 sps:$4 sm:$0xff]   ;;  %v13669_v18 = vld [vmem:[#allocation6 + $0x88] sm:$0xff] }
 0x4dd   : > { %v1973_v50 = vpop.xlane.xlu1 %1972  ;;  %v1975_v26 = vpop.xlane.xlu0 %1974  ;;  %2536 = vmatpush1.bf16.msra.mxu0 %v10848_v56  ;;  %v10868_v56 = vld [vmem:[%s13207_s29 + $0x94] ss:$24 sps:$4 sm:$0xff]  }
 0x4de   : > { %v2003_v37 = vmul.f32 0.03125, %v1973_v50  ;;  %v2004_v54 = vmul.f32 0.03125, %v1975_v26  ;;  %v13215_v16 = vmul.f32 %v12892_v39, %v2018_v14  ;;  %v10851_v14 = vld [vmem:[%s13207_s29 + $0x128] ss:$24 sps:$4 sm:$0xff]  }
 0x4df   : > { %2649 = vmatpush1.bf16.msra.mxu1 %v10851_v14  ;;  %v10871_v14 = vld [vmem:[%s13207_s29 + $0x9c] ss:$24 sps:$4 sm:$0xff]  }
 0x4e0   : > { %v2019_v17 = vsub.f32 %v13153_v6, %v2003_v37  ;;  %v2020_v19 = vsub.f32 %v13149_v0, %v2004_v54  ;;  %v2050_v28 = vmul.f32 %v13215_v16, %v13215_v16 }
 0x4e1   : > { %v1977_v61 = vpop.xlane.xlu1 %1976  ;;  %v1979_v60 = vpop.xlane.xlu0 %1978 }
 0x4e2   : > { %v2005_v22 = vmul.f32 0.03125, %v1977_v61  ;;  %v2006_v25 = vmul.f32 0.03125, %v1979_v60  ;;  %2066 = vadd.xlane.f32.xlu0 %v2050_v28  ;;  %v13222_v63 = vmul.f32 %v12892_v39, %v2019_v17  ;;  %v13225_v52 = vmul.f32 %v12892_v39, %v2020_v19  ;;  %v10856_v61 = vld [vmem:[%s13207_s29 + $0xf4] ss:$24 sps:$4 sm:$0xff]  }
 0x4e3   : > { %v10859_v60 = vld [vmem:[%s13207_s29 + $0xfc] ss:$24 sps:$4 sm:$0xff]   ;;  %2537 = vmatprep.subr.bf16.mxu0 %v10856_v61 }
 0x4e4   : > { %v2021_v33 = vsub.f32 %v13157_v9, %v2005_v22  ;;  %v2022_v62 = vsub.f32 %v13159_v42, %v2006_v25  ;;  %v2051_v30 = vmul.f32 %v13222_v63, %v13222_v63  ;;  %v2052_v57 = vmul.f32 %v13225_v52, %v13225_v52  ;;  %2650 = vmatprep.subr.bf16.mxu1 %v10859_v60 }
 0x4e5   : > { %v1981_v35 = vpop.xlane.xlu1 %1980  ;;  %v1983_v40 = vpop.xlane.xlu0 %1982  ;;  %v18051_v9 = vmov 0  }
 0x4e6   : > { %v2007_v41 = vmul.f32 0.03125, %v1981_v35  ;;  %v2008_v10 = vmul.f32 0.03125, %v1983_v40  ;;  %2068 = vadd.xlane.f32.xlu1 %v2051_v30  ;;  %2070 = vadd.xlane.f32.xlu0 %v2052_v57  ;;  %v13234_v15 = vmul.f32 %v12892_v39, %v2021_v33  ;;  %v13237_v27 = vmul.f32 %v12892_v39, %v2022_v62  ;;  %v10854_v33 = vld [vmem:[%s13207_s29 + $0xf0] ss:$24 sps:$4 sm:$0xff]  }
 0x4e7   : > { %v10857_v62 = vld [vmem:[%s13207_s29 + $0xf8] ss:$24 sps:$4 sm:$0xff]   ;;  %2538 = vmatpush1.bf16.msra.mxu0 %v10854_v33  ;;  %v10877_v33 = vld [vmem:[%s13207_s29 + $0x6c] ss:$24 sps:$4 sm:$0xff]  }
 0x4e8   : > { %v2023_v46 = vsub.f32 %v13167_v20, %v2007_v41  ;;  %v2024_v3 = vsub.f32 %v13165_v47, %v2008_v10  ;;  %v2053_v51 = vmul.f32 %v13234_v15, %v13234_v15  ;;  %v2054_v12 = vmul.f32 %v13237_v27, %v13237_v27  ;;  %2651 = vmatpush1.bf16.msra.mxu1 %v10857_v62  ;;  %v10872_v62 = vld [vmem:[%s13207_s29 + $0x60] ss:$24 sps:$4 sm:$0xff]  }
 0x4e9   : > { %v1985_v21 = vpop.xlane.xlu1 %1984 }
 0x4ea   : > { %v2009_v53 = vmul.f32 0.03125, %v1985_v21  ;;  %v1987_v2 = vpop.xlane.xlu0 %1986  ;;  %2072 = vadd.xlane.f32.xlu1 %v2053_v51  ;;  %2074 = vadd.xlane.f32.xlu0 %v2054_v12  ;;  %v13246_v58 = vmul.f32 %v12892_v39, %v2023_v46  ;;  %v13249_v59 = vmul.f32 %v12892_v39, %v2024_v3  ;;  %v10862_v51 = vld [vmem:[%s13207_s29 + $0xc4] ss:$24 sps:$4 sm:$0xff]  }
 0x4eb   : > { %v2010_v36 = vmul.f32 0.03125, %v1987_v2  ;;  %v10865_v12 = vld [vmem:[%s13207_s29 + $0xcc] ss:$24 sps:$4 sm:$0xff]   ;;  %v10860_v2 = vld [vmem:[%s13207_s29 + $0xc0] ss:$24 sps:$4 sm:$0xff]   ;;  %2539 = vmatprep.subr.bf16.mxu0 %v10862_v51 }
 0x4ec   : > { %v2025_v13 = vsub.f32 %v13173_v55, %v2009_v53  ;;  %v2055_v23 = vmul.f32 %v13246_v58, %v13246_v58  ;;  %v2056_v1 = vmul.f32 %v13249_v59, %v13249_v59  ;;  %2652 = vmatprep.subr.bf16.mxu1 %v10865_v12  ;;  %2540 = vmatpush1.bf16.msra.mxu0 %v10860_v2  ;;  %v10881_v51 = vld [vmem:[%s13207_s29 + $0x38] ss:$24 sps:$4 sm:$0xff]   ;;  %v10886_v12 = vld [vmem:[%s13207_s29 + $0x4] ss:$24 sps:$4 sm:$0xff]   ;;  %v10887_v2 = vld [vmem:[%s13207_s29 + $0x8] ss:$24 sps:$4 sm:$0xff]  }
 0x4ed   : > { %v2026_v5 = vsub.f32 %v13176_v48, %v2010_v36  ;;  %v10863_v36 = vld [vmem:[%s13207_s29 + $0xc8] ss:$24 sps:$4 sm:$0xff]   ;;  %2541 = vmatprep.subr.bf16.mxu0 %v10868_v56 }
 0x4ee   : > { %v1989_v43 = vpop.xlane.xlu1 %1988  ;;  %v1991_v45 = vpop.xlane.xlu0 %1990  ;;  %2076 = vadd.xlane.f32.xlu1 %v2055_v23  ;;  %2078 = vadd.xlane.f32.xlu0 %v2056_v1  ;;  %v13260_v11 = vmul.f32 %v12892_v39, %v2025_v13 }
 0x4ef   : > { %v2011_v50 = vmul.f32 0.03125, %v1989_v43  ;;  %v2012_v26 = vmul.f32 0.03125, %v1991_v45  ;;  %v13265_v37 = vmul.f32 %v12892_v39, %v2026_v5  ;;  %2653 = vmatpush1.bf16.msra.mxu1 %v10863_v36  ;;  %v17723_v36 = vmov 0  }
 0x4f0   : > { %v2057_v54 = vmul.f32 %v13260_v11, %v13260_v11  ;;  %2654 = vmatprep.subr.bf16.mxu1 %v10871_v14  ;;  %2565 = vmatprep.mubr.bf16.mxu0 %v17723_v36 }
 0x4f1   : > { %v2027_v17 = vsub.f32 %v13185_v49, %v2011_v50  ;;  %v2028_v19 = vsub.f32 %v13181_v24, %v2012_v26  ;;  %v2058_v28 = vmul.f32 %v13265_v37, %v13265_v37  ;;  %v10866_v26 = vld [vmem:[%s13207_s29 + $0x90] ss:$24 sps:$4 sm:$0xff]   ;;  %2678 = vmatprep.mubr.bf16.mxu1 %v17723_v36  ;;  %10630 = vset.pattern.permute.xlu1 %v17723_v36 }
 0x4f2   : > { %v1993_v22 = vpop.xlane.xlu1 %1992  ;;  %v1995_v25 = vpop.xlane.xlu0 %1994  ;;  %2080 = vadd.xlane.f32.xlu1 %v2057_v54  ;;  %v10869_v54 = vld [vmem:[%s13207_s29 + $0x98] ss:$24 sps:$4 sm:$0xff]   ;;  %2542 = vmatpush1.bf16.msra.mxu0 %v10866_v26 }
 0x4f3   : > { %v2013_v30 = vmul.f32 0.03125, %v1993_v22  ;;  %v2014_v57 = vmul.f32 0.03125, %v1995_v25  ;;  %2082 = vadd.xlane.f32.xlu0 %v2058_v28  ;;  %v13278_v35 = vmul.f32 %v12892_v39, %v2027_v17  ;;  %v13281_v40 = vmul.f32 %v12892_v39, %v2028_v19  ;;  %v10874_v25 = vld [vmem:[%s13207_s29 + $0x64] ss:$24 sps:$4 sm:$0xff]   ;;  %2655 = vmatpush1.bf16.msra.mxu1 %v10869_v54 }
 0x4f4   : > { %2543 = vmatprep.subr.bf16.mxu0 %v10874_v25  ;;  %2656 = vmatprep.subr.bf16.mxu1 %v10877_v33 }
 0x4f5   : > { %v2029_v41 = vsub.f32 %v13189_v34, %v2013_v30  ;;  %v2030_v10 = vsub.f32 %v13191_v29, %v2014_v57  ;;  %v2059_v46 = vmul.f32 %v13278_v35, %v13278_v35  ;;  %v2060_v3 = vmul.f32 %v13281_v40, %v13281_v40  ;;  %v10875_v30 = vld [vmem:[%s13207_s29 + $0x68] ss:$24 sps:$4 sm:$0xff]   ;;  %10624 = vset.pattern.permute.xlu0 %v17723_v36 }
 0x4f6   : > { %v1997_v21 = vpop.xlane.xlu1 %1996  ;;  %v1999_v53 = vpop.xlane.xlu0 %1998  ;;  %2544 = vmatpush1.bf16.msra.mxu0 %v10872_v62 }
 0x4f7   : > { %v2015_v13 = vmul.f32 0.03125, %v1997_v21  ;;  %v2016_v23 = vmul.f32 0.03125, %v1999_v53  ;;  %2084 = vadd.xlane.f32.xlu1 %v2059_v46  ;;  %2086 = vadd.xlane.f32.xlu0 %v2060_v3  ;;  %v13294_v1 = vmul.f32 %v12892_v39, %v2029_v41  ;;  %v13297_v5 = vmul.f32 %v12892_v39, %v2030_v10  ;;  %v10880_v10 = vld [vmem:[%s13207_s29 + $0x34] ss:$24 sps:$4 sm:$0xff]   ;;  %v10878_v3 = vld [vmem:[%s13207_s29 + $0x30] ss:$24 sps:$4 sm:$0xff]  }
 0x4f8   : > { %2657 = vmatpush1.bf16.msra.mxu1 %v10875_v30  ;;  %v10883_v46 = vld [vmem:[%s13207_s29 + $0x3c] ss:$24 sps:$4 sm:$0xff]   ;;  %2545 = vmatprep.subr.bf16.mxu0 %v10880_v10  ;;  %v10889_v21 = vld [vmem:[%s13207_s29 + $0xc] ss:$24 sps:$4 sm:$0xff]   ;;  %v10884_v53 = vld [vmem:[%s13207_s29] ss:$24 sps:$4 sm:$0xff]  }
 0x4f9   : > { %v2031_v44 = vsub.f32 %v13199_v4, %v2015_v13  ;;  %v2032_v8 = vsub.f32 %v13197_v31, %v2016_v23  ;;  %v2061_v43 = vmul.f32 %v13294_v1, %v13294_v1  ;;  %v2062_v45 = vmul.f32 %v13297_v5, %v13297_v5  ;;  %2658 = vmatprep.subr.bf16.mxu1 %v10883_v46  ;;  %v10892_v13 = vld [vmem:[%s13207_s29 + $0x164] ss:$24 sps:$4 sm:$0xff]  }
 0x4fa   : > { %v2001_v50 = vpop.xlane.xlu1 %2000  ;;  %2546 = vmatpush1.bf16.msra.mxu0 %v10878_v3 }
 0x4fb   : > { %v2017_v17 = vmul.f32 0.03125, %v2001_v50  ;;  %2088 = vadd.xlane.f32.xlu1 %v2061_v43  ;;  %2090 = vadd.xlane.f32.xlu0 %v2062_v45  ;;  %v13310_v19 = vmul.f32 %v12892_v39, %v2031_v44  ;;  %v13313_v28 = vmul.f32 %v12892_v39, %v2032_v8 }
 0x4fc   : > { %2659 = vmatpush1.bf16.msra.mxu1 %v10881_v51  ;;  %2547 = vmatprep.subr.bf16.mxu0 %v10886_v12 }
 0x4fd   : > { %v2033_v61 = vsub.f32 %v13203_v7, %v2017_v17  ;;  %v2063_v60 = vmul.f32 %v13310_v19, %v13310_v19  ;;  %v2064_v22 = vmul.f32 %v13313_v28, %v13313_v28  ;;  %2660 = vmatprep.subr.bf16.mxu1 %v10889_v21  ;;  %v13344_v21 = vld [vmem:[%s12809_s3 + $0x1] ss:$0 sm:$0xff] }
 0x4fe   : > { %2548 = vmatpush1.bf16.msra.mxu0 %v10884_v53 }
 0x4ff   : > { %2092 = vadd.xlane.f32.xlu1 %v2063_v60  ;;  %2094 = vadd.xlane.f32.xlu0 %v2064_v22  ;;  %v13325_v57 = vmul.f32 %v12892_v39, %v2033_v61  ;;  %v13619_v39 = vld [vmem:[#allocation6 + $0xd0] sm:$0xff] }
 0x500   : > { %2661 = vmatpush1.bf16.msra.mxu1 %v10887_v2  ;;  %2759 = vmatprep.subr.bf16.mxu0 %v10892_v13  ;;  %18044 = vst [vmem:[#allocation92_spill] sm:$0xff] %v13619_v39 }
 0x501   : > { %v2065_v41 = vmul.f32 %v13325_v57, %v13325_v57 }
 0x503   : > { %2096 = vadd.xlane.f32.xlu1 %v2065_v41 }
 0x56b   : > { %v2067_v23 = vpop.xlane.xlu0 %2066 }
 0x56c   : > { %v2098_v44 = vmul.f32 0.03125, %v2067_v23 }
 0x56e   : > { %v2114_v8 = vadd.f32 1e-05, %v2098_v44 }
 0x56f   : > { %v2069_v43 = vpop.xlane.xlu1 %2068  ;;  %v2071_v45 = vpop.xlane.xlu0 %2070 }
 0x570   : > { %11122 = vrsqrt.f32 %v2114_v8  ;;  %v2099_v56 = vmul.f32 0.03125, %v2069_v43  ;;  %v2100_v14 = vmul.f32 0.03125, %v2071_v45 }
 0x572   : > { %v2115_v50 = vadd.f32 1e-05, %v2099_v56  ;;  %v2116_v26 = vadd.f32 1e-05, %v2100_v14  ;;  %v13350_v56 = vld [vmem:[%s12814_s25 + $0x1] ss:$0 sm:$0xff] }
 0x573   : > { %v2073_v54 = vpop.xlane.xlu1 %2072  ;;  %v2075_v17 = vpop.xlane.xlu0 %2074 }
 0x574   : > { %11124 = vrsqrt.f32 %v2115_v50  ;;  %v2101_v61 = vmul.f32 0.03125, %v2073_v54  ;;  %v2102_v22 = vmul.f32 0.03125, %v2075_v17 }
 0x575   : > { %11126 = vrsqrt.f32 %v2116_v26  ;;  %v10916_v26 = vld [vmem:[%s13353_s11 + $0xe4] ss:$16 sps:$4 sm:$0xff]  }
 0x576   : > { %v2117_v60 = vadd.f32 1e-05, %v2101_v61  ;;  %v2118_v62 = vadd.f32 1e-05, %v2102_v22  ;;  %v10890_v22 = vld [vmem:[%s13207_s29 + $0x160] ss:$24 sps:$4 sm:$0xff]   ;;  %3121 = vmatprep.subr.bf16.mxu1 %v10916_v26 }
 0x577   : > { %v2077_v25 = vpop.xlane.xlu1 %2076  ;;  %v2079_v41 = vpop.xlane.xlu0 %2078  ;;  %v10901_v26 = vld [vmem:[%s13207_s29 + $0xd4] ss:$24 sps:$4 sm:$0xff]  }
 0x578   : > { %11128 = vrsqrt.f32 %v2117_v60  ;;  %v2103_v33 = vmul.f32 0.03125, %v2077_v25  ;;  %v2104_v51 = vmul.f32 0.03125, %v2079_v41 }
 0x57a   : > { %v2119_v30 = vadd.f32 1e-05, %v2103_v33  ;;  %v2120_v13 = vadd.f32 1e-05, %v2104_v51 }
 0x57b   : > { %v2081_v10 = vpop.xlane.xlu1 %2080 }
 0x57c   : > { %11130 = vrsqrt.f32 %v2119_v30  ;;  %v2105_v46 = vmul.f32 0.03125, %v2081_v10  ;;  %v2083_v8 = vpop.xlane.xlu0 %2082  ;;  %v10914_v30 = vld [vmem:[%s13353_s11 + $0xe0] ss:$16 sps:$4 sm:$0xff]  }
 0x57d   : > { %v11123_v3 = vpop.eup %11122  ;;  %11132 = vrsqrt.f32 %v2118_v62 }
 0x57e   : > { %v2146_v12 = vmul.f32 %v11123_v3, %v13215_v16  ;;  %v2121_v53 = vadd.f32 1e-05, %v2105_v46  ;;  %v10895_v46 = vld [vmem:[%s13207_s29 + $0x134] ss:$24 sps:$4 sm:$0xff]  }
 0x57f   : > { %v10919_v3 = vld [vmem:[%s13353_s11 + $0xc4] ss:$16 sps:$4 sm:$0xff]  }
 0x580   : > { %v2085_v23 = vpop.xlane.xlu1 %2084  ;;  %v2166_v43 = vmul.f32 %v13344_v21, %v2146_v12  ;;  %11134 = vrsqrt.f32 %v2121_v53  ;;  %v2087_v12 = vpop.xlane.xlu0 %2086  ;;  %v10893_v53 = vld [vmem:[%s13207_s29 + $0x130] ss:$24 sps:$4 sm:$0xff]  }
 0x581   : > { %v11125_v2 = vpop.eup %11124  ;;  %v2107_v14 = vmul.f32 0.03125, %v2085_v23  ;;  %11136 = vrsqrt.f32 %v2120_v13 }
 0x582   : > { %v2147_v44 = vmul.f32 %v11125_v2, %v13222_v63  ;;  %v11127_v45 = vpop.eup %11126  ;;  %v2106_v63 = vmul.f32 0.03125, %v2083_v8  ;;  %v2186_v54 = vadd.f32 %v13350_v56, %v2166_v43  ;;  %v10898_v2 = vld [vmem:[%s13207_s29 + $0x104] ss:$24 sps:$4 sm:$0xff]   ;;  %v10917_v8 = vld [vmem:[%s13353_s11 + $0xc0] ss:$16 sps:$4 sm:$0xff]  }
 0x583   : > { %v2148_v61 = vmul.f32 %v11127_v45, %v13225_v52  ;;  %v2123_v25 = vadd.f32 1e-05, %v2107_v14  ;;  %v10922_v43 = vld [vmem:[%s13353_s11 + $0xa4] ss:$16 sps:$4 sm:$0xff]   ;;  %v2108_v45 = vmul.f32 0.03125, %v2087_v12 }
 0x584   : > { %v2167_v16 = vmul.f32 %v13344_v21, %v2147_v44  ;;  %v2089_v10 = vpop.xlane.xlu1 %2088  ;;  %v2122_v51 = vadd.f32 1e-05, %v2106_v63  ;;  %v10920_v63 = vld [vmem:[%s13353_s11 + $0xa0] ss:$16 sps:$4 sm:$0xff]  }
 0x585   : > { %v11129_v50 = vpop.eup %11128  ;;  %v2168_v52 = vmul.f32 %v13344_v21, %v2148_v61  ;;  %11138 = vrsqrt.f32 %v2123_v25  ;;  %v2109_v13 = vmul.f32 0.03125, %v2089_v10 }
 0x586   : > { %v2187_v17 = vadd.f32 %v13350_v56, %v2167_v16  ;;  %v2149_v60 = vmul.f32 %v11129_v50, %v13234_v15  ;;  %11140 = vrsqrt.f32 %v2122_v51  ;;  %v10896_v50 = vld [vmem:[%s13207_s29 + $0x100] ss:$24 sps:$4 sm:$0xff]  }
 0x587   : > { %v2188_v14 = vadd.f32 %v13350_v56, %v2168_v52  ;;  %v10923_v51 = vld [vmem:[%s13353_s11 + $0x80] ss:$16 sps:$4 sm:$0xff]   ;;  %v10904_v52 = vld [vmem:[%s13207_s29 + $0xa4] ss:$24 sps:$4 sm:$0xff]  }
 0x588   : > { %v13361_v33 = vpack.c.bf16 %v2187_v17, %v2186_v54  ;;  %v2169_v62 = vmul.f32 %v13344_v21, %v2149_v60  ;;  %v10925_v54 = vld [vmem:[%s13353_s11 + $0x84] ss:$16 sps:$4 sm:$0xff]   ;;  %v2125_v17 = vadd.f32 1e-05, %v2109_v13 }
 0x589   : > { %v11131_v41 = vpop.eup %11130 }
 0x58a   : > { %2566 = vmatmul.mubr.bf16.vlgmr.msra.gmra.mxu0 %v13361_v33  ;;  %2679 = vmatmul.mubr.bf16.vlgmr.msra.gmra.mxu1 %v13361_v33  ;;  %v11133_v15 = vpop.eup %11132  ;;  %v2189_v23 = vadd.f32 %v13350_v56, %v2169_v62  ;;  %v2151_v44 = vmul.f32 %v11131_v41, %v13246_v58  ;;  %v2124_v62 = vadd.f32 1e-05, %v2108_v45  ;;  %v2091_v41 = vpop.xlane.xlu0 %2090  ;;  %11142 = vrsqrt.f32 %v2125_v17 }
 0x58b   : > { %2575 = vmatprep.mubr.bf16.mxu0 %v17723_v36  ;;  %2688 = vmatprep.mubr.bf16.mxu1 %v17723_v36  ;;  %v2150_v16 = vmul.f32 %v11133_v15, %v13237_v27  ;;  %v10928_v15 = vld [vmem:[%s13353_s11 + $0x64] ss:$16 sps:$4 sm:$0xff]   ;;  %v2110_v12 = vmul.f32 0.03125, %v2091_v41 }
 0x58c   : > { %2760 = vmatpush1.bf16.msra.mxu0 %v10890_v22  ;;  %3122 = vmatpush1.bf16.msra.mxu1 %v10914_v30  ;;  %v13384_v61 = vpack.c.bf16 %v2189_v23, %v2188_v14  ;;  %v2171_v58 = vmul.f32 %v13344_v21, %v2151_v44  ;;  %v2093_v22 = vpop.xlane.xlu1 %2092  ;;  %v10899_v30 = vld [vmem:[%s13207_s29 + $0xd0] ss:$24 sps:$4 sm:$0xff]   ;;  %11144 = vrsqrt.f32 %v2124_v62  ;;  %v10902_v44 = vld [vmem:[%s13207_s29 + $0xa0] ss:$24 sps:$4 sm:$0xff]   ;;  %v10907_v14 = vld [vmem:[%s13207_s29 + $0x74] ss:$24 sps:$4 sm:$0xff]  }
 0x58d   : > { %2761 = vmatprep.subr.bf16.mxu0 %v10895_v46  ;;  %3123 = vmatprep.subr.bf16.mxu1 %v10919_v3  ;;  %v11135_v60 = vpop.eup %11134  ;;  %v2170_v27 = vmul.f32 %v13344_v21, %v2150_v16  ;;  %v2111_v10 = vmul.f32 0.03125, %v2093_v22  ;;  %v10931_v16 = vld [vmem:[%s13353_s11 + $0x44] ss:$16 sps:$4 sm:$0xff]   ;;  %v10929_v22 = vld [vmem:[%s13353_s11 + $0x40] ss:$16 sps:$4 sm:$0xff]  }
 0x58e   : > { %v11137_v25 = vpop.eup %11136  ;;  %v2191_v46 = vadd.f32 %v13350_v56, %v2171_v58  ;;  %v2153_v3 = vmul.f32 %v11135_v60, %v13260_v11  ;;  %v10905_v60 = vld [vmem:[%s13207_s29 + $0x70] ss:$24 sps:$4 sm:$0xff]   ;;  %v10934_v62 = vld [vmem:[%s13353_s11 + $0x24] ss:$16 sps:$4 sm:$0xff]  }
 0x58f   : > { %v2127_v13 = vadd.f32 1e-05, %v2111_v10 }
 0x590   : > { %2762 = vmatpush1.bf16.msra.mxu0 %v10893_v53  ;;  %3124 = vmatpush1.bf16.msra.mxu1 %v10917_v8  ;;  %v2190_v53 = vadd.f32 %v13350_v56, %v2170_v27  ;;  %v2173_v11 = vmul.f32 %v13344_v21, %v2153_v3  ;;  %v10926_v8 = vld [vmem:[%s13353_s11 + $0x60] ss:$16 sps:$4 sm:$0xff]   ;;  %v2097_v45 = vpop.xlane.xlu1 %2096 }
 0x591   : > { %2763 = vmatprep.subr.bf16.mxu0 %v10898_v2  ;;  %3125 = vmatprep.subr.bf16.mxu1 %v10922_v43  ;;  %v2152_v2 = vmul.f32 %v11137_v25, %v13249_v59  ;;  %11146 = vrsqrt.f32 %v2127_v13  ;;  %v10910_v25 = vld [vmem:[%s13207_s29 + $0x44] ss:$24 sps:$4 sm:$0xff]   ;;  %v10908_v3 = vld [vmem:[%s13207_s29 + $0x40] ss:$24 sps:$4 sm:$0xff]  }
 0x592   : > { %2576 = vmatmul.mubr.bf16.gmra.mxu0 %v13384_v61  ;;  %2689 = vmatmul.mubr.bf16.gmra.mxu1 %v13384_v61  ;;  %v13400_v23 = vpack.c.bf16 %v2191_v46, %v2190_v53  ;;  %v11139_v43 = vpop.eup %11138  ;;  %v2193_v17 = vadd.f32 %v13350_v56, %v2173_v11  ;;  %v10911_v11 = vld [vmem:[%s13207_s29 + $0x10] ss:$24 sps:$4 sm:$0xff]  }
 0x593   : > { %2585 = vmatprep.mubr.bf16.mxu0 %v17723_v36  ;;  %2698 = vmatprep.mubr.bf16.mxu1 %v17723_v36  ;;  %v2172_v59 = vmul.f32 %v13344_v21, %v2152_v2  ;;  %v2155_v58 = vmul.f32 %v11139_v43, %v13278_v35 }
 0x594   : > { %2764 = vmatpush1.bf16.msra.mxu0 %v10896_v50  ;;  %3126 = vmatpush1.bf16.msra.mxu1 %v10920_v63  ;;  %v2126_v50 = vadd.f32 1e-05, %v2110_v12  ;;  %v11141_v63 = vpop.eup %11140 }
 0x595   : > { %2765 = vmatprep.subr.bf16.mxu0 %v10901_v26  ;;  %3127 = vmatprep.subr.bf16.mxu1 %v10925_v54  ;;  %v2095_v26 = vpop.xlane.xlu0 %2094  ;;  %v2113_v54 = vmul.f32 0.03125, %v2097_v45  ;;  %v2154_v41 = vmul.f32 %v11141_v63, %v13265_v37  ;;  %v2175_v35 = vmul.f32 %v13344_v21, %v2155_v58 }
 0x596   : > { %11148 = vrsqrt.f32 %v2126_v50  ;;  %v2112_v27 = vmul.f32 0.03125, %v2095_v26 }
 0x597   : > { %v2129_v10 = vadd.f32 1e-05, %v2113_v54  ;;  %v2174_v37 = vmul.f32 %v13344_v21, %v2154_v41  ;;  %v2195_v2 = vadd.f32 %v13350_v56, %v2175_v35 }
 0x598   : > { %2766 = vmatpush1.bf16.msra.mxu0 %v10899_v30  ;;  %3128 = vmatpush1.bf16.msra.mxu1 %v10923_v51  ;;  %v2192_v30 = vadd.f32 %v13350_v56, %v2172_v59  ;;  %v10932_v51 = vld [vmem:[%s13353_s11 + $0x20] ss:$16 sps:$4 sm:$0xff]   ;;  %v2128_v12 = vadd.f32 1e-05, %v2112_v27 }
 0x599   : > { %2767 = vmatprep.subr.bf16.mxu0 %v10904_v52  ;;  %3129 = vmatprep.subr.bf16.mxu1 %v10928_v15  ;;  %v11143_v52 = vpop.eup %11142  ;;  %v10913_v15 = vld [vmem:[%s13207_s29 + $0x14] ss:$24 sps:$4 sm:$0xff]   ;;  %11150 = vrsqrt.f32 %v2129_v10 }
 0x59a   : > { %2586 = vmatmul.mubr.bf16.gmra.mxu0 %v13400_v23  ;;  %2699 = vmatmul.mubr.bf16.gmra.mxu1 %v13400_v23  ;;  %v13420_v46 = vpack.c.bf16 %v2193_v17, %v2192_v30  ;;  %v11145_v53 = vpop.eup %11144  ;;  %v2157_v13 = vmul.f32 %v11143_v52, %v13294_v1  ;;  %11152 = vrsqrt.f32 %v2128_v12 }
 0x59b   : > { %2595 = vmatprep.mubr.bf16.mxu0 %v17723_v36  ;;  %2708 = vmatprep.mubr.bf16.mxu1 %v17723_v36 }
 0x59c   : > { %2768 = vmatpush1.bf16.msra.mxu0 %v10902_v44  ;;  %3130 = vmatpush1.bf16.msra.mxu1 %v10926_v8  ;;  %v2194_v44 = vadd.f32 %v13350_v56, %v2174_v37  ;;  %v2156_v8 = vmul.f32 %v11145_v53, %v13281_v40  ;;  %v2177_v45 = vmul.f32 %v13344_v21, %v2157_v13 }
 0x59d   : > { %2769 = vmatprep.subr.bf16.mxu0 %v10907_v14  ;;  %3131 = vmatprep.subr.bf16.mxu1 %v10931_v16 }
 0x59e   : > { %v2257_v43 = vpack.c.bf16 %v2195_v2, %v2194_v44  ;;  %v11147_v14 = vpop.eup %11146  ;;  %v2176_v16 = vmul.f32 %v13344_v21, %v2156_v8  ;;  %v2197_v1 = vadd.f32 %v13350_v56, %v2177_v45  ;;  %v13501_v2 = vld [vmem:[%s18022_s6] ss:$0 sm:$0xff]  ;;  %s18467_s6 = sld [smem:[#allocation161_spill]] (!%p9802_p0) }
 0x59f   : > { %v2159_v59 = vmul.f32 %v11147_v14, %v13310_v19 }
 0x5a0   : > { %2770 = vmatpush1.bf16.msra.mxu0 %v10905_v60  ;;  %3132 = vmatpush1.bf16.msra.mxu1 %v10929_v22  ;;  %v2196_v40 = vadd.f32 %v13350_v56, %v2176_v16 }
 0x5a1   : > { %2771 = vmatprep.subr.bf16.mxu0 %v10910_v25  ;;  %3133 = vmatprep.subr.bf16.mxu1 %v10934_v62  ;;  %v2179_v54 = vmul.f32 %v13344_v21, %v2159_v59 }
 0x5a2   : > { %2596 = vmatmul.mubr.bf16.gmra.mxu0 %v13420_v46  ;;  %2709 = vmatmul.mubr.bf16.gmra.mxu1 %v13420_v46  ;;  %v2258_v26 = vpack.c.bf16 %v2197_v1, %v2196_v40 }
 0x5a3   : > { %2605 = vmatprep.mubr.bf16.mxu0 %v17723_v36  ;;  %2718 = vmatprep.mubr.bf16.mxu1 %v17723_v36  ;;  %v11149_v50 = vpop.eup %11148  ;;  %v2199_v22 = vadd.f32 %v13350_v56, %v2179_v54 }
 0x5a4   : > { %2772 = vmatpush1.bf16.msra.mxu0 %v10908_v3  ;;  %3134 = vmatpush1.bf16.msra.mxu1 %v10932_v51  ;;  %v2158_v63 = vmul.f32 %v11149_v50, %v13297_v5 }
 0x5a5   : > { %2773 = vmatprep.subr.bf16.mxu0 %v10913_v15 }
 0x5a6   : > { %v11151_v17 = vpop.eup %11150  ;;  %v2178_v58 = vmul.f32 %v13344_v21, %v2158_v63 }
 0x5a7   : > { %v11153_v60 = vpop.eup %11152  ;;  %v2161_v19 = vmul.f32 %v11151_v17, %v13325_v57 }
 0x5a8   : > { %2774 = vmatpush1.bf16.msra.mxu0 %v10911_v11  ;;  %v2198_v25 = vadd.f32 %v13350_v56, %v2178_v58  ;;  %v2160_v5 = vmul.f32 %v11153_v60, %v13313_v28  ;;  %v10935_v28 = vld [vmem:[%s13353_s11] ss:$16 sps:$4 sm:$0xff]  }
 0x5a9   : > { %v2181_v27 = vmul.f32 %v13344_v21, %v2161_v19 }
 0x5aa   : > { %2606 = vmatmul.mubr.bf16.gmra.mxu0 %v2257_v43  ;;  %2719 = vmatmul.mubr.bf16.gmra.mxu1 %v2257_v43  ;;  %v2259_v62 = vpack.c.bf16 %v2199_v22, %v2198_v25  ;;  %v2180_v30 = vmul.f32 %v13344_v21, %v2160_v5  ;;  %v10937_v21 = vld [vmem:[%s13353_s11 + $0x4] ss:$16 sps:$4 sm:$0xff]  }
 0x5ab   : > { %2615 = vmatprep.mubr.bf16.mxu0 %v17723_v36  ;;  %2728 = vmatprep.mubr.bf16.mxu1 %v17723_v36  ;;  %v2201_v41 = vadd.f32 %v13350_v56, %v2181_v27 }
 0x5ac   : > { %v2200_v57 = vadd.f32 %v13350_v56, %v2180_v30  ;;  %3135 = vmatprep.subr.bf16.mxu1 %v10937_v21  ;;  %v13474_v56 = vshrl.u32 %v1232_v32, 7  ;;  %v13529_v30 = vld [vmem:[%s18026_s1] ss:$0 sm:$0xff] }
 0x5ad   : > { %3136 = vmatpush1.bf16.msra.mxu1 %v10935_v28 }
 0x5ae   : > { %v2260_v10 = vpack.c.bf16 %v2201_v41, %v2200_v57  ;;  %18020 = vst [vmem:[#allocation70_spill] sm:$0xff] %v13474_v56 }
 0x5b2   : > { %2616 = vmatmul.mubr.bf16.gmra.mxu0 %v2258_v26  ;;  %2729 = vmatmul.mubr.bf16.gmra.mxu1 %v2258_v26 }
 0x5b3   : > { %2625 = vmatprep.mubr.bf16.mxu0 %v17723_v36  ;;  %2738 = vmatprep.mubr.bf16.mxu1 %v17723_v36 }
 0x5ba   : > { %2626 = vmatmul.mubr.bf16.gmra.mxu0 %v2259_v62  ;;  %2739 = vmatmul.mubr.bf16.gmra.mxu1 %v2259_v62 }
 0x5bb   : > { %2635 = vmatprep.mubr.bf16.mxu0 %v17723_v36  ;;  %2748 = vmatprep.mubr.bf16.mxu1 %v17723_v36 }
 0x5c2   : > { %2636 = vmatmul.mubr.bf16.gmra.mxu0 %v2260_v10  ;;  %2749 = vmatmul.mubr.bf16.gmra.mxu1 %v2260_v10 }
 0x5c3   : > { %2791 = vmatprep.mubr.bf16.mxu0 %v17723_v36  ;;  %3153 = vmatprep.mubr.bf16.mxu1 %v17723_v36 }
 0x5ca   : > { %2792 = vmatmul.mubr.bf16.vlgmr.msra.gmra.mxu0 %v13361_v33  ;;  %v17717_v33 = vsub.s32 0, %v13474_v56 }
 0x5cb   : > { %2801 = vmatprep.mubr.bf16.mxu0 %v17723_v36 }
 0x5d2   : > { %2802 = vmatmul.mubr.bf16.gmra.mxu0 %v13384_v61  ;;  %v2277_v61 = vsub.s32 3, %v13474_v56 }
 0x5d3   : > { %2811 = vmatprep.mubr.bf16.mxu0 %v17723_v36 }
 0x5da   : > { %2812 = vmatmul.mubr.bf16.gmra.mxu0 %v13400_v23  ;;  %v13479_v23 = vld [vmem:[%s12824_s5] sm:$0x3f] }
 0x5db   : > { %2821 = vmatprep.mubr.bf16.mxu0 %v17723_v36  ;;  %v13485_v35 = vrot.slane %v13479_v23, %v17717_v33  ;;  %v13488_v3 = vrot.slane %v13479_v23, %v2277_v61  ;;  %v13609_v33 = vld [vmem:[#allocation6 + $0xc8] sm:$0xff] }
 0x5dc   : > { %18041 = vst [vmem:[#allocation89_spill] sm:$0xff] %v13609_v33  ;;  %v13630_v29 = vpack.c.bf16 %v13611_v38, %v13609_v33  ;;  %v13783_v33 = vld [vmem:[#allocation6 + $0x50] sm:$0xff] }
 0x5de   : > { %18046 = vst [vmem:[#allocation94_spill] sm:$0xff] %v13630_v29 }
 0x5e2   : > { %2822 = vmatmul.mubr.bf16.gmra.mxu0 %v13420_v46  ;;  %v2273_v46 = vsub.s32 2, %v13474_v56 }
 0x5e3   : > { %2831 = vmatprep.mubr.bf16.mxu0 %v17723_v36 }
 0x5e4   : > { %v13491_v32 = vrot.slane %v13479_v23, %v2273_v46 }
 0x5ea   : > { %2832 = vmatmul.mubr.bf16.gmra.mxu0 %v2257_v43 }
 0x5eb   : > { %2841 = vmatprep.mubr.bf16.mxu0 %v17723_v36 }
 0x5f2   : > { %2842 = vmatmul.mubr.bf16.gmra.mxu0 %v2258_v26 }
 0x5f3   : > { %2851 = vmatprep.mubr.bf16.mxu0 %v17723_v36 }
 0x5fa   : > { %2852 = vmatmul.mubr.bf16.gmra.mxu0 %v2259_v62 }
 0x5fb   : > { %2861 = vmatprep.mubr.bf16.mxu0 %v17723_v36 }
 0x602   : > { %2862 = vmatmul.mubr.bf16.gmra.mxu0 %v2260_v10 }
 0x64a   : > { %v2567_v51 = vpop.f32.mrf.mxu0  ;;  %v2680_v52 = vpop.f32.mrf.mxu1 }
 0x64b   : > { %v13496_v37 = vadd.f32 %v2567_v51, %v13485_v35  ;;  %v2681_v44 = vadd.f32 %v2680_v52, %v13491_v32 }
 0x64c   : > { %v13493_v15 = vpop.f32.mrf.mxu0  ;;  %v2682_v12 = vpop.f32.mrf.mxu1 }
 0x64d   : > { %18021 = vst [vmem:[#allocation71_spill] sm:$0xff] %v13493_v15  ;;  %v2683_v53 = vadd.f32 %v2682_v12, %v13488_v3  ;;  %v3001_v16 = vadd.f32 %v13501_v2, %v13496_v37 }
 0x64e   : > { %v2571_v13 = vpop.f32.mrf.mxu0  ;;  %v2684_v11 = vpop.f32.mrf.mxu1 }
 0x64f   : > { %v13505_v8 = vadd.f32 %v2571_v13, %v13485_v35  ;;  %v2685_v43 = vadd.f32 %v2684_v11, %v13491_v32 }
 0x650   : > { %v13508_v45 = vpop.f32.mrf.mxu0  ;;  %v2686_v14 = vpop.f32.mrf.mxu1 }
 0x651   : > { %18023 = vst [vmem:[#allocation72_spill] sm:$0xff] %v13508_v45  ;;  %v3002_v50 = vadd.f32 %v13501_v2, %v13505_v8  ;;  %v13514_v1 = vpack.c.bf16 %v2685_v43, %v2681_v44  ;;  %v2687_v59 = vadd.f32 %v2686_v14, %v13488_v3 }
 0x652   : > { %v2577_v40 = vpop.f32.mrf.mxu0  ;;  %v2690_v63 = vpop.f32.mrf.mxu1 }
 0x653   : > { %v3033_v26 = vpack.c.bf16 %v3002_v50, %v3001_v16  ;;  %v13517_v54 = vpack.c.bf16 %v2687_v59, %v2683_v53  ;;  %v2578_v60 = vadd.f32 %v2577_v40, %v13485_v35  ;;  %v2691_v5 = vadd.f32 %v2690_v63, %v13491_v32 }
 0x654   : > { %v13519_v17 = vpop.f32.mrf.mxu0  ;;  %v2692_v58 = vpop.f32.mrf.mxu1 }
 0x655   : > { %18024 = vst [vmem:[#allocation73_spill] sm:$0xff] %v13517_v54  ;;  %18025 = vst [vmem:[#allocation74_spill] sm:$0xff] %v13519_v17  ;;  %3154 = vmatmul.mubr.bf16.vlgmr.msra.gmra.mxu1 %v3033_v26  ;;  %v2693_v22 = vadd.f32 %v2692_v58, %v13488_v3  ;;  %v13534_v10 = vadd.f32 %v13529_v30, %v2578_v60  ;;  %v3003_v46 = vadd.f32 %v13501_v2, %v2578_v60 }
 0x656   : > { %v2581_v19 = vpop.f32.mrf.mxu0  ;;  %v2694_v25 = vpop.f32.mrf.mxu1  ;;  %3163 = vmatprep.mubr.bf16.mxu1 %v17723_v36 }
 0x657   : > { %v2582_v62 = vadd.f32 %v2581_v19, %v13485_v35  ;;  %v2695_v27 = vadd.f32 %v2694_v25, %v13491_v32 }
 0x658   : > { %v13531_v41 = vpop.f32.mrf.mxu0  ;;  %v2696_v57 = vpop.f32.mrf.mxu1 }
 0x659   : > { %18027 = vst [vmem:[#allocation75_spill] sm:$0xff] %v13531_v41  ;;  %v13537_v28 = vadd.f32 %v13529_v30, %v2582_v62  ;;  %v3004_v21 = vadd.f32 %v13501_v2, %v2582_v62  ;;  %v13540_v61 = vpack.c.bf16 %v2695_v27, %v2691_v5  ;;  %v2697_v51 = vadd.f32 %v2696_v57, %v13488_v3  ;;  %v13564_v5 = vld [vmem:[#allocation6 + $0xe8] sm:$0xff]  ;;  %v13566_v62 = vld [vmem:[#allocation6 + $0xf8] sm:$0xff]  ;;  %v13568_v27 = vld [vmem:[#allocation6 + $0xe0] sm:$0xff] }
 0x65a   : > { %v2587_v52 = vpop.f32.mrf.mxu0  ;;  %v2700_v12 = vpop.f32.mrf.mxu1  ;;  %18031 = vst [vmem:[#allocation79_spill] sm:$0xff] %v13564_v5  ;;  %18032 = vst [vmem:[#allocation80_spill] sm:$0xff] %v13566_v62 }
 0x65b   : > { %v13546_v13 = vpack.c.bf16 %v2697_v51, %v2693_v22  ;;  %v3034_v43 = vpack.c.bf16 %v3004_v21, %v3003_v46  ;;  %v2588_v14 = vadd.f32 %v2587_v52, %v13485_v35  ;;  %v2701_v40 = vadd.f32 %v2700_v12, %v13491_v32  ;;  %18033 = vst [vmem:[#allocation81_spill] sm:$0xff] %v13568_v27 }
 0x65c   : > { %v13548_v11 = vpop.f32.mrf.mxu0  ;;  %v2702_v44 = vpop.f32.mrf.mxu1  ;;  %v13579_v12 = vpack.c.bf16 %v13566_v62, %v13564_v5 }
 0x65d   : > { %18028 = vst [vmem:[#allocation76_spill] sm:$0xff] %v13546_v13  ;;  %18029 = vst [vmem:[#allocation77_spill] sm:$0xff] %v13548_v11  ;;  %v2703_v16 = vadd.f32 %v2702_v44, %v13488_v3  ;;  %3164 = vmatmul.mubr.bf16.gmra.mxu1 %v3034_v43  ;;  %v13571_v57 = vadd.f32 %v13529_v30, %v2588_v14  ;;  %v3005_v21 = vadd.f32 %v13501_v2, %v2588_v14  ;;  %v13581_v44 = vld [vmem:[#allocation6 + $0xf0] sm:$0xff] }
 0x65e   : > { %v2591_v50 = vpop.f32.mrf.mxu0  ;;  %v2704_v59 = vpop.f32.mrf.mxu1  ;;  %3173 = vmatprep.mubr.bf16.mxu1 %v17723_v36  ;;  %18034 = vst [vmem:[#allocation82_spill] sm:$0xff] %v13581_v44  ;;  %3362 = vmatprep.subr.bf16.mxu0 %v13579_v12 }
 0x65f   : > { %v2592_v63 = vadd.f32 %v2591_v50, %v13485_v35  ;;  %v2705_v26 = vadd.f32 %v2704_v59, %v13491_v32 }
 0x660   : > { %v13556_v58 = vpop.f32.mrf.mxu0  ;;  %v2706_v60 = vpop.f32.mrf.mxu1 }
 0x661   : > { %18030 = vst [vmem:[#allocation78_spill] sm:$0xff] %v13556_v58  ;;  %v13559_v22 = vadd.f32 %v13529_v30, %v2592_v63  ;;  %v3006_v19 = vadd.f32 %v13501_v2, %v2592_v63  ;;  %v13562_v25 = vpack.c.bf16 %v2705_v26, %v2701_v40  ;;  %v2707_v46 = vadd.f32 %v2706_v60, %v13488_v3  ;;  %v13613_v63 = vld [vmem:[#allocation6 + $0xc0] sm:$0xff] }
 0x662   : > { %v2597_v51 = vpop.f32.mrf.mxu0  ;;  %v13575_v52 = vpop.f32.mrf.mxu1  ;;  %v13595_v26 = vpack.c.bf16 %v13581_v44, %v13568_v27  ;;  %18043 = vst [vmem:[#allocation91_spill] sm:$0xff] %v13613_v63  ;;  %v13634_v34 = vpack.c.bf16 %v13619_v39, %v13613_v63  ;;  %v13781_v63 = vld [vmem:[#allocation6 + $0x40] sm:$0xff] }
 0x663   : > { %v2598_v43 = vadd.f32 %v2597_v51, %v13485_v35  ;;  %v13584_v50 = vpack.c.bf16 %v2707_v46, %v2703_v16  ;;  %v3035_v14 = vpack.c.bf16 %v3006_v19, %v3005_v21 }
 0x664   : > { %v13586_v59 = vpop.f32.mrf.mxu0  ;;  %v13588_v40 = vpop.f32.mrf.mxu1  ;;  %18038 = vst [vmem:[#allocation86_spill] sm:$0xff] %v13595_v26  ;;  %3363 = vmatpush1.bf16.xpose.msra.mxu0 %v13595_v26  ;;  %18047 = vst [vmem:[#allocation95_spill] sm:$0xff] %v13634_v34 }
 0x665   : > { %18035 = vst [vmem:[#allocation83_spill] sm:$0xff] %v13584_v50  ;;  %18036 = vst [vmem:[#allocation84_spill] sm:$0xff] %v13586_v59  ;;  %v13598_v60 = vadd.f32 %v13529_v30, %v2598_v43  ;;  %3174 = vmatmul.mubr.bf16.gmra.mxu1 %v3035_v14  ;;  %v3007_v7 = vadd.f32 %v13501_v2, %v2598_v43  ;;  %3364 = vmatprep.subr.bf16.mxu0 %v13630_v29  ;;  %v13710_v59 = vld [vmem:[#allocation6 + $0x78] sm:$0xff] }
 0x666   : > { %18037 = vst [vmem:[#allocation85_spill] sm:$0xff] %v13588_v40  ;;  %v2601_v16 = vpop.f32.mrf.mxu0  ;;  %v13600_v46 = vpop.f32.mrf.mxu1  ;;  %3183 = vmatprep.mubr.bf16.mxu1 %v17723_v36  ;;  %v13623_v36 = vld [vmem:[#allocation6 + $0xb8] sm:$0xff] }
 0x667   : > { %v2602_v19 = vadd.f32 %v2601_v16, %v13485_v35  ;;  %v13621_v16 = vld [vmem:[#allocation6 + $0xa8] sm:$0xff]  ;;  %18045 = vst [vmem:[#allocation93_spill] sm:$0xff] %v13623_v36 }
 0x668   : > { %v13605_v21 = vpop.f32.mrf.mxu0  ;;  %v13607_v51 = vpop.f32.mrf.mxu1  ;;  %v13639_v49 = vpack.c.bf16 %v13623_v36, %v13621_v16 }
 0x669   : > { %18039 = vst [vmem:[#allocation87_spill] sm:$0xff] %v13605_v21  ;;  %18040 = vst [vmem:[#allocation88_spill] sm:$0xff] %v13607_v51  ;;  %v13616_v14 = vadd.f32 %v13529_v30, %v2602_v19  ;;  %v3008_v53 = vadd.f32 %v13501_v2, %v2602_v19 }
 0x66a   : > { %v2607_v4 = vpop.f32.mrf.mxu0  ;;  %v13626_v31 = vpop.f32.mrf.mxu1  ;;  %18048 = vst [vmem:[#allocation96_spill] sm:$0xff] %v13639_v49 }
 0x66b   : > { %v2608_v19 = vadd.f32 %v2607_v4, %v13485_v35  ;;  %v3036_v48 = vpack.c.bf16 %v3008_v53, %v3007_v7  ;;  %v13657_v7 = vld [vmem:[#allocation6 + $0xa0] sm:$0xff]  ;;  %v13659_v53 = vld [vmem:[#allocation6 + $0xb0] sm:$0xff] }
 0x66c   : > { %v13641_v24 = vpop.f32.mrf.mxu0  ;;  %v13643_v43 = vpop.f32.mrf.mxu1  ;;  %3365 = vmatpush1.bf16.xpose.msra.mxu0 %v13634_v34  ;;  %18052 = vst [vmem:[#allocation99_spill] sm:$0xff] %v13659_v53  ;;  %v13678_v26 = vpack.c.bf16 %v13659_v53, %v13657_v7 }
 0x66d   : > { %18049 = vst [vmem:[#allocation97_spill] sm:$0xff] %v13641_v24  ;;  %18050 = vst [vmem:[#allocation98_spill] sm:$0xff] %v13643_v43  ;;  %v13649_v20 = vadd.f32 %v13529_v30, %v2608_v19  ;;  %3184 = vmatmul.mubr.bf16.gmra.mxu1 %v3036_v48  ;;  %3366 = vmatprep.subr.bf16.mxu0 %v13639_v49  ;;  %v3009_v34 = vadd.f32 %v13501_v2, %v2608_v19 }
 0x66e   : > { %v2611_v47 = vpop.f32.mrf.mxu0  ;;  %v13651_v4 = vpop.f32.mrf.mxu1  ;;  %3193 = vmatprep.mubr.bf16.mxu1 %v18051_v9  ;;  %18055 = vst [vmem:[#allocation102_spill] sm:$0xff] %v13678_v26 }
 0x66f   : > { %v2612_v42 = vadd.f32 %v2611_v47, %v13485_v35  ;;  %v13671_v47 = vld [vmem:[#allocation6 + $0x98] sm:$0xff] }
 0x670   : > { %v13661_v55 = vpop.f32.mrf.mxu0  ;;  %v13663_v6 = vpop.f32.mrf.mxu1  ;;  %v13689_v19 = vpack.c.bf16 %v13671_v47, %v13669_v18 }
 0x671   : > { %18053 = vst [vmem:[#allocation100_spill] sm:$0xff] %v13661_v55  ;;  %18054 = vst [vmem:[#allocation101_spill] sm:$0xff] %v13663_v6  ;;  %v13666_v48 = vadd.f32 %v13529_v30, %v2612_v42  ;;  %v3010_v0 = vadd.f32 %v13501_v2, %v2612_v42 }
 0x672   : > { %v2617_v49 = vpop.f32.mrf.mxu0  ;;  %v13674_v29 = vpop.f32.mrf.mxu1  ;;  %18058 = vst [vmem:[#allocation105_spill] sm:$0xff] %v13689_v19 }
 0x673   : > { %v2618_v54 = vadd.f32 %v2617_v49, %v13485_v35  ;;  %v3037_v42 = vpack.c.bf16 %v3010_v0, %v3009_v34  ;;  %v13699_v0 = vld [vmem:[#allocation6 + $0x80] sm:$0xff]  ;;  %v13701_v34 = vld [vmem:[#allocation6 + $0x90] sm:$0xff] }
 0x674   : > { %v13681_v13 = vpop.f32.mrf.mxu0  ;;  %v13683_v50 = vpop.f32.mrf.mxu1  ;;  %3367 = vmatpush1.bf16.xpose.msra.mxu0 %v13678_v26 }
 0x675   : > { %18056 = vst [vmem:[#allocation103_spill] sm:$0xff] %v13681_v13  ;;  %18057 = vst [vmem:[#allocation104_spill] sm:$0xff] %v13683_v50  ;;  %v13692_v55 = vadd.f32 %v13529_v30, %v2618_v54  ;;  %3194 = vmatmul.mubr.bf16.gmra.mxu1 %v3037_v42  ;;  %3368 = vmatprep.subr.bf16.mxu0 %v13689_v19  ;;  %v13708_v42 = vld [vmem:[#allocation6 + $0x68] sm:$0xff]  ;;  %v3011_v43 = vadd.f32 %v13501_v2, %v2618_v54 }
 0x676   : > { %v2621_v40 = vpop.f32.mrf.mxu0  ;;  %v13694_v51 = vpop.f32.mrf.mxu1  ;;  %3203 = vmatprep.mubr.bf16.mxu1 %v18051_v9  ;;  %v13724_v19 = vpack.c.bf16 %v13710_v59, %v13708_v42 }
 0x677   : > { %v2622_v49 = vadd.f32 %v2621_v40, %v13485_v35 }
 0x678   : > { %v13703_v24 = vpop.f32.mrf.mxu0  ;;  %v13705_v13 = vpop.f32.mrf.mxu1  ;;  %18062 = vst [vmem:[#allocation109_spill] sm:$0xff] %v13724_v19 }
 0x679   : > { %18059 = vst [vmem:[#allocation106_spill] sm:$0xff] %v13703_v24  ;;  %18060 = vst [vmem:[#allocation107_spill] sm:$0xff] %v13705_v13  ;;  %v13713_v26 = vadd.f32 %v13529_v30, %v2622_v49  ;;  %v3012_v40 = vadd.f32 %v13501_v2, %v2622_v49  ;;  %v13719_v24 = vpack.c.bf16 %v13701_v34, %v13699_v0 }
 0x67a   : > { %v2627_v21 = vpop.f32.mrf.mxu0  ;;  %v2740_v6 = vpop.f32.mrf.mxu1 }
 0x67b   : > { %18061 = vst [vmem:[#allocation108_spill] sm:$0xff] %v13719_v24  ;;  %v2628_v11 = vadd.f32 %v2627_v21, %v13485_v35  ;;  %v3038_v13 = vpack.c.bf16 %v3012_v40, %v3011_v43  ;;  %v13741_v43 = vld [vmem:[#allocation6 + $0x70] sm:$0xff] }
 0x67c   : > { %v13726_v50 = vpop.f32.mrf.mxu0  ;;  %v13728_v58 = vpop.f32.mrf.mxu1  ;;  %3369 = vmatpush1.bf16.xpose.msra.mxu0 %v13719_v24  ;;  %v13751_v24 = vld [vmem:[#allocation6 + $0x48] sm:$0xff] }
 0x67d   : > { %18063 = vst [vmem:[#allocation110_spill] sm:$0xff] %v13726_v50  ;;  %18064 = vst [vmem:[#allocation111_spill] sm:$0xff] %v13728_v58  ;;  %v13733_v49 = vadd.f32 %v13529_v30, %v2628_v11  ;;  %3204 = vmatmul.mubr.bf16.gmra.mxu1 %v3038_v13  ;;  %3370 = vmatprep.subr.bf16.mxu0 %v13724_v19  ;;  %v13739_v50 = vld [vmem:[#allocation6 + $0x60] sm:$0xff]  ;;  %v3013_v15 = vadd.f32 %v13501_v2, %v2628_v11 }
 0x67e   : > { %v2631_v17 = vpop.f32.mrf.mxu0  ;;  %v2744_v41 = vpop.f32.mrf.mxu1  ;;  %3213 = vmatprep.mubr.bf16.mxu1 %v18051_v9  ;;  %v13758_v62 = vpack.c.bf16 %v13741_v43, %v13739_v50 }
 0x67f   : > { %v2632_v21 = vadd.f32 %v2631_v17, %v13485_v35  ;;  %v13753_v17 = vld [vmem:[#allocation6 + $0x58] sm:$0xff] }
 0x680   : > { %v13743_v40 = vpop.f32.mrf.mxu0  ;;  %v13745_v54 = vpop.f32.mrf.mxu1  ;;  %18067 = vst [vmem:[#allocation114_spill] sm:$0xff] %v13758_v62  ;;  %v13769_v5 = vpack.c.bf16 %v13753_v17, %v13751_v24 }
 0x681   : > { %18065 = vst [vmem:[#allocation112_spill] sm:$0xff] %v13743_v40  ;;  %18066 = vst [vmem:[#allocation113_spill] sm:$0xff] %v13745_v54  ;;  %v13748_v13 = vadd.f32 %v13529_v30, %v2632_v21  ;;  %v3014_v58 = vadd.f32 %v13501_v2, %v2632_v21 }
 0x682   : > { %v2637_v19 = vpop.f32.mrf.mxu0  ;;  %v2750_v45 = vpop.f32.mrf.mxu1  ;;  %18069 = vst [vmem:[#allocation116_spill] sm:$0xff] %v13769_v5 }
 0x683   : > { %v2638_v40 = vadd.f32 %v2637_v19, %v13485_v35  ;;  %v3039_v27 = vpack.c.bf16 %v3014_v58, %v3013_v15  ;;  %v2281_v19 = vsub.s32 4, %v13474_v56  ;;  %v2751_v15 = vadd.f32 %v2750_v45, %v13491_v32  ;;  %v13791_v45 = vld [vmem:[#allocation6 + $0x28] sm:$0xff] }
 0x684   : > { %v13761_v54 = vpop.f32.mrf.mxu0  ;;  %v13763_v44 = vpop.f32.mrf.mxu1  ;;  %3371 = vmatpush1.bf16.xpose.msra.mxu0 %v13758_v62  ;;  %v2741_v56 = vadd.f32 %v2740_v6, %v13491_v32 }
 0x685   : > { %18068 = vst [vmem:[#allocation115_spill] sm:$0xff] %v13761_v54  ;;  %v13772_v11 = vadd.f32 %v13529_v30, %v2638_v40  ;;  %3214 = vmatmul.mubr.bf16.gmra.mxu1 %v3039_v27  ;;  %v2745_v54 = vadd.f32 %v2744_v41, %v13491_v32  ;;  %v2981_v27 = vadd.f32 %v13529_v30, %v13505_v8 }
 0x686   : > { %v2641_v38 = vpop.f32.mrf.mxu0  ;;  %v2754_v39 = vpop.f32.mrf.mxu1  ;;  %3223 = vmatprep.mubr.bf16.mxu1 %v18051_v9  ;;  %3372 = vmatprep.subr.bf16.mxu0 %v13769_v5  ;;  %v13801_v8 = vrot.slane %v13479_v23, %v2281_v19  ;;  %v2980_v5 = vadd.f32 %v13529_v30, %v13496_v37  ;;  %v13856_v23 = vld [vmem:[#allocation6] sm:$0xff] }
 0x687   : > { %v2642_v58 = vadd.f32 %v2641_v38, %v13485_v35  ;;  %v2755_v21 = vadd.f32 %v2754_v39, %v13491_v32  ;;  %v13793_v38 = vld [vmem:[#allocation6 + $0x38] sm:$0xff]  ;;  %v3015_v39 = vadd.f32 %v13501_v2, %v2638_v40  ;;  %v3031_v36 = vpack.c.bf16 %v2745_v54, %v2741_v56  ;;  %v13825_v54 = vld [vmem:[#allocation6 + $0x30] sm:$0xff] }
 0x688   : > { %v13788_v62 = vpop.f32.mrf.mxu0  ;;  %v13811_v53 = vpack.c.bf16 %v13793_v38, %v13791_v45  ;;  %v2735_v56 = vadd.f32 %v13694_v51, %v13491_v32 }
 0x689   : > { %18070 = vst [vmem:[#allocation117_spill] sm:$0xff] %v13788_v62  ;;  %v13797_v35 = vadd.f32 %v13529_v30, %v2642_v58  ;;  %v3016_v41 = vadd.f32 %v13501_v2, %v2642_v58  ;;  %v3032_v9 = vpack.c.bf16 %v2755_v21, %v2751_v15  ;;  %v13805_v62 = vpack.c.bf16 %v13783_v33, %v13781_v63 }
 0x68a   : > { %v2793_v6 = vpop.f32.mrf.mxu0  ;;  %18072 = vst [vmem:[#allocation119_spill] sm:$0xff] %v13811_v53  ;;  %v3017_v21 = vpack.c.bf16 %v2981_v27, %v2980_v5  ;;  %v2731_v5 = vadd.f32 %v13674_v29, %v13491_v32 }
 0x68b   : > { %18071 = vst [vmem:[#allocation118_spill] sm:$0xff] %v13805_v62  ;;  %10081 = vmatprep.subr.bf16.mxu1 %v3032_v9  ;;  %v3040_v40 = vpack.c.bf16 %v3016_v41, %v3015_v39  ;;  %v2794_v37 = vadd.f32 %v2793_v6, %v13801_v8 }
 0x68c   : > { %v13813_v2 = vpop.f32.mrf.mxu0  ;;  %10082 = vmatpush3.bf16.xpose.msra.mxu1 %v3032_v9  ;;  %3373 = vmatpush1.bf16.xpose.msra.mxu0 %v13805_v62  ;;  %v13823_v9 = vld [vmem:[#allocation6 + $0x20] sm:$0xff]  ;;  %v3030_v39 = vpack.c.bf16 %v2735_v56, %v2731_v5  ;;  %v10940_v62 = vld [vmem:[%s13353_s11 + $0xec] ss:$16 sps:$4 sm:$0xff]  }
 0x68d   : > { %18073 = vst [vmem:[#allocation120_spill] sm:$0xff] %v13813_v2  ;;  %10083 = vmatprep.subr.bf16.mxu1 %v3031_v36  ;;  %3224 = vmatmul.mubr.bf16.gmra.mxu1 %v3040_v40  ;;  %v13835_v51 = vpack.c.bf16 %v13825_v54, %v13823_v9  ;;  %v2725_v40 = vadd.f32 %v13651_v4, %v13491_v32  ;;  %v13858_v4 = vld [vmem:[#allocation6 + $0x10] sm:$0xff] }
 0x68e   : > { %v2797_v19 = vpop.f32.mrf.mxu0  ;;  %10097 = vmatprep.mubr.bf16.mxu1 %v3017_v21  ;;  %3374 = vmatprep.subr.bf16.mxu0 %v13811_v53 }
 0x68f   : > { %v2798_v30 = vadd.f32 %v2797_v19, %v13801_v8  ;;  %18075 = vst [vmem:[#allocation122_spill] sm:$0xff] %v13835_v51 }
 0x690   : > { %v13827_v15 = vpop.f32.mrf.mxu0 }
 0x691   : > { %18074 = vst [vmem:[#allocation121_spill] sm:$0xff] %v13827_v15  ;;  %v13831_v58 = vpack.c.bf16 %v2798_v30, %v2794_v37  ;;  %v2721_v37 = vadd.f32 %v13626_v31, %v13491_v32  ;;  %v13850_v30 = vld [vmem:[#allocation6 + $0x8] sm:$0xff]  ;;  %v13866_v31 = vpack.c.bf16 %v13858_v4, %v13856_v23 }
 0x692   : > { %v2803_v27 = vpop.f32.mrf.mxu0 }
 0x693   : > { %v2804_v29 = vadd.f32 %v2803_v27, %v13801_v8  ;;  %18079 = vst [vmem:[#allocation126_spill] sm:$0xff] %v13866_v31 }
 0x694   : > { %v13837_v41 = vpop.f32.mrf.mxu0  ;;  %10084 = vmatpush3.bf16.xpose.msra.mxu1 %v3031_v36  ;;  %3375 = vmatpush1.bf16.xpose.msra.mxu0 %v13835_v51  ;;  %v13852_v36 = vld [vmem:[#allocation6 + $0x18] sm:$0xff]  ;;  %v2715_v51 = vadd.f32 %v13600_v46, %v13491_v32 }
 0x695   : > { %18076 = vst [vmem:[#allocation123_spill] sm:$0xff] %v13837_v41  ;;  %10085 = vmatprep.subr.bf16.mxu1 %v3030_v39  ;;  %v13862_v27 = vpack.c.bf16 %v13852_v36, %v13850_v30 }
 0x696   : > { %v2807_v6 = vpop.f32.mrf.mxu0 }
 0x697   : > { %v2808_v21 = vadd.f32 %v2807_v6, %v13801_v8  ;;  %18078 = vst [vmem:[#allocation125_spill] sm:$0xff] %v13862_v27  ;;  %v3029_v6 = vpack.c.bf16 %v2725_v40, %v2721_v37  ;;  %3376 = vmatprep.subr.bf16.mxu0 %v13862_v27  ;;  %v2711_v40 = vadd.f32 %v13575_v52, %v13491_v32 }
 0x698   : > { %v13844_v19 = vpop.f32.mrf.mxu0 }
 0x699   : > { %18077 = vst [vmem:[#allocation124_spill] sm:$0xff] %v13844_v19  ;;  %v13848_v56 = vpack.c.bf16 %v2808_v21, %v2804_v29  ;;  %v3028_v2 = vpack.c.bf16 %v2715_v51, %v2711_v40 }
 0x69a   : > { %v13854_v5 = vpop.f32.mrf.mxu0 }
 0x69c   : > { %v13868_v29 = vpop.f32.mrf.mxu0  ;;  %10086 = vmatpush3.bf16.xpose.msra.mxu1 %v3030_v39  ;;  %3377 = vmatpush1.bf16.xpose.msra.mxu0 %v13866_v31 }
 0x69d   : > { %18080 = vst [vmem:[#allocation127_spill] sm:$0xff] %v13868_v29  ;;  %10087 = vmatprep.subr.bf16.mxu1 %v3029_v6  ;;  %4021 = vmatprep.subr.bf16.mxu0 %v10940_v62 }
 0x69e   : > { %v2817_v21 = vpop.f32.mrf.mxu0 }
 0x6a0   : > { %v13874_v53 = vpop.f32.mrf.mxu0 }
 0x6a1   : > { %18081 = vst [vmem:[#allocation128_spill] sm:$0xff] %v13874_v53 }
 0x6a2   : > { %v2823_v37 = vpop.f32.mrf.mxu0 }
 0x6a4   : > { %v13879_v15 = vpop.f32.mrf.mxu0  ;;  %10088 = vmatpush3.bf16.xpose.msra.mxu1 %v3029_v6 }
 0x6a5   : > { %18082 = vst [vmem:[#allocation129_spill] sm:$0xff] %v13879_v15  ;;  %10089 = vmatprep.subr.bf16.mxu1 %v3028_v2 }
 0x6a6   : > { %v2827_v39 = vpop.f32.mrf.mxu0 }
 0x6a8   : > { %v13881_v27 = vpop.f32.mrf.mxu0 }
 0x6a9   : > { %18083 = vst [vmem:[#allocation130_spill] sm:$0xff] %v13881_v27 }
 0x6aa   : > { %v2833_v31 = vpop.f32.mrf.mxu0 }
 0x6ac   : > { %v13883_v41 = vpop.f32.mrf.mxu0  ;;  %10090 = vmatpush3.bf16.xpose.msra.mxu1 %v3028_v2 }
 0x6ad   : > { %18084 = vst [vmem:[#allocation131_spill] sm:$0xff] %v13883_v41  ;;  %10091 = vmatprep.subr.bf16.mxu1 %v13562_v25 }
 0x6ae   : > { %v2837_v46 = vpop.f32.mrf.mxu0 }
 0x6b0   : > { %v13886_v19 = vpop.f32.mrf.mxu0 }
 0x6b1   : > { %18085 = vst [vmem:[#allocation132_spill] sm:$0xff] %v13886_v19 }
 0x6b2   : > { %v2843_v32 = vpop.f32.mrf.mxu0 }
 0x6b4   : > { %v13888_v52 = vpop.f32.mrf.mxu0  ;;  %10092 = vmatpush3.bf16.xpose.msra.mxu1 %v13562_v25 }
 0x6b5   : > { %18086 = vst [vmem:[#allocation133_spill] sm:$0xff] %v13888_v52  ;;  %10093 = vmatprep.subr.bf16.mxu1 %v13540_v61 }
 0x6b6   : > { %v2847_v62 = vpop.f32.mrf.mxu0 }
 0x6b8   : > { %v13892_v51 = vpop.f32.mrf.mxu0 }
 0x6b9   : > { %18087 = vst [vmem:[#allocation134_spill] sm:$0xff] %v13892_v51  ;;  %v2848_v51 = vadd.f32 %v2847_v62, %v13801_v8 }
 0x6ba   : > { %v2853_v6 = vpop.f32.mrf.mxu0 }
 0x6bb   : > { %v2854_v52 = vadd.f32 %v2853_v6, %v13801_v8 }
 0x6bc   : > { %v13894_v40 = vpop.f32.mrf.mxu0  ;;  %10094 = vmatpush3.bf16.xpose.msra.mxu1 %v13540_v61 }
 0x6bd   : > { %18088 = vst [vmem:[#allocation135_spill] sm:$0xff] %v13894_v40  ;;  %10095 = vmatprep.subr.bf16.mxu1 %v13514_v1 }
 0x6be   : > { %v2857_v2 = vpop.f32.mrf.mxu0 }
 0x6bf   : > { %v2858_v27 = vadd.f32 %v2857_v2, %v13801_v8  ;;  %v2838_v2 = vadd.f32 %v2837_v46, %v13801_v8 }
 0x6c0   : > { %v13898_v29 = vpop.f32.mrf.mxu0 }
 0x6c1   : > { %18089 = vst [vmem:[#allocation136_spill] sm:$0xff] %v13898_v29  ;;  %v3768_v40 = vpack.c.bf16 %v2858_v27, %v2854_v52  ;;  %v18090_v29 = vpack.c.bf16 %v13537_v28, %v13534_v10  ;;  %v18092_v28 = vpack.c.bf16 %v13616_v14, %v13598_v60  ;;  %v2818_v27 = vadd.f32 %v2817_v21, %v13801_v8 }
 0x6c2   : > { %v2863_v53 = vpop.f32.mrf.mxu0  ;;  %v18094_v60 = vpack.c.bf16 %v13713_v26, %v13692_v55  ;;  %v18096_v14 = vpack.c.bf16 %v13797_v35, %v13772_v11  ;;  %v13942_v55 = vpop.f32.mrf.mxu1 }
 0x6c3   : > { %v2864_v41 = vadd.f32 %v2863_v53, %v13801_v8  ;;  %v2844_v53 = vadd.f32 %v2843_v32, %v13801_v8 }
 0x6c4   : > { %v13900_v15 = vpop.f32.mrf.mxu0  ;;  %10096 = vmatpush3.bf16.xpose.msra.mxu1 %v13514_v1  ;;  %v18091_v1 = vpack.c.bf16 %v13559_v22, %v13571_v57  ;;  %v18093_v22 = vpack.c.bf16 %v13666_v48, %v13649_v20  ;;  %v2824_v57 = vadd.f32 %v2823_v37, %v13801_v8  ;;  %v18095_v20 = vpack.c.bf16 %v13748_v13, %v13733_v49 }
 0x6c5   : > { %v3767_v6 = vpack.c.bf16 %v2848_v51, %v2844_v53 }
 0x6c6   : > { %v2867_v25 = vpop.f32.mrf.mxu0 }
 0x6c7   : > { %v2868_v19 = vadd.f32 %v2867_v25, %v13801_v8  ;;  %v10938_v25 = vld [vmem:[%s13353_s11 + $0xe8] ss:$16 sps:$4 sm:$0xff]  }
 0x6c9   : > { %v3769_v61 = vpack.c.bf16 %v2868_v19, %v2864_v41  ;;  %v2834_v41 = vadd.f32 %v2833_v31, %v13801_v8  ;;  %v2828_v19 = vadd.f32 %v2827_v39, %v13801_v8  ;;  %v2814_v31 = vadd.f32 %v13854_v5, %v13801_v8 }
 0x6cb   : > { %10098 = vmatmul.mubr.bf16.vlgmr.msra.gmra.mxu1 %v18090_v29  ;;  %10113 = vmatprep.subr.bf16.mxu1 %v3769_v61  ;;  %v3766_v10 = vpack.c.bf16 %v2838_v2, %v2834_v41  ;;  %v3765_v29 = vpack.c.bf16 %v2828_v19, %v2824_v57  ;;  %v3764_v39 = vpack.c.bf16 %v2818_v27, %v2814_v31 }
 0x6cc   : > { %10101 = vmatprep.mubr.bf16.mxu1 %v18091_v1  ;;  %10114 = vmatpush3.bf16.msra.mxu1 %v3769_v61 }
 0x6cd   : > { %10115 = vmatprep.subr.bf16.mxu1 %v3768_v40 }
 0x6d0   : > { %10116 = vmatpush3.bf16.msra.mxu1 %v3768_v40 }
 0x6d1   : > { %10117 = vmatprep.subr.bf16.mxu1 %v3767_v6 }
 0x6d3   : > { %10102 = vmatmul.mubr.bf16.gmra.mxu1 %v18092_v28 }
 0x6d4   : > { %10105 = vmatprep.mubr.bf16.mxu1 %v18093_v22  ;;  %10118 = vmatpush3.bf16.msra.mxu1 %v3767_v6  ;;  %v10941_v6 = vld [vmem:[%s13353_s11 + $0xc8] ss:$16 sps:$4 sm:$0xff]   ;;  %v10946_v22 = vld [vmem:[%s13353_s11 + $0xac] ss:$16 sps:$4 sm:$0xff]  }
 0x6d5   : > { %10119 = vmatprep.subr.bf16.mxu1 %v3766_v10 }
 0x6d8   : > { %10120 = vmatpush3.bf16.msra.mxu1 %v3766_v10 }
 0x6d9   : > { %10121 = vmatprep.subr.bf16.mxu1 %v3765_v29 }
 0x6db   : > { %10106 = vmatmul.mubr.bf16.gmra.mxu1 %v18094_v60  ;;  %v10944_v60 = vld [vmem:[%s13353_s11 + $0xa8] ss:$16 sps:$4 sm:$0xff]  }
 0x6dc   : > { %10109 = vmatprep.mubr.bf16.mxu1 %v18095_v20  ;;  %10122 = vmatpush3.bf16.msra.mxu1 %v3765_v29 }
 0x6dd   : > { %10123 = vmatprep.subr.bf16.mxu1 %v3764_v39 }
 0x6e0   : > { %10124 = vmatpush3.bf16.msra.mxu1 %v3764_v39 }
 0x6e1   : > { %10125 = vmatprep.subr.bf16.mxu1 %v13848_v56 }
 0x6e3   : > { %10110 = vmatmul.mubr.bf16.gmra.mxu1 %v18096_v14 }
 0x6e4   : > { %10126 = vmatpush3.bf16.msra.mxu1 %v13848_v56 }
 0x6e5   : > { %10127 = vmatprep.subr.bf16.mxu1 %v13831_v58 }
 0x6e8   : > { %10128 = vmatpush3.bf16.msra.mxu1 %v13831_v58 }
 0x6e9   : > { %4246 = vmatprep.subr.bf16.mxu1 %v13579_v12 }
 0x715   : > { %v3155_v26 = vpop.f32.mrf.mxu1 }
 0x716   : > { %v3234_v11 = vmul.f32 %v3155_v26, %v13856_v23  ;;  %v3298_v35 = vmul.f32 %v3155_v26, %v13850_v30  ;;  %v10949_v26 = vld [vmem:[%s13353_s11 + $0x8c] ss:$16 sps:$4 sm:$0xff]  }
 0x717   : > { %v3157_v48 = vpop.f32.mrf.mxu1 }
 0x718   : > { %v3250_v13 = vmul.f32 %v3157_v48, %v13850_v30  ;;  %v3282_v8 = vmul.f32 %v3157_v48, %v13856_v23  ;;  %v10943_v30 = vld [vmem:[%s13353_s11 + $0xcc] ss:$16 sps:$4 sm:$0xff]  }
 0x719   : > { %v3159_v49 = vpop.f32.mrf.mxu1 }
 0x71a   : > { %v3235_v58 = vmul.f32 %v3159_v49, %v13858_v4  ;;  %v3299_v12 = vmul.f32 %v3159_v49, %v13852_v36  ;;  %v3266_v37 = vadd.f32 %v3250_v13, %v3234_v11  ;;  %v3314_v46 = vsub.f32 %v3282_v8, %v3298_v35 }
 0x71b   : > { %v3161_v56 = vpop.f32.mrf.mxu1 }
 0x71c   : > { %v3251_v5 = vmul.f32 %v3161_v56, %v13852_v36  ;;  %v3283_v21 = vmul.f32 %v3161_v56, %v13858_v4 }
 0x71d   : > { %v3165_v62 = vpop.f32.mrf.mxu1 }
 0x71e   : > { %v3267_v32 = vadd.f32 %v3251_v5, %v3235_v58  ;;  %v3315_v52 = vsub.f32 %v3283_v21, %v3299_v12  ;;  %v3236_v4 = vmul.f32 %v3165_v62, %v13823_v9  ;;  %v3300_v53 = vmul.f32 %v3165_v62, %v13791_v45  ;;  %v10947_v58 = vld [vmem:[%s13353_s11 + $0x88] ss:$16 sps:$4 sm:$0xff]   ;;  %v10952_v5 = vld [vmem:[%s13353_s11 + $0x6c] ss:$16 sps:$4 sm:$0xff]  }
 0x71f   : > { %v3167_v23 = vpop.f32.mrf.mxu1 }
 0x720   : > { %v3330_v51 = vpack.c.bf16 %v3315_v52, %v3314_v46  ;;  %v3331_v40 = vpack.c.bf16 %v3267_v32, %v3266_v37  ;;  %v3252_v1 = vmul.f32 %v3167_v23, %v13791_v45  ;;  %v3284_v36 = vmul.f32 %v3167_v23, %v13823_v9  ;;  %v10950_v52 = vld [vmem:[%s13353_s11 + $0x68] ss:$16 sps:$4 sm:$0xff]  }
 0x721   : > { %v3169_v61 = vpop.f32.mrf.mxu1 }
 0x722   : > { %3394 = vmatprep.mubr.bf16.mxu0 %v3331_v40  ;;  %v3237_v41 = vmul.f32 %v3169_v61, %v13825_v54  ;;  %v3301_v19 = vmul.f32 %v3169_v61, %v13793_v38  ;;  %v3268_v27 = vadd.f32 %v3252_v1, %v3236_v4  ;;  %v3316_v9 = vsub.f32 %v3284_v36, %v3300_v53  ;;  %v10953_v53 = vld [vmem:[%s13353_s11 + $0x48] ss:$16 sps:$4 sm:$0xff]  }
 0x723   : > { %3395 = vmatmul.mubr.bf16.vlgmr.msra.gmra.mxu0 %v3330_v51  ;;  %v3171_v2 = vpop.f32.mrf.mxu1 }
 0x724   : > { %4022 = vmatpush1.bf16.msra.mxu0 %v10938_v25  ;;  %v3253_v10 = vmul.f32 %v3171_v2, %v13793_v38  ;;  %v3285_v28 = vmul.f32 %v3171_v2, %v13825_v54 }
 0x725   : > { %4023 = vmatprep.subr.bf16.mxu0 %v10943_v30  ;;  %v3175_v57 = vpop.f32.mrf.mxu1 }
 0x726   : > { %v3269_v29 = vadd.f32 %v3253_v10, %v3237_v41  ;;  %v3317_v45 = vsub.f32 %v3285_v28, %v3301_v19  ;;  %v3238_v48 = vmul.f32 %v3175_v57, %v13781_v63  ;;  %v3302_v49 = vmul.f32 %v3175_v57, %v13751_v24 }
 0x727   : > { %v3177_v31 = vpop.f32.mrf.mxu1 }
 0x728   : > { %4024 = vmatpush1.bf16.msra.mxu0 %v10941_v6  ;;  %v3333_v39 = vpack.c.bf16 %v3269_v29, %v3268_v27  ;;  %v3332_v20 = vpack.c.bf16 %v3317_v45, %v3316_v9  ;;  %v3254_v38 = vmul.f32 %v3177_v31, %v13751_v24  ;;  %v3286_v54 = vmul.f32 %v3177_v31, %v13781_v63  ;;  %v10958_v6 = vld [vmem:[%s13353_s11 + $0x2c] ss:$16 sps:$4 sm:$0xff]  }
 0x729   : > { %4025 = vmatprep.subr.bf16.mxu0 %v10946_v22  ;;  %v3179_v14 = vpop.f32.mrf.mxu1  ;;  %v10956_v22 = vld [vmem:[%s13353_s11 + $0x28] ss:$16 sps:$4 sm:$0xff]   ;;  %v2757_v29 = vadd.f32 %v13942_v55, %v13488_v3 }
 0x72a   : > { %3402 = vmatprep.mubr.bf16.mxu0 %v3333_v39  ;;  %v3239_v8 = vmul.f32 %v3179_v14, %v13783_v33  ;;  %v3303_v11 = vmul.f32 %v3179_v14, %v13753_v17  ;;  %v3270_v63 = vadd.f32 %v3254_v38, %v3238_v48  ;;  %v3318_v21 = vsub.f32 %v3286_v54, %v3302_v49  ;;  %v10959_v38 = vld [vmem:[%s13353_s11 + $0x8] ss:$16 sps:$4 sm:$0xff]  }
 0x72b   : > { %v3181_v13 = vpop.f32.mrf.mxu1  ;;  %3403 = vmatmul.mubr.bf16.gmra.mxu0 %v3332_v20  ;;  %v2753_v54 = vadd.f32 %v13763_v44, %v13488_v3 }
 0x72c   : > { %v3255_v35 = vmul.f32 %v3181_v13, %v13753_v17  ;;  %v3287_v56 = vmul.f32 %v3181_v13, %v13783_v33  ;;  %4026 = vmatpush1.bf16.msra.mxu0 %v10944_v60  ;;  %v10955_v17 = vld [vmem:[%s13353_s11 + $0x4c] ss:$16 sps:$4 sm:$0xff]  }
 0x72d   : > { %v3185_v12 = vpop.f32.mrf.mxu1  ;;  %4027 = vmatprep.subr.bf16.mxu0 %v10949_v26  ;;  %v14003_v13 = vpack.c.bf16 %v2757_v29, %v2753_v54  ;;  %v18103_v29 = vld [vmem:[#allocation79_spill] sm:$0xff]  ;;  %v18106_v54 = vld [vmem:[#allocation82_spill] sm:$0xff] }
 0x72e   : > { %v3271_v24 = vadd.f32 %v3255_v35, %v3239_v8  ;;  %v3319_v37 = vsub.f32 %v3287_v56, %v3303_v11  ;;  %v3240_v40 = vmul.f32 %v3185_v12, %v13739_v50  ;;  %v3304_v25 = vmul.f32 %v3185_v12, %v13708_v42 }
 0x72f   : > { %v3187_v46 = vpop.f32.mrf.mxu1 }
 0x730   : > { %4028 = vmatpush1.bf16.msra.mxu0 %v10947_v58  ;;  %v3335_v32 = vpack.c.bf16 %v3271_v24, %v3270_v63  ;;  %v3334_v62 = vpack.c.bf16 %v3319_v37, %v3318_v21  ;;  %v3256_v33 = vmul.f32 %v3187_v46, %v13708_v42  ;;  %v3288_v23 = vmul.f32 %v3187_v46, %v13739_v50  ;;  %v18098_v21 = vld [vmem:[#allocation93_spill] sm:$0xff] }
 0x731   : > { %v3189_v51 = vpop.f32.mrf.mxu1  ;;  %4029 = vmatprep.subr.bf16.mxu0 %v10952_v5  ;;  %v18097_v5 = vld [vmem:[#allocation99_spill] sm:$0xff] }
 0x732   : > { %3410 = vmatprep.mubr.bf16.mxu0 %v3335_v32  ;;  %v3241_v61 = vmul.f32 %v3189_v51, %v13741_v43  ;;  %v3305_v1 = vmul.f32 %v3189_v51, %v13710_v59  ;;  %v3272_v50 = vadd.f32 %v3256_v33, %v3240_v40  ;;  %v3320_v41 = vsub.f32 %v3288_v23, %v3304_v25 }
 0x733   : > { %v3191_v30 = vpop.f32.mrf.mxu1  ;;  %3411 = vmatmul.mubr.bf16.gmra.mxu0 %v3334_v62 }
 0x734   : > { %v3257_v36 = vmul.f32 %v3191_v30, %v13710_v59  ;;  %v3289_v4 = vmul.f32 %v3191_v30, %v13741_v43  ;;  %4030 = vmatpush1.bf16.msra.mxu0 %v10950_v52  ;;  %v10961_v59 = vld [vmem:[%s13353_s11 + $0xc] ss:$16 sps:$4 sm:$0xff]   ;;  %s18202_s11 = smov %s18201_s30 }
 0x735   : > { %v3195_v2 = vpop.f32.mrf.mxu1  ;;  %4031 = vmatprep.subr.bf16.mxu0 %v10955_v17  ;;  %v18100_v30 = vld [vmem:[#allocation91_spill] sm:$0xff] }
 0x736   : > { %v3273_v42 = vadd.f32 %v3257_v36, %v3241_v61  ;;  %v3321_v19 = vsub.f32 %v3289_v4, %v3305_v1  ;;  %v3242_v45 = vmul.f32 %v3195_v2, %v13699_v0  ;;  %v3306_v31 = vmul.f32 %v3195_v2, %v13669_v18 }
 0x737   : > { %v3197_v10 = vpop.f32.mrf.mxu1 }
 0x738   : > { %4032 = vmatpush1.bf16.msra.mxu0 %v10953_v53  ;;  %v3337_v28 = vpack.c.bf16 %v3273_v42, %v3272_v50  ;;  %v3336_v57 = vpack.c.bf16 %v3321_v19, %v3320_v41  ;;  %v3258_v43 = vmul.f32 %v3197_v10, %v13669_v18  ;;  %v3290_v9 = vmul.f32 %v3197_v10, %v13699_v0  ;;  %v18101_v53 = vld [vmem:[#allocation92_spill] sm:$0xff] }
 0x739   : > { %v3199_v27 = vpop.f32.mrf.mxu1  ;;  %4033 = vmatprep.subr.bf16.mxu0 %v10958_v6  ;;  %v18102_v6 = vld [vmem:[#allocation90_spill] sm:$0xff] }
 0x73a   : > { %3418 = vmatprep.mubr.bf16.mxu0 %v3337_v28  ;;  %v3243_v60 = vmul.f32 %v3199_v27, %v13701_v34  ;;  %v3307_v20 = vmul.f32 %v3199_v27, %v13671_v47  ;;  %v3274_v0 = vadd.f32 %v3258_v43, %v3242_v45  ;;  %v3322_v48 = vsub.f32 %v3290_v9, %v3306_v31  ;;  %v18104_v31 = vld [vmem:[#allocation81_spill] sm:$0xff] }
 0x73b   : > { %v3201_v39 = vpop.f32.mrf.mxu1  ;;  %3419 = vmatmul.mubr.bf16.gmra.mxu0 %v3336_v57 }
 0x73c   : > { %v3259_v14 = vmul.f32 %v3201_v39, %v13671_v47  ;;  %v3291_v26 = vmul.f32 %v3201_v39, %v13701_v34  ;;  %4034 = vmatpush1.bf16.msra.mxu0 %v10956_v22 }
 0x73d   : > { %v3205_v55 = vpop.f32.mrf.mxu1  ;;  %4035 = vmatprep.subr.bf16.mxu0 %v10961_v59 }
 0x73e   : > { %v3275_v18 = vadd.f32 %v3259_v14, %v3243_v60  ;;  %v3323_v49 = vsub.f32 %v3291_v26, %v3307_v20  ;;  %v3244_v44 = vmul.f32 %v3205_v55, %v13657_v7  ;;  %v3308_v58 = vmul.f32 %v3205_v55, %v13621_v16  ;;  %v18105_v60 = vld [vmem:[#allocation70_spill] sm:$0xff] }
 0x73f   : > { %v3207_v8 = vpop.f32.mrf.mxu1  ;;  %v17783_v20 = vsub.s32 1, %v18105_v60 }
 0x740   : > { %4036 = vmatpush1.bf16.msra.mxu0 %v10959_v38  ;;  %v3339_v11 = vpack.c.bf16 %v3275_v18, %v3274_v0  ;;  %v3338_v35 = vpack.c.bf16 %v3323_v49, %v3322_v48  ;;  %v3260_v34 = vmul.f32 %v3207_v8, %v13621_v16  ;;  %v3292_v56 = vmul.f32 %v3207_v8, %v13657_v7  ;;  %v18099_v16 = vld [vmem:[#allocation89_spill] sm:$0xff]  ;;  %v18107_v0 = vld [vmem:[#allocation80_spill] sm:$0xff] }
 0x741   : > { %10145 = vmatprep.subr.bf16.mxu0 %v14003_v13  ;;  %v3209_v47 = vpop.f32.mrf.mxu1 }
 0x742   : > { %3426 = vmatprep.mubr.bf16.mxu0 %v3339_v11  ;;  %v3245_v63 = vmul.f32 %v3209_v47, %v18097_v5  ;;  %v3309_v24 = vmul.f32 %v3209_v47, %v18098_v21  ;;  %v3276_v52 = vadd.f32 %v3260_v34, %v3244_v44  ;;  %v3324_v62 = vsub.f32 %v3292_v56, %v3308_v58  ;;  %v14032_v34 = vld [vmem:[%s12824_s5] sm:$0x3f] }
 0x743   : > { %v3211_v12 = vpop.f32.mrf.mxu1  ;;  %3427 = vmatmul.mubr.bf16.gmra.mxu0 %v3338_v35  ;;  %v14037_v56 = vrot.slane %v14032_v34, %v17783_v20 }
 0x744   : > { %v3261_v37 = vmul.f32 %v3211_v12, %v18098_v21  ;;  %v3293_v46 = vmul.f32 %v3211_v12, %v18097_v5  ;;  %v18108_v12 = vld [vmem:[#allocation72_spill] sm:$0xff] }
 0x745   : > { %v3215_v32 = vpop.f32.mrf.mxu1  ;;  %v14041_v5 = vadd.f32 %v18108_v12, %v14037_v56  ;;  %v18129_v12 = vld [vmem:[#allocation103_spill] sm:$0xff] }
 0x746   : > { %v3277_v51 = vadd.f32 %v3261_v37, %v3245_v63  ;;  %v3325_v17 = vsub.f32 %v3293_v46, %v3309_v24  ;;  %v3246_v1 = vmul.f32 %v3215_v32, %v18100_v30  ;;  %v3310_v36 = vmul.f32 %v3215_v32, %v18099_v16  ;;  %v18109_v63 = vld [vmem:[#allocation71_spill] sm:$0xff] }
 0x747   : > { %v3217_v33 = vpop.f32.mrf.mxu1  ;;  %v14045_v21 = vadd.f32 %v18109_v63, %v14037_v56  ;;  %v14049_v24 = vld [vmem:[%s18110_s18 + $0x1] ss:$0 sm:$0xff]  ;;  %v18111_v37 = vmov 0   ;;  %v14131_v63 = vadd.f32 %v18129_v12, %v14037_v56 }
 0x748   : > { %v3341_v23 = vpack.c.bf16 %v3277_v51, %v3276_v52  ;;  %v3340_v7 = vpack.c.bf16 %v3325_v17, %v3324_v62  ;;  %v3262_v25 = vmul.f32 %v3217_v33, %v18099_v16  ;;  %v3294_v61 = vmul.f32 %v3217_v33, %v18100_v30  ;;  %v18112_v52 = vld [vmem:[#allocation113_spill] sm:$0xff]  ;;  %v18113_v17 = vld [vmem:[#allocation75_spill] sm:$0xff] }
 0x749   : > { %v3219_v40 = vpop.f32.mrf.mxu1  ;;  %v3902_v46 = vadd.f32 %v14049_v24, %v14041_v5  ;;  %v3901_v32 = vadd.f32 %v14049_v24, %v14045_v21  ;;  %v2747_v62 = vadd.f32 %v18112_v52, %v13488_v3  ;;  %v14060_v33 = vadd.f32 %v18113_v17, %v14037_v56 }
 0x74a   : > { %3434 = vmatprep.mubr.bf16.mxu0 %v3341_v23  ;;  %v3247_v2 = vmul.f32 %v3219_v40, %v18101_v53  ;;  %v3311_v50 = vmul.f32 %v3219_v40, %v18102_v6  ;;  %v3278_v10 = vadd.f32 %v3262_v25, %v3246_v1  ;;  %v3326_v28 = vsub.f32 %v3294_v61, %v3310_v36  ;;  %v18114_v23 = vld [vmem:[#allocation111_spill] sm:$0xff]  ;;  %v18115_v40 = vld [vmem:[#allocation74_spill] sm:$0xff] }
 0x74b   : > { %v3221_v4 = vpop.f32.mrf.mxu1  ;;  %3435 = vmatmul.mubr.bf16.gmra.mxu0 %v3340_v7  ;;  %v3933_v51 = vpack.c.bf16 %v3902_v46, %v3901_v32  ;;  %v2743_v7 = vadd.f32 %v18114_v23, %v13488_v3  ;;  %v14066_v16 = vadd.f32 %v18115_v40, %v14037_v56  ;;  %v3904_v30 = vadd.f32 %v14049_v24, %v14060_v33  ;;  %v18116_v1 = vld [vmem:[#allocation107_spill] sm:$0xff]  ;;  %v18132_v23 = vld [vmem:[#allocation110_spill] sm:$0xff] }
 0x74c   : > { %v3263_v41 = vmul.f32 %v3221_v4, %v18102_v6  ;;  %v3295_v42 = vmul.f32 %v3221_v4, %v18101_v53  ;;  %v2737_v36 = vadd.f32 %v18116_v1, %v13488_v3  ;;  %v18117_v53 = vld [vmem:[#allocation78_spill] sm:$0xff]  ;;  %v18118_v6 = vld [vmem:[#allocation104_spill] sm:$0xff]  ;;  %v18130_v32 = vld [vmem:[#allocation83_spill] sm:$0xff]  ;;  %v3911_v52 = vadd.f32 %v14049_v24, %v14131_v63 }
 0x74d   : > { %v3225_v19 = vpop.f32.mrf.mxu1  ;;  %v3931_v25 = vpack.c.bf16 %v2747_v62, %v2743_v7  ;;  %v3903_v61 = vadd.f32 %v14049_v24, %v14066_v16  ;;  %v14145_v7 = vadd.f32 %v18132_v23, %v14037_v56  ;;  %v18134_v1 = vld [vmem:[#allocation117_spill] sm:$0xff]  ;;  %v18146_v23 = vld [vmem:[#allocation128_spill] sm:$0xff] }
 0x74e   : > { %v3279_v22 = vadd.f32 %v3263_v41, %v3247_v2  ;;  %v3327_v57 = vsub.f32 %v3295_v42, %v3311_v50  ;;  %v3248_v14 = vmul.f32 %v3225_v19, %v18104_v31  ;;  %v3312_v26 = vmul.f32 %v3225_v19, %v18103_v29  ;;  %v18119_v50 = vld [vmem:[#allocation77_spill] sm:$0xff] }
 0x74f   : > { %v3227_v27 = vpop.f32.mrf.mxu1  ;;  %v3934_v4 = vpack.c.bf16 %v3904_v30, %v3903_v61  ;;  %v14078_v2 = vadd.f32 %v18117_v53, %v14037_v56  ;;  %v14084_v41 = vadd.f32 %v18119_v50, %v14037_v56  ;;  %v3913_v30 = vadd.f32 %v14049_v24, %v14145_v7  ;;  %v18135_v53 = vld [vmem:[#allocation115_spill] sm:$0xff] }
 0x750   : > { %v3343_v59 = vpack.c.bf16 %v3279_v22, %v3278_v10  ;;  %v3342_v43 = vpack.c.bf16 %v3327_v57, %v3326_v28  ;;  %v3264_v45 = vmul.f32 %v3227_v27, %v18103_v29  ;;  %v3296_v39 = vmul.f32 %v3227_v27, %v18104_v31  ;;  %v18120_v28 = vld [vmem:[#allocation101_spill] sm:$0xff]  ;;  %v18121_v27 = vld [vmem:[#allocation87_spill] sm:$0xff]  ;;  %v18123_v29 = vld [vmem:[#allocation84_spill] sm:$0xff] }
 0x751   : > { %v3229_v9 = vpop.f32.mrf.mxu1  ;;  %v3906_v19 = vadd.f32 %v14049_v24, %v14078_v2  ;;  %v3905_v10 = vadd.f32 %v14049_v24, %v14084_v41  ;;  %v2727_v22 = vadd.f32 %v18120_v28, %v13488_v3  ;;  %v14167_v50 = vld [vmem:[%s18136_s12 + $0x1] ss:$0 sm:$0xff] }
 0x752   : > { %3442 = vmatprep.mubr.bf16.mxu0 %v3343_v59  ;;  %v3249_v55 = vmul.f32 %v3229_v9, %v18106_v54  ;;  %v3313_v48 = vmul.f32 %v3229_v9, %v18107_v0  ;;  %v3280_v8 = vadd.f32 %v3264_v45, %v3248_v14  ;;  %v3328_v11 = vsub.f32 %v3296_v39, %v3312_v26  ;;  %v18124_v26 = vld [vmem:[#allocation88_spill] sm:$0xff] }
 0x753   : > { %v3231_v38 = vpop.f32.mrf.mxu1  ;;  %3443 = vmatmul.mubr.bf16.gmra.mxu0 %v3342_v43  ;;  %v3935_v57 = vpack.c.bf16 %v3906_v19, %v3905_v10  ;;  %v14095_v59 = vadd.f32 %v18121_v27, %v14037_v56  ;;  %v18122_v43 = vld [vmem:[#allocation98_spill] sm:$0xff]  ;;  %v14101_v45 = vadd.f32 %v18123_v29, %v14037_v56  ;;  %v18137_v10 = vld [vmem:[#allocation73_spill] sm:$0xff]  ;;  %v18138_v29 = vld [vmem:[#allocation136_spill] sm:$0xff] }
 0x754   : > { %v3265_v18 = vmul.f32 %v3231_v38, %v18107_v0  ;;  %v3297_v49 = vmul.f32 %v3231_v38, %v18106_v54  ;;  %v2723_v9 = vadd.f32 %v18122_v43, %v13488_v3  ;;  %v2717_v38 = vadd.f32 %v18124_v26, %v13488_v3  ;;  %v18125_v54 = vld [vmem:[#allocation85_spill] sm:$0xff] }
 0x755   : > { %v3908_v39 = vadd.f32 %v14049_v24, %v14095_v59  ;;  %v3907_v14 = vadd.f32 %v14049_v24, %v14101_v45 }
 0x756   : > { %v3281_v35 = vadd.f32 %v3265_v18, %v3249_v55  ;;  %v3329_v47 = vsub.f32 %v3297_v49, %v3313_v48  ;;  %v3929_v31 = vpack.c.bf16 %v2727_v22, %v2723_v9  ;;  %v2713_v55 = vadd.f32 %v18125_v54, %v13488_v3  ;;  %v18126_v48 = vld [vmem:[#allocation100_spill] sm:$0xff] }
 0x757   : > { %v3936_v0 = vpack.c.bf16 %v3908_v39, %v3907_v14  ;;  %v14114_v18 = vadd.f32 %v18126_v48, %v14037_v56  ;;  %v18139_v14 = vld [vmem:[#allocation135_spill] sm:$0xff]  ;;  %v3886_v48 = vadd.f32 %v14167_v50, %v14101_v45 }
 0x758   : > { %v3345_v44 = vpack.c.bf16 %v3281_v35, %v3280_v8  ;;  %v3344_v58 = vpack.c.bf16 %v3329_v47, %v3328_v11  ;;  %v3928_v49 = vpack.c.bf16 %v2717_v38, %v2713_v55  ;;  %v18127_v8 = vld [vmem:[#allocation97_spill] sm:$0xff] }
 0x759   : > { %v14118_v11 = vadd.f32 %v18127_v8, %v14037_v56  ;;  %v3910_v35 = vadd.f32 %v14049_v24, %v14114_v18 }
 0x75a   : > { %3450 = vmatprep.mubr.bf16.mxu0 %v3345_v44  ;;  %v18128_v44 = vld [vmem:[#allocation106_spill] sm:$0xff] }
 0x75b   : > { %3451 = vmatmul.mubr.bf16.gmra.mxu0 %v3344_v58  ;;  %v14127_v58 = vadd.f32 %v18128_v44, %v14037_v56 }
 0x75c   : > { %4053 = vmatprep.mubr.bf16.mxu0 %v18111_v37 }
 0x75d   : > { %v3912_v46 = vadd.f32 %v14049_v24, %v14127_v58  ;;  %v3891_v45 = vadd.f32 %v14167_v50, %v14127_v58  ;;  %v18147_v58 = vld [vmem:[#allocation127_spill] sm:$0xff] }
 0x75f   : > { %v3938_v62 = vpack.c.bf16 %v3912_v46, %v3911_v52  ;;  %v18144_v46 = vld [vmem:[#allocation130_spill] sm:$0xff]  ;;  %v18145_v52 = vld [vmem:[#allocation129_spill] sm:$0xff] }
 0x763   : > { %4054 = vmatmul.mubr.bf16.vlgmr.msra.gmra.mxu0 %v3933_v51  ;;  %v18131_v51 = vld [vmem:[#allocation112_spill] sm:$0xff] }
 0x764   : > { %10146 = vmatpush3.bf16.xpose.msra.mxu0 %v14003_v13  ;;  %4063 = vmatprep.mubr.bf16.mxu0 %v18111_v37  ;;  %v2733_v13 = vadd.f32 %v18118_v6, %v13488_v3  ;;  %v3909_v3 = vadd.f32 %v14049_v24, %v14118_v11  ;;  %v14141_v17 = vadd.f32 %v18131_v51, %v14037_v56 }
 0x765   : > { %10147 = vmatprep.subr.bf16.mxu0 %v3931_v25  ;;  %v14161_v6 = vadd.f32 %v18135_v53, %v14037_v56  ;;  %v3890_v51 = vadd.f32 %v14167_v50, %v14131_v63  ;;  %v18148_v53 = vld [vmem:[#allocation124_spill] sm:$0xff] }
 0x766   : > { %v3930_v42 = vpack.c.bf16 %v2737_v36, %v2733_v13  ;;  %v3937_v47 = vpack.c.bf16 %v3910_v35, %v3909_v3  ;;  %v3914_v40 = vadd.f32 %v14049_v24, %v14141_v17  ;;  %v14156_v36 = vadd.f32 %v18134_v1, %v14037_v56  ;;  %v2869_v13 = vpop.f32.mrf.mxu0 }
 0x767   : > { %v3881_v56 = vadd.f32 %v14167_v50, %v14041_v5  ;;  %v3915_v28 = vadd.f32 %v14049_v24, %v14161_v6  ;;  %v3883_v5 = vadd.f32 %v14167_v50, %v14060_v33  ;;  %v18140_v33 = vld [vmem:[#allocation134_spill] sm:$0xff]  ;;  %v3888_v3 = vadd.f32 %v14167_v50, %v14118_v11 }
 0x768   : > { %v3939_v61 = vpack.c.bf16 %v3914_v40, %v3913_v30  ;;  %v3892_v30 = vadd.f32 %v14167_v50, %v14145_v7  ;;  %v3895_v63 = vadd.f32 %v14167_v50, %v14156_v36 }
 0x76b   : > { %4064 = vmatmul.mubr.bf16.gmra.mxu0 %v3934_v4  ;;  %v2285_v4 = vsub.s32 5, %v18105_v60 }
 0x76c   : > { %10148 = vmatpush3.bf16.xpose.msra.mxu0 %v3931_v25  ;;  %4073 = vmatprep.mubr.bf16.mxu0 %v18111_v37  ;;  %v18133_v25 = vld [vmem:[#allocation76_spill] sm:$0xff] }
 0x76d   : > { %10149 = vmatprep.subr.bf16.mxu0 %v3930_v42  ;;  %v14172_v19 = vrot.slane %v14032_v34, %v2285_v4 }
 0x76f   : > { %v2870_v22 = vadd.f32 %v2869_v13, %v14172_v19  ;;  %v2866_v43 = vadd.f32 %v13900_v15, %v14172_v19  ;;  %v3884_v15 = vadd.f32 %v14167_v50, %v14084_v41  ;;  %v2856_v26 = vadd.f32 %v18139_v14, %v14172_v19 }
 0x770   : > { %v2850_v54 = vadd.f32 %v18140_v33, %v14172_v19  ;;  %v3889_v41 = vadd.f32 %v14167_v50, %v14114_v18  ;;  %v2830_v18 = vadd.f32 %v18144_v46, %v14172_v19  ;;  %v2826_v11 = vadd.f32 %v18145_v52, %v14172_v19 }
 0x771   : > { %v4647_v34 = vpack.c.bf16 %v2870_v22, %v2866_v43  ;;  %v2820_v40 = vadd.f32 %v18146_v23, %v14172_v19  ;;  %v2816_v1 = vadd.f32 %v18147_v58, %v14172_v19 }
 0x772   : > { %v3921_v12 = vpack.c.bf16 %v3889_v41, %v3888_v3 }
 0x773   : > { %4074 = vmatmul.mubr.bf16.gmra.mxu0 %v3935_v57  ;;  %v3880_v57 = vadd.f32 %v14167_v50, %v14045_v21  ;;  %v3882_v21 = vadd.f32 %v14167_v50, %v14066_v16  ;;  %v3887_v16 = vadd.f32 %v14167_v50, %v14095_v59  ;;  %v18143_v59 = vld [vmem:[#allocation131_spill] sm:$0xff]  ;;  %v4642_v13 = vpack.c.bf16 %v2820_v40, %v2816_v1 }
 0x774   : > { %10150 = vmatpush3.bf16.xpose.msra.mxu0 %v3930_v42  ;;  %4083 = vmatprep.mubr.bf16.mxu0 %v18111_v37  ;;  %v3916_v42 = vadd.f32 %v14049_v24, %v14156_v36  ;;  %v3885_v24 = vadd.f32 %v14167_v50, %v14078_v2  ;;  %v18141_v2 = vld [vmem:[#allocation133_spill] sm:$0xff]  ;;  %v2836_v44 = vadd.f32 %v18143_v59, %v14172_v19 }
 0x775   : > { %10151 = vmatprep.subr.bf16.mxu0 %v3929_v31  ;;  %v3917_v9 = vpack.c.bf16 %v3881_v56, %v3880_v57  ;;  %v3918_v39 = vpack.c.bf16 %v3883_v5, %v3882_v21  ;;  %v18150_v56 = vld [vmem:[#allocation121_spill] sm:$0xff]  ;;  %v14242_v21 = vld [vmem:[%s12804_s13] ss:$0 sm:$0xff] }
 0x776   : > { %v3940_v27 = vpack.c.bf16 %v3916_v42, %v3915_v28  ;;  %v3919_v38 = vpack.c.bf16 %v3885_v24, %v3884_v15  ;;  %v18149_v42 = vld [vmem:[#allocation123_spill] sm:$0xff]  ;;  %v2800_v28 = vadd.f32 %v18150_v56, %v14172_v19 }
 0x777   : > { %v2806_v7 = vadd.f32 %v18149_v42, %v14172_v19 }
 0x77b   : > { %4084 = vmatmul.mubr.bf16.gmra.mxu0 %v3936_v0  ;;  %v2846_v0 = vadd.f32 %v18141_v2, %v14172_v19 }
 0x77c   : > { %10152 = vmatpush3.bf16.xpose.msra.mxu0 %v3929_v31  ;;  %4093 = vmatprep.mubr.bf16.mxu0 %v18111_v37  ;;  %v2860_v31 = vadd.f32 %v18138_v29, %v14172_v19 }
 0x77d   : > { %10153 = vmatprep.subr.bf16.mxu0 %v3928_v49  ;;  %v4645_v35 = vpack.c.bf16 %v2850_v54, %v2846_v0 }
 0x77e   : > { %v4646_v55 = vpack.c.bf16 %v2860_v31, %v2856_v26 }
 0x783   : > { %4094 = vmatmul.mubr.bf16.gmra.mxu0 %v3937_v47  ;;  %v3920_v47 = vpack.c.bf16 %v3887_v16, %v3886_v48 }
 0x784   : > { %10154 = vmatpush3.bf16.xpose.msra.mxu0 %v3928_v49  ;;  %4103 = vmatprep.mubr.bf16.mxu0 %v18111_v37  ;;  %v18142_v49 = vld [vmem:[#allocation132_spill] sm:$0xff] }
 0x785   : > { %10155 = vmatprep.subr.bf16.mxu0 %v18130_v32  ;;  %v2840_v8 = vadd.f32 %v18142_v49, %v14172_v19 }
 0x78b   : > { %4104 = vmatmul.mubr.bf16.gmra.mxu0 %v3938_v62  ;;  %v3893_v62 = vadd.f32 %v14167_v50, %v14141_v17  ;;  %v2810_v17 = vadd.f32 %v18148_v53, %v14172_v19  ;;  %v10099_v36 = vpop.f32.mrf.mxu1 }
 0x78c   : > { %10156 = vmatpush3.bf16.xpose.msra.mxu0 %v18130_v32  ;;  %4113 = vmatprep.mubr.bf16.mxu0 %v18111_v37  ;;  %v4644_v32 = vpack.c.bf16 %v2840_v8, %v2836_v44 }
 0x78d   : > { %10157 = vmatprep.subr.bf16.mxu0 %v18133_v25  ;;  %v3923_v4 = vpack.c.bf16 %v3893_v62, %v3892_v30  ;;  %v4641_v22 = vpack.c.bf16 %v2810_v17, %v2806_v7 }
 0x793   : > { %4114 = vmatmul.mubr.bf16.gmra.mxu0 %v3939_v61  ;;  %v3922_v61 = vpack.c.bf16 %v3891_v45, %v3890_v51 }
 0x794   : > { %10158 = vmatpush3.bf16.xpose.msra.mxu0 %v18133_v25  ;;  %4123 = vmatprep.mubr.bf16.mxu0 %v18111_v37  ;;  %v4643_v25 = vpack.c.bf16 %v2830_v18, %v2826_v11 }
 0x795   : > { %10159 = vmatprep.subr.bf16.mxu0 %v18137_v10 }
 0x79b   : > { %4124 = vmatmul.mubr.bf16.gmra.mxu0 %v3940_v27  ;;  %v18151_v27 = vld [vmem:[#allocation120_spill] sm:$0xff] }
 0x79c   : > { %10160 = vmatpush3.bf16.xpose.msra.mxu0 %v18137_v10  ;;  %10161 = vmatprep.mubr.bf16.mxu0 %v3917_v9  ;;  %v3894_v10 = vadd.f32 %v14167_v50, %v14161_v6  ;;  %v2796_v43 = vadd.f32 %v18151_v27, %v14172_v19 }
 0x79d   : > { %10177 = vmatprep.subr.bf16.mxu0 %v4647_v34 }
 0x79e   : > { %v3924_v57 = vpack.c.bf16 %v3895_v63, %v3894_v10  ;;  %v4640_v9 = vpack.c.bf16 %v2800_v28, %v2796_v43 }
 0x7a3   : > { %10162 = vmatmul.mubr.bf16.vlgmr.msra.gmra.mxu0 %v3918_v39 }
 0x7a4   : > { %10178 = vmatpush3.bf16.msra.mxu0 %v4647_v34  ;;  %10165 = vmatprep.mubr.bf16.mxu0 %v3919_v38  ;;  %v3493_v34 = vpop.f32.mrf.mxu1 }
 0x7a5   : > { %10179 = vmatprep.subr.bf16.mxu0 %v4646_v55 }
 0x7a6   : > { %v10100_v5 = vpop.f32.mrf.mxu1 }
 0x7a8   : > { %10180 = vmatpush3.bf16.msra.mxu0 %v4646_v55  ;;  %v3496_v31 = vpop.f32.mrf.mxu1 }
 0x7a9   : > { %10181 = vmatprep.subr.bf16.mxu0 %v4645_v35 }
 0x7aa   : > { %v10103_v38 = vpop.f32.mrf.mxu1 }
 0x7ab   : > { %10166 = vmatmul.mubr.bf16.gmra.mxu0 %v3920_v47 }
 0x7ac   : > { %10182 = vmatpush3.bf16.msra.mxu0 %v4645_v35  ;;  %10169 = vmatprep.mubr.bf16.mxu0 %v3921_v12  ;;  %v3509_v0 = vpop.f32.mrf.mxu1 }
 0x7ad   : > { %10183 = vmatprep.subr.bf16.mxu0 %v4644_v32 }
 0x7ae   : > { %v10104_v3 = vpop.f32.mrf.mxu1 }
 0x7b0   : > { %10184 = vmatpush3.bf16.msra.mxu0 %v4644_v32  ;;  %v3512_v18 = vpop.f32.mrf.mxu1 }
 0x7b1   : > { %10185 = vmatprep.subr.bf16.mxu0 %v4643_v25 }
 0x7b2   : > { %v10107_v51 = vpop.f32.mrf.mxu1 }
 0x7b3   : > { %10170 = vmatmul.mubr.bf16.gmra.mxu0 %v3922_v61 }
 0x7b4   : > { %10186 = vmatpush3.bf16.msra.mxu0 %v4643_v25  ;;  %10173 = vmatprep.mubr.bf16.mxu0 %v3923_v4  ;;  %v3525_v58 = vpop.f32.mrf.mxu1 }
 0x7b5   : > { %10187 = vmatprep.subr.bf16.mxu0 %v4642_v13 }
 0x7b6   : > { %v10108_v63 = vpop.f32.mrf.mxu1 }
 0x7b8   : > { %10188 = vmatpush3.bf16.msra.mxu0 %v4642_v13 }
 0x7b9   : > { %10189 = vmatprep.subr.bf16.mxu0 %v4641_v22 }
 0x7bb   : > { %10174 = vmatmul.mubr.bf16.gmra.mxu0 %v3924_v57 }
 0x7bc   : > { %10190 = vmatpush3.bf16.msra.mxu0 %v4641_v22  ;;  %v3528_v22 = vpop.f32.mrf.mxu1 }
 0x7bd   : > { %10191 = vmatprep.subr.bf16.mxu0 %v4640_v9 }
 0x7c0   : > { %10192 = vmatpush3.bf16.msra.mxu0 %v4640_v9 }
 0x7e3   : > { %v3396_v6 = vpop.f32.mrf.mxu0 }
 0x7e4   : > { %v3494_v50 = vadd.f32 %v3493_v34, %v3396_v6  ;;  %v10111_v34 = vpop.f32.mrf.mxu1 }
 0x7e5   : > { %v3398_v24 = vpop.f32.mrf.mxu0 }
 0x7e6   : > { %v3556_v29 = vmul.f32 0.25, %v3494_v50 }
 0x7e7   : > { %v3399_v15 = vpop.f32.mrf.mxu0 }
 0x7e8   : > { %v3497_v39 = vadd.f32 %v3496_v31, %v3399_v15  ;;  %v14245_v19 = vadd.f32 %v14242_v21, %v3556_v29  ;;  %v3541_v31 = vpop.f32.mrf.mxu1 }
 0x7e9   : > { %v3401_v14 = vpop.f32.mrf.mxu0 }
 0x7ea   : > { %v3557_v26 = vmul.f32 0.25, %v3497_v39  ;;  %3594 = vmax.xlane.f32.xlu0 %v14245_v19 }
 0x7eb   : > { %v3404_v33 = vpop.f32.mrf.mxu0 }
 0x7ec   : > { %v14249_v54 = vadd.f32 %v14242_v21, %v3557_v26  ;;  %v3502_v55 = vadd.f32 %v10099_v36, %v3404_v33  ;;  %v10112_v33 = vpop.f32.mrf.mxu1 }
 0x7ed   : > { %v3406_v16 = vpop.f32.mrf.mxu0 }
 0x7ee   : > { %3596 = vmax.xlane.f32.xlu1 %v14249_v54  ;;  %v3558_v2 = vmul.f32 0.25, %v3502_v55 }
 0x7ef   : > { %v3407_v41 = vpop.f32.mrf.mxu0 }
 0x7f0   : > { %v3505_v48 = vadd.f32 %v10100_v5, %v3407_v41  ;;  %v14253_v49 = vadd.f32 %v14242_v21, %v3558_v2 }
 0x7f1   : > { %v3409_v8 = vpop.f32.mrf.mxu0 }
 0x7f2   : > { %v3559_v35 = vmul.f32 0.25, %v3505_v48  ;;  %3598 = vmax.xlane.f32.xlu0 %v14253_v49  ;;  %v3544_v48 = vpop.f32.mrf.mxu1 }
 0x7f3   : > { %v3412_v47 = vpop.f32.mrf.mxu0 }
 0x7f4   : > { %v3510_v59 = vadd.f32 %v3509_v0, %v3412_v47  ;;  %v14257_v44 = vadd.f32 %v14242_v21, %v3559_v35 }
 0x7f5   : > { %v3414_v12 = vpop.f32.mrf.mxu0 }
 0x7f6   : > { %v3560_v46 = vmul.f32 0.25, %v3510_v59  ;;  %3600 = vmax.xlane.f32.xlu1 %v14257_v44 }
 0x7f7   : > { %v3415_v32 = vpop.f32.mrf.mxu0 }
 0x7f8   : > { %v3513_v45 = vadd.f32 %v3512_v18, %v3415_v32  ;;  %v14261_v52 = vadd.f32 %v14242_v21, %v3560_v46 }
 0x7f9   : > { %v3417_v11 = vpop.f32.mrf.mxu0 }
 0x7fa   : > { %v3561_v62 = vmul.f32 0.25, %v3513_v45  ;;  %3602 = vmax.xlane.f32.xlu0 %v14261_v52 }
 0x7fb   : > { %v3420_v23 = vpop.f32.mrf.mxu0 }
 0x7fc   : > { %v3518_v40 = vadd.f32 %v10103_v38, %v3420_v23  ;;  %v14265_v25 = vadd.f32 %v14242_v21, %v3561_v62 }
 0x7fd   : > { %v3422_v30 = vpop.f32.mrf.mxu0 }
 0x7fe   : > { %v3562_v61 = vmul.f32 0.25, %v3518_v40  ;;  %3604 = vmax.xlane.f32.xlu1 %v14265_v25 }
 0x7ff   : > { %v3423_v1 = vpop.f32.mrf.mxu0 }
 0x800   : > { %v3521_v4 = vadd.f32 %v10104_v3, %v3423_v1  ;;  %v14269_v53 = vadd.f32 %v14242_v21, %v3562_v61 }
 0x801   : > { %v3425_v17 = vpop.f32.mrf.mxu0 }
 0x802   : > { %v3563_v13 = vmul.f32 0.25, %v3521_v4  ;;  %3606 = vmax.xlane.f32.xlu0 %v14269_v53 }
 0x803   : > { %v3428_v42 = vpop.f32.mrf.mxu0 }
 0x804   : > { %v3526_v7 = vadd.f32 %v3525_v58, %v3428_v42  ;;  %v14273_v10 = vadd.f32 %v14242_v21, %v3563_v13 }
 0x805   : > { %v3430_v56 = vpop.f32.mrf.mxu0 }
 0x806   : > { %v3564_v28 = vmul.f32 0.25, %v3526_v7  ;;  %3608 = vmax.xlane.f32.xlu1 %v14273_v10 }
 0x807   : > { %v3431_v57 = vpop.f32.mrf.mxu0 }
 0x808   : > { %v3529_v27 = vadd.f32 %v3528_v22, %v3431_v57  ;;  %v14277_v43 = vadd.f32 %v14242_v21, %v3564_v28 }
 0x809   : > { %v3433_v9 = vpop.f32.mrf.mxu0 }
 0x80a   : > { %v3565_v36 = vmul.f32 0.25, %v3529_v27  ;;  %3610 = vmax.xlane.f32.xlu0 %v14277_v43 }
 0x80b   : > { %v3436_v5 = vpop.f32.mrf.mxu0 }
 0x80c   : > { %v3534_v6 = vadd.f32 %v10107_v51, %v3436_v5  ;;  %v14281_v50 = vadd.f32 %v14242_v21, %v3565_v36 }
 0x80d   : > { %v3438_v24 = vpop.f32.mrf.mxu0 }
 0x80e   : > { %v3566_v29 = vmul.f32 0.25, %v3534_v6  ;;  %3612 = vmax.xlane.f32.xlu1 %v14281_v50 }
 0x80f   : > { %v3439_v15 = vpop.f32.mrf.mxu0 }
 0x810   : > { %v3537_v39 = vadd.f32 %v10108_v63, %v3439_v15  ;;  %v14285_v14 = vadd.f32 %v14242_v21, %v3566_v29 }
 0x811   : > { %v3441_v26 = vpop.f32.mrf.mxu0 }
 0x812   : > { %v3567_v38 = vmul.f32 0.25, %v3537_v39  ;;  %3614 = vmax.xlane.f32.xlu0 %v14285_v14 }
 0x813   : > { %v3444_v55 = vpop.f32.mrf.mxu0 }
 0x814   : > { %v3542_v16 = vadd.f32 %v3541_v31, %v3444_v55  ;;  %v14289_v2 = vadd.f32 %v14242_v21, %v3567_v38 }
 0x815   : > { %v3446_v0 = vpop.f32.mrf.mxu0 }
 0x816   : > { %v3568_v41 = vmul.f32 0.25, %v3542_v16  ;;  %3616 = vmax.xlane.f32.xlu1 %v14289_v2 }
 0x817   : > { %v3447_v8 = vpop.f32.mrf.mxu0 }
 0x818   : > { %v3545_v35 = vadd.f32 %v3544_v48, %v3447_v8  ;;  %v14293_v3 = vadd.f32 %v14242_v21, %v3568_v41 }
 0x819   : > { %v3449_v47 = vpop.f32.mrf.mxu0 }
 0x81a   : > { %v3569_v59 = vmul.f32 0.25, %v3545_v35  ;;  %3618 = vmax.xlane.f32.xlu0 %v14293_v3 }
 0x81b   : > { %v3452_v12 = vpop.f32.mrf.mxu0 }
 0x81c   : > { %v3550_v46 = vadd.f32 %v10111_v34, %v3452_v12  ;;  %v14297_v18 = vadd.f32 %v14242_v21, %v3569_v59 }
 0x81d   : > { %v3454_v32 = vpop.f32.mrf.mxu0 }
 0x81e   : > { %v3570_v45 = vmul.f32 0.25, %v3550_v46  ;;  %3620 = vmax.xlane.f32.xlu1 %v14297_v18 }
 0x81f   : > { %v3455_v11 = vpop.f32.mrf.mxu0 }
 0x820   : > { %v3553_v62 = vadd.f32 %v10112_v33, %v3455_v11  ;;  %v14301_v51 = vadd.f32 %v14242_v21, %v3570_v45 }
 0x821   : > { %v3457_v23 = vpop.f32.mrf.mxu0 }
 0x822   : > { %v3571_v40 = vmul.f32 0.25, %v3553_v62  ;;  %3622 = vmax.xlane.f32.xlu0 %v14301_v51 }
 0x824   : > { %v14305_v30 = vadd.f32 %v14242_v21, %v3571_v40 }
 0x826   : > { %3624 = vmax.xlane.f32.xlu1 %v14305_v30 }
 0x873   : > { %v3595_v61 = vpop.xlane.xlu0 %3594 }
 0x874   : > { %v3626_v58 = vsub.f32 %v14245_v19, %v3595_v61 }
 0x876   : > { %v3642_v1 = vmul.f32 1.442695, %v3626_v58 }
 0x877   : > { %v3597_v4 = vpop.xlane.xlu1 %3596 }
 0x878   : > { %11154 = vpow2.f32 %v3642_v1  ;;  %v3627_v17 = vsub.f32 %v14249_v54, %v3597_v4 }
 0x87a   : > { %v3644_v13 = vmul.f32 1.442695, %v3627_v17 }
 0x87b   : > { %v3599_v63 = vpop.xlane.xlu0 %3598 }
 0x87c   : > { %11156 = vpow2.f32 %v3644_v13  ;;  %v3628_v42 = vsub.f32 %v14253_v49, %v3599_v63  ;;  %v14372_v63 = vpop.f32.mrf.mxu0 }
 0x87e   : > { %v3646_v7 = vmul.f32 1.442695, %v3628_v42 }
 0x87f   : > { %v3601_v56 = vpop.xlane.xlu1 %3600 }
 0x880   : > { %11158 = vpow2.f32 %v3646_v7  ;;  %v3629_v28 = vsub.f32 %v14257_v44, %v3601_v56  ;;  %v14374_v7 = vpop.f32.mrf.mxu0 }
 0x882   : > { %v3648_v22 = vmul.f32 1.442695, %v3629_v28 }
 0x883   : > { %v3603_v57 = vpop.xlane.xlu0 %3602 }
 0x884   : > { %11160 = vpow2.f32 %v3648_v22  ;;  %v3630_v19 = vsub.f32 %v14261_v52, %v3603_v57  ;;  %v14376_v22 = vpop.f32.mrf.mxu0 }
 0x885   : > { %v14312_v27 = vpop.eup %11154 }
 0x886   : > { %3674 = vadd.xlane.f32.xlu0 %v14312_v27  ;;  %v3650_v54 = vmul.f32 1.442695, %v3630_v19 }
 0x887   : > { %v3605_v9 = vpop.xlane.xlu1 %3604 }
 0x888   : > { %11162 = vpow2.f32 %v3650_v54  ;;  %v3631_v49 = vsub.f32 %v14265_v25, %v3605_v9 }
 0x889   : > { %v14316_v36 = vpop.eup %11156 }
 0x88a   : > { %3676 = vadd.xlane.f32.xlu1 %v14316_v36  ;;  %v3652_v34 = vmul.f32 1.442695, %v3631_v49  ;;  %v14380_v49 = vpop.f32.mrf.mxu0 }
 0x88b   : > { %v3607_v44 = vpop.xlane.xlu0 %3606 }
 0x88c   : > { %11164 = vpow2.f32 %v3652_v34  ;;  %v3632_v5 = vsub.f32 %v14269_v53, %v3607_v44 }
 0x88d   : > { %v14321_v6 = vpop.eup %11158 }
 0x88e   : > { %v3654_v24 = vmul.f32 1.442695, %v3632_v5  ;;  %3678 = vadd.xlane.f32.xlu0 %v14321_v6  ;;  %v14382_v5 = vpop.f32.mrf.mxu0 }
 0x88f   : > { %v3609_v52 = vpop.xlane.xlu1 %3608 }
 0x890   : > { %11166 = vpow2.f32 %v3654_v24  ;;  %v3633_v29 = vsub.f32 %v14273_v10, %v3609_v52 }
 0x891   : > { %v14325_v31 = vpop.eup %11160 }
 0x892   : > { %v3656_v15 = vmul.f32 1.442695, %v3633_v29  ;;  %3680 = vadd.xlane.f32.xlu1 %v14325_v31 }
 0x893   : > { %v3611_v25 = vpop.xlane.xlu0 %3610 }
 0x894   : > { %11168 = vpow2.f32 %v3656_v15  ;;  %v3634_v39 = vsub.f32 %v14277_v43, %v3611_v25  ;;  %v14384_v15 = vpop.f32.mrf.mxu0 }
 0x895   : > { %v14329_v26 = vpop.eup %11162 }
 0x896   : > { %v3658_v53 = vmul.f32 1.442695, %v3634_v39  ;;  %3682 = vadd.xlane.f32.xlu0 %v14329_v26 }
 0x897   : > { %v3613_v38 = vpop.xlane.xlu1 %3612 }
 0x898   : > { %11170 = vpow2.f32 %v3658_v53  ;;  %v3635_v33 = vsub.f32 %v14281_v50, %v3613_v38  ;;  %v14388_v53 = vpop.f32.mrf.mxu0 }
 0x899   : > { %v14333_v55 = vpop.eup %11164 }
 0x89a   : > { %v3660_v10 = vmul.f32 1.442695, %v3635_v33  ;;  %3684 = vadd.xlane.f32.xlu1 %v14333_v55  ;;  %v18152_v33 = vld [vmem:[#allocation86_spill] sm:$0xff] }
 0x89b   : > { %v3615_v16 = vpop.xlane.xlu0 %3614 }
 0x89c   : > { %11172 = vpow2.f32 %v3660_v10  ;;  %v3636_v0 = vsub.f32 %v14285_v14, %v3615_v16  ;;  %v18153_v16 = vld [vmem:[#allocation94_spill] sm:$0xff] }
 0x89d   : > { %v14337_v41 = vpop.eup %11166 }
 0x89e   : > { %v3662_v43 = vmul.f32 1.442695, %v3636_v0  ;;  %3686 = vadd.xlane.f32.xlu0 %v14337_v41 }
 0x89f   : > { %v3617_v48 = vpop.xlane.xlu1 %3616 }
 0x8a0   : > { %11174 = vpow2.f32 %v3662_v43  ;;  %v3637_v8 = vsub.f32 %v14289_v2, %v3617_v48  ;;  %v14392_v43 = vpop.f32.mrf.mxu0 }
 0x8a1   : > { %v14341_v35 = vpop.eup %11168 }
 0x8a2   : > { %v3664_v50 = vmul.f32 1.442695, %v3637_v8  ;;  %3688 = vadd.xlane.f32.xlu1 %v14341_v35 }
 0x8a3   : > { %v3619_v47 = vpop.xlane.xlu0 %3618 }
 0x8a4   : > { %11176 = vpow2.f32 %v3664_v50  ;;  %v3638_v59 = vsub.f32 %v14293_v3, %v3619_v47  ;;  %v14396_v50 = vpop.f32.mrf.mxu0 }
 0x8a5   : > { %v14345_v12 = vpop.eup %11170 }
 0x8a6   : > { %v3666_v14 = vmul.f32 1.442695, %v3638_v59  ;;  %3690 = vadd.xlane.f32.xlu0 %v14345_v12  ;;  %v18154_v59 = vld [vmem:[#allocation95_spill] sm:$0xff] }
 0x8a7   : > { %v3621_v46 = vpop.xlane.xlu1 %3620 }
 0x8a8   : > { %11178 = vpow2.f32 %v3666_v14  ;;  %v3639_v32 = vsub.f32 %v14297_v18, %v3621_v46  ;;  %v18155_v46 = vld [vmem:[#allocation96_spill] sm:$0xff] }
 0x8a9   : > { %v14349_v45 = vpop.eup %11172 }
 0x8aa   : > { %v3668_v2 = vmul.f32 1.442695, %v3639_v32  ;;  %3692 = vadd.xlane.f32.xlu1 %v14349_v45 }
 0x8ab   : > { %v3623_v11 = vpop.xlane.xlu0 %3622 }
 0x8ac   : > { %11180 = vpow2.f32 %v3668_v2  ;;  %v3640_v62 = vsub.f32 %v14301_v51, %v3623_v11  ;;  %v14400_v2 = vpop.f32.mrf.mxu0 }
 0x8ad   : > { %v14353_v23 = vpop.eup %11174 }
 0x8ae   : > { %v3670_v3 = vmul.f32 1.442695, %v3640_v62  ;;  %3694 = vadd.xlane.f32.xlu0 %v14353_v23 }
 0x8af   : > { %v3625_v40 = vpop.xlane.xlu1 %3624 }
 0x8b0   : > { %11182 = vpow2.f32 %v3670_v3  ;;  %v3641_v61 = vsub.f32 %v14305_v30, %v3625_v40  ;;  %v14404_v3 = vpop.f32.mrf.mxu0 }
 0x8b1   : > { %v14357_v58 = vpop.eup %11176 }
 0x8b2   : > { %v3672_v18 = vmul.f32 1.442695, %v3641_v61  ;;  %3696 = vadd.xlane.f32.xlu1 %v14357_v58  ;;  %v18156_v61 = vld [vmem:[#allocation102_spill] sm:$0xff] }
 0x8b4   : > { %11184 = vpow2.f32 %v3672_v18 }
 0x8b5   : > { %v14360_v1 = vpop.eup %11178 }
 0x8b6   : > { %3698 = vadd.xlane.f32.xlu0 %v14360_v1 }
 0x8b9   : > { %v14363_v51 = vpop.eup %11180 }
 0x8ba   : > { %3700 = vadd.xlane.f32.xlu1 %v14363_v51 }
 0x8bd   : > { %v14366_v4 = vpop.eup %11182 }
 0x8be   : > { %3702 = vadd.xlane.f32.xlu0 %v14366_v4 }
 0x8c1   : > { %v14369_v17 = vpop.eup %11184 }
 0x8c2   : > { %3704 = vadd.xlane.f32.xlu1 %v14369_v17 }
 0x90f   : > { %v3675_v30 = vpop.xlane.xlu0 %3674 }
 0x910   : > { %11186 = vrcp.f32 %v3675_v30  ;;  %v18157_v30 = vld [vmem:[#allocation105_spill] sm:$0xff] }
 0x913   : > { %v3677_v13 = vpop.xlane.xlu1 %3676 }
 0x914   : > { %11188 = vrcp.f32 %v3677_v13 }
 0x917   : > { %v3679_v42 = vpop.xlane.xlu0 %3678 }
 0x918   : > { %11190 = vrcp.f32 %v3679_v42  ;;  %v14408_v42 = vpop.f32.mrf.mxu0 }
 0x91b   : > { %v3681_v56 = vpop.xlane.xlu1 %3680 }
 0x91c   : > { %11192 = vrcp.f32 %v3681_v56 }
 0x91d   : > { %v11187_v28 = vpop.eup %11186 }
 0x91e   : > { %v3738_v54 = vmul.f32 %v11187_v28, %v14312_v27 }
 0x91f   : > { %v3683_v57 = vpop.xlane.xlu0 %3682 }
 0x920   : > { %11194 = vrcp.f32 %v3683_v57  ;;  %v14412_v57 = vpop.f32.mrf.mxu0 }
 0x921   : > { %v11189_v19 = vpop.eup %11188 }
 0x922   : > { %v3739_v9 = vmul.f32 %v11189_v19, %v14316_v36 }
 0x923   : > { %v3685_v34 = vpop.xlane.xlu1 %3684 }
 0x924   : > { %v3754_v44 = vpack.c.bf16 %v3739_v9, %v3738_v54  ;;  %11196 = vrcp.f32 %v3685_v34  ;;  %v18158_v54 = vld [vmem:[#allocation108_spill] sm:$0xff]  ;;  %v18159_v34 = vld [vmem:[#allocation109_spill] sm:$0xff] }
 0x925   : > { %v11191_v24 = vpop.eup %11190 }
 0x926   : > { %10129 = vmatprep.mubr.bf16.mxu1 %v3754_v44  ;;  %v3740_v25 = vmul.f32 %v11191_v24, %v14321_v6  ;;  %v14416_v24 = vpop.f32.mrf.mxu0 }
 0x927   : > { %v3687_v52 = vpop.xlane.xlu0 %3686 }
 0x928   : > { %11198 = vrcp.f32 %v3687_v52 }
 0x929   : > { %v11193_v29 = vpop.eup %11192 }
 0x92a   : > { %v3741_v27 = vmul.f32 %v11193_v29, %v14325_v31 }
 0x92b   : > { %v3689_v36 = vpop.xlane.xlu1 %3688 }
 0x92c   : > { %11200 = vrcp.f32 %v3689_v36  ;;  %v3755_v39 = vpack.c.bf16 %v3741_v27, %v3740_v25  ;;  %v14420_v25 = vpop.f32.mrf.mxu0  ;;  %v18160_v36 = vld [vmem:[#allocation114_spill] sm:$0xff] }
 0x92d   : > { %v11195_v38 = vpop.eup %11194 }
 0x92e   : > { %10130 = vmatmul.mubr.bf16.vlgmr.msra.gmra.mxu1 %v3755_v39  ;;  %v3742_v6 = vmul.f32 %v11195_v38, %v14329_v26  ;;  %v18161_v39 = vld [vmem:[#allocation116_spill] sm:$0xff] }
 0x92f   : > { %4247 = vmatpush1.bf16.xpose.msra.mxu1 %v18152_v33  ;;  %v3691_v10 = vpop.xlane.xlu0 %3690  ;;  %v14424_v33 = vpop.f32.mrf.mxu0 }
 0x930   : > { %4248 = vmatprep.subr.bf16.mxu1 %v18153_v16  ;;  %11202 = vrcp.f32 %v3691_v10 }
 0x931   : > { %v11197_v0 = vpop.eup %11196 }
 0x932   : > { %v3743_v31 = vmul.f32 %v11197_v0, %v14333_v55 }
 0x933   : > { %v3693_v48 = vpop.xlane.xlu1 %3692 }
 0x934   : > { %11204 = vrcp.f32 %v3693_v48  ;;  %v3756_v8 = vpack.c.bf16 %v3743_v31, %v3742_v6  ;;  %v14429_v6 = vpop.f32.mrf.mxu0  ;;  %v11620_v48 = vld [vmem:[#allocation6 + $0x8] sm:$0xff] }
 0x935   : > { %v11199_v47 = vpop.eup %11198 }
 0x936   : > { %10133 = vmatprep.mubr.bf16.mxu1 %v3756_v8  ;;  %v3744_v26 = vmul.f32 %v11199_v47, %v14337_v41  ;;  %v4150_v8 = vmul.f32 %v11620_v48, %v14374_v7  ;;  %v11621_v47 = vld [vmem:[#allocation6 + $0x10] sm:$0xff] }
 0x937   : > { %4249 = vmatpush1.bf16.xpose.msra.mxu1 %v18154_v59  ;;  %v3695_v14 = vpop.xlane.xlu0 %3694  ;;  %v4135_v59 = vmul.f32 %v11621_v47, %v14376_v22 }
 0x938   : > { %4250 = vmatprep.subr.bf16.mxu1 %v18155_v46  ;;  %11206 = vrcp.f32 %v3695_v14  ;;  %v18162_v14 = vld [vmem:[#allocation118_spill] sm:$0xff]  ;;  %v18163_v46 = vld [vmem:[#allocation119_spill] sm:$0xff] }
 0x939   : > { %v11201_v32 = vpop.eup %11200 }
 0x93a   : > { %v3745_v55 = vmul.f32 %v11201_v32, %v14341_v35 }
 0x93b   : > { %v3697_v11 = vpop.xlane.xlu1 %3696 }
 0x93c   : > { %11208 = vrcp.f32 %v3697_v11  ;;  %v3757_v62 = vpack.c.bf16 %v3745_v55, %v3744_v26  ;;  %v14436_v55 = vpop.f32.mrf.mxu0 }
 0x93d   : > { %v11203_v40 = vpop.eup %11202 }
 0x93e   : > { %10134 = vmatmul.mubr.bf16.gmra.mxu1 %v3757_v62  ;;  %v3746_v41 = vmul.f32 %v11203_v40, %v14345_v12 }
 0x93f   : > { %4251 = vmatpush1.bf16.xpose.msra.mxu1 %v18156_v61  ;;  %v3699_v18 = vpop.xlane.xlu0 %3698 }
 0x940   : > { %4252 = vmatprep.subr.bf16.mxu1 %v18157_v30  ;;  %11210 = vrcp.f32 %v3699_v18  ;;  %v14440_v30 = vpop.f32.mrf.mxu0 }
 0x941   : > { %v11205_v13 = vpop.eup %11204 }
 0x942   : > { %v3747_v35 = vmul.f32 %v11205_v13, %v14349_v45  ;;  %v18164_v13 = vld [vmem:[#allocation122_spill] sm:$0xff] }
 0x943   : > { %v3701_v56 = vpop.xlane.xlu1 %3700 }
 0x944   : > { %11212 = vrcp.f32 %v3701_v56  ;;  %v3758_v28 = vpack.c.bf16 %v3747_v35, %v3746_v41  ;;  %v18165_v41 = vld [vmem:[#allocation125_spill] sm:$0xff]  ;;  %v14444_v35 = vpop.f32.mrf.mxu0  ;;  %v4183_v56 = vmul.f32 %v11621_v47, %v14380_v49 }
 0x945   : > { %v11207_v19 = vpop.eup %11206  ;;  %v11629_v47 = vld [vmem:[#allocation6 + $0x50] sm:$0xff] }
 0x946   : > { %10137 = vmatprep.mubr.bf16.mxu1 %v3758_v28  ;;  %v3748_v12 = vmul.f32 %v11207_v19, %v14353_v23  ;;  %v11623_v28 = vld [vmem:[#allocation6 + $0x38] sm:$0xff] }
 0x947   : > { %4253 = vmatpush1.bf16.xpose.msra.mxu1 %v18158_v54  ;;  %v3703_v9 = vpop.xlane.xlu0 %3702  ;;  %v14450_v54 = vpop.f32.mrf.mxu0 }
 0x948   : > { %4254 = vmatprep.subr.bf16.mxu1 %v18159_v34  ;;  %11214 = vrcp.f32 %v3703_v9  ;;  %v11624_v9 = vld [vmem:[#allocation6 + $0x28] sm:$0xff] }
 0x949   : > { %v11209_v44 = vpop.eup %11208  ;;  %v4152_v34 = vmul.f32 %v11624_v9, %v14384_v15 }
 0x94a   : > { %v3749_v45 = vmul.f32 %v11209_v44, %v14357_v58  ;;  %v11619_v58 = vld [vmem:[#allocation6 + $0x18] sm:$0xff]  ;;  %v11625_v44 = vld [vmem:[#allocation6 + $0x30] sm:$0xff] }
 0x94b   : > { %v3705_v52 = vpop.xlane.xlu1 %3704  ;;  %v4151_v0 = vmul.f32 %v11619_v58, %v14380_v49  ;;  %v4199_v19 = vmul.f32 %v11619_v58, %v14376_v22 }
 0x94c   : > { %11216 = vrcp.f32 %v3705_v52  ;;  %v3759_v29 = vpack.c.bf16 %v3749_v45, %v3748_v12  ;;  %v4137_v12 = vmul.f32 %v11625_v44, %v14388_v53  ;;  %v18166_v45 = vld [vmem:[#allocation126_spill] sm:$0xff]  ;;  %v4198_v52 = vmul.f32 %v11620_v48, %v14372_v63  ;;  %v11628_v48 = vld [vmem:[#allocation6 + $0x48] sm:$0xff] }
 0x94d   : > { %v11211_v27 = vpop.eup %11210  ;;  %v4167_v26 = vadd.f32 %v4151_v0, %v4135_v59  ;;  %v4215_v49 = vsub.f32 %v4183_v56, %v4199_v19  ;;  %v4139_v59 = vmul.f32 %v11629_v47, %v14404_v3  ;;  %v11634_v19 = vld [vmem:[#allocation6 + $0x60] sm:$0xff] }
 0x94e   : > { %10138 = vmatmul.mubr.bf16.gmra.mxu1 %v3759_v29  ;;  %v3750_v10 = vmul.f32 %v11211_v27, %v14360_v1  ;;  %v11626_v29 = vld [vmem:[#allocation6 + $0x20] sm:$0xff] }
 0x94f   : > { %4255 = vmatpush1.bf16.xpose.msra.mxu1 %v18160_v36  ;;  %v4136_v27 = vmul.f32 %v11626_v29, %v14382_v5  ;;  %v4184_v0 = vmul.f32 %v11626_v29, %v14384_v15 }
 0x950   : > { %4256 = vmatprep.subr.bf16.mxu1 %v18161_v39  ;;  %v14457_v39 = vpop.f32.mrf.mxu0 }
 0x951   : > { %v11213_v38 = vpop.eup %11212  ;;  %v4168_v22 = vadd.f32 %v4152_v34, %v4136_v27  ;;  %v4188_v27 = vmul.f32 %v11634_v19, %v14416_v24 }
 0x952   : > { %v3751_v23 = vmul.f32 %v11213_v38, %v14363_v51  ;;  %v11622_v51 = vld [vmem:[#allocation6] sm:$0xff] }
 0x953   : > { %v4134_v32 = vmul.f32 %v11622_v51, %v14372_v63  ;;  %v4201_v63 = vmul.f32 %v11623_v28, %v14388_v53 }
 0x954   : > { %v3760_v16 = vpack.c.bf16 %v3751_v23, %v3750_v10  ;;  %v4185_v10 = vmul.f32 %v11625_v44, %v14392_v43  ;;  %v11627_v23 = vld [vmem:[#allocation6 + $0x58] sm:$0xff] }
 0x955   : > { %v11215_v31 = vpop.eup %11214  ;;  %v4166_v40 = vadd.f32 %v4150_v8, %v4134_v32  ;;  %v4154_v8 = vmul.f32 %v11628_v48, %v14400_v2 }
 0x956   : > { %10141 = vmatprep.mubr.bf16.mxu1 %v3760_v16  ;;  %v3752_v11 = vmul.f32 %v11215_v31, %v14366_v4  ;;  %v4153_v4 = vmul.f32 %v11623_v28, %v14392_v43  ;;  %v4155_v16 = vmul.f32 %v11627_v23, %v14408_v42  ;;  %v14463_v31 = vpop.f32.mrf.mxu0  ;;  %v4200_v43 = vmul.f32 %v11624_v9, %v14382_v5  ;;  %v11633_v28 = vld [vmem:[#allocation6 + $0x70] sm:$0xff] }
 0x957   : > { %4257 = vmatpush1.bf16.xpose.msra.mxu1 %v18162_v14  ;;  %v4231_v18 = vpack.c.bf16 %v4167_v26, %v4166_v40  ;;  %v4217_v14 = vsub.f32 %v4185_v10, %v4201_v63  ;;  %v4203_v5 = vmul.f32 %v11627_v23, %v14404_v3  ;;  %v4140_v9 = vmul.f32 %v11634_v19, %v14412_v57 }
 0x958   : > { %4258 = vmatprep.subr.bf16.mxu1 %v18163_v46  ;;  %v4169_v36 = vadd.f32 %v4153_v4, %v4137_v12  ;;  %v11630_v46 = vld [vmem:[#allocation6 + $0x40] sm:$0xff]  ;;  %v4216_v15 = vsub.f32 %v4184_v0, %v4200_v43  ;;  %v14469_v32 = vpop.f32.mrf.mxu0  ;;  %v4141_v4 = vmul.f32 %v11633_v28, %v14420_v25 }
 0x959   : > { %v11217_v1 = vpop.eup %11216 }
 0x95a   : > { %v3753_v62 = vmul.f32 %v11217_v1, %v14369_v17  ;;  %v4182_v17 = vmul.f32 %v11622_v51, %v14374_v7  ;;  %v4233_v58 = vpack.c.bf16 %v4169_v36, %v4168_v22  ;;  %v4138_v1 = vmul.f32 %v11630_v46, %v14396_v50 }
 0x95b   : > { %v4171_v51 = vadd.f32 %v4155_v16, %v4139_v59  ;;  %v4232_v26 = vpack.c.bf16 %v4217_v14, %v4216_v15  ;;  %v11638_v16 = vld [vmem:[#allocation6 + $0x80] sm:$0xff]  ;;  %v11641_v15 = vld [vmem:[#allocation6 + $0xb0] sm:$0xff] }
 0x95c   : > { %v3761_v61 = vpack.c.bf16 %v3753_v62, %v3752_v11  ;;  %v4214_v7 = vsub.f32 %v4182_v17, %v4198_v52  ;;  %v4170_v53 = vadd.f32 %v4154_v8, %v4138_v1  ;;  %v4187_v11 = vmul.f32 %v11629_v47, %v14408_v42  ;;  %v11631_v62 = vld [vmem:[#allocation6 + $0x78] sm:$0xff]  ;;  %v11640_v1 = vld [vmem:[#allocation6 + $0xa8] sm:$0xff] }
 0x95d   : > { %v4157_v40 = vmul.f32 %v11631_v62, %v14424_v33  ;;  %v4202_v42 = vmul.f32 %v11628_v48, %v14396_v50  ;;  %v11635_v52 = vld [vmem:[#allocation6 + $0x98] sm:$0xff]  ;;  %v4205_v50 = vmul.f32 %v11631_v62, %v14420_v25  ;;  %v4190_v14 = vmul.f32 %v11638_v16, %v14436_v55 }
 0x95e   : > { %10142 = vmatmul.mubr.bf16.gmra.mxu1 %v3761_v61  ;;  %v4230_v38 = vpack.c.bf16 %v4215_v49, %v4214_v7  ;;  %v4235_v61 = vpack.c.bf16 %v4171_v51, %v4170_v53  ;;  %v4219_v17 = vsub.f32 %v4187_v11, %v4203_v5  ;;  %v4159_v49 = vmul.f32 %v11635_v52, %v14444_v35  ;;  %v11636_v7 = vld [vmem:[#allocation6 + $0x88] sm:$0xff]  ;;  %v11639_v47 = vld [vmem:[#allocation6 + $0xb8] sm:$0xff]  ;;  %v11642_v11 = vld [vmem:[#allocation6 + $0xa0] sm:$0xff] }
 0x95f   : > { %4259 = vmatpush1.bf16.xpose.msra.mxu1 %v18164_v13  ;;  %4278 = vmatprep.mubr.bf16.mxu1 %v4231_v18  ;;  %v4186_v18 = vmul.f32 %v11630_v46, %v14400_v2  ;;  %v14475_v13 = vpop.f32.mrf.mxu0  ;;  %v4173_v34 = vadd.f32 %v4157_v40, %v4141_v4  ;;  %v4158_v22 = vmul.f32 %v11636_v7, %v14436_v55 }
 0x960   : > { %4260 = vmatprep.subr.bf16.mxu1 %v18165_v41  ;;  %v11632_v41 = vld [vmem:[#allocation6 + $0x68] sm:$0xff]  ;;  %v4161_v59 = vmul.f32 %v11639_v47, %v14469_v32  ;;  %v4207_v46 = vmul.f32 %v11635_v52, %v14440_v30  ;;  %v4160_v51 = vmul.f32 %v11640_v1, %v14457_v39  ;;  %v4145_v53 = vmul.f32 %v11641_v15, %v14463_v31 }
 0x961   : > { %v4156_v56 = vmul.f32 %v11632_v41, %v14416_v24  ;;  %v4218_v2 = vsub.f32 %v4186_v18, %v4202_v42  ;;  %v14481_v44 = vpop.f32.mrf.mxu0  ;;  %v4144_v62 = vmul.f32 %v11642_v11, %v14450_v54  ;;  %v4193_v5 = vmul.f32 %v11641_v15, %v14469_v32  ;;  %v11646_v32 = vld [vmem:[#allocation6 + $0xc0] sm:$0xff] }
 0x962   : > { %v4177_v40 = vadd.f32 %v4161_v59, %v4145_v53  ;;  %v4192_v4 = vmul.f32 %v11642_v11, %v14457_v39  ;;  %v4209_v42 = vmul.f32 %v11639_v47, %v14463_v31 }
 0x963   : > { %v4172_v3 = vadd.f32 %v4156_v56, %v4140_v9  ;;  %v4234_v12 = vpack.c.bf16 %v4219_v17, %v4218_v2  ;;  %v14487_v36 = vpop.f32.mrf.mxu0  ;;  %v11645_v9 = vld [vmem:[#allocation6 + $0xd0] sm:$0xff]  ;;  %v4208_v2 = vmul.f32 %v11640_v1, %v14450_v54 }
 0x965   : > { %v4237_v29 = vpack.c.bf16 %v4173_v34, %v4172_v3  ;;  %v4121_v63 = vpop.f32.mrf.mxu0  ;;  %v4147_v34 = vmul.f32 %v11645_v9, %v14487_v36  ;;  %v4225_v3 = vsub.f32 %v4193_v5, %v4209_v42  ;;  %v4224_v52 = vsub.f32 %v4192_v4, %v4208_v2 }
 0x967   : > { %4261 = vmatpush1.bf16.xpose.msra.mxu1 %v18166_v45  ;;  %v4189_v45 = vmul.f32 %v11633_v28, %v14424_v33  ;;  %v4204_v33 = vmul.f32 %v11632_v41, %v14412_v57  ;;  %v14497_v57 = vpop.f32.mrf.mxu0  ;;  %v11643_v41 = vld [vmem:[#allocation6 + $0xd8] sm:$0xff]  ;;  %v4240_v31 = vpack.c.bf16 %v4225_v3, %v4224_v52 }
 0x968   : > { %v4163_v56 = vmul.f32 %v11643_v41, %v4121_v63 }
 0x969   : > { %v4221_v23 = vsub.f32 %v4189_v45, %v4205_v50  ;;  %v4220_v24 = vsub.f32 %v4188_v27, %v4204_v33  ;;  %v11647_v27 = vld [vmem:[#allocation6 + $0xf8] sm:$0xff]  ;;  %v11649_v33 = vld [vmem:[#allocation6 + $0xf0] sm:$0xff] }
 0x96a   : > { %v4179_v45 = vadd.f32 %v4163_v56, %v4147_v34 }
 0x96b   : > { %v4236_v48 = vpack.c.bf16 %v4221_v23, %v4220_v24 }
 0x96e   : > { %4279 = vmatmul.mubr.bf16.vlgmr.msra.gmra.mxu1 %v4230_v38  ;;  %v11637_v38 = vld [vmem:[#allocation6 + $0x90] sm:$0xff] }
 0x96f   : > { %4286 = vmatprep.mubr.bf16.mxu1 %v4233_v58  ;;  %v4143_v10 = vmul.f32 %v11637_v38, %v14440_v30  ;;  %v4142_v58 = vmul.f32 %v11638_v16, %v14429_v6  ;;  %v4191_v8 = vmul.f32 %v11637_v38, %v14444_v35  ;;  %v4206_v35 = vmul.f32 %v11636_v7, %v14429_v6  ;;  %v11644_v6 = vld [vmem:[#allocation6 + $0xc8] sm:$0xff] }
 0x970   : > { %v4176_v30 = vadd.f32 %v4160_v51, %v4144_v62  ;;  %v4162_v19 = vmul.f32 %v11644_v6, %v14481_v44  ;;  %v4211_v38 = vmul.f32 %v11643_v41, %v14487_v36  ;;  %v4210_v16 = vmul.f32 %v11644_v6, %v14475_v13 }
 0x971   : > { %v4175_v0 = vadd.f32 %v4159_v49, %v4143_v10  ;;  %v4174_v25 = vadd.f32 %v4158_v22, %v4142_v58  ;;  %v4222_v55 = vsub.f32 %v4190_v14, %v4206_v35  ;;  %v4194_v22 = vmul.f32 %v11646_v32, %v14481_v44  ;;  %v11648_v10 = vld [vmem:[#allocation6 + $0xe8] sm:$0xff] }
 0x972   : > { %v4241_v28 = vpack.c.bf16 %v4177_v40, %v4176_v30 }
 0x973   : > { %v4239_v43 = vpack.c.bf16 %v4175_v0, %v4174_v25  ;;  %v11650_v0 = vld [vmem:[#allocation6 + $0xe0] sm:$0xff]  ;;  %v4226_v25 = vsub.f32 %v4194_v22, %v4210_v16 }
 0x974   : > { %v4148_v24 = vmul.f32 %v11650_v0, %v14497_v57 }
 0x976   : > { %4287 = vmatmul.mubr.bf16.gmra.mxu1 %v4232_v26  ;;  %v4223_v26 = vsub.f32 %v4191_v8, %v4207_v46 }
 0x977   : > { %4294 = vmatprep.mubr.bf16.mxu1 %v4235_v61  ;;  %v4127_v61 = vpop.f32.mrf.mxu0 }
 0x978   : > { %v4238_v18 = vpack.c.bf16 %v4223_v26, %v4222_v55  ;;  %v4164_v54 = vmul.f32 %v11648_v10, %v4127_v61  ;;  %v4196_v59 = vmul.f32 %v11650_v0, %v4127_v61 }
 0x979   : > { %v4129_v17 = vpop.f32.mrf.mxu0 }
 0x97a   : > { %v4149_v23 = vmul.f32 %v11649_v33, %v4129_v17  ;;  %v4213_v36 = vmul.f32 %v11647_v27, %v4129_v17 }
 0x97b   : > { %v4131_v39 = vpop.f32.mrf.mxu0 }
 0x97c   : > { %v4165_v50 = vmul.f32 %v11647_v27, %v4131_v39  ;;  %v4197_v47 = vmul.f32 %v11649_v33, %v4131_v39 }
 0x97d   : > { %v10163_v34 = vpop.f32.mrf.mxu0 }
 0x97e   : > { %4295 = vmatmul.mubr.bf16.gmra.mxu1 %v4234_v12  ;;  %v4146_v12 = vmul.f32 %v11646_v32, %v14475_v13  ;;  %v4229_v14 = vsub.f32 %v4197_v47, %v4213_v36 }
 0x97f   : > { %4302 = vmatprep.mubr.bf16.mxu1 %v4237_v29  ;;  %v4195_v29 = vmul.f32 %v11645_v9, %v4121_v63  ;;  %v4181_v63 = vadd.f32 %v4165_v50, %v4149_v23  ;;  %v4377_v2 = vpop.f32.mrf.mxu0 }
 0x980   : > { %v4178_v49 = vadd.f32 %v4162_v19, %v4146_v12 }
 0x981   : > { %v4227_v58 = vsub.f32 %v4195_v29, %v4211_v38  ;;  %v10164_v3 = vpop.f32.mrf.mxu0 }
 0x982   : > { %v4243_v7 = vpack.c.bf16 %v4179_v45, %v4178_v49 }
 0x983   : > { %v4242_v8 = vpack.c.bf16 %v4227_v58, %v4226_v25  ;;  %v4380_v39 = vpop.f32.mrf.mxu0 }
 0x986   : > { %4303 = vmatmul.mubr.bf16.gmra.mxu1 %v4236_v48  ;;  %v4180_v48 = vadd.f32 %v4164_v54, %v4148_v24 }
 0x987   : > { %4310 = vmatprep.mubr.bf16.mxu1 %v4239_v43  ;;  %v4212_v43 = vmul.f32 %v11648_v10, %v14497_v57 }
 0x988   : > { %v4245_v44 = vpack.c.bf16 %v4181_v63, %v4180_v48 }
 0x989   : > { %v4228_v46 = vsub.f32 %v4196_v59, %v4212_v43 }
 0x98b   : > { %v4244_v1 = vpack.c.bf16 %v4229_v14, %v4228_v46 }
 0x98e   : > { %4311 = vmatmul.mubr.bf16.gmra.mxu1 %v4238_v18 }
 0x98f   : > { %4318 = vmatprep.mubr.bf16.mxu1 %v4241_v28 }
 0x996   : > { %4319 = vmatmul.mubr.bf16.gmra.mxu1 %v4240_v31 }
 0x997   : > { %4326 = vmatprep.mubr.bf16.mxu1 %v4243_v7  ;;  %v10167_v7 = vpop.f32.mrf.mxu0 }
 0x999   : > { %v4393_v23 = vpop.f32.mrf.mxu0 }
 0x99b   : > { %v10168_v25 = vpop.f32.mrf.mxu0 }
 0x99d   : > { %v4396_v43 = vpop.f32.mrf.mxu0 }
 0x99e   : > { %4327 = vmatmul.mubr.bf16.gmra.mxu1 %v4242_v8  ;;  %v14576_v8 = vld [vmem:[%s12804_s13] ss:$0 sm:$0xff]  ;;  %s9834_s13 = sshll.u32 %s18002_s14, 7 }
 0x99f   : > { %4334 = vmatprep.mubr.bf16.mxu1 %v4245_v44  ;;  %s14700_s9 = scalar_lea.vmem %s18167_s22, %s9834_s13  ;;  %s14844_s21 = scalar_lea.vmem [#allocation17], %s9834_s13 }
 0x9a6   : > { %4335 = vmatmul.mubr.bf16.gmra.mxu1 %v4244_v1 }
 0x9ee   : > { %v14515_v13 = vpop.f32.mrf.mxu1 }
 0x9f0   : > { %v14517_v51 = vpop.f32.mrf.mxu1 }
 0x9f2   : > { %v14519_v15 = vpop.f32.mrf.mxu1 }
 0x9f3   : > { %v3868_v53 = vpack.c.bf16 %v14519_v15, %v14515_v13 }
 0x9f4   : > { %v14523_v35 = vpop.f32.mrf.mxu1 }
 0x9f5   : > { %v3867_v26 = vpack.c.bf16 %v14523_v35, %v14517_v51 }
 0x9fe   : > { %v14527_v11 = vpop.f32.mrf.mxu1 }
 0xa00   : > { %v14529_v57 = vpop.f32.mrf.mxu1 }
 0xa02   : > { %v14531_v62 = vpop.f32.mrf.mxu1 }
 0xa03   : > { %v3870_v40 = vpack.c.bf16 %v14531_v62, %v14527_v11 }
 0xa04   : > { %v14535_v55 = vpop.f32.mrf.mxu1 }
 0xa05   : > { %v3869_v61 = vpack.c.bf16 %v14535_v55, %v14529_v57 }
 0xa0e   : > { %v14539_v30 = vpop.f32.mrf.mxu1 }
 0xa10   : > { %v14541_v18 = vpop.f32.mrf.mxu1 }
 0xa12   : > { %v14543_v5 = vpop.f32.mrf.mxu1 }
 0xa13   : > { %v3872_v41 = vpack.c.bf16 %v14543_v5, %v14539_v30 }
 0xa14   : > { %v14547_v56 = vpop.f32.mrf.mxu1 }
 0xa15   : > { %v3871_v28 = vpack.c.bf16 %v14547_v56, %v14541_v18 }
 0xa1e   : > { %v14551_v4 = vpop.f32.mrf.mxu1 }
 0xa20   : > { %v14553_v42 = vpop.f32.mrf.mxu1 }
 0xa22   : > { %v14555_v17 = vpop.f32.mrf.mxu1 }
 0xa23   : > { %v3874_v6 = vpack.c.bf16 %v14555_v17, %v14551_v4 }
 0xa24   : > { %v14559_v19 = vpop.f32.mrf.mxu1 }
 0xa25   : > { %v3873_v9 = vpack.c.bf16 %v14559_v19, %v14553_v42 }
 0xa2e   : > { %v4280_v32 = vpop.f32.mrf.mxu1 }
 0xa2f   : > { %v4378_v12 = vadd.f32 %v4377_v2, %v4280_v32  ;;  %v10171_v2 = vpop.f32.mrf.mxu0 }
 0xa30   : > { %v4282_v45 = vpop.f32.mrf.mxu1 }
 0xa31   : > { %v4440_v52 = vmul.f32 0.25, %v4378_v12 }
 0xa32   : > { %v4283_v49 = vpop.f32.mrf.mxu1 }
 0xa33   : > { %v4381_v31 = vadd.f32 %v4380_v39, %v4283_v49  ;;  %v14564_v29 = vadd.f32 %v14242_v21, %v4440_v52  ;;  %v4409_v39 = vpop.f32.mrf.mxu0 }
 0xa34   : > { %v4285_v27 = vpop.f32.mrf.mxu1 }
 0xa35   : > { %v4441_v50 = vmul.f32 0.25, %v4381_v31  ;;  %4472 = vmax.xlane.f32.xlu0 %v14564_v29 }
 0xa36   : > { %v4288_v22 = vpop.f32.mrf.mxu1 }
 0xa37   : > { %v4386_v38 = vadd.f32 %v10163_v34, %v4288_v22  ;;  %v14568_v10 = vadd.f32 %v14242_v21, %v4441_v50 }
 0xa38   : > { %v4290_v54 = vpop.f32.mrf.mxu1 }
 0xa39   : > { %v4442_v33 = vmul.f32 0.25, %v4386_v38  ;;  %4474 = vmax.xlane.f32.xlu1 %v14568_v10  ;;  %v10172_v38 = vpop.f32.mrf.mxu0 }
 0xa3a   : > { %v4291_v16 = vpop.f32.mrf.mxu1 }
 0xa3b   : > { %v14572_v58 = vadd.f32 %v14242_v21, %v4442_v33  ;;  %v4389_v0 = vadd.f32 %v10164_v3, %v4291_v16 }
 0xa3c   : > { %v4293_v24 = vpop.f32.mrf.mxu1 }
 0xa3d   : > { %v4443_v63 = vmul.f32 0.25, %v4389_v0  ;;  %4476 = vmax.xlane.f32.xlu0 %v14572_v58  ;;  %v4412_v0 = vpop.f32.mrf.mxu0 }
 0xa3e   : > { %v4296_v48 = vpop.f32.mrf.mxu1 }
 0xa3f   : > { %v14579_v47 = vadd.f32 %v14576_v8, %v4443_v63  ;;  %v4394_v44 = vadd.f32 %v4393_v23, %v4296_v48 }
 0xa40   : > { %v4298_v59 = vpop.f32.mrf.mxu1 }
 0xa41   : > { %v4444_v36 = vmul.f32 0.25, %v4394_v44  ;;  %4478 = vmax.xlane.f32.xlu1 %v14579_v47  ;;  %v10175_v59 = vpop.f32.mrf.mxu0 }
 0xa42   : > { %v4299_v21 = vpop.f32.mrf.mxu1 }
 0xa43   : > { %v14583_v14 = vadd.f32 %v14576_v8, %v4444_v36  ;;  %v4397_v46 = vadd.f32 %v4396_v43, %v4299_v21 }
 0xa44   : > { %v4301_v1 = vpop.f32.mrf.mxu1 }
 0xa45   : > { %v4445_v34 = vmul.f32 0.25, %v4397_v46  ;;  %4480 = vmax.xlane.f32.xlu0 %v14583_v14 }
 0xa46   : > { %v4304_v3 = vpop.f32.mrf.mxu1 }
 0xa47   : > { %v14587_v32 = vadd.f32 %v14576_v8, %v4445_v34  ;;  %v4402_v12 = vadd.f32 %v10167_v7, %v4304_v3  ;;  %v4425_v34 = vpop.f32.mrf.mxu0 }
 0xa48   : > { %v4306_v45 = vpop.f32.mrf.mxu1 }
 0xa49   : > { %v4446_v52 = vmul.f32 0.25, %v4402_v12  ;;  %4482 = vmax.xlane.f32.xlu1 %v14587_v32 }
 0xa4a   : > { %v4307_v49 = vpop.f32.mrf.mxu1 }
 0xa4b   : > { %v14591_v31 = vadd.f32 %v14576_v8, %v4446_v52  ;;  %v4405_v27 = vadd.f32 %v10168_v25, %v4307_v49  ;;  %v10176_v49 = vpop.f32.mrf.mxu0 }
 0xa4c   : > { %v4309_v50 = vpop.f32.mrf.mxu1 }
 0xa4d   : > { %v4447_v22 = vmul.f32 0.25, %v4405_v27  ;;  %4484 = vmax.xlane.f32.xlu0 %v14591_v31 }
 0xa4e   : > { %v4312_v54 = vpop.f32.mrf.mxu1 }
 0xa4f   : > { %v14595_v33 = vadd.f32 %v14576_v8, %v4447_v22  ;;  %v4410_v7 = vadd.f32 %v4409_v39, %v4312_v54 }
 0xa50   : > { %v4314_v23 = vpop.f32.mrf.mxu1 }
 0xa51   : > { %v4448_v16 = vmul.f32 0.25, %v4410_v7  ;;  %4486 = vmax.xlane.f32.xlu1 %v14595_v33  ;;  %v4428_v7 = vpop.f32.mrf.mxu0 }
 0xa52   : > { %v4315_v24 = vpop.f32.mrf.mxu1 }
 0xa53   : > { %v14599_v63 = vadd.f32 %v14576_v8, %v4448_v16  ;;  %v4413_v25 = vadd.f32 %v4412_v0, %v4315_v24 }
 0xa54   : > { %v4317_v48 = vpop.f32.mrf.mxu1 }
 0xa55   : > { %v4449_v44 = vmul.f32 0.25, %v4413_v25  ;;  %4488 = vmax.xlane.f32.xlu0 %v14599_v63 }
 0xa56   : > { %v4320_v36 = vpop.f32.mrf.mxu1 }
 0xa57   : > { %v14603_v43 = vadd.f32 %v14576_v8, %v4449_v44  ;;  %v4418_v21 = vadd.f32 %v10171_v2, %v4320_v36 }
 0xa58   : > { %v4322_v46 = vpop.f32.mrf.mxu1 }
 0xa59   : > { %v4450_v1 = vmul.f32 0.25, %v4418_v21  ;;  %4490 = vmax.xlane.f32.xlu1 %v14603_v43 }
 0xa5a   : > { %v4323_v3 = vpop.f32.mrf.mxu1 }
 0xa5b   : > { %v14607_v12 = vadd.f32 %v14576_v8, %v4450_v1  ;;  %v4421_v45 = vadd.f32 %v10172_v38, %v4323_v3 }
 0xa5c   : > { %v4325_v52 = vpop.f32.mrf.mxu1 }
 0xa5d   : > { %v4451_v39 = vmul.f32 0.25, %v4421_v45  ;;  %4492 = vmax.xlane.f32.xlu0 %v14607_v12 }
 0xa5e   : > { %v4328_v27 = vpop.f32.mrf.mxu1 }
 0xa5f   : > { %v14611_v50 = vadd.f32 %v14576_v8, %v4451_v39  ;;  %v4426_v2 = vadd.f32 %v4425_v34, %v4328_v27 }
 0xa60   : > { %v4330_v22 = vpop.f32.mrf.mxu1 }
 0xa61   : > { %v4452_v54 = vmul.f32 0.25, %v4426_v2  ;;  %4494 = vmax.xlane.f32.xlu1 %v14611_v50 }
 0xa62   : > { %v4331_v23 = vpop.f32.mrf.mxu1 }
 0xa63   : > { %v14615_v16 = vadd.f32 %v14576_v8, %v4452_v54  ;;  %v4429_v38 = vadd.f32 %v4428_v7, %v4331_v23 }
 0xa64   : > { %v4333_v0 = vpop.f32.mrf.mxu1 }
 0xa65   : > { %v4453_v24 = vmul.f32 0.25, %v4429_v38  ;;  %4496 = vmax.xlane.f32.xlu0 %v14615_v16 }
 0xa66   : > { %v4336_v25 = vpop.f32.mrf.mxu1 }
 0xa67   : > { %v14619_v48 = vadd.f32 %v14576_v8, %v4453_v24  ;;  %v4434_v44 = vadd.f32 %v10175_v59, %v4336_v25 }
 0xa68   : > { %v4338_v36 = vpop.f32.mrf.mxu1 }
 0xa69   : > { %v4454_v21 = vmul.f32 0.25, %v4434_v44  ;;  %4498 = vmax.xlane.f32.xlu1 %v14619_v48 }
 0xa6a   : > { %v4339_v46 = vpop.f32.mrf.mxu1 }
 0xa6b   : > { %v14623_v1 = vadd.f32 %v14576_v8, %v4454_v21  ;;  %v4437_v34 = vadd.f32 %v10176_v49, %v4339_v46 }
 0xa6c   : > { %v4341_v3 = vpop.f32.mrf.mxu1 }
 0xa6d   : > { %v4455_v45 = vmul.f32 0.25, %v4437_v34  ;;  %4500 = vmax.xlane.f32.xlu0 %v14623_v1 }
 0xa6f   : > { %v14627_v52 = vadd.f32 %v14576_v8, %v4455_v45 }
 0xa71   : > { %4502 = vmax.xlane.f32.xlu1 %v14627_v52 }
 0xabe   : > { %v4473_v39 = vpop.xlane.xlu0 %4472 }
 0xabf   : > { %v4504_v59 = vsub.f32 %v14564_v29, %v4473_v39 }
 0xac1   : > { %v4520_v27 = vmul.f32 1.442695, %v4504_v59 }
 0xac2   : > { %v4475_v2 = vpop.xlane.xlu1 %4474 }
 0xac3   : > { %11218 = vpow2.f32 %v4520_v27  ;;  %v4505_v22 = vsub.f32 %v14568_v10, %v4475_v2 }
 0xac5   : > { %v4522_v54 = vmul.f32 1.442695, %v4505_v22 }
 0xac6   : > { %v4477_v7 = vpop.xlane.xlu0 %4476 }
 0xac7   : > { %11220 = vpow2.f32 %v4522_v54  ;;  %v4506_v49 = vsub.f32 %v14572_v58, %v4477_v7 }
 0xac9   : > { %v4524_v23 = vmul.f32 1.442695, %v4506_v49 }
 0xaca   : > { %v4479_v38 = vpop.xlane.xlu1 %4478 }
 0xacb   : > { %11222 = vpow2.f32 %v4524_v23  ;;  %v4507_v8 = vsub.f32 %v14579_v47, %v4479_v38 }
 0xacd   : > { %v4526_v0 = vmul.f32 1.442695, %v4507_v8 }
 0xace   : > { %v4481_v24 = vpop.xlane.xlu0 %4480 }
 0xacf   : > { %11224 = vpow2.f32 %v4526_v0  ;;  %v4508_v29 = vsub.f32 %v14583_v14, %v4481_v24 }
 0xad0   : > { %v14635_v25 = vpop.eup %11218 }
 0xad1   : > { %v4528_v44 = vmul.f32 1.442695, %v4508_v29  ;;  %4552 = vadd.xlane.f32.xlu0 %v14635_v25 }
 0xad2   : > { %v4483_v10 = vpop.xlane.xlu1 %4482 }
 0xad3   : > { %11226 = vpow2.f32 %v4528_v44  ;;  %v4509_v36 = vsub.f32 %v14587_v32, %v4483_v10 }
 0xad4   : > { %v14639_v58 = vpop.eup %11220 }
 0xad5   : > { %v4530_v21 = vmul.f32 1.442695, %v4509_v36  ;;  %4554 = vadd.xlane.f32.xlu1 %v14639_v58 }
 0xad6   : > { %v4485_v47 = vpop.xlane.xlu0 %4484 }
 0xad7   : > { %11228 = vpow2.f32 %v4530_v21  ;;  %v4510_v46 = vsub.f32 %v14591_v31, %v4485_v47 }
 0xad8   : > { %v14643_v34 = vpop.eup %11222 }
 0xad9   : > { %v4532_v14 = vmul.f32 1.442695, %v4510_v46  ;;  %4556 = vadd.xlane.f32.xlu0 %v14643_v34 }
 0xada   : > { %v4487_v3 = vpop.xlane.xlu1 %4486 }
 0xadb   : > { %11230 = vpow2.f32 %v4532_v14  ;;  %v4511_v45 = vsub.f32 %v14595_v33, %v4487_v3 }
 0xadc   : > { %v14647_v39 = vpop.eup %11224 }
 0xadd   : > { %v4534_v32 = vmul.f32 1.442695, %v4511_v45  ;;  %4558 = vadd.xlane.f32.xlu1 %v14647_v39 }
 0xade   : > { %v4489_v59 = vpop.xlane.xlu0 %4488 }
 0xadf   : > { %11232 = vpow2.f32 %v4534_v32  ;;  %v4512_v27 = vsub.f32 %v14599_v63, %v4489_v59 }
 0xae0   : > { %v14651_v2 = vpop.eup %11226 }
 0xae1   : > { %v4536_v31 = vmul.f32 1.442695, %v4512_v27  ;;  %4560 = vadd.xlane.f32.xlu0 %v14651_v2 }
 0xae2   : > { %v4491_v22 = vpop.xlane.xlu1 %4490 }
 0xae3   : > { %11234 = vpow2.f32 %v4536_v31  ;;  %v4513_v54 = vsub.f32 %v14603_v43, %v4491_v22 }
 0xae4   : > { %v14655_v7 = vpop.eup %11228 }
 0xae5   : > { %v4538_v33 = vmul.f32 1.442695, %v4513_v54  ;;  %4562 = vadd.xlane.f32.xlu1 %v14655_v7  ;;  %v10970_v54 = vld [vmem:[%s14700_s9 + $0x78] sm:$0xff]  }
 0xae6   : > { %v4493_v49 = vpop.xlane.xlu0 %4492  ;;  %10209 = vmatprep.subr.bf16.mxu1 %v10970_v54 }
 0xae7   : > { %11236 = vpow2.f32 %v4538_v33  ;;  %v4514_v23 = vsub.f32 %v14607_v12, %v4493_v49  ;;  %v10971_v33 = vld [vmem:[%s14700_s9 + $0x70] sm:$0xff]   ;;  %10210 = vmatpush3.bf16.msra.mxu1 %v10970_v54  ;;  %v10972_v49 = vld [vmem:[%s14700_s9 + $0x68] sm:$0xff]  }
 0xae8   : > { %v14659_v38 = vpop.eup %11230  ;;  %10211 = vmatprep.subr.bf16.mxu1 %v10971_v33 }
 0xae9   : > { %v4540_v63 = vmul.f32 1.442695, %v4514_v23  ;;  %4564 = vadd.xlane.f32.xlu0 %v14659_v38  ;;  %v10973_v23 = vld [vmem:[%s14700_s9 + $0x60] sm:$0xff]  }
 0xaea   : > { %v4495_v8 = vpop.xlane.xlu1 %4494 }
 0xaeb   : > { %11238 = vpow2.f32 %v4540_v63  ;;  %v4515_v0 = vsub.f32 %v14611_v50, %v4495_v8  ;;  %10212 = vmatpush3.bf16.msra.mxu1 %v10971_v33  ;;  %v10974_v63 = vld [vmem:[%s14700_s9 + $0x58] sm:$0xff]   ;;  %v10975_v8 = vld [vmem:[%s14700_s9 + $0x50] sm:$0xff]  }
 0xaec   : > { %v14663_v24 = vpop.eup %11232  ;;  %10213 = vmatprep.subr.bf16.mxu1 %v10972_v49 }
 0xaed   : > { %v4542_v43 = vmul.f32 1.442695, %v4515_v0  ;;  %4566 = vadd.xlane.f32.xlu1 %v14663_v24 }
 0xaee   : > { %v4497_v29 = vpop.xlane.xlu0 %4496 }
 0xaef   : > { %11240 = vpow2.f32 %v4542_v43  ;;  %v4516_v44 = vsub.f32 %v14615_v16, %v4497_v29  ;;  %10214 = vmatpush3.bf16.msra.mxu1 %v10972_v49  ;;  %v10976_v43 = vld [vmem:[%s14700_s9 + $0x48] sm:$0xff]  }
 0xaf0   : > { %v14667_v10 = vpop.eup %11234  ;;  %10215 = vmatprep.subr.bf16.mxu1 %v10973_v23 }
 0xaf1   : > { %v4544_v12 = vmul.f32 1.442695, %v4516_v44  ;;  %4568 = vadd.xlane.f32.xlu0 %v14667_v10 }
 0xaf2   : > { %v4499_v36 = vpop.xlane.xlu1 %4498 }
 0xaf3   : > { %11242 = vpow2.f32 %v4544_v12  ;;  %v4517_v21 = vsub.f32 %v14619_v48, %v4499_v36  ;;  %10216 = vmatpush3.bf16.msra.mxu1 %v10973_v23 }
 0xaf4   : > { %v14671_v47 = vpop.eup %11236  ;;  %10217 = vmatprep.subr.bf16.mxu1 %v10974_v63 }
 0xaf5   : > { %v4546_v50 = vmul.f32 1.442695, %v4517_v21  ;;  %4570 = vadd.xlane.f32.xlu1 %v14671_v47 }
 0xaf6   : > { %v4501_v46 = vpop.xlane.xlu0 %4500 }
 0xaf7   : > { %11244 = vpow2.f32 %v4546_v50  ;;  %v4518_v14 = vsub.f32 %v14623_v1, %v4501_v46  ;;  %10218 = vmatpush3.bf16.msra.mxu1 %v10974_v63 }
 0xaf8   : > { %v14675_v3 = vpop.eup %11238  ;;  %10219 = vmatprep.subr.bf16.mxu1 %v10975_v8 }
 0xaf9   : > { %v4548_v16 = vmul.f32 1.442695, %v4518_v14  ;;  %4572 = vadd.xlane.f32.xlu0 %v14675_v3 }
 0xafa   : > { %v4503_v45 = vpop.xlane.xlu1 %4502 }
 0xafb   : > { %11246 = vpow2.f32 %v4548_v16  ;;  %v4519_v48 = vsub.f32 %v14627_v52, %v4503_v45  ;;  %v10962_v52 = vld [vmem:[%s14700_s9 + $0x38] sm:$0xff]   ;;  %10220 = vmatpush3.bf16.msra.mxu1 %v10975_v8  ;;  %v10963_v8 = vld [vmem:[%s14700_s9 + $0x30] sm:$0xff]  }
 0xafc   : > { %v14679_v32 = vpop.eup %11240  ;;  %10241 = vmatprep.subr.bf16.mxu0 %v10962_v52  ;;  %10221 = vmatprep.subr.bf16.mxu1 %v10976_v43 }
 0xafd   : > { %v4550_v59 = vmul.f32 1.442695, %v4519_v48  ;;  %4574 = vadd.xlane.f32.xlu1 %v14679_v32 }
 0xaff   : > { %11248 = vpow2.f32 %v4550_v59  ;;  %10222 = vmatpush3.bf16.msra.mxu1 %v10976_v43 }
 0xb00   : > { %v14682_v27 = vpop.eup %11242 }
 0xb01   : > { %4576 = vadd.xlane.f32.xlu0 %v14682_v27 }
 0xb04   : > { %v14685_v1 = vpop.eup %11244 }
 0xb05   : > { %4578 = vadd.xlane.f32.xlu1 %v14685_v1 }
 0xb08   : > { %v14688_v31 = vpop.eup %11246 }
 0xb09   : > { %4580 = vadd.xlane.f32.xlu0 %v14688_v31 }
 0xb0c   : > { %v14691_v22 = vpop.eup %11248 }
 0xb0d   : > { %4582 = vadd.xlane.f32.xlu1 %v14691_v22 }
 0xb5a   : > { %v4553_v0 = vpop.xlane.xlu0 %4552 }
 0xb5b   : > { %11250 = vrcp.f32 %v4553_v0  ;;  %v10964_v0 = vld [vmem:[%s14700_s9 + $0x28] sm:$0xff]  }
 0xb5e   : > { %v4555_v29 = vpop.xlane.xlu1 %4554 }
 0xb5f   : > { %11252 = vrcp.f32 %v4555_v29 }
 0xb62   : > { %v4557_v44 = vpop.xlane.xlu0 %4556 }
 0xb63   : > { %11254 = vrcp.f32 %v4557_v44 }
 0xb66   : > { %v4559_v12 = vpop.xlane.xlu1 %4558 }
 0xb67   : > { %11256 = vrcp.f32 %v4559_v12  ;;  %v10965_v12 = vld [vmem:[%s14700_s9 + $0x20] sm:$0xff]  }
 0xb68   : > { %v11251_v36 = vpop.eup %11250 }
 0xb69   : > { %v4616_v46 = vmul.f32 %v11251_v36, %v14635_v25 }
 0xb6a   : > { %v4561_v21 = vpop.xlane.xlu0 %4560 }
 0xb6b   : > { %11258 = vrcp.f32 %v4561_v21 }
 0xb6c   : > { %v11253_v50 = vpop.eup %11252 }
 0xb6d   : > { %v4617_v14 = vmul.f32 %v11253_v50, %v14639_v58 }
 0xb6e   : > { %v4563_v16 = vpop.xlane.xlu1 %4562 }
 0xb6f   : > { %11260 = vrcp.f32 %v4563_v16  ;;  %v4632_v45 = vpack.c.bf16 %v4617_v14, %v4616_v46  ;;  %v10967_v16 = vld [vmem:[%s14700_s9 + $0x10] sm:$0xff]  }
 0xb70   : > { %v11255_v48 = vpop.eup %11254 }
 0xb71   : > { %10193 = vmatprep.mubr.bf16.mxu0 %v4632_v45  ;;  %v4618_v33 = vmul.f32 %v11255_v48, %v14643_v34 }
 0xb72   : > { %v4565_v59 = vpop.xlane.xlu0 %4564 }
 0xb73   : > { %11262 = vrcp.f32 %v4565_v59  ;;  %v10968_v59 = vld [vmem:[%s14700_s9 + $0x8] sm:$0xff]  }
 0xb74   : > { %v11257_v54 = vpop.eup %11256 }
 0xb75   : > { %v4619_v49 = vmul.f32 %v11257_v54, %v14647_v39 }
 0xb76   : > { %v4567_v23 = vpop.xlane.xlu1 %4566 }
 0xb77   : > { %11264 = vrcp.f32 %v4567_v23  ;;  %v4633_v63 = vpack.c.bf16 %v4619_v49, %v4618_v33  ;;  %v10969_v23 = vld [vmem:[%s14700_s9] sm:$0xff]  }
 0xb78   : > { %v11259_v25 = vpop.eup %11258 }
 0xb79   : > { %10194 = vmatmul.mubr.bf16.vlgmr.msra.gmra.mxu0 %v4633_v63  ;;  %v4620_v29 = vmul.f32 %v11259_v25, %v14651_v2 }
 0xb7a   : > { %v4569_v58 = vpop.xlane.xlu0 %4568  ;;  %10242 = vmatpush3.bf16.msra.mxu0 %v10962_v52  ;;  %v10966_v52 = vld [vmem:[%s14700_s9 + $0x18] sm:$0xff]  }
 0xb7b   : > { %10243 = vmatprep.subr.bf16.mxu0 %v10963_v8  ;;  %11266 = vrcp.f32 %v4569_v58 }
 0xb7c   : > { %v11261_v43 = vpop.eup %11260 }
 0xb7d   : > { %v4621_v34 = vmul.f32 %v11261_v43, %v14655_v7 }
 0xb7e   : > { %v4571_v39 = vpop.xlane.xlu1 %4570  ;;  %10244 = vmatpush3.bf16.msra.mxu0 %v10963_v8 }
 0xb7f   : > { %11268 = vrcp.f32 %v4571_v39  ;;  %v4634_v44 = vpack.c.bf16 %v4621_v34, %v4620_v29  ;;  %10245 = vmatprep.subr.bf16.mxu0 %v10964_v0 }
 0xb80   : > { %v11263_v36 = vpop.eup %11262 }
 0xb81   : > { %10197 = vmatprep.mubr.bf16.mxu0 %v4634_v44  ;;  %v4622_v2 = vmul.f32 %v11263_v36, %v14659_v38 }
 0xb82   : > { %v4573_v21 = vpop.xlane.xlu0 %4572  ;;  %10246 = vmatpush3.bf16.msra.mxu0 %v10964_v0 }
 0xb83   : > { %10247 = vmatprep.subr.bf16.mxu0 %v10965_v12  ;;  %11270 = vrcp.f32 %v4573_v21 }
 0xb84   : > { %v11265_v50 = vpop.eup %11264 }
 0xb85   : > { %v4623_v7 = vmul.f32 %v11265_v50, %v14663_v24 }
 0xb86   : > { %v4575_v46 = vpop.xlane.xlu1 %4574  ;;  %10248 = vmatpush3.bf16.msra.mxu0 %v10965_v12 }
 0xb87   : > { %11272 = vrcp.f32 %v4575_v46  ;;  %v4635_v14 = vpack.c.bf16 %v4623_v7, %v4622_v2  ;;  %10249 = vmatprep.subr.bf16.mxu0 %v10966_v52 }
 0xb88   : > { %v11267_v45 = vpop.eup %11266 }
 0xb89   : > { %10198 = vmatmul.mubr.bf16.gmra.mxu0 %v4635_v14  ;;  %v4624_v33 = vmul.f32 %v11267_v45, %v14667_v10  ;;  %v18168_v14 = vld [vmem:[#allocation54_spill] sm:$0xff] }
 0xb8a   : > { %v4577_v48 = vpop.xlane.xlu0 %4576  ;;  %10250 = vmatpush3.bf16.msra.mxu0 %v10966_v52 }
 0xb8b   : > { %10251 = vmatprep.subr.bf16.mxu0 %v10967_v16  ;;  %11274 = vrcp.f32 %v4577_v48 }
 0xb8c   : > { %v11269_v54 = vpop.eup %11268 }
 0xb8d   : > { %v4625_v38 = vmul.f32 %v11269_v54, %v14671_v47  ;;  %v18169_v54 = vld [vmem:[#allocation55_spill] sm:$0xff] }
 0xb8e   : > { %v4579_v24 = vpop.xlane.xlu1 %4578  ;;  %10252 = vmatpush3.bf16.msra.mxu0 %v10967_v16 }
 0xb8f   : > { %11276 = vrcp.f32 %v4579_v24  ;;  %v4636_v49 = vpack.c.bf16 %v4625_v38, %v4624_v33  ;;  %10253 = vmatprep.subr.bf16.mxu0 %v10968_v59 }
 0xb90   : > { %v11271_v63 = vpop.eup %11270 }
 0xb91   : > { %10201 = vmatprep.mubr.bf16.mxu0 %v4636_v49  ;;  %v4626_v58 = vmul.f32 %v11271_v63, %v14675_v3 }
 0xb92   : > { %v4581_v8 = vpop.xlane.xlu0 %4580  ;;  %10254 = vmatpush3.bf16.msra.mxu0 %v10968_v59  ;;  %v14761_v59 = vld [vmem:[%s12819_s19 + $0x1] ss:$0 sm:$0xff] }
 0xb93   : > { %10255 = vmatprep.subr.bf16.mxu0 %v10969_v23  ;;  %11278 = vrcp.f32 %v4581_v8 }
 0xb94   : > { %v11273_v25 = vpop.eup %11272 }
 0xb95   : > { %v4627_v0 = vmul.f32 %v11273_v25, %v14679_v32  ;;  %v18172_v25 = vld [vmem:[#allocation57_spill] sm:$0xff] }
 0xb96   : > { %v4583_v10 = vpop.xlane.xlu1 %4582  ;;  %10256 = vmatpush3.bf16.msra.mxu0 %v10969_v23  ;;  %v18171_v23 = vld [vmem:[#allocation56_spill] sm:$0xff] }
 0xb97   : > { %11280 = vrcp.f32 %v4583_v10  ;;  %v4637_v47 = vpack.c.bf16 %v4627_v0, %v4626_v58 }
 0xb98   : > { %v11275_v43 = vpop.eup %11274 }
 0xb99   : > { %10202 = vmatmul.mubr.bf16.gmra.mxu0 %v4637_v47  ;;  %v4628_v34 = vmul.f32 %v11275_v43, %v14682_v27  ;;  %v10977_v27 = vld [vmem:[%s14700_s9 + $0x40] sm:$0xff]  }
 0xb9a   : > { %10223 = vmatprep.subr.bf16.mxu1 %v10977_v27 }
 0xb9b   : > { %10224 = vmatpush3.bf16.msra.mxu1 %v10977_v27 }
 0xb9c   : > { %v11277_v29 = vpop.eup %11276 }
 0xb9d   : > { %v4629_v39 = vmul.f32 %v11277_v29, %v14685_v1 }
 0xb9f   : > { %v4638_v44 = vpack.c.bf16 %v4629_v39, %v4628_v34 }
 0xba0   : > { %v11279_v12 = vpop.eup %11278 }
 0xba1   : > { %10205 = vmatprep.mubr.bf16.mxu0 %v4638_v44  ;;  %v4630_v3 = vmul.f32 %v11279_v12, %v14688_v31 }
 0xba4   : > { %v11281_v36 = vpop.eup %11280 }
 0xba5   : > { %v4631_v32 = vmul.f32 %v11281_v36, %v14691_v22 }
 0xba7   : > { %v4639_v21 = vpack.c.bf16 %v4631_v32, %v4630_v3  ;;  %v18176_v3 = vld [vmem:[#allocation58_spill] sm:$0xff] }
 0xba9   : > { %10206 = vmatmul.mubr.bf16.gmra.mxu0 %v4639_v21 }
 0xbaa   : > { %10257 = vmatprep.mubr.bf16.mxu0 %v3867_v26 }
 0xbb1   : > { %10258 = vmatmul.mubr.bf16.vlgmr.msra.gmra.mxu0 %v3868_v53 }
 0xbb2   : > { %10261 = vmatprep.mubr.bf16.mxu0 %v3869_v61 }
 0xbb9   : > { %10262 = vmatmul.mubr.bf16.gmra.mxu0 %v3870_v40 }
 0xbba   : > { %10265 = vmatprep.mubr.bf16.mxu0 %v3871_v28 }
 0xbc1   : > { %10266 = vmatmul.mubr.bf16.gmra.mxu0 %v3872_v41 }
 0xbc2   : > { %10269 = vmatprep.mubr.bf16.mxu0 %v3873_v9 }
 0xbc9   : > { %10270 = vmatmul.mubr.bf16.gmra.mxu0 %v3874_v6 }
 0xc39   : > { %v10195_v13 = vpop.f32.mrf.mxu0 }
 0xc3b   : > { %v4682_v51 = vpop.f32.mrf.mxu0 }
 0xc3d   : > { %v10196_v15 = vpop.f32.mrf.mxu0 }
 0xc3e   : > { %v4746_v26 = vpack.c.bf16 %v10196_v15, %v10195_v13  ;;  %v18177_v13 = vld [vmem:[#allocation59_spill] sm:$0xff] }
 0xc3f   : > { %v4685_v53 = vpop.f32.mrf.mxu0 }
 0xc40   : > { %v4745_v35 = vpack.c.bf16 %v4685_v53, %v4682_v51 }
 0xc42   : > { %10225 = vmatprep.mubr.bf16.mxu1 %v4745_v35 }
 0xc43   : > { %10226 = vmatmul.mubr.bf16.vlgmr.msra.gmra.mxu1 %v4746_v26  ;;  %v18179_v26 = vld [vmem:[#allocation60_spill] sm:$0xff] }
 0xc49   : > { %v10199_v11 = vpop.f32.mrf.mxu0 }
 0xc4b   : > { %v4698_v57 = vpop.f32.mrf.mxu0 }
 0xc4d   : > { %v10200_v62 = vpop.f32.mrf.mxu0 }
 0xc4e   : > { %v4748_v61 = vpack.c.bf16 %v10200_v62, %v10199_v11  ;;  %v18180_v62 = vld [vmem:[#allocation61_spill] sm:$0xff] }
 0xc4f   : > { %v4701_v40 = vpop.f32.mrf.mxu0 }
 0xc50   : > { %v4747_v55 = vpack.c.bf16 %v4701_v40, %v4698_v57 }
 0xc52   : > { %10229 = vmatprep.mubr.bf16.mxu1 %v4747_v55 }
 0xc53   : > { %10230 = vmatmul.mubr.bf16.gmra.mxu1 %v4748_v61 }
 0xc59   : > { %v10203_v30 = vpop.f32.mrf.mxu0 }
 0xc5b   : > { %v4714_v18 = vpop.f32.mrf.mxu0 }
 0xc5d   : > { %v10204_v5 = vpop.f32.mrf.mxu0 }
 0xc5e   : > { %v4750_v28 = vpack.c.bf16 %v10204_v5, %v10203_v30 }
 0xc5f   : > { %v4717_v41 = vpop.f32.mrf.mxu0 }
 0xc60   : > { %v4749_v56 = vpack.c.bf16 %v4717_v41, %v4714_v18 }
 0xc62   : > { %10233 = vmatprep.mubr.bf16.mxu1 %v4749_v56 }
 0xc63   : > { %10234 = vmatmul.mubr.bf16.gmra.mxu1 %v4750_v28 }
 0xc69   : > { %v10207_v4 = vpop.f32.mrf.mxu0 }
 0xc6b   : > { %v4730_v42 = vpop.f32.mrf.mxu0 }
 0xc6d   : > { %v10208_v17 = vpop.f32.mrf.mxu0 }
 0xc6e   : > { %v4752_v9 = vpack.c.bf16 %v10208_v17, %v10207_v4  ;;  %v18184_v17 = vld [vmem:[#allocation62_spill] sm:$0xff] }
 0xc6f   : > { %v4733_v6 = vpop.f32.mrf.mxu0 }
 0xc70   : > { %v4751_v19 = vpack.c.bf16 %v4733_v6, %v4730_v42 }
 0xc71   : > { %v10259_v1 = vpop.f32.mrf.mxu0 }
 0xc72   : > { %10237 = vmatprep.mubr.bf16.mxu1 %v4751_v19 }
 0xc73   : > { %10238 = vmatmul.mubr.bf16.gmra.mxu1 %v4752_v9  ;;  %v4980_v31 = vpop.f32.mrf.mxu0 }
 0xc74   : > { %5452 = vmatprep.mubr.bf16.mxu1 %v18111_v37 }
 0xc75   : > { %v10260_v52 = vpop.f32.mrf.mxu0 }
 0xc77   : > { %v4983_v45 = vpop.f32.mrf.mxu0 }
 0xc79   : > { %v10263_v8 = vpop.f32.mrf.mxu0 }
 0xc7b   : > { %v4996_v47 = vpop.f32.mrf.mxu0 }
 0xc7d   : > { %v10264_v34 = vpop.f32.mrf.mxu0 }
 0xc7f   : > { %v4999_v21 = vpop.f32.mrf.mxu0 }
 0xc81   : > { %v10267_v57 = vpop.f32.mrf.mxu0 }
 0xc83   : > { %v5012_v30 = vpop.f32.mrf.mxu0 }
 0xc85   : > { %v10268_v41 = vpop.f32.mrf.mxu0 }
 0xc87   : > { %v5015_v19 = vpop.f32.mrf.mxu0 }
 0xd03   : > { %v10227_v22 = vpop.f32.mrf.mxu1 }
 0xd04   : > { %v4989_v2 = vadd.f32 %v10259_v1, %v10227_v22  ;;  %v18185_v1 = vld [vmem:[#allocation63_spill] sm:$0xff] }
 0xd05   : > { %v4835_v50 = vpop.f32.mrf.mxu1 }
 0xd06   : > { %v4981_v7 = vadd.f32 %v4980_v31, %v4835_v50  ;;  %v5045_v33 = vadd.f32 %v4989_v2, %v18169_v54  ;;  %v18187_v2 = vld [vmem:[#allocation64_spill] sm:$0xff] }
 0xd07   : > { %v10228_v46 = vpop.f32.mrf.mxu1 }
 0xd08   : > { %v5043_v16 = vadd.f32 %v4981_v7, %v18168_v14  ;;  %v4992_v38 = vadd.f32 %v10260_v52, %v10228_v46  ;;  %v14771_v0 = vadd.f32 %v14761_v59, %v5045_v33  ;;  %v10271_v46 = vpop.f32.mrf.mxu0  ;;  %v18188_v14 = vld [vmem:[#allocation65_spill] sm:$0xff] }
 0xd09   : > { %v4838_v48 = vpop.f32.mrf.mxu1 }
 0xd0a   : > { %v4984_v24 = vadd.f32 %v4983_v45, %v4838_v48  ;;  %v14765_v49 = vadd.f32 %v14761_v59, %v5043_v16  ;;  %v5046_v58 = vadd.f32 %v4992_v38, %v18172_v25  ;;  %18173 = vst [vmem:[#allocation93_spill] sm:$0xff] %v14771_v0  ;;  %v5028_v54 = vpop.f32.mrf.mxu0 }
 0xd0c   : > { %18170 = vst [vmem:[#allocation99_spill] sm:$0xff] %v14765_v49  ;;  %v5044_v63 = vadd.f32 %v4984_v24, %v18171_v23  ;;  %5082 = vadd.xlane.f32.xlu0 %v14765_v49  ;;  %v14779_v43 = vadd.f32 %v14761_v59, %v5046_v58  ;;  %v10272_v24 = vpop.f32.mrf.mxu0  ;;  %v18192_v58 = vld [vmem:[#allocation66_spill] sm:$0xff] }
 0xd0e   : > { %v14774_v10 = vadd.f32 %v14761_v59, %v5044_v63  ;;  %18175 = vst [vmem:[#allocation91_spill] sm:$0xff] %v14779_v43 }
 0xd10   : > { %18174 = vst [vmem:[#allocation89_spill] sm:$0xff] %v14774_v10  ;;  %5086 = vadd.xlane.f32.xlu0 %v14771_v0  ;;  %5084 = vadd.xlane.f32.xlu1 %v14774_v10 }
 0xd13   : > { %v10231_v29 = vpop.f32.mrf.mxu1 }
 0xd14   : > { %5088 = vadd.xlane.f32.xlu1 %v14779_v43  ;;  %v5005_v44 = vadd.f32 %v10263_v8, %v10231_v29  ;;  %v5031_v29 = vpop.f32.mrf.mxu0 }
 0xd15   : > { %v4851_v39 = vpop.f32.mrf.mxu1 }
 0xd16   : > { %v4997_v12 = vadd.f32 %v4996_v47, %v4851_v39  ;;  %v5049_v51 = vadd.f32 %v5005_v44, %v18177_v13  ;;  %v18193_v39 = vld [vmem:[#allocation67_spill] sm:$0xff] }
 0xd17   : > { %v10232_v36 = vpop.f32.mrf.mxu1 }
 0xd18   : > { %v5047_v32 = vadd.f32 %v4997_v12, %v18176_v3  ;;  %v5008_v15 = vadd.f32 %v10264_v34, %v10232_v36  ;;  %v14791_v55 = vadd.f32 %v14761_v59, %v5049_v51 }
 0xd19   : > { %v4854_v27 = vpop.f32.mrf.mxu1 }
 0xd1a   : > { %v5000_v53 = vadd.f32 %v4999_v21, %v4854_v27  ;;  %v14785_v35 = vadd.f32 %v14761_v59, %v5047_v32  ;;  %v5050_v40 = vadd.f32 %v5008_v15, %v18180_v62  ;;  %18181 = vst [vmem:[#allocation90_spill] sm:$0xff] %v14791_v55  ;;  %v18195_v32 = vld [vmem:[#allocation68_spill] sm:$0xff]  ;;  %v18196_v27 = vld [vmem:[#allocation69_spill] sm:$0xff] }
 0xd1c   : > { %18178 = vst [vmem:[#allocation92_spill] sm:$0xff] %v14785_v35  ;;  %v5048_v11 = vadd.f32 %v5000_v53, %v18179_v26  ;;  %5090 = vadd.xlane.f32.xlu0 %v14785_v35  ;;  %v14799_v18 = vadd.f32 %v14761_v59, %v5050_v40  ;;  %v10978_v26 = vld [vmem:[%s14844_s21 + $0x70] ss:$8 sps:$4 sm:$0xff]  }
 0xd1e   : > { %v14794_v61 = vadd.f32 %v14761_v59, %v5048_v11  ;;  %18183 = vst [vmem:[#allocation81_spill] sm:$0xff] %v14799_v18  ;;  %v10980_v11 = vld [vmem:[%s14844_s21 + $0x74] ss:$8 sps:$4 sm:$0xff]  }
 0xd1f   : > { %5420 = vmatprep.subr.bf16.mxu1 %v10980_v11 }
 0xd20   : > { %18182 = vst [vmem:[#allocation79_spill] sm:$0xff] %v14794_v61  ;;  %5094 = vadd.xlane.f32.xlu0 %v14791_v55  ;;  %5092 = vadd.xlane.f32.xlu1 %v14794_v61 }
 0xd21   : > { %5421 = vmatpush1.bf16.msra.mxu1 %v10978_v26  ;;  %v10989_v26 = vld [vmem:[%s14844_s21 + $0x44] ss:$8 sps:$4 sm:$0xff]  }
 0xd23   : > { %v10235_v5 = vpop.f32.mrf.mxu1 }
 0xd24   : > { %5096 = vadd.xlane.f32.xlu1 %v14799_v18  ;;  %v5021_v28 = vadd.f32 %v10267_v57, %v10235_v5 }
 0xd25   : > { %v4867_v56 = vpop.f32.mrf.mxu1 }
 0xd26   : > { %v5013_v4 = vadd.f32 %v5012_v30, %v4867_v56  ;;  %v5053_v31 = vadd.f32 %v5021_v28, %v18185_v1 }
 0xd27   : > { %v10236_v42 = vpop.f32.mrf.mxu1 }
 0xd28   : > { %v5051_v6 = vadd.f32 %v5013_v4, %v18184_v17  ;;  %v5024_v22 = vadd.f32 %v10268_v41, %v10236_v42  ;;  %v14811_v45 = vadd.f32 %v14761_v59, %v5053_v31  ;;  %v18200_v41 = vld [vmem:[#allocation53_spill] sm:$0xff] }
 0xd29   : > { %v4870_v9 = vpop.f32.mrf.mxu1 }
 0xd2a   : > { %v5016_v52 = vadd.f32 %v5015_v19, %v4870_v9  ;;  %v14805_v50 = vadd.f32 %v14761_v59, %v5051_v6  ;;  %v5054_v16 = vadd.f32 %v5024_v22, %v18188_v14  ;;  %18189 = vst [vmem:[#allocation80_spill] sm:$0xff] %v14811_v45 }
 0xd2c   : > { %18186 = vst [vmem:[#allocation82_spill] sm:$0xff] %v14805_v50  ;;  %v5052_v7 = vadd.f32 %v5016_v52, %v18187_v2  ;;  %5098 = vadd.xlane.f32.xlu0 %v14805_v50  ;;  %v14819_v33 = vadd.f32 %v14761_v59, %v5054_v16 }
 0xd2e   : > { %v14814_v48 = vadd.f32 %v14761_v59, %v5052_v7  ;;  %18191 = vst [vmem:[#allocation71_spill] sm:$0xff] %v14819_v33 }
 0xd30   : > { %18190 = vst [vmem:[#allocation72_spill] sm:$0xff] %v14814_v48  ;;  %5102 = vadd.xlane.f32.xlu0 %v14811_v45  ;;  %5100 = vadd.xlane.f32.xlu1 %v14814_v48 }
 0xd33   : > { %v10239_v38 = vpop.f32.mrf.mxu1 }
 0xd34   : > { %5104 = vadd.xlane.f32.xlu1 %v14819_v33  ;;  %v5037_v63 = vadd.f32 %v10271_v46, %v10239_v38 }
 0xd35   : > { %v4883_v23 = vpop.f32.mrf.mxu1 }
 0xd36   : > { %v5029_v8 = vadd.f32 %v5028_v54, %v4883_v23  ;;  %v5057_v44 = vadd.f32 %v5037_v63, %v18193_v39  ;;  %v10983_v54 = vld [vmem:[%s14844_s21 + $0x64] ss:$8 sps:$4 sm:$0xff]   ;;  %v10981_v23 = vld [vmem:[%s14844_s21 + $0x60] ss:$8 sps:$4 sm:$0xff]   ;;  %v10986_v39 = vld [vmem:[%s14844_s21 + $0x54] ss:$8 sps:$4 sm:$0xff]  }
 0xd37   : > { %v10240_v25 = vpop.f32.mrf.mxu1  ;;  %5422 = vmatprep.subr.bf16.mxu1 %v10983_v54 }
 0xd38   : > { %v5055_v47 = vadd.f32 %v5029_v8, %v18192_v58  ;;  %v5040_v12 = vadd.f32 %v10272_v24, %v10240_v25  ;;  %v14834_v15 = vadd.f32 %v14761_v59, %v5057_v44  ;;  %5423 = vmatpush1.bf16.msra.mxu1 %v10981_v23  ;;  %v10996_v23 = vld [vmem:[%s14844_s21 + $0x10] ss:$8 sps:$4 sm:$0xff]  }
 0xd39   : > { %v4886_v34 = vpop.f32.mrf.mxu1  ;;  %5424 = vmatprep.subr.bf16.mxu1 %v10986_v39 }
 0xd3a   : > { %v5032_v36 = vadd.f32 %v5031_v29, %v4886_v34  ;;  %v14825_v3 = vadd.f32 %v14761_v59, %v5055_v47  ;;  %v5058_v13 = vadd.f32 %v5040_v12, %v18196_v27  ;;  %18198 = vst [vmem:[#allocation111_spill] sm:$0xff] %v14834_v15 }
 0xd3c   : > { %18194 = vst [vmem:[#allocation113_spill] sm:$0xff] %v14825_v3  ;;  %v5056_v21 = vadd.f32 %v5032_v36, %v18195_v32  ;;  %5106 = vadd.xlane.f32.xlu0 %v14825_v3  ;;  %v14839_v53 = vadd.f32 %v14761_v59, %v5058_v13  ;;  %v10984_v32 = vld [vmem:[%s14844_s21 + $0x50] ss:$8 sps:$4 sm:$0xff]  }
 0xd3d   : > { %5425 = vmatpush1.bf16.msra.mxu1 %v10984_v32 }
 0xd3e   : > { %v14831_v51 = vadd.f32 %v14761_v59, %v5056_v21  ;;  %18199 = vst [vmem:[#allocation74_spill] sm:$0xff] %v14839_v53  ;;  %5426 = vmatprep.subr.bf16.mxu1 %v10989_v26 }
 0xd40   : > { %18197 = vst [vmem:[#allocation75_spill] sm:$0xff] %v14831_v51  ;;  %5108 = vadd.xlane.f32.xlu1 %v14831_v51  ;;  %5110 = vadd.xlane.f32.xlu0 %v14834_v15 }
 0xd44   : > { %5112 = vadd.xlane.f32.xlu1 %v14839_v53 }
 0xd95   : > { %v5083_v57 = vpop.xlane.xlu0 %5082 }
 0xd96   : > { %v5114_v62 = vmul.f32 0.03125, %v5083_v57  ;;  %v10987_v57 = vld [vmem:[%s14844_s21 + $0x40] ss:$8 sps:$4 sm:$0xff]  }
 0xd97   : > { %5427 = vmatpush1.bf16.msra.mxu1 %v10987_v57 }
 0xd98   : > { %v5130_v40 = vsub.f32 %v14765_v49, %v5114_v62 }
 0xd99   : > { %v5087_v30 = vpop.xlane.xlu0 %5086  ;;  %v5085_v5 = vpop.xlane.xlu1 %5084 }
 0xd9a   : > { %v14850_v59 = vmul.f32 %v18200_v41, %v5130_v40  ;;  %v5116_v56 = vmul.f32 0.03125, %v5087_v30  ;;  %v5115_v28 = vmul.f32 0.03125, %v5085_v5  ;;  %v10992_v30 = vld [vmem:[%s14844_s21 + $0x34] ss:$8 sps:$4 sm:$0xff]  }
 0xd9b   : > { %5428 = vmatprep.subr.bf16.mxu1 %v10992_v30 }
 0xd9c   : > { %v5132_v4 = vsub.f32 %v14771_v0, %v5116_v56  ;;  %v5131_v42 = vsub.f32 %v14774_v10, %v5115_v28  ;;  %v5162_v17 = vmul.f32 %v14850_v59, %v14850_v59  ;;  %v10990_v56 = vld [vmem:[%s14844_s21 + $0x30] ss:$8 sps:$4 sm:$0xff]  }
 0xd9d   : > { %v5089_v6 = vpop.xlane.xlu1 %5088  ;;  %5429 = vmatpush1.bf16.msra.mxu1 %v10990_v56 }
 0xd9e   : > { %v14857_v19 = vmul.f32 %v18200_v41, %v5132_v4  ;;  %v14860_v9 = vmul.f32 %v18200_v41, %v5131_v42  ;;  %v5117_v1 = vmul.f32 0.03125, %v5089_v6  ;;  %5178 = vadd.xlane.f32.xlu0 %v5162_v17  ;;  %v10995_v17 = vld [vmem:[%s14844_s21 + $0x24] ss:$8 sps:$4 sm:$0xff]  }
 0xd9f   : > { %5430 = vmatprep.subr.bf16.mxu1 %v10995_v17 }
 0xda0   : > { %v5133_v31 = vsub.f32 %v14779_v43, %v5117_v1  ;;  %v5163_v22 = vmul.f32 %v14860_v9, %v14860_v9  ;;  %v5164_v52 = vmul.f32 %v14857_v19, %v14857_v19 }
 0xda2   : > { %v14868_v2 = vmul.f32 %v18200_v41, %v5133_v31  ;;  %5180 = vadd.xlane.f32.xlu1 %v5163_v22  ;;  %5182 = vadd.xlane.f32.xlu0 %v5164_v52  ;;  %v10993_v22 = vld [vmem:[%s14844_s21 + $0x20] ss:$8 sps:$4 sm:$0xff]  }
 0xda3   : > { %5431 = vmatpush1.bf16.msra.mxu1 %v10993_v22 }
 0xda4   : > { %v5165_v7 = vmul.f32 %v14868_v2, %v14868_v2 }
 0xda5   : > { %v5091_v46 = vpop.xlane.xlu0 %5090 }
 0xda6   : > { %v5118_v14 = vmul.f32 0.03125, %v5091_v46  ;;  %5184 = vadd.xlane.f32.xlu1 %v5165_v7 }
 0xda8   : > { %v5134_v16 = vsub.f32 %v14785_v35, %v5118_v14 }
 0xda9   : > { %v5095_v38 = vpop.xlane.xlu0 %5094  ;;  %v5093_v24 = vpop.xlane.xlu1 %5092 }
 0xdaa   : > { %v14876_v63 = vmul.f32 %v18200_v41, %v5134_v16  ;;  %v5120_v8 = vmul.f32 0.03125, %v5095_v38  ;;  %v5119_v25 = vmul.f32 0.03125, %v5093_v24  ;;  %v10998_v16 = vld [vmem:[%s14844_s21 + $0x14] ss:$8 sps:$4 sm:$0xff]  }
 0xdab   : > { %5432 = vmatprep.subr.bf16.mxu1 %v10998_v16 }
 0xdac   : > { %v5136_v58 = vsub.f32 %v14791_v55, %v5120_v8  ;;  %v5135_v47 = vsub.f32 %v14794_v61, %v5119_v25  ;;  %v5166_v29 = vmul.f32 %v14876_v63, %v14876_v63  ;;  %5433 = vmatpush1.bf16.msra.mxu1 %v10996_v23  ;;  %v14978_v23 = vld [vmem:[%s18202_s11 + $0x18] sm:$0xff]  ;;  %v15577_v61 = vld [vmem:[%s12819_s19 + $0x2] ss:$0 sm:$0xff] }
 0xdad   : > { %v5097_v34 = vpop.xlane.xlu1 %5096 }
 0xdae   : > { %v14884_v44 = vmul.f32 %v18200_v41, %v5136_v58  ;;  %v14887_v12 = vmul.f32 %v18200_v41, %v5135_v47  ;;  %v5121_v36 = vmul.f32 0.03125, %v5097_v34  ;;  %5186 = vadd.xlane.f32.xlu0 %v5166_v29  ;;  %v11001_v47 = vld [vmem:[%s14844_s21 + $0x4] ss:$8 sps:$4 sm:$0xff]   ;;  %v10999_v34 = vld [vmem:[%s14844_s21] ss:$8 sps:$4 sm:$0xff]  }
 0xdaf   : > { %5434 = vmatprep.subr.bf16.mxu1 %v11001_v47  ;;  %v6003_v47 = vadd.f32 -1.0, %v14978_v23 }
 0xdb0   : > { %v5137_v21 = vsub.f32 %v14799_v18, %v5121_v36  ;;  %v5167_v27 = vmul.f32 %v14887_v12, %v14887_v12  ;;  %v5168_v13 = vmul.f32 %v14884_v44, %v14884_v44  ;;  %5435 = vmatpush1.bf16.msra.mxu1 %v10999_v34  ;;  %v18203_v34 = vmov 0.0  }
 0xdb1   : > { %vm6019_vm15 = vcmp.ge.f32.partialorder %v6003_v47, 0.0  ;;  %vm6035_vm0 = vcmp.lt.f32.partialorder %v6003_v47, 16.0 }
 0xdb2   : > { %v14897_v11 = vmul.f32 %v18200_v41, %v5137_v21  ;;  %5188 = vadd.xlane.f32.xlu1 %v5167_v27  ;;  %5190 = vadd.xlane.f32.xlu0 %v5168_v13 }
 0xdb4   : > { %v5169_v62 = vmul.f32 %v14897_v11, %v14897_v11 }
 0xdb5   : > { %v5099_v40 = vpop.xlane.xlu0 %5098 }
 0xdb6   : > { %v5122_v5 = vmul.f32 0.03125, %v5099_v40  ;;  %5192 = vadd.xlane.f32.xlu1 %v5169_v62 }
 0xdb8   : > { %v5138_v28 = vsub.f32 %v14805_v50, %v5122_v5 }
 0xdb9   : > { %v5103_v4 = vpop.xlane.xlu0 %5102  ;;  %v5101_v42 = vpop.xlane.xlu1 %5100 }
 0xdba   : > { %v14907_v6 = vmul.f32 %v18200_v41, %v5138_v28  ;;  %v5124_v1 = vmul.f32 0.03125, %v5103_v4  ;;  %v5123_v31 = vmul.f32 0.03125, %v5101_v42 }
 0xdbc   : > { %v5140_v52 = vsub.f32 %v14811_v45, %v5124_v1  ;;  %v5139_v7 = vsub.f32 %v14814_v48, %v5123_v31  ;;  %v5170_v46 = vmul.f32 %v14907_v6, %v14907_v6 }
 0xdbd   : > { %v5105_v14 = vpop.xlane.xlu1 %5104 }
 0xdbe   : > { %v14916_v54 = vmul.f32 %v18200_v41, %v5140_v52  ;;  %v14919_v38 = vmul.f32 %v18200_v41, %v5139_v7  ;;  %v5125_v24 = vmul.f32 0.03125, %v5105_v14  ;;  %5194 = vadd.xlane.f32.xlu0 %v5170_v46  ;;  %v14961_v7 = vld [vmem:[%s18201_s30] sm:$0xff]  ;;  %v14966_v46 = vld [vmem:[%s18202_s11 + $0x8] sm:$0xff]  ;;  %s16877_s30 = scalar_lea.vmem [#allocation21], %s12935_s17 }
 0xdbf   : > { %v6000_v14 = vadd.f32 -1.0, %v14961_v7  ;;  %v6001_v16 = vadd.f32 -1.0, %v14966_v46 }
 0xdc0   : > { %v5141_v8 = vsub.f32 %v14819_v33, %v5125_v24  ;;  %v5171_v25 = vmul.f32 %v14919_v38, %v14919_v38  ;;  %v5172_v58 = vmul.f32 %v14916_v54, %v14916_v54  ;;  %v14973_v24 = vld [vmem:[%s18202_s11 + $0x10] sm:$0xff] }
 0xdc1   : > { %vm6016_vm1 = vcmp.ge.f32.partialorder %v6000_v14, 0.0  ;;  %vm6032_vm2 = vcmp.lt.f32.partialorder %v6000_v14, 16.0  ;;  %vm6017_vm3 = vcmp.ge.f32.partialorder %v6001_v16, 0.0  ;;  %vm6033_vm4 = vcmp.lt.f32.partialorder %v6001_v16, 16.0 }
 0xdc2   : > { %v14929_v29 = vmul.f32 %v18200_v41, %v5141_v8  ;;  %5196 = vadd.xlane.f32.xlu1 %v5171_v25  ;;  %5198 = vadd.xlane.f32.xlu0 %v5172_v58  ;;  %v5740_v8 = vadd.f32 -2.0, %v14973_v24  ;;  %v5741_v25 = vadd.f32 -2.0, %v14978_v23  ;;  %vm6048_vm5 = vmand %vm6016_vm1, %vm6032_vm2  ;;  %v6002_v58 = vadd.f32 -1.0, %v14973_v24 }
 0xdc3   : > { %vm6049_vm6 = vmand %vm6017_vm3, %vm6033_vm4  ;;  %vm6245_vm3 = vcmp.ge.f32.partialorder %v14961_v7, 0.0  ;;  %vm6261_vm4 = vcmp.lt.f32.partialorder %v14961_v7, 16.0  ;;  %v6753_v16 = vadd.f32 2.0, %v14961_v7 }
 0xdc4   : > { %v5173_v39 = vmul.f32 %v14929_v29, %v14929_v29  ;;  %vm5756_vm7 = vcmp.ge.f32.partialorder %v5740_v8, 0.0  ;;  %vm5772_vm8 = vcmp.lt.f32.partialorder %v5740_v8, 16.0  ;;  %vm5757_vm9 = vcmp.ge.f32.partialorder %v5741_v25, 0.0  ;;  %vm6051_vm2 = vmand %vm6019_vm15, %vm6035_vm0 }
 0xdc5   : > { %v5107_v36 = vpop.xlane.xlu0 %5106  ;;  %vm5773_vm10 = vcmp.lt.f32.partialorder %v5741_v25, 16.0  ;;  %vm5788_vm11 = vmand %vm5756_vm7, %vm5772_vm8  ;;  %vm6018_vm13 = vcmp.ge.f32.partialorder %v6002_v58, 0.0  ;;  %vm6034_vm14 = vcmp.lt.f32.partialorder %v6002_v58, 16.0  ;;  %v6754_v8 = vadd.f32 2.0, %v14966_v46 }
 0xdc6   : > { %v5126_v32 = vmul.f32 0.03125, %v5107_v36  ;;  %5200 = vadd.xlane.f32.xlu1 %v5173_v39  ;;  %v9665_v39 = vsel %vm6048_vm5, 1.0, %v18203_v34  ;;  %v9666_v36 = vsel %vm6049_vm6, 1.0, %v18203_v34  ;;  %vm5789_vm12 = vmand %vm5757_vm9, %vm5773_vm10  ;;  %vm6246_vm5 = vcmp.ge.f32.partialorder %v14966_v46, 0.0 }
 0xdc7   : > { %vm6050_vm1 = vmand %vm6018_vm13, %vm6034_vm14  ;;  %vm6262_vm6 = vcmp.lt.f32.partialorder %v14966_v46, 16.0  ;;  %vm6247_vm9 = vcmp.ge.f32.partialorder %v14973_v24, 0.0  ;;  %vm6263_vm10 = vcmp.lt.f32.partialorder %v14973_v24, 16.0 }
 0xdc8   : > { %v5142_v21 = vsub.f32 %v14825_v3, %v5126_v32  ;;  %v10631_v32 = vpack.i.bf16 %v9666_v36, %v9665_v39  ;;  %vm6277_vm7 = vmand %vm6245_vm3, %vm6261_vm4  ;;  %v15013_v39 = vld [vmem:[%s18202_s11 + $0x20] sm:$0xff]  ;;  %v15018_v36 = vld [vmem:[%s18202_s11 + $0x28] sm:$0xff] }
 0xdc9   : > { %v5109_v27 = vpop.xlane.xlu1 %5108  ;;  %v5111_v13 = vpop.xlane.xlu0 %5110  ;;  %vm6278_vm8 = vmand %vm6246_vm5, %vm6262_vm6 }
 0xdca   : > { %v14936_v26 = vmul.f32 %v18200_v41, %v5142_v21  ;;  %v5127_v57 = vmul.f32 0.03125, %v5109_v27  ;;  %v5128_v62 = vmul.f32 0.03125, %v5111_v13  ;;  %v9650_v21 = vsel %vm5788_vm11, 1.0, %v18203_v34  ;;  %vm6279_vm13 = vmand %vm6247_vm9, %vm6263_vm10 }
 0xdcb   : > { %v9651_v27 = vsel %vm5789_vm12, 1.0, %v18203_v34  ;;  %vm6248_vm11 = vcmp.ge.f32.partialorder %v14978_v23, 0.0  ;;  %vm6264_vm12 = vcmp.lt.f32.partialorder %v14978_v23, 16.0  ;;  %vm6769_vm10 = vcmp.ge.f32.partialorder %v6753_v16, 0.0 }
 0xdcc   : > { %v5143_v40 = vsub.f32 %v14831_v51, %v5127_v57  ;;  %v5144_v30 = vsub.f32 %v14834_v15, %v5128_v62  ;;  %v5174_v5 = vmul.f32 %v14936_v26, %v14936_v26  ;;  %v10636_v13 = vpack.i.bf16 %v9651_v27, %v9650_v21  ;;  %vm6280_vm14 = vmand %vm6248_vm11, %vm6264_vm12 }
 0xdcd   : > { %v5113_v56 = vpop.xlane.xlu1 %5112  ;;  %v9667_v57 = vsel %vm6050_vm1, 1.0, %v18203_v34  ;;  %v9668_v62 = vsel %vm6051_vm2, 1.0, %v18203_v34  ;;  %v9685_v14 = vsel %vm6280_vm14, 1.0, %v18203_v34  ;;  %vm6770_vm11 = vcmp.ge.f32.partialorder %v6754_v8, 0.0 }
 0xdce   : > { %v14943_v28 = vmul.f32 %v18200_v41, %v5143_v40  ;;  %v14946_v4 = vmul.f32 %v18200_v41, %v5144_v30  ;;  %v5129_v42 = vmul.f32 0.03125, %v5113_v56  ;;  %5202 = vadd.xlane.f32.xlu0 %v5174_v5  ;;  %v6491_v40 = vadd.f32 1.0, %v14961_v7 }
 0xdcf   : > { %v6492_v30 = vadd.f32 1.0, %v14966_v46  ;;  %v10641_v5 = vpack.i.bf16 %v9668_v62, %v9667_v57  ;;  %v9682_v56 = vsel %vm6277_vm7, 1.0, %v18203_v34  ;;  %vm6785_vm12 = vcmp.lt.f32.partialorder %v6753_v16, 16.0  ;;  %v15027_v62 = vld [vmem:[%s18202_s11 + $0x30] sm:$0xff] }
 0xdd0   : > { %v5145_v17 = vsub.f32 %v14839_v53, %v5129_v42  ;;  %v5175_v1 = vmul.f32 %v14943_v28, %v14943_v28  ;;  %v5176_v31 = vmul.f32 %v14946_v4, %v14946_v4  ;;  %v9683_v42 = vsel %vm6278_vm8, 1.0, %v18203_v34 }
 0xdd1   : > { %vm6507_vm15 = vcmp.ge.f32.partialorder %v6491_v40, 0.0  ;;  %vm6523_vm0 = vcmp.lt.f32.partialorder %v6491_v40, 16.0  ;;  %vm6508_vm1 = vcmp.ge.f32.partialorder %v6492_v30, 0.0  ;;  %vm6524_vm2 = vcmp.lt.f32.partialorder %v6492_v30, 16.0  ;;  %v15032_v40 = vld [vmem:[%s18202_s11 + $0x38] sm:$0xff] }
 0xdd2   : > { %v14954_v22 = vmul.f32 %v18200_v41, %v5145_v17  ;;  %5204 = vadd.xlane.f32.xlu1 %v5175_v1  ;;  %5206 = vadd.xlane.f32.xlu0 %v5176_v31  ;;  %v6493_v17 = vadd.f32 1.0, %v14973_v24  ;;  %v6494_v1 = vadd.f32 1.0, %v14978_v23  ;;  %v10646_v31 = vpack.i.bf16 %v9683_v42, %v9682_v56  ;;  %vm6539_vm3 = vmand %vm6507_vm15, %vm6523_vm0 }
 0xdd3   : > { %vm6540_vm4 = vmand %vm6508_vm1, %vm6524_vm2  ;;  %v9699_v58 = vsel %vm6539_vm3, 1.0, %v18203_v34  ;;  %vm6786_vm14 = vcmp.lt.f32.partialorder %v6754_v8, 16.0  ;;  %v5743_v21 = vadd.f32 -2.0, %v15018_v36  ;;  %v5744_v56 = vadd.f32 -2.0, %v15027_v62 }
 0xdd4   : > { %v5177_v52 = vmul.f32 %v14954_v22, %v14954_v22  ;;  %vm6509_vm5 = vcmp.ge.f32.partialorder %v6493_v17, 0.0  ;;  %vm6525_vm6 = vcmp.lt.f32.partialorder %v6493_v17, 16.0  ;;  %vm6510_vm7 = vcmp.ge.f32.partialorder %v6494_v1, 0.0  ;;  %vm6801_vm15 = vmand %vm6769_vm10, %vm6785_vm12 }
 0xdd5   : > { %vm6526_vm8 = vcmp.lt.f32.partialorder %v6494_v1, 16.0  ;;  %v9700_v47 = vsel %vm6540_vm4, 1.0, %v18203_v34  ;;  %vm6541_vm9 = vmand %vm6509_vm5, %vm6525_vm6  ;;  %vm5759_vm2 = vcmp.ge.f32.partialorder %v5743_v21, 0.0  ;;  %vm5775_vm4 = vcmp.lt.f32.partialorder %v5743_v21, 16.0 }
 0xdd6   : > { %5208 = vadd.xlane.f32.xlu1 %v5177_v52  ;;  %v9684_v52 = vsel %vm6279_vm13, 1.0, %v18203_v34  ;;  %vm6542_vm13 = vmand %vm6510_vm7, %vm6526_vm8  ;;  %v10656_v27 = vpack.i.bf16 %v9700_v47, %v9699_v58  ;;  %v9716_v30 = vsel %vm6801_vm15, 1.0, %v18203_v34  ;;  %v5745_v42 = vadd.f32 -2.0, %v15032_v40 }
 0xdd7   : > { %v10651_v25 = vpack.i.bf16 %v9685_v14, %v9684_v52  ;;  %vm6802_vm0 = vmand %vm6770_vm11, %vm6786_vm14  ;;  %v9702_v57 = vsel %vm6542_vm13, 1.0, %v18203_v34  ;;  %vm5760_vm7 = vcmp.ge.f32.partialorder %v5744_v56, 0.0  ;;  %vm6249_vm13 = vcmp.ge.f32.partialorder %v15013_v39, 0.0 }
 0xdd8   : > { %vm5791_vm6 = vmand %vm5759_vm2, %vm5775_vm4  ;;  %vm5761_vm8 = vcmp.ge.f32.partialorder %v5745_v42, 0.0  ;;  %vm5777_vm10 = vcmp.lt.f32.partialorder %v5745_v42, 16.0  ;;  %vm6250_vm14 = vcmp.ge.f32.partialorder %v15018_v36, 0.0  ;;  %vm6265_vm15 = vcmp.lt.f32.partialorder %v15013_v39, 16.0 }
 0xdd9   : > { %v9653_v52 = vsel %vm5791_vm6, 1.0, %v18203_v34  ;;  %vm5793_vm12 = vmand %vm5761_vm8, %vm5777_vm10  ;;  %v6495_v8 = vadd.f32 1.0, %v15013_v39  ;;  %v6758_v21 = vadd.f32 2.0, %v15018_v36  ;;  %v6760_v53 = vadd.f32 2.0, %v15032_v40 }
 0xdda   : > { %v15047_v16 = vsel %vm5793_vm12, 1.0, %v18203_v34 }
 0xddb   : > { %vm6790_vm12 = vcmp.lt.f32.partialorder %v6758_v21, 16.0 }
 0xde7   : > { %10632 = vperm.xlu1 %10630, %v10631_v32   ;;  %v5742_v32 = vadd.f32 -2.0, %v15013_v39 }
 0xde9   : > { %vm5758_vm1 = vcmp.ge.f32.partialorder %v5742_v32, 0.0  ;;  %vm5774_vm3 = vcmp.lt.f32.partialorder %v5742_v32, 16.0  ;;  %v6757_v32 = vadd.f32 2.0, %v15013_v39 }
 0xdea   : > { %vm5790_vm5 = vmand %vm5758_vm1, %vm5774_vm3  ;;  %vm6511_vm3 = vcmp.ge.f32.partialorder %v6495_v8, 0.0 }
 0xdeb   : > { %10637 = vperm.xlu1 %10630, %v10636_v13   ;;  %v9701_v13 = vsel %vm6541_vm9, 1.0, %v18203_v34  ;;  %vm5776_vm9 = vcmp.lt.f32.partialorder %v5744_v56, 16.0  ;;  %vm6281_vm1 = vmand %vm6249_vm13, %vm6265_vm15  ;;  %vm6773_vm8 = vcmp.ge.f32.partialorder %v6757_v32, 0.0 }
 0xdec   : > { %v10661_v17 = vpack.i.bf16 %v9702_v57, %v9701_v13  ;;  %vm5792_vm11 = vmand %vm5760_vm7, %vm5776_vm9  ;;  %v15062_v13 = vsel %vm6281_vm1, 1.0, %v18203_v34  ;;  %v15067_v57 = vld [vmem:[%s18202_s11 + $0x48] sm:$0xff]  ;;  %vm6774_vm9 = vcmp.ge.f32.partialorder %v6758_v21, 0.0 }
 0xded   : > { %v15041_v14 = vsel %vm5792_vm11, 1.0, %v18203_v34  ;;  %vm6789_vm11 = vcmp.lt.f32.partialorder %v6757_v32, 16.0 }
 0xdee   : > { %v10686_v47 = vpack.i.bf16 %v15047_v16, %v15041_v14  ;;  %vm6805_vm13 = vmand %vm6773_vm8, %vm6789_vm11  ;;  %v15090_v16 = vld [vmem:[%s18202_s11 + $0x50] sm:$0xff] }
 0xdef   : > { %10642 = vperm.xlu1 %10630, %v10641_v5   ;;  %v9717_v5 = vsel %vm6802_vm0, 1.0, %v18203_v34  ;;  %vm6266_vm0 = vcmp.lt.f32.partialorder %v15018_v36, 16.0  ;;  %v15085_v14 = vsel %vm6805_vm13, 1.0, %v18203_v34  ;;  %v5748_v21 = vadd.f32 -2.0, %v15090_v16 }
 0xdf0   : > { %v10666_v1 = vpack.i.bf16 %v9717_v5, %v9716_v30  ;;  %vm6282_vm2 = vmand %vm6250_vm14, %vm6266_vm0 }
 0xdf1   : > { %v15070_v30 = vsel %vm6282_vm2, 1.0, %v18203_v34  ;;  %vm6806_vm14 = vmand %vm6774_vm9, %vm6790_vm12  ;;  %vm5764_vm11 = vcmp.ge.f32.partialorder %v5748_v21, 0.0  ;;  %vm5780_vm13 = vcmp.lt.f32.partialorder %v5748_v21, 16.0  ;;  %v6005_v21 = vadd.f32 -1.0, %v15018_v36 }
 0xdf3   : > { %10647 = vperm.xlu1 %10630, %v10646_v31   ;;  %v9652_v31 = vsel %vm5790_vm5, 1.0, %v18203_v34  ;;  %vm6527_vm5 = vcmp.lt.f32.partialorder %v6495_v8, 16.0 }
 0xdf4   : > { %v10676_v58 = vpack.i.bf16 %v9653_v52, %v9652_v31  ;;  %vm6543_vm7 = vmand %vm6511_vm3, %vm6527_vm5  ;;  %v5738_v31 = vadd.f32 -2.0, %v14961_v7  ;;  %v5739_v52 = vadd.f32 -2.0, %v14966_v46  ;;  %v15095_v7 = vld [vmem:[%s18202_s11 + $0x58] sm:$0xff]  ;;  %v15098_v46 = vsel %vm6806_vm14, 1.0, %v18203_v34 }
 0xdf5   : > { %v15073_v5 = vsel %vm6543_vm7, 1.0, %v18203_v34 }
 0xdf6   : > { %vm5770_vm7 = vcmp.lt.f32.partialorder %v5738_v31, 16.0  ;;  %vm5771_vm8 = vcmp.lt.f32.partialorder %v5739_v52, 16.0 }
 0xdf7   : > { %10652 = vperm.xlu1 %10630, %v10651_v25   ;;  %v6496_v25 = vadd.f32 1.0, %v15018_v36  ;;  %v6759_v36 = vadd.f32 2.0, %v15027_v62 }
 0xdf9   : > { %vm6512_vm4 = vcmp.ge.f32.partialorder %v6496_v25, 0.0  ;;  %vm6528_vm6 = vcmp.lt.f32.partialorder %v6496_v25, 16.0  ;;  %v10716_v25 = vpack.i.bf16 %v15098_v46, %v15085_v14 }
 0xdfa   : > { %vm6544_vm10 = vmand %vm6512_vm4, %vm6528_vm6  ;;  %vm5754_vm4 = vcmp.ge.f32.partialorder %v5738_v31, 0.0  ;;  %vm5755_vm6 = vcmp.ge.f32.partialorder %v5739_v52, 0.0  ;;  %v6004_v52 = vadd.f32 -1.0, %v15013_v39 }
 0xdfb   : > { %10657 = vperm.xlu1 %10630, %v10656_v27   ;;  %v15059_v27 = vld [vmem:[%s18202_s11 + $0x40] sm:$0xff]  ;;  %v15077_v42 = vsel %vm6544_vm10, 1.0, %v18203_v34  ;;  %vm5786_vm9 = vmand %vm5754_vm4, %vm5770_vm7  ;;  %vm6254_vm7 = vcmp.ge.f32.partialorder %v15067_v57, 0.0 }
 0xdfc   : > { %v5746_v56 = vadd.f32 -2.0, %v15059_v27  ;;  %v10706_v8 = vpack.i.bf16 %v15077_v42, %v15073_v5  ;;  %vm5787_vm10 = vmand %vm5755_vm6, %vm5771_vm8  ;;  %v6755_v5 = vadd.f32 2.0, %v14973_v24  ;;  %vm6269_vm8 = vcmp.lt.f32.partialorder %v15059_v27, 16.0 }
 0xdfd   : > { %v9649_v42 = vsel %vm5787_vm10, 1.0, %v18203_v34 }
 0xdfe   : > { %vm5762_vm15 = vcmp.ge.f32.partialorder %v5746_v56, 0.0  ;;  %vm5778_vm0 = vcmp.lt.f32.partialorder %v5746_v56, 16.0  ;;  %v6756_v56 = vadd.f32 2.0, %v14978_v23 }
 0xdff   : > { %10662 = vperm.xlu1 %10630, %v10661_v17   ;;  %v5747_v17 = vadd.f32 -2.0, %v15067_v57  ;;  %vm5794_vm3 = vmand %vm5762_vm15, %vm5778_vm0  ;;  %vm6771_vm0 = vcmp.ge.f32.partialorder %v6755_v5, 0.0 }
 0xe00   : > { %v15105_v32 = vsel %vm5794_vm3, 1.0, %v18203_v34  ;;  %vm5796_vm15 = vmand %vm5764_vm11, %vm5780_vm13  ;;  %vm6787_vm3 = vcmp.lt.f32.partialorder %v6755_v5, 16.0  ;;  %vm6788_vm4 = vcmp.lt.f32.partialorder %v6756_v56, 16.0  ;;  %v6500_v5 = vadd.f32 1.0, %v15067_v57 }
 0xe01   : > { %vm5763_vm1 = vcmp.ge.f32.partialorder %v5747_v17, 0.0  ;;  %vm5779_vm2 = vcmp.lt.f32.partialorder %v5747_v17, 16.0  ;;  %v15120_v24 = vsel %vm5796_vm15, 1.0, %v18203_v34  ;;  %vm6803_vm6 = vmand %vm6771_vm0, %vm6787_vm3  ;;  %vm6020_vm13 = vcmp.ge.f32.partialorder %v6004_v52, 0.0 }
 0xe02   : > { %vm5795_vm5 = vmand %vm5763_vm1, %vm5779_vm2  ;;  %vm6772_vm1 = vcmp.ge.f32.partialorder %v6756_v56, 0.0  ;;  %v6006_v56 = vadd.f32 -1.0, %v15027_v62  ;;  %vm6036_vm15 = vcmp.lt.f32.partialorder %v6004_v52, 16.0  ;;  %vm6037_vm0 = vcmp.lt.f32.partialorder %v6005_v21, 16.0 }
 0xe03   : > { %10667 = vperm.xlu1 %10630, %v10666_v1   ;;  %v10696_v1 = vpack.i.bf16 %v15070_v30, %v15062_v13  ;;  %v5749_v13 = vadd.f32 -2.0, %v15095_v7  ;;  %v9648_v30 = vsel %vm5786_vm9, 1.0, %v18203_v34  ;;  %vm6270_vm9 = vcmp.lt.f32.partialorder %v15067_v57, 16.0  ;;  %vm6804_vm10 = vmand %vm6772_vm1, %vm6788_vm4 }
 0xe04   : > { %v10625_v17 = vpack.i.bf16 %v9649_v42, %v9648_v30  ;;  %v6499_v30 = vadd.f32 1.0, %v15059_v27  ;;  %vm6516_vm3 = vcmp.ge.f32.partialorder %v6500_v5, 0.0  ;;  %v6498_v52 = vadd.f32 1.0, %v15032_v40 }
 0xe05   : > { %vm5765_vm12 = vcmp.ge.f32.partialorder %v5749_v13, 0.0  ;;  %vm5781_vm14 = vcmp.lt.f32.partialorder %v5749_v13, 16.0  ;;  %v9719_v13 = vsel %vm6804_vm10, 1.0, %v18203_v34 }
 0xe06   : > { %vm5797_vm2 = vmand %vm5765_vm12, %vm5781_vm14  ;;  %10626 = vperm.xlu0 %10624, %v10625_v17   ;;  %vm6021_vm14 = vcmp.ge.f32.partialorder %v6005_v21, 0.0  ;;  %vm6515_vm1 = vcmp.ge.f32.partialorder %v6499_v30, 0.0  ;;  %vm6531_vm4 = vcmp.lt.f32.partialorder %v6499_v30, 16.0  ;;  %v15166_v30 = vld [vmem:[%s18202_s11 + $0x68] sm:$0xff] }
 0xe07   : > { %10677 = vperm.xlu1 %10630, %v10676_v58   ;;  %v15110_v58 = vsel %vm5795_vm5, 1.0, %v18203_v34  ;;  %vm6253_vm5 = vcmp.ge.f32.partialorder %v15059_v27, 0.0  ;;  %v15126_v23 = vsel %vm5797_vm2, 1.0, %v18203_v34  ;;  %vm6286_vm12 = vmand %vm6254_vm7, %vm6270_vm9  ;;  %vm6022_vm7 = vcmp.ge.f32.partialorder %v6006_v56, 0.0 }
 0xe08   : > { %v10726_v31 = vpack.i.bf16 %v15110_v58, %v15105_v32  ;;  %vm6285_vm11 = vmand %vm6253_vm5, %vm6269_vm8  ;;  %v15141_v39 = vsel %vm6286_vm12, 1.0, %v18203_v34  ;;  %vm6532_vm5 = vcmp.lt.f32.partialorder %v6500_v5, 16.0  ;;  %vm6038_vm8 = vcmp.lt.f32.partialorder %v6006_v56, 16.0 }
 0xe09   : > { %v15138_v17 = vsel %vm6285_vm11, 1.0, %v18203_v34  ;;  %vm6052_vm2 = vmand %vm6020_vm13, %vm6036_vm15  ;;  %vm6251_vm13 = vcmp.ge.f32.partialorder %v15027_v62, 0.0 }
 0xe0a   : > { %vm6547_vm9 = vmand %vm6515_vm1, %vm6531_vm4  ;;  %vm6252_vm4 = vcmp.ge.f32.partialorder %v15032_v40, 0.0 }
 0xe0b   : > { %10687 = vperm.xlu1 %10630, %v10686_v47   ;;  %v9718_v47 = vsel %vm6803_vm6, 1.0, %v18203_v34  ;;  %vm6053_vm6 = vmand %vm6021_vm14, %vm6037_vm0  ;;  %v15161_v56 = vsel %vm6547_vm9, 1.0, %v18203_v34 }
 0xe0c   : > { %v10671_v42 = vpack.i.bf16 %v9719_v13, %v9718_v47  ;;  %v6007_v47 = vadd.f32 -1.0, %v15032_v40  ;;  %v9670_v21 = vsel %vm6053_vm6, 1.0, %v18203_v34  ;;  %v6761_v13 = vadd.f32 2.0, %v15059_v27  ;;  %vm6548_vm10 = vmand %vm6516_vm3, %vm6532_vm5 }
 0xe0d   : > { %vm6054_vm14 = vmand %vm6022_vm7, %vm6038_vm8  ;;  %v15172_v5 = vsel %vm6548_vm10, 1.0, %v18203_v34  ;;  %vm6267_vm6 = vcmp.lt.f32.partialorder %v15027_v62, 16.0  ;;  %vm6268_vm7 = vcmp.lt.f32.partialorder %v15032_v40, 16.0 }
 0xe0e   : > { %10672 = vperm.xlu0 %10624, %v10671_v42   ;;  %v6762_v42 = vadd.f32 2.0, %v15067_v57  ;;  %vm6023_vm11 = vcmp.ge.f32.partialorder %v6007_v47, 0.0  ;;  %vm6039_vm12 = vcmp.lt.f32.partialorder %v6007_v47, 16.0  ;;  %vm6777_vm15 = vcmp.ge.f32.partialorder %v6761_v13, 0.0  ;;  %vm6283_vm9 = vmand %vm6251_vm13, %vm6267_vm6 }
 0xe0f   : > { %10697 = vperm.xlu1 %10630, %v10696_v1   ;;  %v9669_v1 = vsel %vm6052_vm2, 1.0, %v18203_v34  ;;  %vm6793_vm1 = vcmp.lt.f32.partialorder %v6761_v13, 16.0  ;;  %vm6055_vm2 = vmand %vm6023_vm11, %vm6039_vm12 }
 0xe10   : > { %v10681_v20 = vpack.i.bf16 %v9670_v21, %v9669_v1  ;;  %vm6778_vm0 = vcmp.ge.f32.partialorder %v6762_v42, 0.0  ;;  %v9671_v1 = vsel %vm6054_vm14, 1.0, %v18203_v34  ;;  %vm6794_vm3 = vcmp.lt.f32.partialorder %v6762_v42, 16.0  ;;  %vm6809_vm5 = vmand %vm6777_vm15, %vm6793_vm1  ;;  %v15195_v42 = vld [vmem:[%s18202_s11 + $0x70] sm:$0xff] }
 0xe11   : > { %v9672_v47 = vsel %vm6055_vm2, 1.0, %v18203_v34  ;;  %vm6810_vm8 = vmand %vm6778_vm0, %vm6794_vm3  ;;  %v6497_v21 = vadd.f32 1.0, %v15027_v62  ;;  %vm6514_vm1 = vcmp.ge.f32.partialorder %v6498_v52, 0.0 }
 0xe12   : > { %10682 = vperm.xlu0 %10624, %v10681_v20   ;;  %v10691_v46 = vpack.i.bf16 %v9672_v47, %v9671_v1  ;;  %v15182_v20 = vsel %vm6809_vm5, 1.0, %v18203_v34  ;;  %v15187_v13 = vsel %vm6810_vm8, 1.0, %v18203_v34  ;;  %vm6284_vm12 = vmand %vm6252_vm4, %vm6268_vm7  ;;  %v9688_v47 = vsel %vm6283_vm9, 1.0, %v18203_v34 }
 0xe13   : > { %10707 = vperm.xlu1 %10630, %v10706_v8   ;;  %v15158_v8 = vld [vmem:[%s18202_s11 + $0x60] sm:$0xff]  ;;  %v9689_v32 = vsel %vm6284_vm12, 1.0, %v18203_v34  ;;  %vm6513_vm0 = vcmp.ge.f32.partialorder %v6497_v21, 0.0  ;;  %vm6529_vm2 = vcmp.lt.f32.partialorder %v6497_v21, 16.0  ;;  %vm6530_vm4 = vcmp.lt.f32.partialorder %v6498_v52, 16.0 }
 0xe14   : > { %v5750_v14 = vadd.f32 -2.0, %v15158_v8  ;;  %vm6545_vm5 = vmand %vm6513_vm0, %vm6529_vm2  ;;  %v18204_v21 = vpack.i.bf16 %v15126_v23, %v15120_v24  ;;  %vm6775_vm12 = vcmp.ge.f32.partialorder %v6759_v36, 0.0  ;;  %vm6792_vm0 = vcmp.lt.f32.partialorder %v6760_v53, 16.0 }
 0xe15   : > { %vm6546_vm6 = vmand %vm6514_vm1, %vm6530_vm4  ;;  %vm6257_vm2 = vcmp.ge.f32.partialorder %v15158_v8, 0.0  ;;  %v18205_v23 = vpack.i.bf16 %v15141_v39, %v15138_v17  ;;  %v6503_v17 = vadd.f32 1.0, %v15158_v8 }
 0xe16   : > { %vm5766_vm10 = vcmp.ge.f32.partialorder %v5750_v14, 0.0  ;;  %vm5782_vm11 = vcmp.lt.f32.partialorder %v5750_v14, 16.0  ;;  %10692 = vperm.xlu0 %10624, %v10691_v46   ;;  %v15210_v14 = vld [vmem:[%s18202_s11 + $0x78] sm:$0xff]  ;;  %v5752_v46 = vadd.f32 -2.0, %v15195_v42  ;;  %v9706_v58 = vsel %vm6546_vm6, 1.0, %v18203_v34 }
 0xe17   : > { %10717 = vperm.xlu1 %10630, %v10716_v25   ;;  %v5751_v25 = vadd.f32 -2.0, %v15166_v30  ;;  %vm5798_vm15 = vmand %vm5766_vm10, %vm5782_vm11  ;;  %v5753_v1 = vadd.f32 -2.0, %v15210_v14  ;;  %vm6274_vm6 = vcmp.lt.f32.partialorder %v15166_v30, 16.0 }
 0xe18   : > { %vm5768_vm7 = vcmp.ge.f32.partialorder %v5752_v46, 0.0  ;;  %vm5784_vm8 = vcmp.lt.f32.partialorder %v5752_v46, 16.0  ;;  %v6504_v46 = vadd.f32 1.0, %v15166_v30 }
 0xe19   : > { %vm5767_vm13 = vcmp.ge.f32.partialorder %v5751_v25, 0.0  ;;  %vm5783_vm14 = vcmp.lt.f32.partialorder %v5751_v25, 16.0  ;;  %v15217_v25 = vsel %vm5798_vm15, 1.0, %v18203_v34  ;;  %vm5769_vm9 = vcmp.ge.f32.partialorder %v5753_v1, 0.0  ;;  %vm5800_vm11 = vmand %vm5768_vm7, %vm5784_vm8 }
 0xe1a   : > { %vm5799_vm3 = vmand %vm5767_vm13, %vm5783_vm14  ;;  %vm5785_vm10 = vcmp.lt.f32.partialorder %v5753_v1, 16.0  ;;  %v15232_v40 = vsel %vm5800_vm11, 1.0, %v18203_v34  ;;  %vm6776_vm14 = vcmp.ge.f32.partialorder %v6760_v53, 0.0  ;;  %vm6791_vm15 = vcmp.lt.f32.partialorder %v6759_v36, 16.0 }
 0xe1b   : > { %10727 = vperm.xlu1 %10630, %v10726_v31   ;;  %v10701_v31 = vpack.i.bf16 %v9689_v32, %v9688_v47  ;;  %v15226_v47 = vsel %vm5799_vm3, 1.0, %v18203_v34  ;;  %v9705_v32 = vsel %vm6545_vm5, 1.0, %v18203_v34  ;;  %vm5801_vm13 = vmand %vm5769_vm9, %vm5785_vm10  ;;  %vm6258_vm3 = vcmp.ge.f32.partialorder %v15166_v30, 0.0 }
 0xe1c   : > { %v10711_v62 = vpack.i.bf16 %v9706_v58, %v9705_v32  ;;  %v15235_v24 = vsel %vm5801_vm13, 1.0, %v18203_v34  ;;  %vm6807_vm1 = vmand %vm6775_vm12, %vm6791_vm15  ;;  %v10776_v52 = vpack.i.bf16 %v15226_v47, %v15217_v25  ;;  %vm6273_vm5 = vcmp.lt.f32.partialorder %v15158_v8, 16.0 }
 0xe1d   : > { %10702 = vperm.xlu0 %10624, %v10701_v31   ;;  %vm6808_vm4 = vmand %vm6776_vm14, %vm6792_vm0  ;;  %v9722_v36 = vsel %vm6807_vm1, 1.0, %v18203_v34  ;;  %v6008_v1 = vadd.f32 -1.0, %v15059_v27  ;;  %v6009_v58 = vadd.f32 -1.0, %v15067_v57  ;;  %v18206_v57 = vpack.i.bf16 %v15172_v5, %v15161_v56 }
 0xe1e   : > { %v9723_v53 = vsel %vm6808_vm4, 1.0, %v18203_v34  ;;  %vm6289_vm7 = vmand %vm6257_vm2, %vm6273_vm5  ;;  %vm6519_vm14 = vcmp.ge.f32.partialorder %v6503_v17, 0.0  ;;  %vm6520_vm15 = vcmp.ge.f32.partialorder %v6504_v46, 0.0  ;;  %vm6535_vm1 = vcmp.lt.f32.partialorder %v6503_v17, 16.0 }
 0xe1f   : > { %10737 = vperm.xlu1 %10630, %v18204_v21   ;;  %v10721_v31 = vpack.i.bf16 %v9723_v53, %v9722_v36  ;;  %vm6290_vm8 = vmand %vm6258_vm3, %vm6274_vm6  ;;  %v6010_v21 = vadd.f32 -1.0, %v15090_v16  ;;  %v15258_v32 = vsel %vm6289_vm7, 1.0, %v18203_v34  ;;  %vm6024_vm9 = vcmp.ge.f32.partialorder %v6008_v1, 0.0 }
 0xe20   : > { %vm6025_vm10 = vcmp.ge.f32.partialorder %v6009_v58, 0.0  ;;  %vm6040_vm11 = vcmp.lt.f32.partialorder %v6008_v1, 16.0  ;;  %vm6041_vm12 = vcmp.lt.f32.partialorder %v6009_v58, 16.0  ;;  %vm6536_vm2 = vcmp.lt.f32.partialorder %v6504_v46, 16.0  ;;  %vm6551_vm3 = vmand %vm6519_vm14, %vm6535_vm1 }
 0xe21   : > { %10712 = vperm.xlu0 %10624, %v10711_v62   ;;  %v15264_v62 = vsel %vm6290_vm8, 1.0, %v18203_v34  ;;  %vm6056_vm13 = vmand %vm6024_vm9, %vm6040_vm11  ;;  %v6011_v56 = vadd.f32 -1.0, %v15095_v7  ;;  %vm6026_vm4 = vcmp.ge.f32.partialorder %v6010_v21, 0.0  ;;  %vm6042_vm5 = vcmp.lt.f32.partialorder %v6010_v21, 16.0 }
 0xe22   : > { %vm6057_vm0 = vmand %vm6025_vm10, %vm6041_vm12  ;;  %v9673_v36 = vsel %vm6056_vm13, 1.0, %v18203_v34  ;;  %v18207_v17 = vpack.i.bf16 %v15187_v13, %v15182_v20  ;;  %v15276_v46 = vsel %vm6551_vm3, 1.0, %v18203_v34  ;;  %v6766_v21 = vadd.f32 2.0, %v15166_v30 }
 0xe23   : > { %10747 = vperm.xlu1 %10630, %v18205_v23   ;;  %v9674_v53 = vsel %vm6057_vm0, 1.0, %v18203_v34  ;;  %vm6552_vm6 = vmand %vm6520_vm15, %vm6536_vm2  ;;  %vm6027_vm7 = vcmp.ge.f32.partialorder %v6011_v56, 0.0  ;;  %vm6043_vm8 = vcmp.lt.f32.partialorder %v6011_v56, 16.0  ;;  %vm6255_vm0 = vcmp.ge.f32.partialorder %v15090_v16, 0.0 }
 0xe24   : > { %v10731_v58 = vpack.i.bf16 %v9674_v53, %v9673_v36  ;;  %vm6058_vm9 = vmand %vm6026_vm4, %vm6042_vm5  ;;  %v15280_v53 = vsel %vm6552_vm6, 1.0, %v18203_v34  ;;  %vm6782_vm12 = vcmp.ge.f32.partialorder %v6766_v21, 0.0  ;;  %vm6798_vm14 = vcmp.lt.f32.partialorder %v6766_v21, 16.0 }
 0xe25   : > { %10722 = vperm.xlu0 %10624, %v10721_v31   ;;  %v6765_v31 = vadd.f32 2.0, %v15158_v8  ;;  %vm6059_vm10 = vmand %vm6027_vm7, %vm6043_vm8  ;;  %v9675_v1 = vsel %vm6058_vm9, 1.0, %v18203_v34  ;;  %vm6256_vm1 = vcmp.ge.f32.partialorder %v15095_v7, 0.0  ;;  %vm6271_vm2 = vcmp.lt.f32.partialorder %v15090_v16, 16.0 }
 0xe26   : > { %v9676_v20 = vsel %vm6059_vm10, 1.0, %v18203_v34  ;;  %vm6814_vm3 = vmand %vm6782_vm12, %vm6798_vm14  ;;  %vm6272_vm4 = vcmp.lt.f32.partialorder %v15095_v7, 16.0  ;;  %v6501_v47 = vadd.f32 1.0, %v15090_v16 }
 0xe27   : > { %v5179_v27 = vpop.xlane.xlu0 %5178  ;;  %10757 = vperm.xlu1 %10630, %v18206_v57   ;;  %vm6781_vm11 = vcmp.ge.f32.partialorder %v6765_v31, 0.0  ;;  %v10741_v56 = vpack.i.bf16 %v9676_v20, %v9675_v1  ;;  %vm6797_vm13 = vcmp.lt.f32.partialorder %v6765_v31, 16.0  ;;  %vm6287_vm5 = vmand %vm6255_vm0, %vm6271_vm2  ;;  %v18209_v20 = vpack.i.bf16 %v15264_v62, %v15258_v32 }
 0xe28   : > { %v5210_v23 = vmul.f32 0.03125, %v5179_v27  ;;  %vm6813_vm15 = vmand %vm6781_vm11, %vm6797_vm13  ;;  %v9692_v31 = vsel %vm6287_vm5, 1.0, %v18203_v34  ;;  %vm6517_vm7 = vcmp.ge.f32.partialorder %v6501_v47, 0.0  ;;  %vm6533_vm9 = vcmp.lt.f32.partialorder %v6501_v47, 16.0  ;;  %v15326_v47 = vld [vmem:[%s12809_s3 + $0x2] ss:$0 sm:$0xff] }
 0xe29   : > { %10732 = vperm.xlu0 %10624, %v10731_v58   ;;  %v10806_v58 = vpack.i.bf16 %v15280_v53, %v15276_v46  ;;  %v15295_v25 = vsel %vm6813_vm15, 1.0, %v18203_v34  ;;  %vm6288_vm6 = vmand %vm6256_vm1, %vm6272_vm4  ;;  %v6014_v62 = vadd.f32 -1.0, %v15195_v42 }
 0xe2a   : > { %v5226_v5 = vadd.f32 1e-05, %v5210_v23  ;;  %v9693_v46 = vsel %vm6288_vm6, 1.0, %v18203_v34  ;;  %vm6549_vm11 = vmand %vm6517_vm7, %vm6533_vm9 }
 0xe2b   : > { %v5181_v27 = vpop.xlane.xlu1 %5180  ;;  %v5183_v57 = vpop.xlane.xlu0 %5182  ;;  %10767 = vperm.xlu1 %10630, %v18207_v17   ;;  %v10751_v21 = vpack.i.bf16 %v9693_v46, %v9692_v31  ;;  %vm6030_vm9 = vcmp.ge.f32.partialorder %v6014_v62, 0.0 }
 0xe2c   : > { %11282 = vrsqrt.f32 %v5226_v5  ;;  %v5211_v23 = vmul.f32 0.03125, %v5181_v27  ;;  %v5212_v36 = vmul.f32 0.03125, %v5183_v57  ;;  %v6763_v27 = vadd.f32 2.0, %v15090_v16 }
 0xe2d   : > { %10742 = vperm.xlu0 %10624, %v10741_v56   ;;  %v18208_v57 = vpack.i.bf16 %v15235_v24, %v15232_v40  ;;  %v6012_v16 = vadd.f32 -1.0, %v15158_v8  ;;  %v6013_v24 = vadd.f32 -1.0, %v15166_v30 }
 0xe2e   : > { %v5227_v13 = vadd.f32 1e-05, %v5211_v23  ;;  %v5228_v17 = vadd.f32 1e-05, %v5212_v36  ;;  %v6764_v23 = vadd.f32 2.0, %v15095_v7  ;;  %v9709_v36 = vsel %vm6549_vm11, 1.0, %v18203_v34 }
 0xe2f   : > { %v5185_v39 = vpop.xlane.xlu1 %5184  ;;  %10777 = vperm.xlu1 %10630, %v10776_v52   ;;  %v6502_v52 = vadd.f32 1.0, %v15095_v7  ;;  %vm6779_vm13 = vcmp.ge.f32.partialorder %v6763_v27, 0.0  ;;  %vm6795_vm14 = vcmp.lt.f32.partialorder %v6763_v27, 16.0  ;;  %vm6044_vm4 = vcmp.lt.f32.partialorder %v6012_v16, 16.0 }
 0xe30   : > { %11284 = vrsqrt.f32 %v5227_v13  ;;  %v5213_v5 = vmul.f32 0.03125, %v5185_v39  ;;  %v15300_v39 = vsel %vm6814_vm3, 1.0, %v18203_v34  ;;  %vm6780_vm15 = vcmp.ge.f32.partialorder %v6764_v23, 0.0  ;;  %vm6811_vm1 = vmand %vm6779_vm13, %vm6795_vm14 }
 0xe31   : > { %11286 = vrsqrt.f32 %v5228_v17  ;;  %vm6518_vm8 = vcmp.ge.f32.partialorder %v6502_v52, 0.0  ;;  %vm6534_vm10 = vcmp.lt.f32.partialorder %v6502_v52, 16.0  ;;  %10752 = vperm.xlu0 %10624, %v10751_v21   ;;  %vm6796_vm0 = vcmp.lt.f32.partialorder %v6764_v23, 16.0 }
 0xe32   : > { %v5229_v1 = vadd.f32 1e-05, %v5213_v5  ;;  %vm6550_vm12 = vmand %vm6518_vm8, %vm6534_vm10  ;;  %v9726_v13 = vsel %vm6811_vm1, 1.0, %v18203_v34  ;;  %vm6028_vm3 = vcmp.ge.f32.partialorder %v6012_v16, 0.0  ;;  %vm6029_vm5 = vcmp.ge.f32.partialorder %v6013_v24, 0.0 }
 0xe33   : > { %10787 = vperm.xlu1 %10630, %v18208_v57   ;;  %v9710_v40 = vsel %vm6550_vm12, 1.0, %v18203_v34  ;;  %vm6812_vm2 = vmand %vm6780_vm15, %vm6796_vm0  ;;  %vm6045_vm6 = vcmp.lt.f32.partialorder %v6013_v24, 16.0  ;;  %v10816_v30 = vpack.i.bf16 %v15300_v39, %v15295_v25  ;;  %v6015_v5 = vadd.f32 -1.0, %v15210_v14 }
 0xe34   : > { %11288 = vrsqrt.f32 %v5229_v1  ;;  %v10761_v7 = vpack.i.bf16 %v9710_v40, %v9709_v36  ;;  %v9727_v17 = vsel %vm6812_vm2, 1.0, %v18203_v34  ;;  %vm6060_vm7 = vmand %vm6028_vm3, %vm6044_vm4  ;;  %vm6046_vm11 = vcmp.lt.f32.partialorder %v6014_v62, 16.0  ;;  %v15333_v36 = vld [vmem:[%s12814_s25 + $0x2] ss:$0 sm:$0xff] }
 0xe35   : > { %vm6061_vm8 = vmand %vm6029_vm5, %vm6045_vm6  ;;  %v9677_v32 = vsel %vm6060_vm7, 1.0, %v18203_v34  ;;  %v10771_v31 = vpack.i.bf16 %v9727_v17, %v9726_v13  ;;  %vm6031_vm10 = vcmp.ge.f32.partialorder %v6015_v5, 0.0  ;;  %vm6259_vm12 = vcmp.ge.f32.partialorder %v15195_v42, 0.0 }
 0xe36   : > { %10762 = vperm.xlu0 %10624, %v10761_v7   ;;  %v9678_v27 = vsel %vm6061_vm8, 1.0, %v18203_v34  ;;  %vm6062_vm13 = vmand %vm6030_vm9, %vm6046_vm11  ;;  %vm6047_vm14 = vcmp.lt.f32.partialorder %v6015_v5, 16.0  ;;  %vm6260_vm15 = vcmp.ge.f32.partialorder %v15210_v14, 0.0  ;;  %vm6275_vm0 = vcmp.lt.f32.partialorder %v15195_v42, 16.0 }
 0xe37   : > { %v5187_v53 = vpop.xlane.xlu0 %5186  ;;  %10797 = vperm.xlu1 %10630, %v18209_v20   ;;  %v10781_v21 = vpack.i.bf16 %v9678_v27, %v9677_v32  ;;  %vm6063_vm1 = vmand %vm6031_vm10, %vm6047_vm14  ;;  %vm6276_vm2 = vcmp.lt.f32.partialorder %v15210_v14, 16.0  ;;  %v6505_v13 = vadd.f32 1.0, %v15195_v42  ;;  %v6506_v27 = vadd.f32 1.0, %v15210_v14 }
 0xe38   : > { %v5214_v8 = vmul.f32 0.03125, %v5187_v53  ;;  %v9679_v53 = vsel %vm6062_vm13, 1.0, %v18203_v34  ;;  %v9680_v7 = vsel %vm6063_vm1, 1.0, %v18203_v34  ;;  %vm6291_vm3 = vmand %vm6259_vm12, %vm6275_vm0  ;;  %vm5721_vm1 = vcmp.lt.s32.totalorder %v18105_v60, 2 }
 0xe39   : > { %v11283_v56 = vpop.eup %11282  ;;  %vm6292_vm4 = vmand %vm6260_vm15, %vm6276_vm2  ;;  %v10791_v32 = vpack.i.bf16 %v9680_v7, %v9679_v53  ;;  %vm6521_vm5 = vcmp.ge.f32.partialorder %v6505_v13, 0.0  ;;  %vm6537_vm6 = vcmp.lt.f32.partialorder %v6505_v13, 16.0  ;;  %vm6522_vm8 = vcmp.ge.f32.partialorder %v6506_v27, 0.0 }
 0xe3a   : > { %v5258_v52 = vmul.f32 %v11283_v56, %v14850_v59  ;;  %v5230_v1 = vadd.f32 1e-05, %v5214_v8  ;;  %10772 = vperm.xlu0 %10624, %v10771_v31   ;;  %v9697_v31 = vsel %vm6292_vm4, 1.0, %v18203_v34  ;;  %vm6553_vm7 = vmand %vm6521_vm5, %vm6537_vm6  ;;  %vm6538_vm9 = vcmp.lt.f32.partialorder %v6506_v27, 16.0 }
 0xe3b   : > { %v5189_v57 = vpop.xlane.xlu1 %5188  ;;  %v5191_v46 = vpop.xlane.xlu0 %5190  ;;  %10807 = vperm.xlu1 %10630, %v10806_v58   ;;  %vm6554_vm10 = vmand %vm6522_vm8, %vm6538_vm9  ;;  %vm5983_vm2 = vcmp.lt.s32.totalorder %v18105_v60, 1  ;;  %vm6474_vm4 = vcmp.lt.s32.totalorder %v18105_v60, 7 }
 0xe3c   : > { %11290 = vrsqrt.f32 %v5230_v1  ;;  %v5215_v25 = vmul.f32 0.03125, %v5189_v57  ;;  %v5216_v39 = vmul.f32 0.03125, %v5191_v46  ;;  %v5278_v23 = vmul.f32 %v15326_v47, %v5258_v52 }
 0xe3d   : > { %v11285_v59 = vpop.eup %11284  ;;  %v9696_v1 = vsel %vm6291_vm3, 1.0, %v18203_v34  ;;  %vm6736_vm3 = vcmp.lt.s32.totalorder %v18105_v60, 6 }
 0xe3e   : > { %v11287_v58 = vpop.eup %11286  ;;  %v5259_v16 = vmul.f32 %v11285_v59, %v14860_v9  ;;  %v5231_v40 = vadd.f32 1e-05, %v5215_v25  ;;  %v5232_v24 = vadd.f32 1e-05, %v5216_v39  ;;  %v5298_v56 = vadd.f32 %v15333_v36, %v5278_v23  ;;  %10782 = vperm.xlu0 %10624, %v10781_v21  }
 0xe3f   : > { %v5193_v20 = vpop.xlane.xlu1 %5192  ;;  %10817 = vperm.xlu1 %10630, %v10816_v30   ;;  %v5260_v30 = vmul.f32 %v11287_v58, %v14857_v19  ;;  %v6767_v19 = vadd.f32 2.0, %v15195_v42  ;;  %v10801_v39 = vpack.i.bf16 %v9697_v31, %v9696_v1  ;;  %v9713_v59 = vsel %vm6553_vm7, 1.0, %v18203_v34 }
 0xe40   : > { %v5279_v9 = vmul.f32 %v15326_v47, %v5259_v16  ;;  %11292 = vrsqrt.f32 %v5231_v40  ;;  %v5217_v8 = vmul.f32 0.03125, %v5193_v20  ;;  %v9714_v23 = vsel %vm6554_vm10, 1.0, %v18203_v34 }
 0xe41   : > { %v11289_v17 = vpop.eup %11288  ;;  %11294 = vrsqrt.f32 %v5232_v24  ;;  %v5280_v25 = vmul.f32 %v15326_v47, %v5260_v30  ;;  %vm6783_vm11 = vcmp.ge.f32.partialorder %v6767_v19, 0.0  ;;  %vm6799_vm12 = vcmp.lt.f32.partialorder %v6767_v19, 16.0 }
 0xe42   : > { %v5233_v62 = vadd.f32 1e-05, %v5217_v8  ;;  %v5299_v5 = vadd.f32 %v15333_v36, %v5279_v9  ;;  %v5261_v52 = vmul.f32 %v11289_v17, %v14868_v2  ;;  %v6768_v2 = vadd.f32 2.0, %v15210_v14  ;;  %10792 = vperm.xlu0 %10624, %v10791_v32   ;;  %vm6815_vm15 = vmand %vm6783_vm11, %vm6799_vm12 }
 0xe43   : > { %v5300_v40 = vadd.f32 %v15333_v36, %v5280_v25  ;;  %v10811_v53 = vpack.i.bf16 %v9714_v23, %v9713_v59  ;;  %v9730_v13 = vsel %vm6815_vm15, 1.0, %v18203_v34 }
 0xe44   : > { %11296 = vrsqrt.f32 %v5233_v62  ;;  %v5332_v57 = vpack.c.bf16 %v5299_v5, %v5298_v56  ;;  %v5281_v46 = vmul.f32 %v15326_v47, %v5261_v52  ;;  %vm6784_vm13 = vcmp.ge.f32.partialorder %v6768_v2, 0.0 }
 0xe45   : > { %vm6800_vm14 = vcmp.lt.f32.partialorder %v6768_v2, 16.0 }
 0xe46   : > { %5453 = vmatmul.mubr.bf16.vlgmr.msra.gmra.mxu1 %v5332_v57  ;;  %v5301_v14 = vadd.f32 %v15333_v36, %v5281_v46  ;;  %vm6816_vm0 = vmand %vm6784_vm13, %vm6800_vm14  ;;  %10802 = vperm.xlu0 %10624, %v10801_v39  }
 0xe47   : > { %v5195_v21 = vpop.xlane.xlu0 %5194  ;;  %5462 = vmatprep.mubr.bf16.mxu1 %v18111_v37  ;;  %v9731_v9 = vsel %vm6816_vm0, 1.0, %v18203_v34 }
 0xe48   : > { %v5218_v42 = vmul.f32 0.03125, %v5195_v21  ;;  %v5333_v56 = vpack.c.bf16 %v5301_v14, %v5300_v40  ;;  %v10821_v1 = vpack.i.bf16 %v9731_v9, %v9730_v13 }
 0xe49   : > { %v11291_v58 = vpop.eup %11290 }
 0xe4a   : > { %v5234_v16 = vadd.f32 1e-05, %v5218_v42  ;;  %v5262_v24 = vmul.f32 %v11291_v58, %v14876_v63  ;;  %10812 = vperm.xlu0 %10624, %v10811_v53  }
 0xe4b   : > { %v5197_v20 = vpop.xlane.xlu1 %5196  ;;  %v5199_v7 = vpop.xlane.xlu0 %5198 }
 0xe4c   : > { %11298 = vrsqrt.f32 %v5234_v16  ;;  %v5219_v8 = vmul.f32 0.03125, %v5197_v20  ;;  %v5220_v17 = vmul.f32 0.03125, %v5199_v7  ;;  %v5282_v32 = vmul.f32 %v15326_v47, %v5262_v24 }
 0xe4d   : > { %v11293_v30 = vpop.eup %11292 }
 0xe4e   : > { %v11295_v62 = vpop.eup %11294  ;;  %v5235_v5 = vadd.f32 1e-05, %v5219_v8  ;;  %v5236_v52 = vadd.f32 1e-05, %v5220_v17  ;;  %5463 = vmatmul.mubr.bf16.gmra.mxu1 %v5333_v56  ;;  %v5263_v63 = vmul.f32 %v11293_v30, %v14887_v12  ;;  %v5302_v46 = vadd.f32 %v15333_v36, %v5282_v32  ;;  %10822 = vperm.xlu0 %10624, %v10821_v1  }
 0xe4f   : > { %v5201_v31 = vpop.xlane.xlu1 %5200  ;;  %5472 = vmatprep.mubr.bf16.mxu1 %v18111_v37  ;;  %v5264_v25 = vmul.f32 %v11295_v62, %v14884_v44 }
 0xe50   : > { %11300 = vrsqrt.f32 %v5235_v5  ;;  %v5221_v34 = vmul.f32 0.03125, %v5201_v31  ;;  %v5283_v27 = vmul.f32 %v15326_v47, %v5263_v63 }
 0xe51   : > { %v11297_v57 = vpop.eup %11296  ;;  %11302 = vrsqrt.f32 %v5236_v52  ;;  %v5284_v59 = vmul.f32 %v15326_v47, %v5264_v25 }
 0xe52   : > { %v5237_v19 = vadd.f32 1e-05, %v5221_v34  ;;  %v5303_v2 = vadd.f32 %v15333_v36, %v5283_v27  ;;  %v5265_v12 = vmul.f32 %v11297_v57, %v14897_v11 }
 0xe53   : > { %v5304_v44 = vadd.f32 %v15333_v36, %v5284_v59 }
 0xe54   : > { %11304 = vrsqrt.f32 %v5237_v19  ;;  %v5334_v39 = vpack.c.bf16 %v5303_v2, %v5302_v46  ;;  %v5285_v21 = vmul.f32 %v15326_v47, %v5265_v12 }
 0xe56   : > { %5473 = vmatmul.mubr.bf16.gmra.mxu1 %v5334_v39  ;;  %v5305_v14 = vadd.f32 %v15333_v36, %v5285_v21 }
 0xe57   : > { %v5203_v23 = vpop.xlane.xlu0 %5202  ;;  %5482 = vmatprep.mubr.bf16.mxu1 %v18111_v37 }
 0xe58   : > { %v5222_v42 = vmul.f32 0.03125, %v5203_v23  ;;  %v5335_v7 = vpack.c.bf16 %v5305_v14, %v5304_v44 }
 0xe59   : > { %v11299_v58 = vpop.eup %11298 }
 0xe5a   : > { %v5238_v16 = vadd.f32 1e-05, %v5222_v42  ;;  %v5266_v11 = vmul.f32 %v11299_v58, %v14907_v6 }
 0xe5b   : > { %v5205_v40 = vpop.xlane.xlu1 %5204  ;;  %v5207_v24 = vpop.xlane.xlu0 %5206 }
 0xe5c   : > { %11306 = vrsqrt.f32 %v5238_v16  ;;  %v5223_v53 = vmul.f32 0.03125, %v5205_v40  ;;  %v5224_v20 = vmul.f32 0.03125, %v5207_v24  ;;  %v5286_v9 = vmul.f32 %v15326_v47, %v5266_v11 }
 0xe5d   : > { %v11301_v13 = vpop.eup %11300 }
 0xe5e   : > { %v11303_v8 = vpop.eup %11302  ;;  %v5239_v17 = vadd.f32 1e-05, %v5223_v53  ;;  %v5240_v56 = vadd.f32 1e-05, %v5224_v20  ;;  %5483 = vmatmul.mubr.bf16.gmra.mxu1 %v5335_v7  ;;  %v5267_v30 = vmul.f32 %v11301_v13, %v14919_v38  ;;  %v5306_v52 = vadd.f32 %v15333_v36, %v5286_v9 }
 0xe5f   : > { %v5209_v32 = vpop.xlane.xlu1 %5208  ;;  %5492 = vmatprep.mubr.bf16.mxu1 %v18111_v37  ;;  %v5268_v63 = vmul.f32 %v11303_v8, %v14916_v54 }
 0xe60   : > { %11308 = vrsqrt.f32 %v5239_v17  ;;  %v5225_v6 = vmul.f32 0.03125, %v5209_v32  ;;  %v5287_v62 = vmul.f32 %v15326_v47, %v5267_v30 }
 0xe61   : > { %v11305_v5 = vpop.eup %11304  ;;  %11310 = vrsqrt.f32 %v5240_v56  ;;  %v5288_v57 = vmul.f32 %v15326_v47, %v5268_v63 }
 0xe62   : > { %v5241_v1 = vadd.f32 1e-05, %v5225_v6  ;;  %v5307_v31 = vadd.f32 %v15333_v36, %v5287_v62  ;;  %v5269_v34 = vmul.f32 %v11305_v5, %v14929_v29 }
 0xe63   : > { %v5308_v54 = vadd.f32 %v15333_v36, %v5288_v57  ;;  %v15408_v53 = vpop.permute.xlu1 %10632 }
 0xe64   : > { %11312 = vrsqrt.f32 %v5241_v1  ;;  %v5336_v38 = vpack.c.bf16 %v5307_v31, %v5306_v52  ;;  %v5289_v27 = vmul.f32 %v15326_v47, %v5269_v34  ;;  %18210 = vst [vmem:[#allocation107_spill] sm:$0xff] %v15408_v53 }
 0xe66   : > { %5493 = vmatmul.mubr.bf16.gmra.mxu1 %v5336_v38  ;;  %v5309_v46 = vadd.f32 %v15333_v36, %v5289_v27 }
 0xe67   : > { %5502 = vmatprep.mubr.bf16.mxu1 %v18111_v37  ;;  %v15410_v20 = vpop.permute.xlu1 %10637 }
 0xe68   : > { %v5337_v25 = vpack.c.bf16 %v5309_v46, %v5308_v54  ;;  %18211 = vst [vmem:[#allocation78_spill] sm:$0xff] %v15410_v20 }
 0xe69   : > { %v11307_v19 = vpop.eup %11306 }
 0xe6a   : > { %v5270_v2 = vmul.f32 %v11307_v19, %v14936_v26 }
 0xe6c   : > { %v5290_v39 = vmul.f32 %v15326_v47, %v5270_v2 }
 0xe6d   : > { %v11309_v12 = vpop.eup %11308 }
 0xe6e   : > { %5503 = vmatmul.mubr.bf16.gmra.mxu1 %v5337_v25  ;;  %v5271_v29 = vmul.f32 %v11309_v12, %v14943_v28  ;;  %v11311_v21 = vpop.eup %11310  ;;  %v5310_v42 = vadd.f32 %v15333_v36, %v5290_v39  ;;  %v15469_v25 = vld [vmem:[%s12819_s19 + $0x3] ss:$0 sm:$0xff] }
 0xe6f   : > { %5512 = vmatprep.mubr.bf16.mxu1 %v18111_v37  ;;  %v5272_v58 = vmul.f32 %v11311_v21, %v14946_v4  ;;  %v15412_v4 = vpop.permute.xlu1 %10642 }
 0xe70   : > { %v5291_v59 = vmul.f32 %v15326_v47, %v5271_v29 }
 0xe71   : > { %v11313_v23 = vpop.eup %11312  ;;  %v5292_v28 = vmul.f32 %v15326_v47, %v5272_v58 }
 0xe72   : > { %v5311_v14 = vadd.f32 %v15333_v36, %v5291_v59  ;;  %v5273_v26 = vmul.f32 %v11313_v23, %v14954_v22 }
 0xe73   : > { %v5312_v40 = vadd.f32 %v15333_v36, %v5292_v28  ;;  %v15414_v22 = vpop.permute.xlu1 %10647 }
 0xe74   : > { %v5338_v16 = vpack.c.bf16 %v5311_v14, %v5310_v42  ;;  %v5293_v44 = vmul.f32 %v15326_v47, %v5273_v26 }
 0xe76   : > { %5513 = vmatmul.mubr.bf16.gmra.mxu1 %v5338_v16  ;;  %v5313_v11 = vadd.f32 %v15333_v36, %v5293_v44 }
 0xe77   : > { %5522 = vmatprep.mubr.bf16.mxu1 %v18111_v37  ;;  %v15416_v7 = vpop.permute.xlu1 %10652 }
 0xe78   : > { %v5339_v24 = vpack.c.bf16 %v5313_v11, %v5312_v40  ;;  %18212 = vst [vmem:[#allocation104_spill] sm:$0xff] %v15416_v7 }
 0xe7b   : > { %v15418_v13 = vpop.permute.xlu1 %10657 }
 0xe7e   : > { %5523 = vmatmul.mubr.bf16.gmra.mxu1 %v5339_v24 }
 0xe7f   : > { %v15420_v47 = vpop.permute.xlu1 %10662 }
 0xe81   : > { %v15424_v9 = vpop.permute.xlu0 %10626 }
 0xe82   : > { %18214 = vst [vmem:[#allocation101_spill] sm:$0xff] %v15424_v9 }
 0xe83   : > { %v15422_v37 = vpop.permute.xlu1 %10667 }
 0xe84   : > { %18213 = vst [vmem:[#allocation77_spill] sm:$0xff] %v15422_v37 }
 0xe87   : > { %v15426_v36 = vpop.permute.xlu1 %10677 }
 0xe89   : > { %v15428_v8 = vpop.permute.xlu0 %10672 }
 0xe8b   : > { %v15430_v17 = vpop.permute.xlu1 %10687 }
 0xe8d   : > { %v15432_v56 = vpop.permute.xlu0 %10682 }
 0xe8f   : > { %v15434_v30 = vpop.permute.xlu1 %10697 }
 0xe91   : > { %v15436_v32 = vpop.permute.xlu0 %10692 }
 0xe93   : > { %v15438_v6 = vpop.permute.xlu1 %10707 }
 0xe97   : > { %v15442_v5 = vpop.permute.xlu1 %10717 }
 0xe98   : > { %v15440_v62 = vpop.permute.xlu0 %10702 }
 0xe9b   : > { %v15446_v63 = vpop.permute.xlu1 %10727 }
 0xe9c   : > { %v15444_v52 = vpop.permute.xlu0 %10712 }
 0xe9f   : > { %v15450_v31 = vpop.permute.xlu1 %10737 }
 0xea0   : > { %v15448_v1 = vpop.permute.xlu0 %10722  ;;  %18215 = vst [vmem:[#allocation87_spill] sm:$0xff] %v15450_v31 }
 0xea3   : > { %v15454_v38 = vpop.permute.xlu1 %10747 }
 0xea4   : > { %v15452_v34 = vpop.permute.xlu0 %10732  ;;  %18216 = vst [vmem:[#allocation98_spill] sm:$0xff] %v15454_v38 }
 0xea7   : > { %v15458_v57 = vpop.permute.xlu1 %10757 }
 0xea8   : > { %v15456_v27 = vpop.permute.xlu0 %10742  ;;  %18218 = vst [vmem:[#allocation88_spill] sm:$0xff] %v15458_v57 }
 0xea9   : > { %18217 = vst [vmem:[#allocation84_spill] sm:$0xff] %v15456_v27  ;;  %v15674_v27 = vld [vmem:[%s12829_s28 + $0x2] ss:$0 sm:$0xff] }
 0xeab   : > { %v15462_v19 = vpop.permute.xlu1 %10767 }
 0xeac   : > { %v15460_v46 = vpop.permute.xlu0 %10752  ;;  %18220 = vst [vmem:[#allocation100_spill] sm:$0xff] %v15462_v19  ;;  %v18244_v19 = vunpack.i.h.bf16 %v15422_v37 }
 0xead   : > { %18219 = vst [vmem:[#allocation85_spill] sm:$0xff] %v15460_v46 }
 0xeaf   : > { %v15471_v29 = vpop.permute.xlu1 %10777 }
 0xeb0   : > { %18222 = vst [vmem:[#allocation106_spill] sm:$0xff] %v15471_v29 }
 0xeb1   : > { %v15464_v54 = vpop.permute.xlu0 %10762 }
 0xeb2   : > { %18221 = vst [vmem:[#allocation97_spill] sm:$0xff] %v15464_v54 }
 0xeb3   : > { %v15481_v26 = vpop.permute.xlu1 %10787 }
 0xeb4   : > { %18224 = vst [vmem:[#allocation83_spill] sm:$0xff] %v15481_v26 }
 0xeb5   : > { %v15476_v59 = vpop.permute.xlu0 %10772 }
 0xeb6   : > { %18223 = vst [vmem:[#allocation103_spill] sm:$0xff] %v15476_v59 }
 0xeb7   : > { %v15501_v3 = vpop.permute.xlu1 %10797 }
 0xeb8   : > { %18226 = vst [vmem:[#allocation110_spill] sm:$0xff] %v15501_v3 }
 0xeb9   : > { %v15483_v28 = vpop.permute.xlu0 %10782 }
 0xeba   : > { %18225 = vst [vmem:[#allocation112_spill] sm:$0xff] %v15483_v28 }
 0xf06   : > { %v15466_v2 = vpop.f32.mrf.mxu1 }
 0xf08   : > { %v5456_v12 = vpop.f32.mrf.mxu1 }
 0xf09   : > { %v5559_v39 = vadd.f32 %v15469_v25, %v5456_v12 }
 0xf0a   : > { %v15474_v21 = vpop.f32.mrf.mxu1 }
 0xf0b   : > { %v9632_v23 = vmul.f32 -1.442695, %v5559_v39  ;;  %v15512_v39 = vpop.permute.xlu0 %10792 }
 0xf0c   : > { %v5460_v42 = vpop.f32.mrf.mxu1  ;;  %18227 = vst [vmem:[#allocation76_spill] sm:$0xff] %v15512_v39  ;;  %v15659_v39 = vld [vmem:[%s12829_s28 + $0x1] ss:$0 sm:$0xff] }
 0xf0d   : > { %11314 = vpow2.f32 %v9632_v23  ;;  %v5560_v14 = vadd.f32 %v15469_v25, %v5460_v42 }
 0xf0e   : > { %v15479_v58 = vpop.f32.mrf.mxu1 }
 0xf0f   : > { %v9633_v16 = vmul.f32 -1.442695, %v5560_v14 }
 0xf10   : > { %v5466_v44 = vpop.f32.mrf.mxu1 }
 0xf11   : > { %11316 = vpow2.f32 %v9633_v16  ;;  %v5561_v24 = vadd.f32 %v15469_v25, %v5466_v44  ;;  %v15530_v16 = vpop.permute.xlu1 %10807 }
 0xf12   : > { %v15492_v51 = vpop.f32.mrf.mxu1  ;;  %18228 = vst [vmem:[#allocation117_spill] sm:$0xff] %v15530_v16 }
 0xf13   : > { %v9634_v40 = vmul.f32 -1.442695, %v5561_v24  ;;  %v15538_v24 = vpop.permute.xlu0 %10802  ;;  %v5541_v0 = vadd.f32 %v15577_v61, %v15492_v51 }
 0xf14   : > { %v5470_v23 = vpop.f32.mrf.mxu1  ;;  %18229 = vst [vmem:[#allocation115_spill] sm:$0xff] %v15538_v24 }
 0xf15   : > { %11318 = vpow2.f32 %v9634_v40  ;;  %v5562_v15 = vadd.f32 %v15469_v25, %v5470_v23  ;;  %v15554_v43 = vpop.permute.xlu1 %10817 }
 0xf16   : > { %v15510_v44 = vpop.f32.mrf.mxu1  ;;  %18230 = vst [vmem:[#allocation73_spill] sm:$0xff] %v15554_v43 }
 0xf17   : > { %v9635_v14 = vmul.f32 -1.442695, %v5562_v15  ;;  %v15562_v55 = vpop.permute.xlu0 %10812 }
 0xf18   : > { %v5476_v12 = vpop.f32.mrf.mxu1  ;;  %18231 = vst [vmem:[#allocation136_spill] sm:$0xff] %v15562_v55  ;;  %v15651_v55 = vld [vmem:[%s12829_s28] ss:$0 sm:$0xff] }
 0xf19   : > { %11320 = vpow2.f32 %v9635_v14  ;;  %v5563_v33 = vadd.f32 %v15469_v25, %v5476_v12 }
 0xf1a   : > { %v11315_v42 = vpop.eup %11314  ;;  %v15528_v11 = vpop.f32.mrf.mxu1 }
 0xf1b   : > { %v5623_v50 = vadd.f32 1.0, %v11315_v42  ;;  %v9636_v45 = vmul.f32 -1.442695, %v5563_v33 }
 0xf1c   : > { %v5480_v18 = vpop.f32.mrf.mxu1 }
 0xf1d   : > { %11322 = vrcp.f32 %v5623_v50  ;;  %v5564_v48 = vadd.f32 %v15469_v25, %v5480_v18 }
 0xf1e   : > { %v11317_v14 = vpop.eup %11316  ;;  %11324 = vpow2.f32 %v9636_v45  ;;  %v15544_v12 = vpop.f32.mrf.mxu1 }
 0xf1f   : > { %v5624_v40 = vadd.f32 1.0, %v11317_v14  ;;  %v9637_v50 = vmul.f32 -1.442695, %v5564_v48  ;;  %v15586_v48 = vpop.permute.xlu0 %10822 }
 0xf20   : > { %v5486_v35 = vpop.f32.mrf.mxu1  ;;  %18232 = vst [vmem:[#allocation135_spill] sm:$0xff] %v15586_v48 }
 0xf21   : > { %11326 = vrcp.f32 %v5624_v40  ;;  %v5565_v14 = vadd.f32 %v15469_v25, %v5486_v35 }
 0xf22   : > { %v11319_v23 = vpop.eup %11318  ;;  %11328 = vpow2.f32 %v9637_v50  ;;  %v5488_v18 = vpop.f32.mrf.mxu1 }
 0xf23   : > { %v5625_v45 = vadd.f32 1.0, %v11319_v23  ;;  %v9638_v10 = vmul.f32 -1.442695, %v5565_v14 }
 0xf24   : > { %v5490_v42 = vpop.f32.mrf.mxu1 }
 0xf25   : > { %11330 = vrcp.f32 %v5625_v45  ;;  %v5566_v33 = vadd.f32 %v15469_v25, %v5490_v42  ;;  %v5539_v42 = vadd.f32 %v15577_v61, %v15474_v21  ;;  %v15618_v21 = vadd.f32 %v15577_v61, %v15544_v12 }
 0xf26   : > { %v11321_v40 = vpop.eup %11320  ;;  %11332 = vpow2.f32 %v9638_v10  ;;  %v5494_v15 = vpop.f32.mrf.mxu1  ;;  %v5538_v10 = vadd.f32 %v15577_v61, %v15466_v2 }
 0xf27   : > { %v5626_v50 = vadd.f32 1.0, %v11321_v40  ;;  %v9639_v49 = vmul.f32 -1.442695, %v5566_v33  ;;  %v15624_v51 = vadd.f32 %v15577_v61, %v5494_v15 }
 0xf28   : > { %v5496_v23 = vpop.f32.mrf.mxu1 }
 0xf29   : > { %11334 = vrcp.f32 %v5626_v50  ;;  %v5567_v33 = vadd.f32 %v15469_v25, %v5496_v23  ;;  %v18235_v23 = vunpack.i.l.bf16 %v15414_v22 }
 0xf2a   : > { %v11323_v14 = vpop.eup %11322  ;;  %11336 = vpow2.f32 %v9639_v49  ;;  %v5498_v35 = vpop.f32.mrf.mxu1  ;;  %v5540_v49 = vadd.f32 %v15577_v61, %v15479_v58 }
 0xf2b   : > { %v11325_v41 = vpop.eup %11324  ;;  %v9640_v50 = vmul.f32 -1.442695, %v5567_v33  ;;  %v15599_v16 = vmul.f32 %v11323_v14, %v5538_v10  ;;  %v15609_v33 = vadd.f32 %v15577_v61, %v15510_v44  ;;  %v15614_v10 = vadd.f32 %v15577_v61, %v15528_v11 }
 0xf2c   : > { %v5627_v2 = vadd.f32 1.0, %v11325_v41  ;;  %v5500_v45 = vpop.f32.mrf.mxu1  ;;  %v15621_v41 = vadd.f32 %v15577_v61, %v5488_v18 }
 0xf2d   : > { %18233 = vst [vmem:[#allocation134_spill] sm:$0xff] %v15599_v16  ;;  %11338 = vpow2.f32 %v9640_v50  ;;  %v5568_v40 = vadd.f32 %v15469_v25, %v5500_v45  ;;  %v15631_v45 = vadd.f32 %v15577_v61, %v5498_v35 }
 0xf2e   : > { %v11327_v14 = vpop.eup %11326  ;;  %v15626_v58 = vpop.f32.mrf.mxu1  ;;  %11340 = vrcp.f32 %v5627_v2 }
 0xf2f   : > { %v11329_v44 = vpop.eup %11328  ;;  %v15628_v50 = vmul.f32 %v11327_v14, %v5539_v42  ;;  %v9641_v11 = vmul.f32 -1.442695, %v5568_v40 }
 0xf30   : > { %v5628_v12 = vadd.f32 1.0, %v11329_v44  ;;  %v5506_v18 = vpop.f32.mrf.mxu1  ;;  %v18234_v44 = vunpack.i.h.bf16 %v15414_v22  ;;  %v18237_v22 = vunpack.i.h.bf16 %v15424_v9 }
 0xf31   : > { %11342 = vpow2.f32 %v9641_v11  ;;  %v5569_v42 = vadd.f32 %v15469_v25, %v5506_v18  ;;  %v5704_v35 = vrot.slane %v15628_v50, 6  ;;  %v6405_v11 = vmul.f32 %v18235_v23, %v15599_v16 }
 0xf32   : > { %v11331_v2 = vpop.eup %11330  ;;  %11344 = vrcp.f32 %v5628_v12  ;;  %v5508_v14 = vpop.f32.mrf.mxu1  ;;  %v6406_v43 = vmul.f32 %v18234_v44, %v15628_v50  ;;  %v18236_v12 = vrot.slane %v15599_v16, 6  ;;  %v18241_v24 = vrot.slane %v15628_v50, 1 }
 0xf33   : > { %v11333_v18 = vpop.eup %11332  ;;  %v15648_v15 = vmul.f32 %v11331_v2, %v5540_v49  ;;  %v9642_v48 = vmul.f32 -1.442695, %v5569_v42  ;;  %v18238_v49 = vrot.slane %v15628_v50, 7  ;;  %v18239_v42 = vrot.slane %v15599_v16, 7 }
 0xf34   : > { %v5736_v40 = vsel %vm5721_vm1, %v18236_v12, %v5704_v35  ;;  %v5629_v3 = vadd.f32 1.0, %v11333_v18  ;;  %v5510_v54 = vpop.f32.mrf.mxu1  ;;  %v18240_v18 = vunpack.i.h.bf16 %v15408_v53  ;;  %v6427_v16 = vmul.f32 %v15674_v27, %v6406_v43 }
 0xf35   : > { %v5915_v23 = vmul.f32 %v18237_v22, %v5736_v40  ;;  %v5998_v2 = vsel %vm5983_vm2, %v18239_v42, %v18238_v49  ;;  %11346 = vpow2.f32 %v9642_v48  ;;  %v5570_v12 = vadd.f32 %v15469_v25, %v5510_v54 }
 0xf36   : > { %v6177_v44 = vmul.f32 %v18240_v18, %v5998_v2  ;;  %v6460_v9 = vrot.slane %v15648_v15, 1  ;;  %v11335_v40 = vpop.eup %11334  ;;  %v5514_v22 = vpop.f32.mrf.mxu1  ;;  %v17831_v49 = vrot.slane %v15648_v15, 2  ;;  %v17836_v42 = vrot.slane %v15648_v15, 6 }
 0xf37   : > { %v5936_v31 = vmul.f32 %v15651_v55, %v5915_v23  ;;  %v11337_v48 = vpop.eup %11336  ;;  %v15681_v26 = vmul.f32 %v11335_v40, %v5541_v0  ;;  %11348 = vrcp.f32 %v5629_v3  ;;  %v9643_v54 = vmul.f32 -1.442695, %v5570_v12 }
 0xf38   : > { %v6198_v2 = vmul.f32 %v15659_v39, %v6177_v44  ;;  %v5630_v18 = vadd.f32 1.0, %v11337_v48  ;;  %v5516_v53 = vpop.f32.mrf.mxu1  ;;  %v6488_v23 = vsel %vm6474_vm4, %v18241_v24, %v6460_v9  ;;  %v18242_v43 = vrot.slane %v15628_v50, 2 }
 0xf39   : > { %v5735_v3 = vsel %vm5721_vm1, %v5704_v35, %v17836_v42  ;;  %11350 = vpow2.f32 %v9643_v54  ;;  %v5571_v44 = vadd.f32 %v15469_v25, %v5516_v53  ;;  %v18243_v40 = vunpack.i.h.bf16 %v15418_v13  ;;  %v15713_v53 = vld [vmem:[%s12829_s28 + $0x4] ss:$0 sm:$0xff] }
 0xf3a   : > { %v6750_v0 = vsel %vm6736_vm3, %v18242_v43, %v17831_v49  ;;  %v6214_v12 = vadd.f32 %v6198_v2, %v5936_v31  ;;  %v11339_v48 = vpop.eup %11338  ;;  %11352 = vrcp.f32 %v5630_v18  ;;  %v15701_v46 = vpop.f32.mrf.mxu1  ;;  %v18245_v49 = vunpack.i.l.bf16 %v15410_v20  ;;  %v15716_v2 = vld [vmem:[%s12829_s28 + $0x3] ss:$0 sm:$0xff]  ;;  %s7350_s28 = scalar_lea.vmem [#allocation18], %s12935_s17  ;;  %s18463_s17 = scalar_lea.vmem [#allocation8], %s12767_s26 }
 0xf3b   : > { %v6668_v24 = vmul.f32 %v18243_v40, %v6488_v23  ;;  %v6930_v43 = vmul.f32 %v18244_v19, %v6750_v0  ;;  %v17839_v28 = vrot.slane %v15648_v15, 7  ;;  %v15710_v35 = vadd.f32 %v15577_v61, %v15626_v58  ;;  %v11341_v23 = vpop.eup %11340  ;;  %s18465_s26 = sld [smem:[#allocation158_spill]] (!%p9802_p0) }
 0xf3c   : > { %v5916_v59 = vmul.f32 %v18245_v49, %v5735_v3  ;;  %v9644_v31 = vmul.f32 -1.442695, %v5571_v44  ;;  %v6443_v54 = vadd.f32 %v6427_v16, %v6214_v12  ;;  %v15719_v18 = vmul.f32 %v15674_v27, %v6405_v11  ;;  %v5520_v49 = vpop.f32.mrf.mxu1 }
 0xf3d   : > { %v5631_v19 = vadd.f32 1.0, %v11339_v48  ;;  %v15722_v0 = vadd.f32 %v15577_v61, %v5508_v14  ;;  %v6689_v3 = vmul.f32 %v15716_v2, %v6668_v24  ;;  %v6951_v58 = vmul.f32 %v15713_v53, %v6930_v43 }
 0xf3e   : > { %18246 = vst [vmem:[#allocation133_spill] sm:$0xff] %v15719_v18  ;;  %v5572_v40 = vadd.f32 %v15469_v25, %v5520_v49  ;;  %v5937_v16 = vmul.f32 %v15651_v55, %v5916_v59  ;;  %v18247_v11 = vrot.slane %v15628_v50, 7  ;;  %v18248_v14 = vunpack.i.l.bf16 %v15416_v7  ;;  %v11343_v48 = vpop.eup %11342  ;;  %v15737_v24 = vpop.f32.mrf.mxu1 }
 0xf3f   : > { %11354 = vpow2.f32 %v9644_v31  ;;  %v6705_v43 = vadd.f32 %v6689_v3, %v6443_v54  ;;  %v18249_v49 = vunpack.i.l.bf16 %v15412_v4  ;;  %v17845_v59 = vrot.slane %v15681_v26, 1  ;;  %v11345_v18 = vpop.eup %11344 }
 0xf40   : > { %v5997_v44 = vsel %vm5983_vm2, %v18247_v11, %v17839_v28  ;;  %v6407_v12 = vmul.f32 %v18248_v14, %v15648_v15  ;;  %v15743_v20 = vmul.f32 %v11341_v23, %v15609_v33  ;;  %v5632_v37 = vadd.f32 1.0, %v11343_v48  ;;  %v15749_v14 = vld [vmem:[%s12819_s19 + $0x4] ss:$0 sm:$0xff]  ;;  %v5526_v31 = vpop.f32.mrf.mxu1 }
 0xf41   : > { %v6178_v42 = vmul.f32 %v18249_v49, %v5997_v44  ;;  %v15746_v11 = vadd.f32 %v15577_v61, %v5514_v22  ;;  %v9645_v28 = vmul.f32 -1.442695, %v5572_v40  ;;  %11356 = vrcp.f32 %v5631_v19 }
 0xf42   : > { %v6967_v7 = vadd.f32 %v6951_v58, %v6705_v43  ;;  %v6487_v3 = vsel %vm6474_vm4, %v6460_v9, %v17845_v59  ;;  %v5573_v33 = vadd.f32 %v15469_v25, %v5526_v31  ;;  %v6428_v23 = vmul.f32 %v15674_v27, %v6407_v12  ;;  %v11347_v48 = vpop.eup %11346 }
 0xf43   : > { %v6199_v54 = vmul.f32 %v15659_v39, %v6178_v42  ;;  %v18250_v22 = vunpack.i.l.bf16 %v15420_v47  ;;  %v17844_v40 = vrot.slane %v15681_v26, 2  ;;  %v15762_v19 = vmul.f32 %v11345_v18, %v15614_v10  ;;  %v15764_v42 = vpop.f32.mrf.mxu1 }
 0xf44   : > { %11358 = vpow2.f32 %v9645_v28  ;;  %v15767_v58 = vadd.f32 %v15749_v14, %v6967_v7  ;;  %v5633_v43 = vadd.f32 1.0, %v11347_v48  ;;  %v9646_v49 = vmul.f32 -1.442695, %v5573_v33  ;;  %v11349_v31 = vpop.eup %11348 }
 0xf45   : > { %v6669_v44 = vmul.f32 %v18250_v22, %v6487_v3  ;;  %v6215_v9 = vadd.f32 %v6199_v54, %v5937_v16  ;;  %11360 = vrcp.f32 %v5632_v37  ;;  %v5530_v3 = vpop.f32.mrf.mxu1  ;;  %v18252_v28 = vrot.slane %v15648_v15, 2 }
 0xf46   : > { %18251 = vst [vmem:[#allocation132_spill] sm:$0xff] %v15767_v58  ;;  %7007 = vadd.xlane.f32.xlu0 %v15767_v58  ;;  %v17854_v7 = vrot.slane %v15681_v26, 6  ;;  %v17841_v37 = vrot.slane %v15743_v20, 6  ;;  %11362 = vrcp.f32 %v5633_v43  ;;  %v5574_v18 = vadd.f32 %v15469_v25, %v5530_v3 }
 0xf47   : > { %v6690_v12 = vmul.f32 %v15716_v2, %v6669_v44  ;;  %v6444_v22 = vadd.f32 %v6428_v23, %v6215_v9  ;;  %v6749_v10 = vsel %vm6736_vm3, %v18252_v28, %v17844_v40  ;;  %v18253_v16 = vunpack.i.l.bf16 %v15428_v8  ;;  %v11351_v23 = vpop.eup %11350 }
 0xf48   : > { %v17849_v33 = vrot.slane %v15681_v26, 7  ;;  %11364 = vpow2.f32 %v9646_v49  ;;  %v5733_v48 = vsel %vm5721_vm1, %v17854_v7, %v17841_v37  ;;  %v17842_v9 = vrot.slane %v15743_v20, 7  ;;  %v11353_v43 = vpop.eup %11352 }
 0xf49   : > { %v6931_v54 = vmul.f32 %v18253_v16, %v6749_v10  ;;  %v6706_v44 = vadd.f32 %v6690_v12, %v6444_v22  ;;  %v5634_v28 = vadd.f32 1.0, %v11351_v23  ;;  %v9647_v25 = vmul.f32 -1.442695, %v5574_v18 }
 0xf4a   : > { %v18254_v10 = vunpack.i.l.bf16 %v15426_v36  ;;  %v15794_v49 = vmul.f32 %v11349_v31, %v15618_v21  ;;  %v15797_v12 = vmul.f32 %v11353_v43, %v15621_v41  ;;  %v5995_v22 = vsel %vm5983_vm2, %v17849_v33, %v17842_v9 }
 0xf4b   : > { %v6952_v3 = vmul.f32 %v15713_v53, %v6931_v54  ;;  %v18255_v18 = vunpack.i.l.bf16 %v15434_v30  ;;  %11366 = vrcp.f32 %v5634_v28  ;;  %v18256_v21 = vunpack.i.l.bf16 %v15432_v56 }
 0xf4c   : > { %v5918_v16 = vmul.f32 %v18254_v10, %v5733_v48  ;;  %11368 = vpow2.f32 %v9647_v25  ;;  %v17848_v43 = vrot.slane %v15743_v20, 1  ;;  %v17843_v10 = vrot.slane %v15762_v19, 1  ;;  %v11355_v37 = vpop.eup %11354 }
 0xf4d   : > { %v6409_v54 = vmul.f32 %v18255_v18, %v15743_v20  ;;  %v6968_v23 = vadd.f32 %v6952_v3, %v6706_v44  ;;  %v6180_v31 = vmul.f32 %v18256_v21, %v5995_v22  ;;  %v17847_v44 = vrot.slane %v15743_v20, 2 }
 0xf4e   : > { %v5939_v48 = vmul.f32 %v15651_v55, %v5918_v16  ;;  %v17846_v28 = vrot.slane %v15762_v19, 2  ;;  %v5635_v3 = vadd.f32 1.0, %v11355_v37  ;;  %v6485_v25 = vsel %vm6474_vm4, %v17848_v43, %v17843_v10 }
 0xf4f   : > { %v6430_v41 = vmul.f32 %v15674_v27, %v6409_v54  ;;  %v15815_v9 = vadd.f32 %v15749_v14, %v6968_v23  ;;  %v6201_v18 = vmul.f32 %v15659_v39, %v6180_v31  ;;  %v17853_v16 = vrot.slane %v15762_v19, 6  ;;  %v11357_v54 = vpop.eup %11356 }
 0xf50   : > { %v17850_v22 = vrot.slane %v15794_v49, 6  ;;  %v18258_v21 = vunpack.i.l.bf16 %v15438_v6  ;;  %v6747_v37 = vsel %vm6736_vm3, %v17847_v44, %v17846_v28  ;;  %v17852_v10 = vrot.slane %v15762_v19, 7 }
 0xf51   : > { %18257 = vst [vmem:[#allocation131_spill] sm:$0xff] %v15815_v9  ;;  %7009 = vadd.xlane.f32.xlu0 %v15815_v9  ;;  %v6217_v23 = vadd.f32 %v6201_v18, %v5939_v48  ;;  %11370 = vrcp.f32 %v5635_v3  ;;  %v18259_v40 = vunpack.i.l.bf16 %v15442_v5  ;;  %v17851_v18 = vrot.slane %v15794_v49, 7 }
 0xf52   : > { %v6671_v31 = vmul.f32 %v18258_v21, %v6485_v25  ;;  %v5731_v48 = vsel %vm5721_vm1, %v17853_v16, %v17850_v22  ;;  %v11359_v25 = vpop.eup %11358  ;;  %v15849_v21 = vadd.f32 %v15577_v61, %v15701_v46  ;;  %v18260_v44 = vunpack.i.l.bf16 %v15430_v17 }
 0xf53   : > { %v6933_v59 = vmul.f32 %v18259_v40, %v6747_v37  ;;  %v6446_v28 = vadd.f32 %v6430_v41, %v6217_v23  ;;  %v11361_v37 = vpop.eup %11360  ;;  %v15855_v43 = vmul.f32 %v11357_v54, %v15624_v51  ;;  %v5636_v33 = vadd.f32 1.0, %v11359_v25 }
 0xf54   : > { %v6692_v3 = vmul.f32 %v15716_v2, %v6671_v31  ;;  %v5920_v40 = vmul.f32 %v18260_v44, %v5731_v48  ;;  %v5993_v46 = vsel %vm5983_vm2, %v17852_v10, %v17851_v18  ;;  %v18261_v31 = vunpack.i.l.bf16 %v15436_v32  ;;  %v11363_v48 = vpop.eup %11362 }
 0xf55   : > { %v6954_v22 = vmul.f32 %v15713_v53, %v6933_v59  ;;  %v18262_v51 = vunpack.i.l.bf16 %v15440_v62  ;;  %11372 = vrcp.f32 %v5636_v33  ;;  %v15872_v59 = vadd.f32 %v15577_v61, %v15737_v24 }
 0xf56   : > { %v6708_v41 = vadd.f32 %v6692_v3, %v6446_v28  ;;  %v5941_v23 = vmul.f32 %v15651_v55, %v5920_v40  ;;  %v6182_v44 = vmul.f32 %v18261_v31, %v5993_v46  ;;  %v17856_v25 = vrot.slane %v15794_v49, 1  ;;  %v11365_v28 = vpop.eup %11364 }
 0xf57   : > { %v6411_v54 = vmul.f32 %v18262_v51, %v15794_v49  ;;  %v17855_v18 = vrot.slane %v15797_v12, 1  ;;  %v17857_v31 = vrot.slane %v15797_v12, 2  ;;  %v5637_v10 = vadd.f32 1.0, %v11365_v28 }
 0xf58   : > { %v6970_v3 = vadd.f32 %v6954_v22, %v6708_v41  ;;  %v6203_v40 = vmul.f32 %v15659_v39, %v6182_v44  ;;  %v17859_v33 = vrot.slane %v15797_v12, 6  ;;  %v17858_v51 = vrot.slane %v15855_v43, 6  ;;  %v11367_v16 = vpop.eup %11366 }
 0xf59   : > { %v6483_v24 = vsel %vm6474_vm4, %v17856_v25, %v17855_v18  ;;  %v15888_v22 = vmul.f32 %v11363_v48, %v15710_v35  ;;  %v6432_v28 = vmul.f32 %v15674_v27, %v6411_v54  ;;  %11374 = vrcp.f32 %v5637_v10 }
 0xf5a   : > { %v15891_v41 = vadd.f32 %v15749_v14, %v6970_v3  ;;  %v6219_v44 = vadd.f32 %v6203_v40, %v5941_v23  ;;  %v18264_v7 = vunpack.i.l.bf16 %v15444_v52  ;;  %v18265_v18 = vrot.slane %v15794_v49, 2  ;;  %v11369_v23 = vpop.eup %11368 }
 0xf5b   : > { %v5729_v35 = vsel %vm5721_vm1, %v17859_v33, %v17858_v51  ;;  %v15909_v10 = vmul.f32 %v11367_v16, %v15722_v0  ;;  %v18266_v54 = vunpack.i.l.bf16 %v15448_v1  ;;  %v18267_v3 = vunpack.i.l.bf16 %v15446_v63 }
 0xf5c   : > { %18263 = vst [vmem:[#allocation130_spill] sm:$0xff] %v15891_v41  ;;  %v6673_v46 = vmul.f32 %v18264_v7, %v6483_v24  ;;  %v6745_v25 = vsel %vm6736_vm3, %v18265_v18, %v17857_v31  ;;  %7013 = vadd.xlane.f32.xlu0 %v15891_v41  ;;  %v6448_v7 = vadd.f32 %v6432_v28, %v6219_v44  ;;  %v5638_v40 = vadd.f32 1.0, %v11369_v23 }
 0xf5d   : > { %v6935_v48 = vmul.f32 %v18266_v54, %v6745_v25  ;;  %v5922_v18 = vmul.f32 %v18267_v3, %v5729_v35  ;;  %v17865_v31 = vrot.slane %v15797_v12, 7  ;;  %v17860_v51 = vrot.slane %v15855_v43, 7 }
 0xf5e   : > { %v6694_v24 = vmul.f32 %v15716_v2, %v6673_v46  ;;  %v15920_v33 = vmul.f32 %v11361_v37, %v15631_v45  ;;  %v17862_v0 = vrot.slane %v15888_v22, 2  ;;  %v17861_v16 = vrot.slane %v15909_v10, 2  ;;  %v11371_v37 = vpop.eup %11370  ;;  %v18273_v46 = vld [vmem:[#allocation112_spill] sm:$0xff] }
 0xf5f   : > { %v15926_v25 = vadd.f32 %v15577_v61, %v15764_v42  ;;  %11376 = vrcp.f32 %v5638_v40  ;;  %v6956_v28 = vmul.f32 %v15713_v53, %v6935_v48  ;;  %v5991_v45 = vsel %vm5983_vm2, %v17865_v31, %v17860_v51 }
 0xf60   : > { %v6710_v44 = vadd.f32 %v6694_v24, %v6448_v7  ;;  %v5943_v35 = vmul.f32 %v15651_v55, %v5922_v18  ;;  %v18268_v23 = vunpack.i.l.bf16 %v15452_v34  ;;  %v18269_v42 = vunpack.i.l.bf16 %v15454_v38 }
 0xf61   : > { %v15943_v54 = vmul.f32 %v11371_v37, %v15746_v11  ;;  %v17867_v48 = vrot.slane %v15909_v10, 6  ;;  %v17870_v3 = vrot.slane %v15909_v10, 7  ;;  %v6741_v18 = vsel %vm6736_vm3, %v17862_v0, %v17861_v16 }
 0xf62   : > { %v6184_v61 = vmul.f32 %v18268_v23, %v5991_v45  ;;  %v6413_v7 = vmul.f32 %v18269_v42, %v15855_v43  ;;  %v6972_v40 = vadd.f32 %v6956_v28, %v6710_v44  ;;  %v17864_v45 = vrot.slane %v15855_v43, 1  ;;  %v11373_v28 = vpop.eup %11372 }
 0xf63   : > { %v17863_v23 = vrot.slane %v15920_v33, 1  ;;  %v17866_v11 = vrot.slane %v15943_v54, 6  ;;  %v17869_v37 = vrot.slane %v15943_v54, 7  ;;  %v17873_v0 = vrot.slane %v15920_v33, 2 }
 0xf64   : > { %v6205_v24 = vmul.f32 %v15659_v39, %v6184_v61  ;;  %v15959_v42 = vadd.f32 %v15749_v14, %v6972_v40  ;;  %v6434_v44 = vmul.f32 %v15674_v27, %v6413_v7  ;;  %v15983_v40 = vmul.f32 %v11373_v28, %v15849_v21  ;;  %v18276_v28 = vld [vmem:[#allocation103_spill] sm:$0xff] }
 0xf65   : > { %v6481_v61 = vsel %vm6474_vm4, %v17864_v45, %v17863_v23  ;;  %v5725_v7 = vsel %vm5721_vm1, %v17867_v48, %v17866_v11  ;;  %v18272_v45 = vunpack.i.l.bf16 %v15471_v29  ;;  %v18274_v11 = vunpack.i.l.bf16 %v18273_v46  ;;  %v18286_v29 = vld [vmem:[#allocation87_spill] sm:$0xff] }
 0xf66   : > { %18270 = vst [vmem:[#allocation129_spill] sm:$0xff] %v15959_v42  ;;  %v6221_v51 = vadd.f32 %v6205_v24, %v5943_v35  ;;  %v5987_v35 = vsel %vm5983_vm2, %v17870_v3, %v17869_v37  ;;  %7017 = vadd.xlane.f32.xlu0 %v15959_v42  ;;  %v18271_v24 = vunpack.i.l.bf16 %v15458_v57  ;;  %v18275_v41 = vrot.slane %v15855_v43, 2 }
 0xf67   : > { %v5926_v31 = vmul.f32 %v18272_v45, %v5725_v7  ;;  %v6188_v48 = vmul.f32 %v18274_v11, %v5987_v35  ;;  %v18277_v37 = vunpack.i.l.bf16 %v18276_v28  ;;  %v17875_v45 = vrot.slane %v15920_v33, 6  ;;  %v11375_v7 = vpop.eup %11374 }
 0xf68   : > { %v6675_v23 = vmul.f32 %v18271_v24, %v6481_v61  ;;  %v6450_v16 = vadd.f32 %v6434_v44, %v6221_v51  ;;  %v6743_v21 = vsel %vm6736_vm3, %v18275_v41, %v17873_v0  ;;  %v18278_v61 = vld [vmem:[#allocation100_spill] sm:$0xff]  ;;  %v17874_v44 = vrot.slane %v15888_v22, 6 }
 0xf69   : > { %v6939_v3 = vmul.f32 %v18277_v37, %v6741_v18  ;;  %v18279_v24 = vunpack.i.l.bf16 %v18278_v61  ;;  %v5947_v51 = vmul.f32 %v15651_v55, %v5926_v31  ;;  %v6209_v11 = vmul.f32 %v15659_v39, %v6188_v48 }
 0xf6a   : > { %v6696_v42 = vmul.f32 %v15716_v2, %v6675_v23  ;;  %v17878_v35 = vrot.slane %v15920_v33, 7  ;;  %v16009_v41 = vmul.f32 %v11375_v7, %v15872_v59  ;;  %v5727_v31 = vsel %vm5721_vm1, %v17875_v45, %v17874_v44  ;;  %v18284_v44 = vld [vmem:[#allocation115_spill] sm:$0xff] }
 0xf6b   : > { %v6937_v9 = vmul.f32 %v18279_v24, %v6743_v21  ;;  %v18281_v48 = vrot.slane %v15888_v22, 7  ;;  %v18282_v24 = vld [vmem:[#allocation85_spill] sm:$0xff]  ;;  %v18285_v45 = vunpack.i.l.bf16 %v18284_v44  ;;  %v18287_v28 = vunpack.i.l.bf16 %v18286_v29 }
 0xf6c   : > { %18280 = vst [vmem:[#allocation128_spill] sm:$0xff] %v16009_v41  ;;  %v6712_v37 = vadd.f32 %v6696_v42, %v6450_v16  ;;  %v18283_v7 = vunpack.i.l.bf16 %v18282_v24  ;;  %v6225_v42 = vadd.f32 %v6209_v11, %v5947_v51  ;;  %v17880_v0 = vrot.slane %v16009_v41, 7  ;;  %v11377_v18 = vpop.eup %11376 }
 0xf6d   : > { %v6958_v21 = vmul.f32 %v15713_v53, %v6937_v9  ;;  %v5989_v59 = vsel %vm5983_vm2, %v17878_v35, %v18281_v48  ;;  %v17879_v9 = vrot.slane %v16009_v41, 6  ;;  %v6419_v58 = vmul.f32 %v18285_v45, %v16009_v41  ;;  %v18288_v35 = vld [vmem:[#allocation84_spill] sm:$0xff] }
 0xf6e   : > { %v6415_v16 = vmul.f32 %v18283_v7, %v15888_v22  ;;  %v5924_v48 = vmul.f32 %v18287_v28, %v5727_v31  ;;  %v18289_v61 = vunpack.i.l.bf16 %v18288_v35  ;;  %v18290_v51 = vrot.slane %v15983_v40, 6 }
 0xf6f   : > { %v6974_v46 = vadd.f32 %v6958_v21, %v6712_v37  ;;  %v18291_v7 = vrot.slane %v15983_v40, 7  ;;  %v16052_v37 = vmul.f32 %v11377_v18, %v15926_v25  ;;  %v17882_v28 = vrot.slane %v16009_v41, 1 }
 0xf70   : > { %v6186_v24 = vmul.f32 %v18289_v61, %v5989_v59  ;;  %v5723_v11 = vsel %vm5721_vm1, %v18290_v51, %v17879_v9  ;;  %v18293_v61 = vld [vmem:[#allocation83_spill] sm:$0xff]  ;;  %v18295_v59 = vld [vmem:[#allocation76_spill] sm:$0xff]  ;;  %v5945_v25 = vmul.f32 %v15651_v55, %v5924_v48  ;;  %v18300_v48 = vld [vmem:[#allocation134_spill] sm:$0xff]  ;;  %v18311_v38 = vrot.slane %v15888_v22, 1 }
 0xf71   : > { %v5985_v45 = vsel %vm5983_vm2, %v18291_v7, %v17880_v0  ;;  %18292 = vst [vmem:[#allocation127_spill] sm:$0xff] %v16052_v37  ;;  %v18294_v21 = vunpack.i.l.bf16 %v18293_v61  ;;  %v18296_v23 = vunpack.i.l.bf16 %v18295_v59  ;;  %v16061_v9 = vadd.f32 %v15749_v14, %v6974_v46  ;;  %v18306_v61 = vld [vmem:[#allocation136_spill] sm:$0xff] }
 0xf72   : > { %v6473_v35 = vrot.slane %v16052_v37, 1  ;;  %v6735_v7 = vrot.slane %v16052_v37, 2  ;;  %v6207_v18 = vmul.f32 %v15659_v39, %v6186_v24  ;;  %v18301_v59 = vrot.slane %v18300_v48, 1 }
 0xf73   : > { %v5928_v31 = vmul.f32 %v18294_v21, %v5723_v11  ;;  %v6190_v44 = vmul.f32 %v18296_v23, %v5985_v45  ;;  %18297 = vst [vmem:[#allocation124_spill] sm:$0xff] %v16061_v9  ;;  %7021 = vadd.xlane.f32.xlu0 %v16061_v9  ;;  %v18298_v45 = vld [vmem:[#allocation110_spill] sm:$0xff]  ;;  %v18304_v23 = vrot.slane %v18300_v48, 2 }
 0xf74   : > { %v18299_v46 = vunpack.i.l.bf16 %v18298_v45  ;;  %v6475_v51 = vsel %vm6474_vm4, %v17882_v28, %v6473_v35  ;;  %v16082_v24 = vsel %vm6474_vm4, %v6473_v35, %v18301_v59  ;;  %v6440_v28 = vmul.f32 %v15674_v27, %v6419_v58  ;;  %v18308_v59 = vld [vmem:[#allocation135_spill] sm:$0xff] }
 0xf75   : > { %v5949_v0 = vmul.f32 %v15651_v55, %v5928_v31  ;;  %v6211_v11 = vmul.f32 %v15659_v39, %v6190_v44  ;;  %18302 = vst [vmem:[#allocation123_spill] sm:$0xff] %v16082_v24  ;;  %v18303_v44 = vrot.slane %v16009_v41, 2  ;;  %v18307_v45 = vunpack.i.l.bf16 %v18306_v61 }
 0xf76   : > { %v6417_v21 = vmul.f32 %v18299_v46, %v15943_v54  ;;  %v16092_v46 = vsel %vm6736_vm3, %v6735_v7, %v18304_v23  ;;  %v6436_v35 = vmul.f32 %v15674_v27, %v6415_v16  ;;  %v18309_v24 = vunpack.i.l.bf16 %v18308_v59 }
 0xf77   : > { %v6737_v31 = vsel %vm6736_vm3, %v18303_v44, %v6735_v7  ;;  %18305 = vst [vmem:[#allocation121_spill] sm:$0xff] %v16092_v46  ;;  %v6227_v9 = vadd.f32 %v6211_v11, %v5949_v0  ;;  %v6681_v29 = vmul.f32 %v18307_v45, %v6475_v51  ;;  %v6223_v57 = vadd.f32 %v6207_v18, %v5945_v25 }
 0xf78   : > { %v6943_v41 = vmul.f32 %v18309_v24, %v6737_v31  ;;  %v18310_v44 = vrot.slane %v15909_v10, 1  ;;  %v6438_v0 = vmul.f32 %v15674_v27, %v6417_v21  ;;  %v6960_v58 = vmul.f32 %v15713_v53, %v6939_v3  ;;  %v18314_v24 = vld [vmem:[#allocation97_spill] sm:$0xff] }
 0xf79   : > { %v18312_v11 = vrot.slane %v15909_v10, 7  ;;  %v18313_v51 = vrot.slane %v15888_v22, 7  ;;  %v6456_v25 = vadd.f32 %v6440_v28, %v6227_v9  ;;  %v6702_v18 = vmul.f32 %v15716_v2, %v6681_v29 }
 0xf7a   : > { %v6479_v7 = vsel %vm6474_vm4, %v18311_v38, %v18310_v44  ;;  %v6964_v23 = vmul.f32 %v15713_v53, %v6943_v41  ;;  %v6452_v45 = vadd.f32 %v6436_v35, %v6223_v57  ;;  %v18315_v38 = vunpack.i.l.bf16 %v18314_v24 }
 0xf7b   : > { %v16114_v16 = vsel %vm5983_vm2, %v18313_v51, %v18312_v11  ;;  %v6454_v21 = vadd.f32 %v6438_v0, %v6225_v42  ;;  %v17888_v3 = vrot.slane %v15943_v54, 1  ;;  %v17887_v44 = vrot.slane %v15983_v40, 1 }
 0xf7c   : > { %v6677_v31 = vmul.f32 %v18315_v38, %v6479_v7  ;;  %v17890_v46 = vrot.slane %v15943_v54, 2  ;;  %v17889_v59 = vrot.slane %v15983_v40, 2  ;;  %v6718_v9 = vadd.f32 %v6702_v18, %v6456_v25  ;;  %v18320_v38 = vld [vmem:[#allocation117_spill] sm:$0xff] }
 0xf7d   : > { %v6477_v57 = vsel %vm6474_vm4, %v17888_v3, %v17887_v44  ;;  %v18316_v28 = vrot.slane %v15628_v50, 1  ;;  %v18317_v35 = vrot.slane %v18300_v48, 1  ;;  %v18318_v0 = vrot.slane %v15628_v50, 2  ;;  %v18322_v3 = vld [vmem:[#allocation73_spill] sm:$0xff] }
 0xf7e   : > { %v6698_v11 = vmul.f32 %v15716_v2, %v6677_v31  ;;  %v6739_v42 = vsel %vm6736_vm3, %v17890_v46, %v17889_v59  ;;  %v18319_v51 = vrot.slane %v18300_v48, 2  ;;  %v18321_v31 = vunpack.i.l.bf16 %v18320_v38 }
 0xf7f   : > { %v6489_v7 = vsel %vm6474_vm4, %v18317_v35, %v18316_v28  ;;  %v18323_v59 = vunpack.i.l.bf16 %v18322_v3  ;;  %v6980_v41 = vadd.f32 %v6964_v23, %v6718_v9  ;;  %v18324_v29 = vrot.slane %v18300_v48, 6 }
 0xf80   : > { %v6751_v25 = vsel %vm6736_vm3, %v18319_v51, %v18318_v0  ;;  %v6714_v18 = vadd.f32 %v6698_v11, %v6452_v45  ;;  %v6679_v44 = vmul.f32 %v18321_v31, %v6477_v57  ;;  %v18325_v61 = vrot.slane %v16052_v37, 6  ;;  %v18329_v0 = vld [vmem:[#allocation77_spill] sm:$0xff] }
 0xf81   : > { %v6941_v46 = vmul.f32 %v18323_v59, %v6739_v42  ;;  %v18326_v28 = vrot.slane %v18300_v48, 7  ;;  %v18327_v35 = vrot.slane %v16052_v37, 7  ;;  %v18328_v11 = vunpack.i.l.bf16 %v15418_v13  ;;  %v18331_v48 = vld [vmem:[#allocation101_spill] sm:$0xff]  ;;  %v18333_v37 = vld [vmem:[#allocation107_spill] sm:$0xff] }
 0xf82   : > { %v5737_v50 = vsel %vm5721_vm1, %v18325_v61, %v18324_v29  ;;  %v18330_v59 = vunpack.i.l.bf16 %v18329_v0  ;;  %v6976_v9 = vadd.f32 %v6960_v58, %v6714_v18  ;;  %v6700_v42 = vmul.f32 %v15716_v2, %v6679_v44 }
 0xf83   : > { %v5999_v45 = vsel %vm5983_vm2, %v18327_v35, %v18326_v28  ;;  %v6667_v57 = vmul.f32 %v18328_v11, %v6489_v7  ;;  %v6962_v51 = vmul.f32 %v15713_v53, %v6941_v46  ;;  %v16174_v61 = vadd.f32 %v15749_v14, %v6980_v41 }
 0xf84   : > { %v6929_v23 = vmul.f32 %v18330_v59, %v6751_v25  ;;  %v18332_v29 = vunpack.i.l.bf16 %v18331_v48  ;;  %v18334_v3 = vunpack.i.l.bf16 %v18333_v37  ;;  %v16183_v25 = vadd.f32 %v15749_v14, %v6976_v9 }
 0xf85   : > { %v6688_v13 = vmul.f32 %v15716_v2, %v6667_v57  ;;  %v6716_v58 = vadd.f32 %v6700_v42, %v6454_v21  ;;  %v18335_v44 = vrot.slane %v15681_v26, 6  ;;  %v18336_v46 = vrot.slane %v15648_v15, 6 }
 0xf86   : > { %v5914_v31 = vmul.f32 %v18332_v29, %v5737_v50  ;;  %v6176_v28 = vmul.f32 %v18334_v3, %v5999_v45  ;;  %v6950_v7 = vmul.f32 %v15713_v53, %v6929_v23  ;;  %v18337_v18 = vrot.slane %v15681_v26, 7  ;;  %v18339_v45 = vld [vmem:[#allocation78_spill] sm:$0xff]  ;;  %7025 = vadd.xlane.f32.xlu0 %v16183_v25  ;;  %v18342_v23 = vld [vmem:[#allocation104_spill] sm:$0xff] }
 0xf87   : > { %v5734_v41 = vsel %vm5721_vm1, %v18336_v46, %v18335_v44  ;;  %v18338_v37 = vrot.slane %v15648_v15, 7  ;;  %v18340_v21 = vunpack.i.h.bf16 %v18339_v45  ;;  %v18341_v57 = vunpack.i.h.bf16 %v15412_v4 }
 0xf88   : > { %v5935_v50 = vmul.f32 %v15651_v55, %v5914_v31  ;;  %v6197_v35 = vmul.f32 %v15659_v39, %v6176_v28  ;;  %v6978_v59 = vadd.f32 %v6962_v51, %v6716_v58  ;;  %v18343_v9 = vunpack.i.h.bf16 %v18342_v23 }
 0xf89   : > { %v5996_v3 = vsel %vm5983_vm2, %v18338_v37, %v18337_v18  ;;  %v5917_v11 = vmul.f32 %v18340_v21, %v5734_v41  ;;  %v18344_v42 = vrot.slane %v15743_v20, 1  ;;  %v18345_v48 = vrot.slane %v15681_v26, 1 }
 0xf8a   : > { %v6179_v0 = vmul.f32 %v18341_v57, %v5996_v3  ;;  %v6408_v15 = vmul.f32 %v18343_v9, %v15681_v26  ;;  %v18346_v31 = vrot.slane %v15743_v20, 2  ;;  %v18347_v28 = vrot.slane %v15681_v26, 2 }
 0xf8b   : > { %v6486_v29 = vsel %vm6474_vm4, %v18345_v48, %v18344_v42  ;;  %v6213_v44 = vadd.f32 %v6197_v35, %v5935_v50  ;;  %v5938_v51 = vmul.f32 %v15651_v55, %v5917_v11  ;;  %v18348_v46 = vunpack.i.h.bf16 %v15420_v47  ;;  %v18352_v35 = vld [vmem:[#allocation133_spill] sm:$0xff] }
 0xf8c   : > { %v6748_v4 = vsel %vm6736_vm3, %v18347_v28, %v18346_v31  ;;  %v6200_v58 = vmul.f32 %v15659_v39, %v6179_v0  ;;  %v16224_v18 = vadd.f32 %v15749_v14, %v6978_v59  ;;  %v6429_v37 = vmul.f32 %v15674_v27, %v6408_v15 }
 0xf8d   : > { %v6670_v41 = vmul.f32 %v18348_v46, %v6486_v29  ;;  %v18349_v3 = vunpack.i.h.bf16 %v15428_v8  ;;  %v18350_v26 = vrot.slane %v15762_v19, 6  ;;  %v18351_v21 = vrot.slane %v15743_v20, 6 }
 0xf8e   : > { %v6442_v11 = vadd.f32 %v18352_v35, %v6213_v44  ;;  %v6216_v57 = vadd.f32 %v6200_v58, %v5938_v51  ;;  %v18353_v0 = vunpack.i.h.bf16 %v15426_v36  ;;  %7029 = vadd.xlane.f32.xlu0 %v16224_v18  ;;  %v18354_v23 = vrot.slane %v15762_v19, 7 }
 0xf8f   : > { %v6932_v45 = vmul.f32 %v18349_v3, %v6748_v4  ;;  %v5732_v50 = vsel %vm5721_vm1, %v18351_v21, %v18350_v26  ;;  %v6691_v47 = vmul.f32 %v15716_v2, %v6670_v41  ;;  %v18355_v9 = vrot.slane %v15743_v20, 7 }
 0xf90   : > { %v5919_v59 = vmul.f32 %v18353_v0, %v5732_v50  ;;  %v18356_v42 = vunpack.i.h.bf16 %v15434_v30  ;;  %v18357_v29 = vrot.slane %v15794_v49, 1  ;;  %v18358_v36 = vrot.slane %v15762_v19, 1 }
 0xf91   : > { %v6953_v8 = vmul.f32 %v15713_v53, %v6932_v45  ;;  %v5994_v15 = vsel %vm5983_vm2, %v18355_v9, %v18354_v23  ;;  %v6704_v28 = vadd.f32 %v6688_v13, %v6442_v11  ;;  %v6445_v4 = vadd.f32 %v6429_v37, %v6216_v57 }
 0xf92   : > { %v6410_v48 = vmul.f32 %v18356_v42, %v15762_v19  ;;  %v6484_v31 = vsel %vm6474_vm4, %v18358_v36, %v18357_v29  ;;  %v5940_v44 = vmul.f32 %v15651_v55, %v5919_v59  ;;  %v18359_v20 = vunpack.i.h.bf16 %v15432_v56  ;;  %7033 = vadd.xlane.f32.xlu0 %v16174_v61 }
 0xf93   : > { %v18360_v46 = vunpack.i.h.bf16 %v15438_v6  ;;  %v18361_v41 = vrot.slane %v15794_v49, 2  ;;  %v18362_v3 = vrot.slane %v15762_v19, 2  ;;  %v18363_v13 = vrot.slane %v15797_v12, 6 }
 0xf94   : > { %v6181_v51 = vmul.f32 %v18359_v20, %v5994_v15  ;;  %v6431_v58 = vmul.f32 %v15674_v27, %v6410_v48  ;;  %v18364_v37 = vrot.slane %v15794_v49, 6  ;;  %v6966_v26 = vadd.f32 %v6950_v7, %v6704_v28 }
 0xf95   : > { %v6672_v30 = vmul.f32 %v18360_v46, %v6484_v31  ;;  %v6746_v45 = vsel %vm6736_vm3, %v18362_v3, %v18361_v41  ;;  %v6707_v21 = vadd.f32 %v6691_v47, %v6445_v4  ;;  %v18365_v6 = vunpack.i.h.bf16 %v15442_v5 }
 0xf96   : > { %v5730_v56 = vsel %vm5721_vm1, %v18364_v37, %v18363_v13  ;;  %v6202_v50 = vmul.f32 %v15659_v39, %v6181_v51  ;;  %v18366_v11 = vunpack.i.h.bf16 %v15430_v17  ;;  %v18367_v0 = vrot.slane %v15797_v12, 7 }
 0xf97   : > { %v6934_v35 = vmul.f32 %v18365_v6, %v6746_v45  ;;  %v6693_v19 = vmul.f32 %v15716_v2, %v6672_v30  ;;  %v18368_v59 = vrot.slane %v15794_v49, 7  ;;  %v18369_v47 = vunpack.i.h.bf16 %v15440_v62 }
 0xf98   : > { %v5921_v57 = vmul.f32 %v18366_v11, %v5730_v56  ;;  %v16291_v5 = vadd.f32 %v15749_v14, %v6966_v26  ;;  %v6969_v9 = vadd.f32 %v6953_v8, %v6707_v21  ;;  %v6218_v15 = vadd.f32 %v6202_v50, %v5940_v44  ;;  %v18383_v11 = vld [vmem:[#allocation98_spill] sm:$0xff] }
 0xf99   : > { %v5992_v7 = vsel %vm5983_vm2, %v18368_v59, %v18367_v0  ;;  %v6412_v23 = vmul.f32 %v18369_v47, %v15797_v12  ;;  %v6955_v42 = vmul.f32 %v15713_v53, %v6934_v35  ;;  %v18370_v48 = vunpack.i.h.bf16 %v15436_v32  ;;  %v18387_v47 = vld [vmem:[#allocation88_spill] sm:$0xff] }
 0xf9a   : > { %v5942_v17 = vmul.f32 %v15651_v55, %v5921_v57  ;;  %v18371_v36 = vrot.slane %v15855_v43, 1  ;;  %v18372_v31 = vrot.slane %v15797_v12, 1  ;;  %7005 = vadd.xlane.f32.xlu1 %v16291_v5  ;;  %v16306_v8 = vadd.f32 %v15749_v14, %v6969_v9 }
 0xf9b   : > { %v6183_v29 = vmul.f32 %v18370_v48, %v5992_v7  ;;  %v6433_v49 = vmul.f32 %v15674_v27, %v6412_v23  ;;  %v6447_v28 = vadd.f32 %v6431_v58, %v6218_v15  ;;  %v18373_v4 = vunpack.i.h.bf16 %v15444_v52 }
 0xf9c   : > { %v6482_v62 = vsel %vm6474_vm4, %v18372_v31, %v18371_v36  ;;  %v18374_v32 = vrot.slane %v15855_v43, 2  ;;  %v18375_v20 = vrot.slane %v15797_v12, 2  ;;  %v18376_v30 = vunpack.i.h.bf16 %v15448_v1 }
 0xf9d   : > { %v6674_v44 = vmul.f32 %v18373_v4, %v6482_v62  ;;  %v6204_v46 = vmul.f32 %v15659_v39, %v6183_v29  ;;  %v18377_v3 = vrot.slane %v15920_v33, 6  ;;  %v18378_v45 = vrot.slane %v15855_v43, 6 }
 0xf9e   : > { %v6744_v51 = vsel %vm6736_vm3, %v18375_v20, %v18374_v32  ;;  %v18379_v58 = vrot.slane %v15920_v33, 7  ;;  %v18380_v13 = vrot.slane %v15855_v43, 7  ;;  %v6709_v37 = vadd.f32 %v6693_v19, %v6447_v28  ;;  %7011 = vadd.xlane.f32.xlu1 %v16306_v8 }
 0xf9f   : > { %v6936_v41 = vmul.f32 %v18376_v30, %v6744_v51  ;;  %v5728_v52 = vsel %vm5721_vm1, %v18378_v45, %v18377_v3  ;;  %v6695_v56 = vmul.f32 %v15716_v2, %v6674_v44  ;;  %v18381_v1 = vunpack.i.h.bf16 %v15446_v63  ;;  %v18393_v44 = vld [vmem:[#allocation100_spill] sm:$0xff]  ;;  %v18395_v51 = vld [vmem:[#allocation87_spill] sm:$0xff]  ;;  %v18399_v45 = vld [vmem:[#allocation85_spill] sm:$0xff] }
 0xfa0   : > { %v5990_v12 = vsel %vm5983_vm2, %v18380_v13, %v18379_v58  ;;  %v18382_v21 = vunpack.i.h.bf16 %v15452_v34  ;;  %v6220_v6 = vadd.f32 %v6204_v46, %v5942_v17  ;;  %v18384_v57 = vunpack.i.h.bf16 %v18383_v11 }
 0xfa1   : > { %v5923_v26 = vmul.f32 %v18381_v1, %v5728_v52  ;;  %v6957_v35 = vmul.f32 %v15713_v53, %v6936_v41  ;;  %v18385_v43 = vrot.slane %v15888_v22, 1  ;;  %v18386_v59 = vrot.slane %v15920_v33, 1  ;;  %v18397_v41 = vld [vmem:[#allocation84_spill] sm:$0xff] }
 0xfa2   : > { %v6185_v50 = vmul.f32 %v18382_v21, %v5990_v12  ;;  %v6414_v0 = vmul.f32 %v18384_v57, %v15920_v33  ;;  %v6971_v63 = vadd.f32 %v6955_v42, %v6709_v37  ;;  %v18388_v23 = vunpack.i.h.bf16 %v18387_v47 }
 0xfa3   : > { %v6480_v19 = vsel %vm6474_vm4, %v18386_v59, %v18385_v43  ;;  %v5944_v34 = vmul.f32 %v15651_v55, %v5923_v26  ;;  %v6449_v15 = vadd.f32 %v6433_v49, %v6220_v6  ;;  %v18389_v48 = vrot.slane %v15888_v22, 2 }
 0xfa4   : > { %v6206_v7 = vmul.f32 %v15659_v39, %v6185_v50  ;;  %v6676_v9 = vmul.f32 %v18388_v23, %v6480_v19  ;;  %v6435_v17 = vmul.f32 %v15674_v27, %v6414_v0  ;;  %v18390_v29 = vrot.slane %v15920_v33, 2  ;;  %v18406_v19 = vld [vmem:[#allocation103_spill] sm:$0xff] }
 0xfa5   : > { %v18391_v31 = vrot.slane %v15909_v10, 6  ;;  %v18392_v42 = vrot.slane %v15888_v22, 6  ;;  %v16365_v28 = vadd.f32 %v15749_v14, %v6971_v63  ;;  %v18394_v32 = vunpack.i.h.bf16 %v18393_v44 }
 0xfa6   : > { %v6742_v36 = vsel %vm6736_vm3, %v18390_v29, %v18389_v48  ;;  %v6222_v49 = vadd.f32 %v6206_v7, %v5944_v34  ;;  %v6697_v4 = vmul.f32 %v15716_v2, %v6676_v9  ;;  %v6711_v33 = vadd.f32 %v6695_v56, %v6449_v15  ;;  %v18410_v9 = vld [vmem:[#allocation106_spill] sm:$0xff] }
 0xfa7   : > { %v5726_v62 = vsel %vm5721_vm1, %v18392_v42, %v18391_v31  ;;  %v6938_v20 = vmul.f32 %v18394_v32, %v6742_v36  ;;  %v18396_v46 = vunpack.i.h.bf16 %v18395_v51  ;;  %v18398_v3 = vunpack.i.h.bf16 %v18397_v41  ;;  %7015 = vadd.xlane.f32.xlu1 %v16365_v28  ;;  %v18418_v51 = vld [vmem:[#allocation128_spill] sm:$0xff] }
 0xfa8   : > { %v18400_v52 = vunpack.i.h.bf16 %v18399_v45  ;;  %v6451_v13 = vadd.f32 %v6435_v17, %v6222_v49  ;;  %v18401_v37 = vrot.slane %v15943_v54, 1  ;;  %v18402_v56 = vrot.slane %v15909_v10, 1 }
 0xfa9   : > { %v5925_v30 = vmul.f32 %v18396_v46, %v5726_v62  ;;  %v6187_v22 = vmul.f32 %v18398_v3, %v16114_v16  ;;  %v6959_v12 = vmul.f32 %v15713_v53, %v6938_v20  ;;  %v18403_v26 = vrot.slane %v15943_v54, 2  ;;  %v18414_v62 = vld [vmem:[#allocation112_spill] sm:$0xff]  ;;  %v18416_v20 = vld [vmem:[#allocation110_spill] sm:$0xff] }
 0xfaa   : > { %v6416_v58 = vmul.f32 %v18400_v52, %v15909_v10  ;;  %v6478_v1 = vsel %vm6474_vm4, %v18402_v56, %v18401_v37  ;;  %v18404_v16 = vrot.slane %v15909_v10, 2  ;;  %v6973_v50 = vadd.f32 %v6957_v35, %v6711_v33 }
 0xfab   : > { %v5946_v6 = vmul.f32 %v15651_v55, %v5925_v30  ;;  %v6208_v11 = vmul.f32 %v15659_v39, %v6187_v22  ;;  %v6713_v0 = vadd.f32 %v6697_v4, %v6451_v13  ;;  %v18405_v43 = vunpack.i.h.bf16 %v18314_v24 }
 0xfac   : > { %v6740_v21 = vsel %vm6736_vm3, %v18404_v16, %v18403_v26  ;;  %v6437_v57 = vmul.f32 %v15674_v27, %v6416_v58  ;;  %v18407_v63 = vunpack.i.h.bf16 %v18406_v19  ;;  %v18408_v7 = vrot.slane %v15983_v40, 6 }
 0xfad   : > { %v6678_v59 = vmul.f32 %v18405_v43, %v6478_v1  ;;  %v18409_v10 = vrot.slane %v15943_v54, 6  ;;  %v16406_v47 = vadd.f32 %v15749_v14, %v6973_v50  ;;  %v6224_v23 = vadd.f32 %v6208_v11, %v5946_v6  ;;  %v18424_v1 = vld [vmem:[#allocation73_spill] sm:$0xff] }
 0xfae   : > { %v6940_v34 = vmul.f32 %v18407_v63, %v6740_v21  ;;  %v18411_v15 = vunpack.i.h.bf16 %v18410_v9  ;;  %v18412_v24 = vrot.slane %v15983_v40, 7  ;;  %v18413_v48 = vrot.slane %v15943_v54, 7  ;;  %v18426_v21 = vld [vmem:[#allocation127_spill] sm:$0xff] }
 0xfaf   : > { %v5724_v35 = vsel %vm5721_vm1, %v18409_v10, %v18408_v7  ;;  %v6975_v36 = vadd.f32 %v6959_v12, %v6713_v0  ;;  %v6699_v31 = vmul.f32 %v15716_v2, %v6678_v59  ;;  %v18415_v49 = vunpack.i.h.bf16 %v18414_v62  ;;  %7019 = vadd.xlane.f32.xlu1 %v16406_v47  ;;  %v18439_v62 = vld [vmem:[#allocation135_spill] sm:$0xff] }
 0xfb0   : > { %v5927_v17 = vmul.f32 %v18411_v15, %v5724_v35  ;;  %v5986_v29 = vsel %vm5983_vm2, %v18413_v48, %v18412_v24  ;;  %v6961_v42 = vmul.f32 %v15713_v53, %v6940_v34  ;;  %v6453_v44 = vadd.f32 %v6437_v57, %v6224_v23  ;;  %v18433_v34 = vld [vmem:[#allocation136_spill] sm:$0xff]  ;;  %v18436_v15 = vld [vmem:[#allocation115_spill] sm:$0xff] }
 0xfb1   : > { %v6189_v4 = vmul.f32 %v18415_v49, %v5986_v29  ;;  %v18417_v33 = vunpack.i.h.bf16 %v18416_v20  ;;  %v18419_v46 = vrot.slane %v18418_v51, 1  ;;  %v18420_v30 = vrot.slane %v15983_v40, 1  ;;  %v18434_v35 = vld [vmem:[#allocation76_spill] sm:$0xff] }
 0xfb2   : > { %v5948_v32 = vmul.f32 %v15651_v55, %v5927_v17  ;;  %v16432_v3 = vadd.f32 %v15749_v14, %v6975_v36  ;;  %v18421_v45 = vunpack.i.h.bf16 %v18320_v38  ;;  %v18422_v58 = vrot.slane %v18418_v51, 2  ;;  %v18438_v36 = vld [vmem:[#allocation123_spill] sm:$0xff] }
 0xfb3   : > { %v6418_v54 = vmul.f32 %v18417_v33, %v15983_v40  ;;  %v6476_v41 = vsel %vm6474_vm4, %v18420_v30, %v18419_v46  ;;  %v6210_v22 = vmul.f32 %v15659_v39, %v6189_v4  ;;  %v18423_v13 = vrot.slane %v15983_v40, 2  ;;  %v18429_v40 = vld [vmem:[#allocation83_spill] sm:$0xff] }
 0xfb4   : > { %v6680_v52 = vmul.f32 %v18421_v45, %v6476_v41  ;;  %v6715_v37 = vadd.f32 %v6699_v31, %v6453_v44  ;;  %v18425_v26 = vunpack.i.h.bf16 %v18424_v1  ;;  %v18427_v50 = vrot.slane %v18426_v21, 6  ;;  %7023 = vadd.xlane.f32.xlu1 %v16432_v3 }
 0xfb5   : > { %v6738_v12 = vsel %vm6736_vm3, %v18423_v13, %v18422_v58  ;;  %v6439_v56 = vmul.f32 %v15674_v27, %v6418_v54  ;;  %v18428_v6 = vrot.slane %v18418_v51, 6  ;;  %v6226_v11 = vadd.f32 %v6210_v22, %v5948_v32  ;;  %v18440_v32 = vld [vmem:[#allocation121_spill] sm:$0xff]  ;;  %v18441_v58 = vld [vmem:[#allocation132_spill] sm:$0xff] }
 0xfb6   : > { %v6942_v16 = vmul.f32 %v18425_v26, %v6738_v12  ;;  %v6701_v57 = vmul.f32 %v15716_v2, %v6680_v52  ;;  %v18430_v0 = vunpack.i.h.bf16 %v18429_v40  ;;  %v18431_v59 = vrot.slane %v18426_v21, 7 }
 0xfb7   : > { %v5722_v38 = vsel %vm5721_vm1, %v18428_v6, %v18427_v50  ;;  %v18432_v19 = vrot.slane %v18418_v51, 7  ;;  %v10815_v7 = vunpack.i.h.bf16 %v18433_v34  ;;  %v6977_v10 = vadd.f32 %v6961_v42, %v6715_v37 }
 0xfb8   : > { %v5929_v43 = vmul.f32 %v18430_v0, %v5722_v38  ;;  %v18435_v23 = vunpack.i.h.bf16 %v18434_v35  ;;  %v18437_v17 = vunpack.i.h.bf16 %v18436_v15  ;;  %v6455_v48 = vadd.f32 %v6439_v56, %v6226_v11  ;;  %v18445_v15 = vld [vmem:[#allocation129_spill] sm:$0xff] }
 0xfb9   : > { %v5984_v63 = vsel %vm5983_vm2, %v18432_v19, %v18431_v59  ;;  %v6682_v31 = vmul.f32 %v10815_v7, %v18438_v36  ;;  %v10825_v60 = vunpack.i.h.bf16 %v18439_v62  ;;  %v16472_v49 = vadd.f32 %v15749_v14, %v6977_v10 }
 0xfba   : > { %v6191_v9 = vmul.f32 %v18435_v23, %v5984_v63  ;;  %v6420_v24 = vmul.f32 %v18437_v17, %v18426_v21  ;;  %v5950_v29 = vmul.f32 %v15651_v55, %v5929_v43  ;;  %v6717_v42 = vadd.f32 %v6701_v57, %v6455_v48  ;;  %v18444_v43 = vld [vmem:[#allocation130_spill] sm:$0xff] }
 0xfbb   : > { %v6963_v44 = vmul.f32 %v15713_v53, %v6942_v16  ;;  %v6944_v20 = vmul.f32 %v10825_v60, %v18440_v32  ;;  %7027 = vadd.xlane.f32.xlu1 %v16472_v49  ;;  %v6703_v51 = vmul.f32 %v15716_v2, %v6682_v31  ;;  %v18442_v2 = vld [vmem:[#allocation53_spill] sm:$0xff] }
 0xfbc   : > { %v6212_v4 = vmul.f32 %v15659_v39, %v6191_v9  ;;  %v6441_v54 = vmul.f32 %v15674_v27, %v6420_v24 }
 0xfbd   : > { %v6979_v55 = vadd.f32 %v6963_v44, %v6717_v42  ;;  %v6965_v41 = vmul.f32 %v15713_v53, %v6944_v20  ;;  %v18446_v42 = vld [vmem:[#allocation124_spill] sm:$0xff] }
 0xfbe   : > { %v6228_v33 = vadd.f32 %v6212_v4, %v5950_v29 }
 0xfbf   : > { %v16481_v30 = vadd.f32 %v15749_v14, %v6979_v55 }
 0xfc0   : > { %v6457_v46 = vadd.f32 %v6441_v54, %v6228_v33 }
 0xfc1   : > { %7031 = vadd.xlane.f32.xlu1 %v16481_v30 }
 0xfc2   : > { %v6719_v39 = vadd.f32 %v6703_v51, %v6457_v46 }
 0xfc4   : > { %v6981_v22 = vadd.f32 %v6965_v41, %v6719_v39 }
 0xfc6   : > { %v16486_v45 = vadd.f32 %v15749_v14, %v6981_v22  ;;  %v18443_v14 = vld [vmem:[#allocation131_spill] sm:$0xff] }
 0xfc8   : > { %7035 = vadd.xlane.f32.xlu1 %v16486_v45 }
 0xfcf   : > { %v7008_v52 = vpop.xlane.xlu0 %7007 }
 0xfd0   : > { %v7038_v27 = vmul.f32 0.03125, %v7008_v52 }
 0xfd2   : > { %v7054_v13 = vsub.f32 %v18441_v58, %v7038_v27 }
 0xfd4   : > { %v16491_v12 = vmul.f32 %v18442_v2, %v7054_v13 }
 0xfd6   : > { %v7086_v37 = vmul.f32 %v16491_v12, %v16491_v12 }
 0xfd8   : > { %7103 = vadd.xlane.f32.xlu1 %v7086_v37 }
 0xfda   : > { %v7010_v53 = vpop.xlane.xlu0 %7009 }
 0xfdb   : > { %v7039_v56 = vmul.f32 0.03125, %v7010_v53 }
 0xfdd   : > { %v7055_v21 = vsub.f32 %v18443_v14, %v7039_v56 }
 0xfdf   : > { %v16501_v0 = vmul.f32 %v18442_v2, %v7055_v21 }
 0xfe1   : > { %v7087_v9 = vmul.f32 %v16501_v0, %v16501_v0 }
 0xfe5   : > { %v7014_v1 = vpop.xlane.xlu0 %7013 }
 0xfe6   : > { %v7041_v50 = vmul.f32 0.03125, %v7014_v1 }
 0xfe8   : > { %v7057_v59 = vsub.f32 %v18444_v43, %v7041_v50 }
 0xfea   : > { %v16511_v23 = vmul.f32 %v18442_v2, %v7057_v59 }
 0xfec   : > { %v7089_v60 = vmul.f32 %v16511_v23, %v16511_v23 }
 0xfef   : > { %v7018_v38 = vpop.xlane.xlu0 %7017 }
 0xff0   : > { %v7043_v19 = vmul.f32 0.03125, %v7018_v38 }
 0xff2   : > { %v7059_v17 = vsub.f32 %v18445_v15, %v7043_v19  ;;  %v11006_v15 = vld [vmem:[%s7350_s28 + $0x18] sm:$0xff]  }
 0xff4   : > { %v16525_v4 = vmul.f32 %v18442_v2, %v7059_v17  ;;  %v11007_v17 = vld [vmem:[%s7350_s28 + $0x10] sm:$0xff]  }
 0xff6   : > { %v7091_v22 = vmul.f32 %v16525_v4, %v16525_v4 }
 0xffc   : > { %v7022_v7 = vpop.xlane.xlu0 %7021 }
 0xffd   : > { %v7045_v24 = vmul.f32 0.03125, %v7022_v7 }
 0xfff   : > { %v7061_v44 = vsub.f32 %v18446_v42, %v7045_v24  ;;  %v11008_v24 = vld [vmem:[%s7350_s28 + $0x8] sm:$0xff]  }
0x1001   : > { %v16535_v46 = vmul.f32 %v18442_v2, %v7061_v44 }
0x1003   : > { %v7093_v1 = vmul.f32 %v16535_v46, %v16535_v46 }
0x100f   : > { %v7026_v29 = vpop.xlane.xlu0 %7025 }
0x1017   : > { %v7030_v20 = vpop.xlane.xlu0 %7029 }
0x1018   : > { %v7049_v39 = vmul.f32 0.03125, %v7030_v20 }
0x101b   : > { %v7034_v52 = vpop.xlane.xlu0 %7033 }
0x101c   : > { %v7051_v56 = vmul.f32 0.03125, %v7034_v52 }
0x1023   : > { %v7006_v26 = vpop.xlane.xlu1 %7005 }
0x1024   : > { %v7037_v16 = vmul.f32 0.03125, %v7006_v26 }
0x1026   : > { %v7053_v6 = vsub.f32 %v16291_v5, %v7037_v16 }
0x1027   : > { %v7012_v11 = vpop.xlane.xlu1 %7011 }
0x1028   : > { %v16498_v57 = vmul.f32 %v18442_v2, %v7053_v6  ;;  %v7040_v40 = vmul.f32 0.03125, %v7012_v11 }
0x102a   : > { %v7056_v63 = vsub.f32 %v16306_v8, %v7040_v40  ;;  %v7085_v34 = vmul.f32 %v16498_v57, %v16498_v57 }
0x102c   : > { %v16508_v5 = vmul.f32 %v18442_v2, %v7056_v63  ;;  %7101 = vadd.xlane.f32.xlu0 %v7085_v34 }
0x102e   : > { %v7088_v48 = vmul.f32 %v16508_v5, %v16508_v5 }
0x1030   : > { %v7016_v10 = vpop.xlane.xlu1 %7015  ;;  %7105 = vadd.xlane.f32.xlu0 %v7087_v9  ;;  %7107 = vadd.xlane.f32.xlu1 %v7088_v48  ;;  %v11004_v9 = vld [vmem:[%s7350_s28 + $0x28] sm:$0xff]  }
0x1031   : > { %v7042_v35 = vmul.f32 0.03125, %v7016_v10  ;;  %v11002_v10 = vld [vmem:[%s7350_s28 + $0x38] sm:$0xff]  }
0x1032   : > { %10273 = vmatprep.subr.bf16.mxu0 %v11002_v10 }
0x1033   : > { %v7058_v8 = vsub.f32 %v16365_v28, %v7042_v35  ;;  %v7047_v28 = vmul.f32 0.03125, %v7026_v29  ;;  %v11003_v35 = vld [vmem:[%s7350_s28 + $0x30] sm:$0xff]   ;;  %10274 = vmatpush3.bf16.msra.mxu0 %v11002_v10 }
0x1034   : > { %7109 = vadd.xlane.f32.xlu0 %v7089_v60  ;;  %10275 = vmatprep.subr.bf16.mxu0 %v11003_v35 }
0x1035   : > { %v16520_v36 = vmul.f32 %v18442_v2, %v7058_v8  ;;  %v7063_v41 = vsub.f32 %v16183_v25, %v7047_v28  ;;  %v7065_v25 = vsub.f32 %v16224_v18, %v7049_v39  ;;  %v7067_v18 = vsub.f32 %v16174_v61, %v7051_v56  ;;  %v11009_v8 = vld [vmem:[%s7350_s28] sm:$0xff]  }
0x1037   : > { %v7090_v32 = vmul.f32 %v16520_v36, %v16520_v36  ;;  %v16547_v53 = vmul.f32 %v18442_v2, %v7063_v41  ;;  %v16559_v21 = vmul.f32 %v18442_v2, %v7065_v25  ;;  %v16568_v11 = vmul.f32 %v18442_v2, %v7067_v18  ;;  %10276 = vmatpush3.bf16.msra.mxu0 %v11003_v35 }
0x1038   : > { %v7020_v31 = vpop.xlane.xlu1 %7019  ;;  %7113 = vadd.xlane.f32.xlu0 %v7091_v22  ;;  %10277 = vmatprep.subr.bf16.mxu0 %v11004_v9 }
0x1039   : > { %v7044_v62 = vmul.f32 0.03125, %v7020_v31  ;;  %7111 = vadd.xlane.f32.xlu1 %v7090_v32  ;;  %v7095_v6 = vmul.f32 %v16547_v53, %v16547_v53  ;;  %v7097_v61 = vmul.f32 %v16559_v21, %v16559_v21  ;;  %v7099_v63 = vmul.f32 %v16568_v11, %v16568_v11 }
0x103b   : > { %v7060_v33 = vsub.f32 %v16406_v47, %v7044_v62  ;;  %10278 = vmatpush3.bf16.msra.mxu0 %v11004_v9 }
0x103c   : > { %7117 = vadd.xlane.f32.xlu0 %v7093_v1 }
0x103d   : > { %v7024_v54 = vpop.xlane.xlu1 %7023  ;;  %v16532_v55 = vmul.f32 %v18442_v2, %v7060_v33  ;;  %v16588_v33 = vld [vmem:[%s12809_s3 + $0x3] ss:$0 sm:$0xff] }
0x103e   : > { %v7046_v51 = vmul.f32 0.03125, %v7024_v54 }
0x103f   : > { %v7092_v47 = vmul.f32 %v16532_v55, %v16532_v55 }
0x1040   : > { %v7062_v27 = vsub.f32 %v16432_v3, %v7046_v51  ;;  %7121 = vadd.xlane.f32.xlu0 %v7095_v6 }
0x1041   : > { %7115 = vadd.xlane.f32.xlu1 %v7092_v47  ;;  %v16592_v47 = vld [vmem:[%s12814_s25 + $0x3] ss:$0 sm:$0xff] }
0x1042   : > { %v16544_v13 = vmul.f32 %v18442_v2, %v7062_v27 }
0x1044   : > { %v7028_v58 = vpop.xlane.xlu1 %7027  ;;  %v7094_v26 = vmul.f32 %v16544_v13, %v16544_v13  ;;  %7125 = vadd.xlane.f32.xlu0 %v7097_v61 }
0x1045   : > { %v7048_v37 = vmul.f32 0.03125, %v7028_v58 }
0x1046   : > { %7119 = vadd.xlane.f32.xlu1 %v7094_v26 }
0x1047   : > { %v7064_v3 = vsub.f32 %v16472_v49, %v7048_v37 }
0x1048   : > { %7129 = vadd.xlane.f32.xlu0 %v7099_v63 }
0x1049   : > { %v16556_v16 = vmul.f32 %v18442_v2, %v7064_v3 }
0x104a   : > { %v7032_v14 = vpop.xlane.xlu1 %7031 }
0x104b   : > { %v7050_v50 = vmul.f32 0.03125, %v7032_v14  ;;  %v7096_v49 = vmul.f32 %v16556_v16, %v16556_v16 }
0x104d   : > { %v7066_v38 = vsub.f32 %v16481_v30, %v7050_v50  ;;  %7123 = vadd.xlane.f32.xlu1 %v7096_v49 }
0x104f   : > { %v16571_v40 = vmul.f32 %v18442_v2, %v7066_v38 }
0x1051   : > { %v7036_v43 = vpop.xlane.xlu1 %7035  ;;  %v7098_v19 = vmul.f32 %v16571_v40, %v16571_v40 }
0x1052   : > { %v7052_v59 = vmul.f32 0.03125, %v7036_v43 }
0x1053   : > { %7127 = vadd.xlane.f32.xlu1 %v7098_v19 }
0x1054   : > { %v7068_v30 = vsub.f32 %v16486_v45, %v7052_v59  ;;  %v11005_v45 = vld [vmem:[%s7350_s28 + $0x20] sm:$0xff]  }
0x1055   : > { %10279 = vmatprep.subr.bf16.mxu0 %v11005_v45 }
0x1056   : > { %v16581_v34 = vmul.f32 %v18442_v2, %v7068_v30  ;;  %10280 = vmatpush3.bf16.msra.mxu0 %v11005_v45 }
0x1057   : > { %10281 = vmatprep.subr.bf16.mxu0 %v11006_v15 }
0x1058   : > { %v7100_v7 = vmul.f32 %v16581_v34, %v16581_v34 }
0x105a   : > { %7131 = vadd.xlane.f32.xlu1 %v7100_v7  ;;  %10282 = vmatpush3.bf16.msra.mxu0 %v11006_v15 }
0x105b   : > { %10283 = vmatprep.subr.bf16.mxu0 %v11007_v17 }
0x105e   : > { %10284 = vmatpush3.bf16.msra.mxu0 %v11007_v17 }
0x105f   : > { %10285 = vmatprep.subr.bf16.mxu0 %v11008_v24 }
0x1061   : > { %v7104_v48 = vpop.xlane.xlu1 %7103 }
0x1062   : > { %10286 = vmatpush3.bf16.msra.mxu0 %v11008_v24  ;;  %v7134_v29 = vmul.f32 0.03125, %v7104_v48 }
0x1063   : > { %10287 = vmatprep.subr.bf16.mxu0 %v11009_v8 }
0x1064   : > { %v7150_v31 = vadd.f32 1e-05, %v7134_v29 }
0x1066   : > { %10288 = vmatpush3.bf16.msra.mxu0 %v11009_v8  ;;  %11378 = vrsqrt.f32 %v7150_v31 }
0x1073   : > { %v11379_v60 = vpop.eup %11378 }
0x1074   : > { %v7182_v20 = vmul.f32 %v11379_v60, %v16491_v12 }
0x1076   : > { %v7202_v27 = vmul.f32 %v16588_v33, %v7182_v20 }
0x1078   : > { %v16595_v1 = vadd.f32 %v16592_v47, %v7202_v27 }
0x107a   : > { %v9737_v49 = vmul.f32 -1.442695, %v16595_v1 }
0x10b5   : > { %v7102_v62 = vpop.xlane.xlu0 %7101 }
0x10b6   : > { %v7133_v42 = vmul.f32 0.03125, %v7102_v62 }
0x10b8   : > { %v7149_v44 = vadd.f32 1e-05, %v7133_v42 }
0x10b9   : > { %v7106_v28 = vpop.xlane.xlu0 %7105  ;;  %v7108_v32 = vpop.xlane.xlu1 %7107 }
0x10ba   : > { %11380 = vrsqrt.f32 %v7149_v44  ;;  %v7135_v54 = vmul.f32 0.03125, %v7106_v28  ;;  %v7136_v51 = vmul.f32 0.03125, %v7108_v32 }
0x10bc   : > { %v7151_v41 = vadd.f32 1e-05, %v7135_v54  ;;  %v7152_v39 = vadd.f32 1e-05, %v7136_v51 }
0x10bd   : > { %v7110_v22 = vpop.xlane.xlu0 %7109 }
0x10be   : > { %11382 = vrsqrt.f32 %v7151_v41  ;;  %v7137_v58 = vmul.f32 0.03125, %v7110_v22 }
0x10bf   : > { %11384 = vrsqrt.f32 %v7152_v39 }
0x10c0   : > { %v7153_v25 = vadd.f32 1e-05, %v7137_v58 }
0x10c1   : > { %v7114_v12 = vpop.xlane.xlu0 %7113 }
0x10c2   : > { %v7112_v52 = vpop.xlane.xlu1 %7111  ;;  %11386 = vrsqrt.f32 %v7153_v25  ;;  %v7139_v3 = vmul.f32 0.03125, %v7114_v12 }
0x10c3   : > { %v7138_v37 = vmul.f32 0.03125, %v7112_v52 }
0x10c4   : > { %v7155_v18 = vadd.f32 1e-05, %v7139_v3 }
0x10c5   : > { %v7154_v56 = vadd.f32 1e-05, %v7138_v37  ;;  %v7118_v6 = vpop.xlane.xlu0 %7117 }
0x10c6   : > { %v7141_v38 = vmul.f32 0.03125, %v7118_v6 }
0x10c7   : > { %11388 = vrsqrt.f32 %v7154_v56  ;;  %v11381_v61 = vpop.eup %11380 }
0x10c8   : > { %11390 = vrsqrt.f32 %v7155_v18  ;;  %v7157_v19 = vadd.f32 1e-05, %v7141_v38  ;;  %v7181_v30 = vmul.f32 %v11381_v61, %v16498_v57 }
0x10c9   : > { %v7122_v7 = vpop.xlane.xlu0 %7121 }
0x10ca   : > { %v7116_v26 = vpop.xlane.xlu1 %7115  ;;  %v7143_v10 = vmul.f32 0.03125, %v7122_v7  ;;  %v7201_v9 = vmul.f32 %v16588_v33, %v7181_v30 }
0x10cb   : > { %v7140_v14 = vmul.f32 0.03125, %v7116_v26  ;;  %v11383_v45 = vpop.eup %11382 }
0x10cc   : > { %v11385_v17 = vpop.eup %11384  ;;  %v7183_v24 = vmul.f32 %v11383_v45, %v16501_v0  ;;  %v7159_v8 = vadd.f32 1e-05, %v7143_v10  ;;  %v16602_v48 = vadd.f32 %v16592_v47, %v7201_v9 }
0x10cd   : > { %v7156_v50 = vadd.f32 1e-05, %v7140_v14  ;;  %v7184_v57 = vmul.f32 %v11385_v17, %v16508_v5  ;;  %v7126_v31 = vpop.xlane.xlu0 %7125 }
0x10ce   : > { %v7203_v62 = vmul.f32 %v16588_v33, %v7183_v24  ;;  %v7145_v60 = vmul.f32 0.03125, %v7126_v31  ;;  %v9736_v42 = vmul.f32 -1.442695, %v16602_v48 }
0x10cf   : > { %v7120_v43 = vpop.xlane.xlu1 %7119  ;;  %11392 = vrsqrt.f32 %v7156_v50  ;;  %v11387_v44 = vpop.eup %11386  ;;  %v7204_v28 = vmul.f32 %v16588_v33, %v7184_v57 }
0x10d0   : > { %v7142_v59 = vmul.f32 0.03125, %v7120_v43  ;;  %11394 = vpow2.f32 %v9737_v49  ;;  %v16609_v20 = vadd.f32 %v16592_v47, %v7203_v62  ;;  %v7161_v54 = vadd.f32 1e-05, %v7145_v60 }
0x10d1   : > { %11396 = vrsqrt.f32 %v7157_v19  ;;  %v16612_v5 = vadd.f32 %v16592_v47, %v7204_v28  ;;  %v7130_v41 = vpop.xlane.xlu0 %7129  ;;  %v7185_v39 = vmul.f32 %v11387_v44, %v16511_v23 }
0x10d2   : > { %v7158_v63 = vadd.f32 1e-05, %v7142_v59  ;;  %v9738_v52 = vmul.f32 -1.442695, %v16609_v20  ;;  %v7147_v58 = vmul.f32 0.03125, %v7130_v41 }
0x10d3   : > { %v9739_v25 = vmul.f32 -1.442695, %v16612_v5  ;;  %v7205_v56 = vmul.f32 %v16588_v33, %v7185_v39 }
0x10d4   : > { %11398 = vrsqrt.f32 %v7158_v63  ;;  %v11389_v0 = vpop.eup %11388  ;;  %v7163_v26 = vadd.f32 1e-05, %v7147_v58 }
0x10d5   : > { %11400 = vrsqrt.f32 %v7159_v8  ;;  %v7186_v22 = vmul.f32 %v11389_v0, %v16520_v36  ;;  %v11391_v37 = vpop.eup %11390  ;;  %v16622_v18 = vadd.f32 %v16592_v47, %v7205_v56 }
0x10d6   : > { %v7124_v35 = vpop.xlane.xlu1 %7123  ;;  %v7187_v23 = vmul.f32 %v11391_v37, %v16525_v4 }
0x10d7   : > { %v7144_v15 = vmul.f32 0.03125, %v7124_v35  ;;  %v7206_v12 = vmul.f32 %v16588_v33, %v7186_v22  ;;  %v9740_v59 = vmul.f32 -1.442695, %v16622_v18 }
0x10d8   : > { %v7207_v38 = vmul.f32 %v16588_v33, %v7187_v23 }
0x10d9   : > { %v7160_v29 = vadd.f32 1e-05, %v7144_v15  ;;  %v16625_v50 = vadd.f32 %v16592_v47, %v7206_v12 }
0x10da   : > { %v16633_v63 = vadd.f32 %v16592_v47, %v7207_v38 }
0x10db   : > { %11402 = vrsqrt.f32 %v7160_v29  ;;  %v9741_v4 = vmul.f32 -1.442695, %v16625_v50 }
0x10dc   : > { %v7128_v32 = vpop.xlane.xlu1 %7127  ;;  %11404 = vpow2.f32 %v9736_v42  ;;  %v11393_v3 = vpop.eup %11392  ;;  %v9742_v9 = vmul.f32 -1.442695, %v16633_v63 }
0x10dd   : > { %v7146_v51 = vmul.f32 0.03125, %v7128_v32  ;;  %11406 = vrsqrt.f32 %v7161_v54  ;;  %v11395_v6 = vpop.eup %11394  ;;  %v7188_v49 = vmul.f32 %v11393_v3, %v16532_v55 }
0x10de   : > { %11408 = vpow2.f32 %v9738_v52  ;;  %v11397_v43 = vpop.eup %11396  ;;  %v7286_v10 = vadd.f32 1.0, %v11395_v6 }
0x10df   : > { %v7162_v27 = vadd.f32 1e-05, %v7146_v51  ;;  %11410 = vpow2.f32 %v9739_v25  ;;  %v7208_v30 = vmul.f32 %v16588_v33, %v7188_v49  ;;  %v7189_v7 = vmul.f32 %v11397_v43, %v16535_v46 }
0x10e1   : > { %11412 = vrsqrt.f32 %v7162_v27  ;;  %v11399_v19 = vpop.eup %11398  ;;  %v16638_v35 = vadd.f32 %v16592_v47, %v7208_v30  ;;  %v7209_v45 = vmul.f32 %v16588_v33, %v7189_v7 }
0x10e2   : > { %11414 = vrsqrt.f32 %v7163_v26  ;;  %v7190_v55 = vmul.f32 %v11399_v19, %v16544_v13  ;;  %v11401_v15 = vpop.eup %11400 }
0x10e3   : > { %v7132_v14 = vpop.xlane.xlu1 %7131  ;;  %v9743_v46 = vmul.f32 -1.442695, %v16638_v35  ;;  %v16645_v8 = vadd.f32 %v16592_v47, %v7209_v45  ;;  %v7191_v13 = vmul.f32 %v11401_v15, %v16547_v53 }
0x10e4   : > { %v7148_v36 = vmul.f32 0.03125, %v7132_v14  ;;  %v7210_v17 = vmul.f32 %v16588_v33, %v7190_v55 }
0x10e5   : > { %v9744_v60 = vmul.f32 -1.442695, %v16645_v8  ;;  %v7211_v42 = vmul.f32 %v16588_v33, %v7191_v13 }
0x10e6   : > { %v7164_v61 = vadd.f32 1e-05, %v7148_v36  ;;  %v16649_v29 = vadd.f32 %v16592_v47, %v7210_v17 }
0x10e7   : > { %v16657_v53 = vadd.f32 %v16592_v47, %v7211_v42 }
0x10e8   : > { %11416 = vrsqrt.f32 %v7164_v61  ;;  %v11403_v24 = vpop.eup %11402  ;;  %v9745_v28 = vmul.f32 -1.442695, %v16649_v29 }
0x10e9   : > { %11418 = vpow2.f32 %v9740_v59  ;;  %v11405_v57 = vpop.eup %11404  ;;  %v7192_v31 = vmul.f32 %v11403_v24, %v16556_v16  ;;  %v9746_v39 = vmul.f32 -1.442695, %v16657_v53 }
0x10ea   : > { %11420 = vpow2.f32 %v9741_v4  ;;  %v7285_v62 = vadd.f32 1.0, %v11405_v57  ;;  %v11407_v44 = vpop.eup %11406 }
0x10eb   : > { %11422 = vpow2.f32 %v9742_v9  ;;  %v7212_v32 = vmul.f32 %v16588_v33, %v7192_v31  ;;  %v7193_v0 = vmul.f32 %v11407_v44, %v16559_v21  ;;  %v11409_v54 = vpop.eup %11408 }
0x10ec   : > { %11424 = vrcp.f32 %v7286_v10  ;;  %v11411_v51 = vpop.eup %11410  ;;  %v7287_v41 = vadd.f32 1.0, %v11409_v54 }
0x10ed   : > { %11426 = vpow2.f32 %v9743_v46  ;;  %v16661_v16 = vadd.f32 %v16592_v47, %v7212_v32  ;;  %v7213_v22 = vmul.f32 %v16588_v33, %v7193_v0  ;;  %v7288_v27 = vadd.f32 1.0, %v11411_v51 }
0x10ee   : > { %11428 = vrcp.f32 %v7285_v62  ;;  %v11413_v52 = vpop.eup %11412 }
0x10ef   : > { %11430 = vpow2.f32 %v9744_v60  ;;  %v9747_v58 = vmul.f32 -1.442695, %v16661_v16  ;;  %v11415_v37 = vpop.eup %11414  ;;  %v7194_v21 = vmul.f32 %v11413_v52, %v16571_v40  ;;  %v16668_v25 = vadd.f32 %v16592_v47, %v7213_v22 }
0x10f0   : > { %11432 = vpow2.f32 %v9745_v28  ;;  %v7195_v56 = vmul.f32 %v11415_v37, %v16568_v11 }
0x10f1   : > { %11434 = vrcp.f32 %v7287_v41  ;;  %v7214_v3 = vmul.f32 %v16588_v33, %v7194_v21  ;;  %v9748_v26 = vmul.f32 -1.442695, %v16668_v25 }
0x10f2   : > { %11436 = vrcp.f32 %v7288_v27  ;;  %v7215_v36 = vmul.f32 %v16588_v33, %v7195_v56 }
0x10f3   : > { %11438 = vpow2.f32 %v9746_v39  ;;  %v16676_v49 = vadd.f32 %v16592_v47, %v7214_v3 }
0x10f4   : > { %11440 = vpow2.f32 %v9747_v58  ;;  %v16680_v61 = vadd.f32 %v16592_v47, %v7215_v36 }
0x10f5   : > { %v11417_v12 = vpop.eup %11416  ;;  %11442 = vpow2.f32 %v9748_v26 }
0x10f6   : > { %v11419_v14 = vpop.eup %11418  ;;  %v7196_v23 = vmul.f32 %v11417_v12, %v16581_v34  ;;  %v9749_v34 = vmul.f32 -1.442695, %v16676_v49  ;;  %v9750_v7 = vmul.f32 -1.442695, %v16680_v61 }
0x10f7   : > { %v11421_v6 = vpop.eup %11420  ;;  %v7289_v40 = vadd.f32 1.0, %v11419_v14 }
0x10f8   : > { %v11423_v38 = vpop.eup %11422  ;;  %v7290_v11 = vadd.f32 1.0, %v11421_v6  ;;  %v7216_v43 = vmul.f32 %v16588_v33, %v7196_v23 }
0x10f9   : > { %v11425_v59 = vpop.eup %11424  ;;  %11444 = vrcp.f32 %v7289_v40  ;;  %v7291_v4 = vadd.f32 1.0, %v11423_v38 }
0x10fa   : > { %v11427_v19 = vpop.eup %11426  ;;  %11446 = vrcp.f32 %v7290_v11  ;;  %v16684_v30 = vadd.f32 %v16592_v47, %v7216_v43  ;;  %v7334_v15 = vmul.f32 %v11425_v59, %v16595_v1 }
0x10fb   : > { %v7292_v10 = vadd.f32 1.0, %v11427_v19  ;;  %11448 = vrcp.f32 %v7291_v4  ;;  %v11429_v55 = vpop.eup %11428 }
0x10fc   : > { %11450 = vpow2.f32 %v9749_v34  ;;  %v9751_v33 = vmul.f32 -1.442695, %v16684_v30  ;;  %v11431_v9 = vpop.eup %11430  ;;  %v7333_v45 = vmul.f32 %v11429_v55, %v16602_v48 }
0x10fd   : > { %11452 = vrcp.f32 %v7292_v10  ;;  %v11433_v17 = vpop.eup %11432  ;;  %v7293_v24 = vadd.f32 1.0, %v11431_v9 }
0x10fe   : > { %11454 = vpow2.f32 %v9750_v7  ;;  %v7367_v46 = vpack.c.bf16 %v7334_v15, %v7333_v45  ;;  %v7294_v47 = vadd.f32 1.0, %v11433_v17  ;;  %v11435_v13 = vpop.eup %11434  ;;  %v9753_v7 = vld [vmem:[%s12819_s19 + $0x5] ss:$0 sm:$0xff]  ;;  %v18448_v17 = vld [vmem:[#allocation93_spill] sm:$0xff] }
0x10ff   : > { %11456 = vpow2.f32 %v9751_v33  ;;  %v11437_v57 = vpop.eup %11436  ;;  %v7335_v31 = vmul.f32 %v11435_v13, %v16609_v20 }
0x1100   : > { %11458 = vrcp.f32 %v7293_v24  ;;  %10289 = vmatprep.mubr.bf16.mxu0 %v7367_v46  ;;  %v11439_v62 = vpop.eup %11438  ;;  %v7336_v60 = vmul.f32 %v11437_v57, %v16612_v5  ;;  %v18449_v24 = vld [vmem:[#allocation89_spill] sm:$0xff] }
0x1101   : > { %11460 = vrcp.f32 %v7294_v47  ;;  %v11441_v48 = vpop.eup %11440  ;;  %v7295_v42 = vadd.f32 1.0, %v11439_v62 }
0x1102   : > { %v11443_v1 = vpop.eup %11442  ;;  %v7368_v44 = vpack.c.bf16 %v7336_v60, %v7335_v31  ;;  %v7296_v28 = vadd.f32 1.0, %v11441_v48  ;;  %v18450_v31 = vld [vmem:[#allocation91_spill] sm:$0xff] }
0x1103   : > { %11462 = vrcp.f32 %v7295_v42  ;;  %v7297_v32 = vadd.f32 1.0, %v11443_v1  ;;  %v18451_v42 = vld [vmem:[#allocation92_spill] sm:$0xff] }
0x1104   : > { %10290 = vmatmul.mubr.bf16.vlgmr.msra.gmra.mxu0 %v7368_v44  ;;  %11464 = vrcp.f32 %v7296_v28 }
0x1105   : > { %11466 = vrcp.f32 %v7297_v32  ;;  %v18452_v32 = vld [vmem:[#allocation90_spill] sm:$0xff] }
0x1106   : > { %v11445_v0 = vpop.eup %11444 }
0x1107   : > { %v11447_v54 = vpop.eup %11446  ;;  %v7337_v51 = vmul.f32 %v11445_v0, %v16622_v18 }
0x1108   : > { %v11449_v41 = vpop.eup %11448  ;;  %v7338_v20 = vmul.f32 %v11447_v54, %v16625_v50 }
0x1109   : > { %v11451_v39 = vpop.eup %11450  ;;  %v7339_v5 = vmul.f32 %v11449_v41, %v16633_v63 }
0x110a   : > { %v11453_v22 = vpop.eup %11452  ;;  %v7369_v52 = vpack.c.bf16 %v7338_v20, %v7337_v51  ;;  %v7298_v27 = vadd.f32 1.0, %v11451_v39  ;;  %v18453_v51 = vld [vmem:[#allocation79_spill] sm:$0xff] }
0x110b   : > { %v11455_v58 = vpop.eup %11454  ;;  %v7340_v37 = vmul.f32 %v11453_v22, %v16638_v35  ;;  %v18454_v22 = vld [vmem:[#allocation81_spill] sm:$0xff] }
0x110c   : > { %v11457_v21 = vpop.eup %11456  ;;  %10293 = vmatprep.mubr.bf16.mxu0 %v7369_v52  ;;  %11468 = vrcp.f32 %v7298_v27  ;;  %v7299_v56 = vadd.f32 1.0, %v11455_v58 }
0x110d   : > { %v11459_v12 = vpop.eup %11458  ;;  %v7370_v3 = vpack.c.bf16 %v7340_v37, %v7339_v5  ;;  %v7300_v18 = vadd.f32 1.0, %v11457_v21  ;;  %v18455_v37 = vld [vmem:[#allocation82_spill] sm:$0xff] }
0x110e   : > { %v11461_v26 = vpop.eup %11460  ;;  %v7341_v50 = vmul.f32 %v11459_v12, %v16645_v8  ;;  %11470 = vrcp.f32 %v7299_v56 }
0x110f   : > { %10294 = vmatmul.mubr.bf16.gmra.mxu0 %v7370_v3  ;;  %v7342_v63 = vmul.f32 %v11461_v26, %v16649_v29  ;;  %11472 = vrcp.f32 %v7300_v18  ;;  %v18456_v3 = vld [vmem:[#allocation80_spill] sm:$0xff] }
0x1110   : > { %v11463_v23 = vpop.eup %11462 }
0x1111   : > { %v7371_v14 = vpack.c.bf16 %v7342_v63, %v7341_v50  ;;  %v11465_v36 = vpop.eup %11464  ;;  %v7343_v35 = vmul.f32 %v11463_v23, %v16657_v53  ;;  %v18457_v50 = vld [vmem:[#allocation72_spill] sm:$0xff] }
0x1112   : > { %v7344_v6 = vmul.f32 %v11465_v36, %v16661_v16  ;;  %v11467_v40 = vpop.eup %11466 }
0x1113   : > { %10297 = vmatprep.mubr.bf16.mxu0 %v7371_v14  ;;  %v7345_v11 = vmul.f32 %v11467_v40, %v16668_v25  ;;  %v18447_v25 = vld [vmem:[#allocation99_spill] sm:$0xff] }
0x1114   : > { %v7372_v38 = vpack.c.bf16 %v7344_v6, %v7343_v35  ;;  %v18458_v35 = vld [vmem:[#allocation71_spill] sm:$0xff] }
0x1117   : > { %10298 = vmatmul.mubr.bf16.gmra.mxu0 %v7372_v38 }
0x1119   : > { %v11469_v8 = vpop.eup %11468 }
0x111a   : > { %v7346_v43 = vmul.f32 %v11469_v8, %v16676_v49 }
0x111b   : > { %v11471_v59 = vpop.eup %11470 }
0x111c   : > { %v11473_v29 = vpop.eup %11472  ;;  %v7373_v4 = vpack.c.bf16 %v7346_v43, %v7345_v11  ;;  %v7347_v34 = vmul.f32 %v11471_v59, %v16680_v61  ;;  %v18459_v11 = vld [vmem:[#allocation113_spill] sm:$0xff] }
0x111d   : > { %v7348_v19 = vmul.f32 %v11473_v29, %v16684_v30  ;;  %v18460_v29 = vld [vmem:[#allocation111_spill] sm:$0xff] }
0x111e   : > { %10301 = vmatprep.mubr.bf16.mxu0 %v7373_v4 }
0x111f   : > { %v7374_v53 = vpack.c.bf16 %v7348_v19, %v7347_v34  ;;  %v18461_v19 = vld [vmem:[#allocation75_spill] sm:$0xff] }
0x1121   : > { %10302 = vmatmul.mubr.bf16.gmra.mxu0 %v7374_v53 }
0x11c4   : > { %v10291_v16 = vpop.f32.mrf.mxu0 }
0x11c5   : > { %v7471_v9 = vadd.f32 %v10291_v16, %v9753_v7  ;;  %v18462_v16 = vld [vmem:[#allocation74_spill] sm:$0xff] }
0x11c6   : > { %v7462_v10 = vpop.f32.mrf.mxu0 }
0x11c7   : > { %v7463_v55 = vadd.f32 %v9753_v7, %v7462_v10  ;;  %v16710_v61 = vadd.f32 %v7471_v9, %v18448_v17 }
0x11c8   : > { %v10292_v33 = vpop.f32.mrf.mxu0 }
0x11c9   : > { %v16706_v45 = vadd.f32 %v7463_v55, %v18447_v25  ;;  %v7474_v30 = vadd.f32 %v10292_v33, %v9753_v7 }
0x11ca   : > { %v7465_v49 = vpop.f32.mrf.mxu0 }
0x11cb   : > { %v7466_v15 = vadd.f32 %v9753_v7, %v7465_v49  ;;  %7543 = vadd.xlane.f32.xlu0 %v16706_v45  ;;  %v16718_v62 = vadd.f32 %v7474_v30, %v18450_v31 }
0x11cd   : > { %v16713_v46 = vadd.f32 %v7466_v15, %v18449_v24 }
0x11cf   : > { %v10295_v47 = vpop.f32.mrf.mxu0  ;;  %7545 = vadd.xlane.f32.xlu1 %v16713_v46  ;;  %7547 = vadd.xlane.f32.xlu0 %v16710_v61 }
0x11d0   : > { %v7487_v48 = vadd.f32 %v10295_v47, %v9753_v7 }
0x11d1   : > { %v7478_v13 = vpop.f32.mrf.mxu0 }
0x11d2   : > { %v7479_v57 = vadd.f32 %v9753_v7, %v7478_v13  ;;  %v16726_v0 = vadd.f32 %v7487_v48, %v18452_v32 }
0x11d3   : > { %v10296_v60 = vpop.f32.mrf.mxu0  ;;  %7549 = vadd.xlane.f32.xlu1 %v16718_v62 }
0x11d4   : > { %v16721_v1 = vadd.f32 %v7479_v57, %v18451_v42  ;;  %v7490_v54 = vadd.f32 %v10296_v60, %v9753_v7 }
0x11d5   : > { %v7481_v44 = vpop.f32.mrf.mxu0 }
0x11d6   : > { %v7482_v28 = vadd.f32 %v9753_v7, %v7481_v44  ;;  %7551 = vadd.xlane.f32.xlu0 %v16721_v1  ;;  %v16734_v52 = vadd.f32 %v7490_v54, %v18454_v22 }
0x11d7   : > { %v10299_v20 = vpop.f32.mrf.mxu0 }
0x11d8   : > { %v16729_v41 = vadd.f32 %v7482_v28, %v18453_v51  ;;  %v7503_v58 = vadd.f32 %v10299_v20, %v9753_v7 }
0x11d9   : > { %v7494_v39 = vpop.f32.mrf.mxu0 }
0x11da   : > { %7553 = vadd.xlane.f32.xlu1 %v16729_v41  ;;  %7555 = vadd.xlane.f32.xlu0 %v16726_v0  ;;  %v7495_v5 = vadd.f32 %v9753_v7, %v7494_v39  ;;  %v16742_v18 = vadd.f32 %v7503_v58, %v18456_v3 }
0x11db   : > { %v10300_v27 = vpop.f32.mrf.mxu0 }
0x11dc   : > { %v16737_v21 = vadd.f32 %v7495_v5, %v18455_v37  ;;  %v7506_v26 = vadd.f32 %v10300_v27, %v9753_v7 }
0x11dd   : > { %v7497_v56 = vpop.f32.mrf.mxu0 }
0x11de   : > { %7557 = vadd.xlane.f32.xlu1 %v16734_v52  ;;  %v7498_v12 = vadd.f32 %v9753_v7, %v7497_v56  ;;  %7559 = vadd.xlane.f32.xlu0 %v16737_v21  ;;  %v16750_v6 = vadd.f32 %v7506_v26, %v18458_v35 }
0x11e0   : > { %v16745_v63 = vadd.f32 %v7498_v12, %v18457_v50 }
0x11e1   : > { %v10303_v14 = vpop.f32.mrf.mxu0 }
0x11e2   : > { %7561 = vadd.xlane.f32.xlu1 %v16745_v63  ;;  %7563 = vadd.xlane.f32.xlu0 %v16742_v18  ;;  %v7519_v38 = vadd.f32 %v10303_v14, %v9753_v7 }
0x11e3   : > { %v7510_v23 = vpop.f32.mrf.mxu0 }
0x11e4   : > { %v7511_v36 = vadd.f32 %v9753_v7, %v7510_v23  ;;  %v16758_v4 = vadd.f32 %v7519_v38, %v18460_v29 }
0x11e5   : > { %v10304_v40 = vpop.f32.mrf.mxu0 }
0x11e6   : > { %v16753_v8 = vadd.f32 %v7511_v36, %v18459_v11  ;;  %7565 = vadd.xlane.f32.xlu1 %v16750_v6  ;;  %v7522_v34 = vadd.f32 %v10304_v40, %v9753_v7 }
0x11e7   : > { %v7513_v43 = vpop.f32.mrf.mxu0 }
0x11e8   : > { %v7514_v59 = vadd.f32 %v9753_v7, %v7513_v43  ;;  %7567 = vadd.xlane.f32.xlu0 %v16753_v8  ;;  %v16766_v10 = vadd.f32 %v7522_v34, %v18462_v16 }
0x11ea   : > { %v16761_v53 = vadd.f32 %v7514_v59, %v18461_v19 }
0x11ec   : > { %7569 = vadd.xlane.f32.xlu1 %v16761_v53  ;;  %7571 = vadd.xlane.f32.xlu0 %v16758_v4 }
0x11f0   : > { %7573 = vadd.xlane.f32.xlu1 %v16766_v10 }
0x1254   : > { %v7544_v55 = vpop.xlane.xlu0 %7543 }
0x1255   : > { %v7575_v33 = vmul.f32 0.03125, %v7544_v55 }
0x1257   : > { %v7591_v9 = vsub.f32 %v16706_v45, %v7575_v33  ;;  %v11010_v33 = vld [vmem:[%s16822_s15 + $0x38] sm:$0xff]  }
0x1258   : > { %v7548_v25 = vpop.xlane.xlu0 %7547  ;;  %v7546_v49 = vpop.xlane.xlu1 %7545  ;;  %10305 = vmatprep.subr.bf16.mxu0 %v11010_v33 }
0x1259   : > { %v16771_v7 = vmul.f32 %v18442_v2, %v7591_v9  ;;  %v7577_v15 = vmul.f32 0.03125, %v7548_v25  ;;  %v7576_v17 = vmul.f32 0.03125, %v7546_v49  ;;  %10306 = vmatpush3.bf16.msra.mxu0 %v11010_v33  ;;  %v11016_v33 = vld [vmem:[%s16822_s15 + $0x8] sm:$0xff]  }
0x125b   : > { %v7593_v30 = vsub.f32 %v16710_v61, %v7577_v15  ;;  %v7592_v24 = vsub.f32 %v16713_v46, %v7576_v17  ;;  %v7623_v47 = vmul.f32 %v16771_v7, %v16771_v7 }
0x125c   : > { %v7550_v13 = vpop.xlane.xlu1 %7549 }
0x125d   : > { %v16778_v57 = vmul.f32 %v18442_v2, %v7593_v30  ;;  %v16781_v31 = vmul.f32 %v18442_v2, %v7592_v24  ;;  %v7578_v48 = vmul.f32 0.03125, %v7550_v13  ;;  %7639 = vadd.xlane.f32.xlu0 %v7623_v47 }
0x125f   : > { %v7552_v60 = vpop.xlane.xlu0 %7551  ;;  %v7594_v44 = vsub.f32 %v16718_v62, %v7578_v48  ;;  %v7625_v28 = vmul.f32 %v16778_v57, %v16778_v57  ;;  %v7624_v32 = vmul.f32 %v16781_v31, %v16781_v31 }
0x1260   : > { %v7579_v42 = vmul.f32 0.03125, %v7552_v60 }
0x1261   : > { %v16790_v51 = vmul.f32 %v18442_v2, %v7594_v44  ;;  %7643 = vadd.xlane.f32.xlu0 %v7625_v28  ;;  %7641 = vadd.xlane.f32.xlu1 %v7624_v32 }
0x1262   : > { %v7595_v54 = vsub.f32 %v16721_v1, %v7579_v42 }
0x1263   : > { %v7556_v20 = vpop.xlane.xlu0 %7555  ;;  %v7554_v39 = vpop.xlane.xlu1 %7553  ;;  %v7626_v58 = vmul.f32 %v16790_v51, %v16790_v51 }
0x1264   : > { %v16793_v5 = vmul.f32 %v18442_v2, %v7595_v54  ;;  %v7581_v22 = vmul.f32 0.03125, %v7556_v20  ;;  %v7580_v27 = vmul.f32 0.03125, %v7554_v39 }
0x1265   : > { %7645 = vadd.xlane.f32.xlu1 %v7626_v58 }
0x1266   : > { %v7597_v37 = vsub.f32 %v16726_v0, %v7581_v22  ;;  %v7596_v56 = vsub.f32 %v16729_v41, %v7580_v27  ;;  %v7627_v12 = vmul.f32 %v16793_v5, %v16793_v5 }
0x1267   : > { %v7558_v3 = vpop.xlane.xlu1 %7557  ;;  %v7560_v14 = vpop.xlane.xlu0 %7559 }
0x1268   : > { %v16802_v26 = vmul.f32 %v18442_v2, %v7597_v37  ;;  %v16805_v50 = vmul.f32 %v18442_v2, %v7596_v56  ;;  %v7582_v23 = vmul.f32 0.03125, %v7558_v3  ;;  %7647 = vadd.xlane.f32.xlu0 %v7627_v12  ;;  %v7583_v36 = vmul.f32 0.03125, %v7560_v14 }
0x126a   : > { %v7598_v35 = vsub.f32 %v16734_v52, %v7582_v23  ;;  %v7629_v40 = vmul.f32 %v16802_v26, %v16802_v26  ;;  %v7628_v38 = vmul.f32 %v16805_v50, %v16805_v50  ;;  %v7599_v11 = vsub.f32 %v16737_v21, %v7583_v36 }
0x126b   : > { %v7564_v59 = vpop.xlane.xlu0 %7563  ;;  %v7562_v29 = vpop.xlane.xlu1 %7561 }
0x126c   : > { %v16814_v43 = vmul.f32 %v18442_v2, %v7598_v35  ;;  %7651 = vadd.xlane.f32.xlu0 %v7629_v40  ;;  %7649 = vadd.xlane.f32.xlu1 %v7628_v38  ;;  %v16817_v34 = vmul.f32 %v18442_v2, %v7599_v11  ;;  %v7585_v19 = vmul.f32 0.03125, %v7564_v59  ;;  %v7584_v16 = vmul.f32 0.03125, %v7562_v29  ;;  %v11011_v59 = vld [vmem:[%s16822_s15 + $0x30] sm:$0xff]   ;;  %v11012_v29 = vld [vmem:[%s16822_s15 + $0x28] sm:$0xff]  }
0x126d   : > { %10307 = vmatprep.subr.bf16.mxu0 %v11011_v59 }
0x126e   : > { %v7630_v55 = vmul.f32 %v16814_v43, %v16814_v43  ;;  %v7601_v9 = vsub.f32 %v16742_v18, %v7585_v19  ;;  %v7600_v25 = vsub.f32 %v16745_v63, %v7584_v16  ;;  %v7631_v49 = vmul.f32 %v16817_v34, %v16817_v34  ;;  %10308 = vmatpush3.bf16.msra.mxu0 %v11011_v59  ;;  %v11013_v19 = vld [vmem:[%s16822_s15 + $0x20] sm:$0xff]   ;;  %v11014_v16 = vld [vmem:[%s16822_s15 + $0x18] sm:$0xff]  }
0x126f   : > { %v7566_v15 = vpop.xlane.xlu1 %7565  ;;  %10309 = vmatprep.subr.bf16.mxu0 %v11012_v29 }
0x1270   : > { %7653 = vadd.xlane.f32.xlu1 %v7630_v55  ;;  %v16830_v17 = vmul.f32 %v18442_v2, %v7601_v9  ;;  %v16833_v30 = vmul.f32 %v18442_v2, %v7600_v25  ;;  %v7586_v47 = vmul.f32 0.03125, %v7566_v15  ;;  %7655 = vadd.xlane.f32.xlu0 %v7631_v49  ;;  %v11015_v55 = vld [vmem:[%s16822_s15 + $0x10] sm:$0xff]   ;;  %v11017_v9 = vld [vmem:[%s16822_s15] sm:$0xff]   ;;  %v11018_v25 = vld [vmem:[%s16877_s30 + $0x38] sm:$0xff]  }
0x1271   : > { %v7568_v24 = vpop.xlane.xlu0 %7567  ;;  %v11019_v49 = vld [vmem:[%s16877_s30 + $0x30] sm:$0xff]   ;;  %10337 = vmatprep.subr.bf16.mxu1 %v11018_v25  ;;  %v11020_v15 = vld [vmem:[%s16877_s30 + $0x28] sm:$0xff]  }
0x1272   : > { %v7587_v13 = vmul.f32 0.03125, %v7568_v24  ;;  %v7602_v60 = vsub.f32 %v16750_v6, %v7586_v47  ;;  %v7633_v48 = vmul.f32 %v16830_v17, %v16830_v17  ;;  %v7632_v42 = vmul.f32 %v16833_v30, %v16833_v30  ;;  %10310 = vmatpush3.bf16.msra.mxu0 %v11012_v29  ;;  %10338 = vmatpush3.bf16.msra.mxu1 %v11018_v25  ;;  %v16884_v25 = vld [vmem:[%s12809_s3 + $0x4] ss:$0 sm:$0xff] }
0x1273   : > { %10311 = vmatprep.subr.bf16.mxu0 %v11013_v19  ;;  %10339 = vmatprep.subr.bf16.mxu1 %v11019_v49 }
0x1274   : > { %v7603_v44 = vsub.f32 %v16753_v8, %v7587_v13  ;;  %v16842_v28 = vmul.f32 %v18442_v2, %v7602_v60  ;;  %7659 = vadd.xlane.f32.xlu0 %v7633_v48  ;;  %7657 = vadd.xlane.f32.xlu1 %v7632_v42 }
0x1275   : > { %v7572_v32 = vpop.xlane.xlu0 %7571  ;;  %v7570_v54 = vpop.xlane.xlu1 %7569 }
0x1276   : > { %v16845_v20 = vmul.f32 %v18442_v2, %v7603_v44  ;;  %v7589_v39 = vmul.f32 0.03125, %v7572_v32  ;;  %v7588_v22 = vmul.f32 0.03125, %v7570_v54  ;;  %v7634_v27 = vmul.f32 %v16842_v28, %v16842_v28  ;;  %10312 = vmatpush3.bf16.msra.mxu0 %v11013_v19  ;;  %10340 = vmatpush3.bf16.msra.mxu1 %v11019_v49 }
0x1277   : > { %10313 = vmatprep.subr.bf16.mxu0 %v11014_v16  ;;  %10341 = vmatprep.subr.bf16.mxu1 %v11020_v15 }
0x1278   : > { %v7605_v58 = vsub.f32 %v16758_v4, %v7589_v39  ;;  %v7604_v37 = vsub.f32 %v16761_v53, %v7588_v22  ;;  %v7635_v56 = vmul.f32 %v16845_v20, %v16845_v20  ;;  %7661 = vadd.xlane.f32.xlu1 %v7634_v27 }
0x1279   : > { %v7574_v12 = vpop.xlane.xlu1 %7573 }
0x127a   : > { %v16854_v3 = vmul.f32 %v18442_v2, %v7605_v58  ;;  %v16857_v14 = vmul.f32 %v18442_v2, %v7604_v37  ;;  %v7590_v23 = vmul.f32 0.03125, %v7574_v12  ;;  %7663 = vadd.xlane.f32.xlu0 %v7635_v56  ;;  %10314 = vmatpush3.bf16.msra.mxu0 %v11014_v16 }
0x127b   : > { %10315 = vmatprep.subr.bf16.mxu0 %v11015_v55  ;;  %10342 = vmatpush3.bf16.msra.mxu1 %v11020_v15 }
0x127c   : > { %v7606_v36 = vsub.f32 %v16766_v10, %v7590_v23  ;;  %v7637_v35 = vmul.f32 %v16854_v3, %v16854_v3  ;;  %v7636_v40 = vmul.f32 %v16857_v14, %v16857_v14 }
0x127e   : > { %v16865_v38 = vmul.f32 %v18442_v2, %v7606_v36  ;;  %7667 = vadd.xlane.f32.xlu0 %v7637_v35  ;;  %7665 = vadd.xlane.f32.xlu1 %v7636_v40 }
0x127f   : > { %10316 = vmatpush3.bf16.msra.mxu0 %v11015_v55 }
0x1280   : > { %v7638_v11 = vmul.f32 %v16865_v38, %v16865_v38  ;;  %10317 = vmatprep.subr.bf16.mxu0 %v11016_v33 }
0x1282   : > { %7669 = vadd.xlane.f32.xlu1 %v7638_v11 }
0x1283   : > { %10318 = vmatpush3.bf16.msra.mxu0 %v11016_v33 }
0x1284   : > { %10319 = vmatprep.subr.bf16.mxu0 %v11017_v9 }
0x1287   : > { %10320 = vmatpush3.bf16.msra.mxu0 %v11017_v9 }
0x12e6   : > { %v7640_v24 = vpop.xlane.xlu0 %7639 }
0x12e7   : > { %v7671_v47 = vmul.f32 0.03125, %v7640_v24 }
0x12e9   : > { %v7687_v13 = vadd.f32 1e-05, %v7671_v47 }
0x12ea   : > { %v7644_v60 = vpop.xlane.xlu0 %7643  ;;  %v7642_v48 = vpop.xlane.xlu1 %7641 }
0x12eb   : > { %11474 = vrsqrt.f32 %v7687_v13  ;;  %v7673_v42 = vmul.f32 0.03125, %v7644_v60  ;;  %v7672_v44 = vmul.f32 0.03125, %v7642_v48 }
0x12ed   : > { %v7689_v32 = vadd.f32 1e-05, %v7673_v42  ;;  %v7688_v54 = vadd.f32 1e-05, %v7672_v44 }
0x12ee   : > { %v7646_v39 = vpop.xlane.xlu1 %7645 }
0x12ef   : > { %11476 = vrsqrt.f32 %v7689_v32  ;;  %v7674_v27 = vmul.f32 0.03125, %v7646_v39  ;;  %v16890_v39 = vld [vmem:[%s12814_s25 + $0x4] ss:$0 sm:$0xff] }
0x12f0   : > { %11478 = vrsqrt.f32 %v7688_v54 }
0x12f1   : > { %v7648_v22 = vpop.xlane.xlu0 %7647  ;;  %v7690_v37 = vadd.f32 1e-05, %v7674_v27 }
0x12f2   : > { %v7675_v58 = vmul.f32 0.03125, %v7648_v22 }
0x12f3   : > { %11480 = vrsqrt.f32 %v7690_v37 }
0x12f4   : > { %v7691_v56 = vadd.f32 1e-05, %v7675_v58 }
0x12f5   : > { %v7652_v12 = vpop.xlane.xlu0 %7651  ;;  %v7650_v23 = vpop.xlane.xlu1 %7649 }
0x12f6   : > { %11482 = vrsqrt.f32 %v7691_v56  ;;  %v7677_v36 = vmul.f32 0.03125, %v7652_v12  ;;  %v7676_v35 = vmul.f32 0.03125, %v7650_v23 }
0x12f8   : > { %v7693_v40 = vadd.f32 1e-05, %v7677_v36  ;;  %v7692_v11 = vadd.f32 1e-05, %v7676_v35  ;;  %v11475_v29 = vpop.eup %11474 }
0x12f9   : > { %v7654_v59 = vpop.xlane.xlu1 %7653  ;;  %v7656_v19 = vpop.xlane.xlu0 %7655  ;;  %v7719_v9 = vmul.f32 %v11475_v29, %v16771_v7 }
0x12fa   : > { %11484 = vrsqrt.f32 %v7693_v40  ;;  %v7678_v16 = vmul.f32 0.03125, %v7654_v59  ;;  %v7679_v55 = vmul.f32 0.03125, %v7656_v19 }
0x12fb   : > { %11486 = vrsqrt.f32 %v7692_v11  ;;  %v7739_v32 = vmul.f32 %v16884_v25, %v7719_v9 }
0x12fc   : > { %v7694_v33 = vadd.f32 1e-05, %v7678_v16  ;;  %v7695_v49 = vadd.f32 1e-05, %v7679_v55  ;;  %v11477_v15 = vpop.eup %11476 }
0x12fd   : > { %v7660_v24 = vpop.xlane.xlu0 %7659  ;;  %v7658_v47 = vpop.xlane.xlu1 %7657  ;;  %v7721_v60 = vmul.f32 %v11477_v15, %v16778_v57  ;;  %v7759_v36 = vadd.f32 %v16890_v39, %v7739_v32 }
0x12fe   : > { %11488 = vrsqrt.f32 %v7694_v33  ;;  %v11479_v13 = vpop.eup %11478  ;;  %v7681_v48 = vmul.f32 0.03125, %v7660_v24  ;;  %v7680_v42 = vmul.f32 0.03125, %v7658_v47 }
0x12ff   : > { %11490 = vrsqrt.f32 %v7695_v49  ;;  %v7720_v44 = vmul.f32 %v11479_v13, %v16781_v31  ;;  %v7741_v56 = vmul.f32 %v16884_v25, %v7721_v60 }
0x1300   : > { %v7697_v54 = vadd.f32 1e-05, %v7681_v48  ;;  %v7696_v7 = vadd.f32 1e-05, %v7680_v42  ;;  %v11481_v22 = vpop.eup %11480 }
0x1301   : > { %v7662_v27 = vpop.xlane.xlu1 %7661  ;;  %v7740_v58 = vmul.f32 %v16884_v25, %v7720_v44  ;;  %v7722_v57 = vmul.f32 %v11481_v22, %v16790_v51  ;;  %v7761_v33 = vadd.f32 %v16890_v39, %v7741_v56 }
0x1302   : > { %11492 = vrsqrt.f32 %v7697_v54  ;;  %v7682_v23 = vmul.f32 0.03125, %v7662_v27 }
0x1303   : > { %v11483_v37 = vpop.eup %11482  ;;  %v7664_v12 = vpop.xlane.xlu0 %7663  ;;  %11494 = vrsqrt.f32 %v7696_v7  ;;  %v7760_v35 = vadd.f32 %v16890_v39, %v7740_v58  ;;  %v7742_v40 = vmul.f32 %v16884_v25, %v7722_v57 }
0x1304   : > { %v7683_v31 = vmul.f32 0.03125, %v7664_v12  ;;  %v7698_v11 = vadd.f32 1e-05, %v7682_v23  ;;  %v7723_v59 = vmul.f32 %v11483_v37, %v16793_v5 }
0x1305   : > { %v7793_v19 = vpack.c.bf16 %v7760_v35, %v7759_v36  ;;  %v7762_v9 = vadd.f32 %v16890_v39, %v7742_v40 }
0x1306   : > { %v7699_v29 = vadd.f32 1e-05, %v7683_v31  ;;  %11496 = vrsqrt.f32 %v7698_v11  ;;  %v7743_v5 = vmul.f32 %v16884_v25, %v7723_v59 }
0x1307   : > { %v11485_v16 = vpop.eup %11484  ;;  %v7668_v55 = vpop.xlane.xlu0 %7667  ;;  %10321 = vmatprep.mubr.bf16.mxu0 %v7793_v19  ;;  %v7794_v47 = vpack.c.bf16 %v7762_v9, %v7761_v33 }
0x1308   : > { %v7666_v51 = vpop.xlane.xlu1 %7665  ;;  %v11487_v49 = vpop.eup %11486  ;;  %11498 = vrsqrt.f32 %v7699_v29  ;;  %v7685_v15 = vmul.f32 0.03125, %v7668_v55  ;;  %v7725_v60 = vmul.f32 %v11485_v16, %v16802_v26 }
0x1309   : > { %v7684_v24 = vmul.f32 0.03125, %v7666_v51  ;;  %v7724_v13 = vmul.f32 %v11487_v49, %v16805_v50  ;;  %10322 = vmatmul.mubr.bf16.vlgmr.msra.gmra.mxu0 %v7794_v47  ;;  %v7763_v50 = vadd.f32 %v16890_v39, %v7743_v5 }
0x130a   : > { %v7701_v48 = vadd.f32 1e-05, %v7685_v15  ;;  %v7745_v58 = vmul.f32 %v16884_v25, %v7725_v60 }
0x130b   : > { %v7700_v42 = vadd.f32 1e-05, %v7684_v24  ;;  %v11489_v44 = vpop.eup %11488  ;;  %v7744_v54 = vmul.f32 %v16884_v25, %v7724_v13 }
0x130c   : > { %v7670_v32 = vpop.xlane.xlu1 %7669  ;;  %v11491_v7 = vpop.eup %11490  ;;  %11500 = vrsqrt.f32 %v7701_v48  ;;  %v7726_v27 = vmul.f32 %v11489_v44, %v16814_v43  ;;  %v7765_v31 = vadd.f32 %v16890_v39, %v7745_v58  ;;  %v11022_v58 = vld [vmem:[%s16877_s30 + $0x18] sm:$0xff]  }
0x130d   : > { %v7686_v22 = vmul.f32 0.03125, %v7670_v32  ;;  %11502 = vrsqrt.f32 %v7700_v42  ;;  %v7764_v37 = vadd.f32 %v16890_v39, %v7744_v54  ;;  %v7727_v57 = vmul.f32 %v11491_v7, %v16817_v34 }
0x130e   : > { %v7746_v56 = vmul.f32 %v16884_v25, %v7726_v27 }
0x130f   : > { %v7702_v26 = vadd.f32 1e-05, %v7686_v22  ;;  %v7795_v12 = vpack.c.bf16 %v7764_v37, %v7763_v50  ;;  %v11493_v23 = vpop.eup %11492  ;;  %v7747_v59 = vmul.f32 %v16884_v25, %v7727_v57  ;;  %v11023_v50 = vld [vmem:[%s16877_s30 + $0x10] sm:$0xff]   ;;  %v11025_v37 = vld [vmem:[%s16877_s30] sm:$0xff]  }
0x1310   : > { %v7766_v36 = vadd.f32 %v16890_v39, %v7746_v56  ;;  %v11495_v43 = vpop.eup %11494  ;;  %v7729_v35 = vmul.f32 %v11493_v23, %v16830_v17 }
0x1311   : > { %11504 = vrsqrt.f32 %v7702_v26  ;;  %10325 = vmatprep.mubr.bf16.mxu0 %v7795_v12  ;;  %v7728_v11 = vmul.f32 %v11495_v43, %v16833_v30  ;;  %v7767_v51 = vadd.f32 %v16890_v39, %v7747_v59 }
0x1312   : > { %v7796_v40 = vpack.c.bf16 %v7766_v36, %v7765_v31  ;;  %v7749_v55 = vmul.f32 %v16884_v25, %v7729_v35 }
0x1313   : > { %v11497_v29 = vpop.eup %11496  ;;  %v7748_v34 = vmul.f32 %v16884_v25, %v7728_v11 }
0x1314   : > { %10326 = vmatmul.mubr.bf16.gmra.mxu0 %v7796_v40  ;;  %v7730_v16 = vmul.f32 %v11497_v29, %v16842_v28  ;;  %v7769_v15 = vadd.f32 %v16890_v39, %v7749_v55 }
0x1315   : > { %v11499_v19 = vpop.eup %11498  ;;  %v7768_v33 = vadd.f32 %v16890_v39, %v7748_v34 }
0x1316   : > { %v7750_v17 = vmul.f32 %v16884_v25, %v7730_v16  ;;  %v7731_v9 = vmul.f32 %v11499_v19, %v16845_v20 }
0x1317   : > { %v7797_v30 = vpack.c.bf16 %v7768_v33, %v7767_v51 }
0x1318   : > { %v7770_v24 = vadd.f32 %v16890_v39, %v7750_v17  ;;  %v7751_v60 = vmul.f32 %v16884_v25, %v7731_v9 }
0x1319   : > { %v11501_v49 = vpop.eup %11500  ;;  %10329 = vmatprep.mubr.bf16.mxu0 %v7797_v30 }
0x131a   : > { %v11503_v47 = vpop.eup %11502  ;;  %v7733_v28 = vmul.f32 %v11501_v49, %v16854_v3  ;;  %v7798_v13 = vpack.c.bf16 %v7770_v24, %v7769_v15  ;;  %v7771_v32 = vadd.f32 %v16890_v39, %v7751_v60 }
0x131b   : > { %v7732_v5 = vmul.f32 %v11503_v47, %v16857_v14 }
0x131c   : > { %10330 = vmatmul.mubr.bf16.gmra.mxu0 %v7798_v13  ;;  %v7753_v44 = vmul.f32 %v16884_v25, %v7733_v28 }
0x131d   : > { %v7752_v20 = vmul.f32 %v16884_v25, %v7732_v5 }
0x131e   : > { %v11505_v48 = vpop.eup %11504  ;;  %v7773_v7 = vadd.f32 %v16890_v39, %v7753_v44 }
0x131f   : > { %v7734_v42 = vmul.f32 %v11505_v48, %v16865_v38  ;;  %v7772_v3 = vadd.f32 %v16890_v39, %v7752_v20  ;;  %v11021_v38 = vld [vmem:[%s16877_s30 + $0x20] sm:$0xff]  }
0x1320   : > { %10343 = vmatprep.subr.bf16.mxu1 %v11021_v38 }
0x1321   : > { %v7754_v54 = vmul.f32 %v16884_v25, %v7734_v42  ;;  %v7799_v14 = vpack.c.bf16 %v7772_v3, %v7771_v32  ;;  %10344 = vmatpush3.bf16.msra.mxu1 %v11021_v38  ;;  %v11024_v25 = vld [vmem:[%s16877_s30 + $0x8] sm:$0xff]  }
0x1322   : > { %10345 = vmatprep.subr.bf16.mxu1 %v11022_v58 }
0x1323   : > { %v7774_v22 = vadd.f32 %v16890_v39, %v7754_v54  ;;  %10333 = vmatprep.mubr.bf16.mxu0 %v7799_v14  ;;  %v16943_v39 = vld [vmem:[%s18463_s17 + $0x1] ss:$0 sm:$0xff] }
0x1325   : > { %v7800_v27 = vpack.c.bf16 %v7774_v22, %v7773_v7  ;;  %10346 = vmatpush3.bf16.msra.mxu1 %v11022_v58 }
0x1326   : > { %10347 = vmatprep.subr.bf16.mxu1 %v11023_v50 }
0x1327   : > { %10334 = vmatmul.mubr.bf16.gmra.mxu0 %v7800_v27 }
0x1329   : > { %10348 = vmatpush3.bf16.msra.mxu1 %v11023_v50 }
0x132a   : > { %10349 = vmatprep.subr.bf16.mxu1 %v11024_v25 }
0x132d   : > { %10350 = vmatpush3.bf16.msra.mxu1 %v11024_v25 }
0x132e   : > { %10351 = vmatprep.subr.bf16.mxu1 %v11025_v37 }
0x1331   : > { %10352 = vmatpush3.bf16.msra.mxu1 %v11025_v37 }
0x13c9   : > { %v10323_v26 = vpop.f32.mrf.mxu0 }
0x13ca   : > { %v16946_v56 = vadd.f32 %v10323_v26, %v16943_v39 }
0x13cb   : > { %v7888_v57 = vpop.f32.mrf.mxu0 }
0x13cc   : > { %v9776_v12 = vmul.f32 -1.442695, %v16946_v56  ;;  %v16950_v23 = vadd.f32 %v16943_v39, %v7888_v57 }
0x13cd   : > { %v10324_v31 = vpop.f32.mrf.mxu0 }
0x13ce   : > { %11506 = vpow2.f32 %v9776_v12  ;;  %v9774_v36 = vmul.f32 -1.442695, %v16950_v23  ;;  %v16954_v43 = vadd.f32 %v10324_v31, %v16943_v39 }
0x13cf   : > { %v7891_v35 = vpop.f32.mrf.mxu0 }
0x13d0   : > { %11508 = vpow2.f32 %v9774_v36  ;;  %v9777_v40 = vmul.f32 -1.442695, %v16954_v43  ;;  %v16958_v11 = vadd.f32 %v16943_v39, %v7891_v35 }
0x13d2   : > { %11510 = vpow2.f32 %v9777_v40  ;;  %v9775_v59 = vmul.f32 -1.442695, %v16958_v11 }
0x13d4   : > { %v10327_v29 = vpop.f32.mrf.mxu0  ;;  %11512 = vpow2.f32 %v9775_v59 }
0x13d5   : > { %v16962_v34 = vadd.f32 %v10327_v29, %v16943_v39 }
0x13d6   : > { %v7904_v19 = vpop.f32.mrf.mxu0 }
0x13d7   : > { %v9780_v16 = vmul.f32 -1.442695, %v16962_v34  ;;  %v16966_v55 = vadd.f32 %v16943_v39, %v7904_v19 }
0x13d8   : > { %v10328_v51 = vpop.f32.mrf.mxu0 }
0x13d9   : > { %11514 = vpow2.f32 %v9780_v16  ;;  %v9778_v33 = vmul.f32 -1.442695, %v16966_v55  ;;  %v16970_v17 = vadd.f32 %v10328_v51, %v16943_v39 }
0x13da   : > { %v7907_v9 = vpop.f32.mrf.mxu0 }
0x13db   : > { %11516 = vpow2.f32 %v9778_v33  ;;  %v9781_v30 = vmul.f32 -1.442695, %v16970_v17  ;;  %v16974_v49 = vadd.f32 %v16943_v39, %v7907_v9  ;;  %v11507_v15 = vpop.eup %11506 }
0x13dc   : > { %v10331_v47 = vpop.f32.mrf.mxu0  ;;  %v8001_v28 = vadd.f32 1.0, %v11507_v15 }
0x13dd   : > { %11518 = vpow2.f32 %v9781_v30  ;;  %v9779_v24 = vmul.f32 -1.442695, %v16974_v49  ;;  %v16978_v13 = vadd.f32 %v10331_v47, %v16943_v39  ;;  %v11509_v5 = vpop.eup %11508 }
0x13de   : > { %v7920_v60 = vpop.f32.mrf.mxu0  ;;  %v7999_v48 = vadd.f32 1.0, %v11509_v5 }
0x13df   : > { %11520 = vpow2.f32 %v9779_v24  ;;  %v9784_v20 = vmul.f32 -1.442695, %v16978_v13  ;;  %v16982_v42 = vadd.f32 %v16943_v39, %v7920_v60  ;;  %v11511_v44 = vpop.eup %11510 }
0x13e0   : > { %11522 = vrcp.f32 %v8001_v28  ;;  %v10332_v32 = vpop.f32.mrf.mxu0  ;;  %v8002_v3 = vadd.f32 1.0, %v11511_v44 }
0x13e1   : > { %11524 = vrcp.f32 %v7999_v48  ;;  %v9782_v54 = vmul.f32 -1.442695, %v16982_v42  ;;  %v16986_v14 = vadd.f32 %v10332_v32, %v16943_v39  ;;  %v11513_v7 = vpop.eup %11512 }
0x13e2   : > { %11526 = vpow2.f32 %v9784_v20  ;;  %v7923_v22 = vpop.f32.mrf.mxu0  ;;  %v8000_v27 = vadd.f32 1.0, %v11513_v7 }
0x13e3   : > { %11528 = vrcp.f32 %v8002_v3  ;;  %v9785_v38 = vmul.f32 -1.442695, %v16986_v14  ;;  %v16990_v58 = vadd.f32 %v16943_v39, %v7923_v22 }
0x13e4   : > { %11530 = vpow2.f32 %v9782_v54 }
0x13e5   : > { %11532 = vrcp.f32 %v8000_v27  ;;  %v9783_v25 = vmul.f32 -1.442695, %v16990_v58 }
0x13e6   : > { %v11515_v50 = vpop.eup %11514  ;;  %11534 = vpow2.f32 %v9785_v38 }
0x13e7   : > { %v10335_v37 = vpop.f32.mrf.mxu0  ;;  %v8005_v26 = vadd.f32 1.0, %v11515_v50  ;;  %11536 = vpow2.f32 %v9783_v25 }
0x13e8   : > { %v16994_v57 = vadd.f32 %v10335_v37, %v16943_v39  ;;  %v11517_v12 = vpop.eup %11516 }
0x13e9   : > { %v7936_v31 = vpop.f32.mrf.mxu0  ;;  %v8003_v36 = vadd.f32 1.0, %v11517_v12  ;;  %11538 = vrcp.f32 %v8005_v26 }
0x13ea   : > { %v9788_v35 = vmul.f32 -1.442695, %v16994_v57  ;;  %v16998_v40 = vadd.f32 %v16943_v39, %v7936_v31  ;;  %v11519_v59 = vpop.eup %11518 }
0x13eb   : > { %v10336_v29 = vpop.f32.mrf.mxu0  ;;  %11540 = vrcp.f32 %v8003_v36  ;;  %v8006_v19 = vadd.f32 1.0, %v11519_v59 }
0x13ec   : > { %v9786_v16 = vmul.f32 -1.442695, %v16998_v40  ;;  %v17002_v51 = vadd.f32 %v10336_v29, %v16943_v39  ;;  %v11521_v33 = vpop.eup %11520  ;;  %11542 = vpow2.f32 %v9788_v35 }
0x13ed   : > { %v7939_v9 = vpop.f32.mrf.mxu0  ;;  %11544 = vrcp.f32 %v8006_v19  ;;  %v8004_v30 = vadd.f32 1.0, %v11521_v33  ;;  %v11523_v47 = vpop.eup %11522 }
0x13ee   : > { %v9789_v15 = vmul.f32 -1.442695, %v17002_v51  ;;  %v17006_v24 = vadd.f32 %v16943_v39, %v7939_v9  ;;  %11546 = vpow2.f32 %v9786_v16  ;;  %v11525_v28 = vpop.eup %11524  ;;  %v8049_v38 = vmul.f32 %v11523_v47, %v16946_v56 }
0x13ef   : > { %11548 = vrcp.f32 %v8004_v30  ;;  %v11527_v60 = vpop.eup %11526  ;;  %v8047_v39 = vmul.f32 %v11525_v28, %v16950_v23 }
0x13f0   : > { %v9787_v5 = vmul.f32 -1.442695, %v17006_v24  ;;  %11550 = vpow2.f32 %v9789_v15  ;;  %v11529_v48 = vpop.eup %11528  ;;  %v8009_v20 = vadd.f32 1.0, %v11527_v60 }
0x13f1   : > { %v11531_v44 = vpop.eup %11530  ;;  %v8050_v3 = vmul.f32 %v11529_v48, %v16954_v43 }
0x13f2   : > { %11552 = vpow2.f32 %v9787_v5  ;;  %v11533_v32 = vpop.eup %11532  ;;  %v8007_v54 = vadd.f32 1.0, %v11531_v44 }
0x13f3   : > { %v11535_v7 = vpop.eup %11534  ;;  %v8048_v22 = vmul.f32 %v11533_v32, %v16958_v11  ;;  %11554 = vrcp.f32 %v8009_v20  ;;  %v8082_v12 = vpack.c.bf16 %v8050_v3, %v8049_v38 }
0x13f4   : > { %v11537_v27 = vpop.eup %11536  ;;  %v8010_v50 = vadd.f32 1.0, %v11535_v7  ;;  %11556 = vrcp.f32 %v8007_v54 }
0x13f5   : > { %v8008_v25 = vadd.f32 1.0, %v11537_v27  ;;  %v8081_v37 = vpack.c.bf16 %v8048_v22, %v8047_v39 }
0x13f6   : > { %v11539_v26 = vpop.eup %11538  ;;  %11558 = vrcp.f32 %v8010_v50 }
0x13f7   : > { %11560 = vrcp.f32 %v8008_v25  ;;  %10353 = vmatprep.mubr.bf16.mxu1 %v8081_v37  ;;  %v8053_v9 = vmul.f32 %v11539_v26, %v16962_v34 }
0x13f8   : > { %v11541_v31 = vpop.eup %11540  ;;  %10354 = vmatmul.mubr.bf16.vlgmr.msra.gmra.mxu1 %v8082_v12 }
0x13f9   : > { %v11543_v43 = vpop.eup %11542  ;;  %v8051_v19 = vmul.f32 %v11541_v31, %v16966_v55 }
0x13fa   : > { %v11545_v36 = vpop.eup %11544  ;;  %v8013_v23 = vadd.f32 1.0, %v11543_v43 }
0x13fb   : > { %v11547_v35 = vpop.eup %11546  ;;  %v8054_v59 = vmul.f32 %v11545_v36, %v16970_v17 }
0x13fc   : > { %v11549_v11 = vpop.eup %11548  ;;  %v8011_v56 = vadd.f32 1.0, %v11547_v35  ;;  %11562 = vrcp.f32 %v8013_v23 }
0x13fd   : > { %v11551_v29 = vpop.eup %11550  ;;  %v8052_v16 = vmul.f32 %v11549_v11, %v16974_v49  ;;  %v8084_v28 = vpack.c.bf16 %v8054_v59, %v8053_v9 }
0x13fe   : > { %v8014_v30 = vadd.f32 1.0, %v11551_v29  ;;  %11564 = vrcp.f32 %v8011_v56 }
0x13ff   : > { %v11553_v33 = vpop.eup %11552  ;;  %v8083_v47 = vpack.c.bf16 %v8052_v16, %v8051_v19 }
0x1400   : > { %v8012_v15 = vadd.f32 1.0, %v11553_v33  ;;  %11566 = vrcp.f32 %v8014_v30  ;;  %v11555_v5 = vpop.eup %11554 }
0x1401   : > { %10357 = vmatprep.mubr.bf16.mxu1 %v8083_v47  ;;  %v11557_v17 = vpop.eup %11556  ;;  %v8057_v20 = vmul.f32 %v11555_v5, %v16978_v13  ;;  %v9791_v13 = vld [vmem:[%s12819_s19 + $0x6] ss:$0 sm:$0xff] }
0x1402   : > { %11568 = vrcp.f32 %v8012_v15  ;;  %10358 = vmatmul.mubr.bf16.gmra.mxu1 %v8084_v28  ;;  %v8055_v49 = vmul.f32 %v11557_v17, %v16982_v42 }
0x1403   : > { %v11559_v60 = vpop.eup %11558 }
0x1404   : > { %v11561_v48 = vpop.eup %11560  ;;  %v8058_v55 = vmul.f32 %v11559_v60, %v16986_v14 }
0x1405   : > { %v8056_v34 = vmul.f32 %v11561_v48, %v16990_v58 }
0x1406   : > { %v8086_v32 = vpack.c.bf16 %v8058_v55, %v8057_v20 }
0x1407   : > { %v8085_v44 = vpack.c.bf16 %v8056_v34, %v8055_v49 }
0x1409   : > { %10361 = vmatprep.mubr.bf16.mxu1 %v8085_v44  ;;  %v11563_v3 = vpop.eup %11562 }
0x140a   : > { %10362 = vmatmul.mubr.bf16.gmra.mxu1 %v8086_v32  ;;  %v8061_v42 = vmul.f32 %v11563_v3, %v16994_v57 }
0x140b   : > { %v11565_v54 = vpop.eup %11564 }
0x140c   : > { %v8059_v27 = vmul.f32 %v11565_v54, %v16998_v40 }
0x140d   : > { %v11567_v7 = vpop.eup %11566 }
0x140e   : > { %v8062_v22 = vmul.f32 %v11567_v7, %v17002_v51 }
0x140f   : > { %v11569_v39 = vpop.eup %11568 }
0x1410   : > { %v8060_v14 = vmul.f32 %v11569_v39, %v17006_v24  ;;  %v8088_v38 = vpack.c.bf16 %v8062_v22, %v8061_v42 }
0x1412   : > { %v8087_v58 = vpack.c.bf16 %v8060_v14, %v8059_v27 }
0x1414   : > { %10365 = vmatprep.mubr.bf16.mxu1 %v8087_v58 }
0x1415   : > { %10366 = vmatmul.mubr.bf16.gmra.mxu1 %v8088_v38 }
0x14b8   : > { %v10355_v50 = vpop.f32.mrf.mxu1 }
0x14b9   : > { %v8185_v25 = vadd.f32 %v10355_v50, %v9791_v13 }
0x14ba   : > { %v8176_v37 = vpop.f32.mrf.mxu1 }
0x14bb   : > { %v17027_v26 = vadd.f32 %v8185_v25, %v16710_v61  ;;  %v8177_v12 = vadd.f32 %v9791_v13, %v8176_v37 }
0x14bc   : > { %v10356_v31 = vpop.f32.mrf.mxu1 }
0x14bd   : > { %v8188_v51 = vadd.f32 %v10356_v31, %v9791_v13  ;;  %8261 = vadd.xlane.f32.xlu0 %v17027_v26  ;;  %v17031_v24 = vadd.f32 %v8177_v12, %v16706_v45 }
0x14be   : > { %v8179_v40 = vpop.f32.mrf.mxu1 }
0x14bf   : > { %v17034_v57 = vadd.f32 %v8188_v51, %v16718_v62  ;;  %v8180_v43 = vadd.f32 %v9791_v13, %v8179_v40 }
0x14c1   : > { %8263 = vadd.xlane.f32.xlu1 %v17034_v57  ;;  %8257 = vadd.xlane.f32.xlu0 %v17031_v24  ;;  %v17039_v23 = vadd.f32 %v8180_v43, %v16713_v46 }
0x14c2   : > { %v10359_v36 = vpop.f32.mrf.mxu1 }
0x14c3   : > { %v8201_v61 = vadd.f32 %v10359_v36, %v9791_v13 }
0x14c4   : > { %v8192_v35 = vpop.f32.mrf.mxu1 }
0x14c5   : > { %v17042_v11 = vadd.f32 %v8201_v61, %v16726_v0  ;;  %v8193_v59 = vadd.f32 %v9791_v13, %v8192_v35  ;;  %8259 = vadd.xlane.f32.xlu1 %v17039_v23 }
0x14c6   : > { %v10360_v45 = vpop.f32.mrf.mxu1 }
0x14c7   : > { %v8204_v62 = vadd.f32 %v10360_v45, %v9791_v13  ;;  %8269 = vadd.xlane.f32.xlu0 %v17042_v11  ;;  %v17047_v29 = vadd.f32 %v8193_v59, %v16721_v1 }
0x14c8   : > { %v8195_v56 = vpop.f32.mrf.mxu1 }
0x14c9   : > { %v17050_v19 = vadd.f32 %v8204_v62, %v16734_v52  ;;  %v8196_v46 = vadd.f32 %v9791_v13, %v8195_v56 }
0x14ca   : > { %v10363_v16 = vpop.f32.mrf.mxu1 }
0x14cb   : > { %8271 = vadd.xlane.f32.xlu1 %v17050_v19  ;;  %8265 = vadd.xlane.f32.xlu0 %v17047_v29  ;;  %v8217_v0 = vadd.f32 %v10363_v16, %v9791_v13  ;;  %v17055_v33 = vadd.f32 %v8196_v46, %v16729_v41 }
0x14cc   : > { %v8208_v9 = vpop.f32.mrf.mxu1 }
0x14cd   : > { %v17058_v30 = vadd.f32 %v8217_v0, %v16742_v18  ;;  %v8209_v15 = vadd.f32 %v9791_v13, %v8208_v9 }
0x14ce   : > { %v10364_v1 = vpop.f32.mrf.mxu1 }
0x14cf   : > { %8267 = vadd.xlane.f32.xlu1 %v17055_v33  ;;  %v8220_v52 = vadd.f32 %v10364_v1, %v9791_v13  ;;  %8277 = vadd.xlane.f32.xlu0 %v17058_v30  ;;  %v17063_v28 = vadd.f32 %v8209_v15, %v16737_v21 }
0x14d0   : > { %v8211_v47 = vpop.f32.mrf.mxu1 }
0x14d1   : > { %v17066_v5 = vadd.f32 %v8220_v52, %v16750_v6  ;;  %v8212_v41 = vadd.f32 %v9791_v13, %v8211_v47 }
0x14d3   : > { %8279 = vadd.xlane.f32.xlu1 %v17066_v5  ;;  %8273 = vadd.xlane.f32.xlu0 %v17063_v28  ;;  %v17071_v18 = vadd.f32 %v8212_v41, %v16745_v63 }
0x14d5   : > { %v10367_v17 = vpop.f32.mrf.mxu1 }
0x14d6   : > { %v8233_v49 = vadd.f32 %v10367_v17, %v9791_v13 }
0x14d7   : > { %v8224_v60 = vpop.f32.mrf.mxu1  ;;  %8275 = vadd.xlane.f32.xlu1 %v17071_v18 }
0x14d8   : > { %v8225_v48 = vadd.f32 %v9791_v13, %v8224_v60  ;;  %v17079_v20 = vadd.f32 %v8233_v49, %v16758_v4 }
0x14d9   : > { %v10368_v55 = vpop.f32.mrf.mxu1 }
0x14da   : > { %v17075_v21 = vadd.f32 %v8225_v48, %v16753_v8  ;;  %v8236_v44 = vadd.f32 %v10368_v55, %v9791_v13 }
0x14db   : > { %v8227_v6 = vpop.f32.mrf.mxu1 }
0x14dc   : > { %v8228_v34 = vadd.f32 %v9791_v13, %v8227_v6  ;;  %8281 = vadd.xlane.f32.xlu0 %v17075_v21  ;;  %v17087_v32 = vadd.f32 %v8236_v44, %v16766_v10 }
0x14de   : > { %v17082_v63 = vadd.f32 %v8228_v34, %v16761_v53 }
0x14e0   : > { %8283 = vadd.xlane.f32.xlu1 %v17082_v63  ;;  %8285 = vadd.xlane.f32.xlu0 %v17079_v20 }
0x14e4   : > { %8287 = vadd.xlane.f32.xlu1 %v17087_v32 }
0x1546   : > { %v8262_v8 = vpop.xlane.xlu0 %8261 }
0x1547   : > { %v8291_v3 = vmul.f32 0.03125, %v8262_v8 }
0x1549   : > { %v8307_v54 = vsub.f32 %v17027_v26, %v8291_v3 }
0x154a   : > { %v8258_v7 = vpop.xlane.xlu0 %8257  ;;  %v8264_v4 = vpop.xlane.xlu1 %8263 }
0x154b   : > { %v17092_v39 = vmul.f32 %v18442_v2, %v8307_v54  ;;  %v8289_v53 = vmul.f32 0.03125, %v8258_v7  ;;  %v8292_v22 = vmul.f32 0.03125, %v8264_v4 }
0x154d   : > { %v8305_v27 = vsub.f32 %v17031_v24, %v8289_v53  ;;  %v8308_v14 = vsub.f32 %v17034_v57, %v8292_v22  ;;  %v8339_v10 = vmul.f32 %v17092_v39, %v17092_v39 }
0x154e   : > { %v8260_v42 = vpop.xlane.xlu1 %8259 }
0x154f   : > { %v17099_v58 = vmul.f32 %v18442_v2, %v8305_v27  ;;  %v17102_v38 = vmul.f32 %v18442_v2, %v8308_v14  ;;  %v8290_v50 = vmul.f32 0.03125, %v8260_v42  ;;  %8357 = vadd.xlane.f32.xlu0 %v8339_v10 }
0x1550   : > { %v8270_v13 = vpop.xlane.xlu0 %8269 }
0x1551   : > { %v8295_v25 = vmul.f32 0.03125, %v8270_v13  ;;  %v8306_v37 = vsub.f32 %v17039_v23, %v8290_v50  ;;  %v8337_v26 = vmul.f32 %v17099_v58, %v17099_v58  ;;  %v8340_v12 = vmul.f32 %v17102_v38, %v17102_v38 }
0x1553   : > { %v8311_v31 = vsub.f32 %v17042_v11, %v8295_v25  ;;  %v17111_v51 = vmul.f32 %v18442_v2, %v8306_v37  ;;  %8353 = vadd.xlane.f32.xlu0 %v8337_v26  ;;  %8359 = vadd.xlane.f32.xlu1 %v8340_v12 }
0x1554   : > { %v8266_v40 = vpop.xlane.xlu0 %8265  ;;  %v8272_v24 = vpop.xlane.xlu1 %8271 }
0x1555   : > { %v17114_v57 = vmul.f32 %v18442_v2, %v8311_v31  ;;  %v8293_v43 = vmul.f32 0.03125, %v8266_v40  ;;  %v8296_v36 = vmul.f32 0.03125, %v8272_v24  ;;  %v8338_v61 = vmul.f32 %v17111_v51, %v17111_v51 }
0x1557   : > { %v8309_v23 = vsub.f32 %v17047_v29, %v8293_v43  ;;  %v8312_v35 = vsub.f32 %v17050_v19, %v8296_v36  ;;  %v8343_v11 = vmul.f32 %v17114_v57, %v17114_v57  ;;  %8355 = vadd.xlane.f32.xlu1 %v8338_v61 }
0x1558   : > { %v8268_v59 = vpop.xlane.xlu1 %8267  ;;  %v8278_v56 = vpop.xlane.xlu0 %8277 }
0x1559   : > { %v17123_v45 = vmul.f32 %v18442_v2, %v8309_v23  ;;  %v17126_v62 = vmul.f32 %v18442_v2, %v8312_v35  ;;  %v8294_v46 = vmul.f32 0.03125, %v8268_v59  ;;  %8365 = vadd.xlane.f32.xlu0 %v8343_v11  ;;  %v8299_v16 = vmul.f32 0.03125, %v8278_v56 }
0x155b   : > { %v8310_v0 = vsub.f32 %v17055_v33, %v8294_v46  ;;  %v8341_v29 = vmul.f32 %v17123_v45, %v17123_v45  ;;  %v8344_v19 = vmul.f32 %v17126_v62, %v17126_v62  ;;  %v8315_v9 = vsub.f32 %v17058_v30, %v8299_v16 }
0x155c   : > { %v8274_v1 = vpop.xlane.xlu0 %8273  ;;  %v8280_v52 = vpop.xlane.xlu1 %8279 }
0x155d   : > { %v17135_v15 = vmul.f32 %v18442_v2, %v8310_v0  ;;  %8361 = vadd.xlane.f32.xlu0 %v8341_v29  ;;  %8367 = vadd.xlane.f32.xlu1 %v8344_v19  ;;  %v17138_v47 = vmul.f32 %v18442_v2, %v8315_v9  ;;  %v8297_v41 = vmul.f32 0.03125, %v8274_v1  ;;  %v8300_v33 = vmul.f32 0.03125, %v8280_v52 }
0x155f   : > { %v8342_v17 = vmul.f32 %v17135_v15, %v17135_v15  ;;  %v8313_v60 = vsub.f32 %v17063_v28, %v8297_v41  ;;  %v8316_v48 = vsub.f32 %v17066_v5, %v8300_v33  ;;  %v8347_v30 = vmul.f32 %v17138_v47, %v17138_v47 }
0x1560   : > { %v8276_v55 = vpop.xlane.xlu1 %8275 }
0x1561   : > { %8363 = vadd.xlane.f32.xlu1 %v8342_v17  ;;  %v17147_v49 = vmul.f32 %v18442_v2, %v8313_v60  ;;  %v17150_v6 = vmul.f32 %v18442_v2, %v8316_v48  ;;  %v8298_v34 = vmul.f32 0.03125, %v8276_v55  ;;  %8373 = vadd.xlane.f32.xlu0 %v8347_v30  ;;  %v17187_v60 = vld [vmem:[%s12809_s3 + $0x5] ss:$0 sm:$0xff] }
0x1563   : > { %v8314_v44 = vsub.f32 %v17071_v18, %v8298_v34  ;;  %v8345_v28 = vmul.f32 %v17147_v49, %v17147_v49  ;;  %v8348_v5 = vmul.f32 %v17150_v6, %v17150_v6 }
0x1565   : > { %v8282_v8 = vpop.xlane.xlu0 %8281  ;;  %v17158_v54 = vmul.f32 %v18442_v2, %v8314_v44  ;;  %8369 = vadd.xlane.f32.xlu0 %v8345_v28  ;;  %8375 = vadd.xlane.f32.xlu1 %v8348_v5  ;;  %v17191_v44 = vld [vmem:[%s12814_s25 + $0x5] ss:$0 sm:$0xff] }
0x1566   : > { %v8301_v3 = vmul.f32 0.03125, %v8282_v8 }
0x1567   : > { %v8346_v18 = vmul.f32 %v17158_v54, %v17158_v54 }
0x1568   : > { %v8317_v7 = vsub.f32 %v17075_v21, %v8301_v3 }
0x1569   : > { %v8286_v4 = vpop.xlane.xlu0 %8285  ;;  %v8284_v53 = vpop.xlane.xlu1 %8283  ;;  %8371 = vadd.xlane.f32.xlu1 %v8346_v18 }
0x156a   : > { %v17164_v22 = vmul.f32 %v18442_v2, %v8317_v7  ;;  %v8303_v27 = vmul.f32 0.03125, %v8286_v4  ;;  %v8302_v14 = vmul.f32 0.03125, %v8284_v53 }
0x156c   : > { %v8319_v10 = vsub.f32 %v17079_v20, %v8303_v27  ;;  %v8318_v42 = vsub.f32 %v17082_v63, %v8302_v14  ;;  %v8349_v13 = vmul.f32 %v17164_v22, %v17164_v22 }
0x156d   : > { %v8288_v50 = vpop.xlane.xlu1 %8287 }
0x156e   : > { %v17171_v21 = vmul.f32 %v18442_v2, %v8319_v10  ;;  %v17174_v25 = vmul.f32 %v18442_v2, %v8318_v42  ;;  %v8304_v37 = vmul.f32 0.03125, %v8288_v50  ;;  %8377 = vadd.xlane.f32.xlu0 %v8349_v13 }
0x1570   : > { %v8320_v26 = vsub.f32 %v17087_v32, %v8304_v37  ;;  %v8351_v12 = vmul.f32 %v17171_v21, %v17171_v21  ;;  %v8350_v20 = vmul.f32 %v17174_v25, %v17174_v25 }
0x1572   : > { %v17182_v63 = vmul.f32 %v18442_v2, %v8320_v26  ;;  %8381 = vadd.xlane.f32.xlu0 %v8351_v12  ;;  %8379 = vadd.xlane.f32.xlu1 %v8350_v20 }
0x1574   : > { %v8352_v31 = vmul.f32 %v17182_v63, %v17182_v63 }
0x1576   : > { %8383 = vadd.xlane.f32.xlu1 %v8352_v31 }
0x15d8   : > { %v8358_v40 = vpop.xlane.xlu0 %8357 }
0x15d9   : > { %v8387_v24 = vmul.f32 0.03125, %v8358_v40 }
0x15db   : > { %v8403_v43 = vadd.f32 1e-05, %v8387_v24 }
0x15dc   : > { %v8354_v36 = vpop.xlane.xlu0 %8353  ;;  %v8360_v32 = vpop.xlane.xlu1 %8359 }
0x15dd   : > { %11570 = vrsqrt.f32 %v8403_v43  ;;  %v8385_v61 = vmul.f32 0.03125, %v8354_v36  ;;  %v8388_v23 = vmul.f32 0.03125, %v8360_v32 }
0x15df   : > { %v8401_v35 = vadd.f32 1e-05, %v8385_v61  ;;  %v8404_v11 = vadd.f32 1e-05, %v8388_v23 }
0x15e0   : > { %v8356_v59 = vpop.xlane.xlu1 %8355 }
0x15e1   : > { %11572 = vrsqrt.f32 %v8401_v35  ;;  %v8386_v56 = vmul.f32 0.03125, %v8356_v59 }
0x15e2   : > { %v8366_v2 = vpop.xlane.xlu0 %8365  ;;  %11574 = vrsqrt.f32 %v8404_v11 }
0x15e3   : > { %v8391_v46 = vmul.f32 0.03125, %v8366_v2  ;;  %v8402_v16 = vadd.f32 1e-05, %v8386_v56 }
0x15e5   : > { %v8407_v0 = vadd.f32 1e-05, %v8391_v46  ;;  %11576 = vrsqrt.f32 %v8402_v16 }
0x15e6   : > { %v8362_v29 = vpop.xlane.xlu0 %8361  ;;  %v8368_v19 = vpop.xlane.xlu1 %8367 }
0x15e7   : > { %11578 = vrsqrt.f32 %v8407_v0  ;;  %v8389_v9 = vmul.f32 0.03125, %v8362_v29  ;;  %v8392_v1 = vmul.f32 0.03125, %v8368_v19 }
0x15e9   : > { %v8405_v52 = vadd.f32 1e-05, %v8389_v9  ;;  %v8408_v41 = vadd.f32 1e-05, %v8392_v1 }
0x15ea   : > { %v8364_v33 = vpop.xlane.xlu1 %8363  ;;  %v11571_v17 = vpop.eup %11570 }
0x15eb   : > { %11580 = vrsqrt.f32 %v8405_v52  ;;  %v8374_v48 = vpop.xlane.xlu0 %8373  ;;  %v8390_v30 = vmul.f32 0.03125, %v8364_v33  ;;  %v8435_v55 = vmul.f32 %v11571_v17, %v17092_v39 }
0x15ec   : > { %11582 = vrsqrt.f32 %v8408_v41  ;;  %v8395_v34 = vmul.f32 0.03125, %v8374_v48 }
0x15ed   : > { %v8406_v8 = vadd.f32 1e-05, %v8390_v30  ;;  %v8455_v28 = vmul.f32 %v17187_v60, %v8435_v55 }
0x15ee   : > { %v8411_v5 = vadd.f32 1e-05, %v8395_v34  ;;  %v11573_v3 = vpop.eup %11572  ;;  %v8376_v4 = vpop.xlane.xlu1 %8375 }
0x15ef   : > { %11584 = vrsqrt.f32 %v8406_v8  ;;  %v8370_v7 = vpop.xlane.xlu0 %8369  ;;  %v11575_v53 = vpop.eup %11574  ;;  %v17195_v18 = vadd.f32 %v17191_v44, %v8455_v28  ;;  %v8433_v27 = vmul.f32 %v11573_v3, %v17099_v58  ;;  %v8396_v10 = vmul.f32 0.03125, %v8376_v4 }
0x15f0   : > { %11586 = vrsqrt.f32 %v8411_v5  ;;  %v8393_v39 = vmul.f32 0.03125, %v8370_v7  ;;  %v8436_v14 = vmul.f32 %v11575_v53, %v17102_v38 }
0x15f1   : > { %8491 = vst [vmem:[#allocation2 + $0x58] sm:$0xff] %v17195_v18  ;;  %v8453_v42 = vmul.f32 %v17187_v60, %v8433_v27  ;;  %v8412_v26 = vadd.f32 1e-05, %v8396_v10 }
0x15f2   : > { %v8409_v13 = vadd.f32 1e-05, %v8393_v39  ;;  %v11577_v50 = vpop.eup %11576  ;;  %v8456_v37 = vmul.f32 %v17187_v60, %v8436_v14  ;;  %v8372_v12 = vpop.xlane.xlu1 %8371 }
0x15f3   : > { %v17203_v31 = vadd.f32 %v17191_v44, %v8453_v42  ;;  %v8434_v58 = vmul.f32 %v11577_v50, %v17111_v51  ;;  %v8394_v40 = vmul.f32 0.03125, %v8372_v12 }
0x15f4   : > { %v11579_v20 = vpop.eup %11578  ;;  %11588 = vrsqrt.f32 %v8409_v13  ;;  %v17207_v38 = vadd.f32 %v17191_v44, %v8456_v37 }
0x15f5   : > { %v8439_v24 = vmul.f32 %v11579_v20, %v17114_v57  ;;  %11590 = vrsqrt.f32 %v8412_v26  ;;  %8489 = vst [vmem:[#allocation2 + $0x30] sm:$0xff] %v17203_v31  ;;  %v8454_v43 = vmul.f32 %v17187_v60, %v8434_v58  ;;  %v8410_v36 = vadd.f32 1e-05, %v8394_v40 }
0x15f6   : > { %8492 = vst [vmem:[#allocation2 + $0x18] sm:$0xff] %v17207_v38 }
0x15f7   : > { %v8378_v32 = vpop.xlane.xlu0 %8377  ;;  %v8459_v61 = vmul.f32 %v17187_v60, %v8439_v24  ;;  %v17215_v35 = vadd.f32 %v17191_v44, %v8454_v43  ;;  %11592 = vrsqrt.f32 %v8410_v36 }
0x15f8   : > { %v8397_v23 = vmul.f32 0.03125, %v8378_v32  ;;  %v11581_v51 = vpop.eup %11580 }
0x15f9   : > { %v11583_v11 = vpop.eup %11582  ;;  %v17218_v57 = vadd.f32 %v17191_v44, %v8459_v61  ;;  %v8437_v59 = vmul.f32 %v11581_v51, %v17123_v45  ;;  %8490 = vst [vmem:[#allocation2] sm:$0xff] %v17215_v35 }
0x15fa   : > { %v8413_v2 = vadd.f32 1e-05, %v8397_v23  ;;  %v8440_v56 = vmul.f32 %v11583_v11, %v17126_v62 }
0x15fb   : > { %v8382_v46 = vpop.xlane.xlu0 %8381  ;;  %v8380_v16 = vpop.xlane.xlu1 %8379  ;;  %8495 = vst [vmem:[#allocation2 + $0x8] sm:$0xff] %v17218_v57  ;;  %v8457_v0 = vmul.f32 %v17187_v60, %v8437_v59 }
0x15fc   : > { %11594 = vrsqrt.f32 %v8413_v2  ;;  %v8399_v29 = vmul.f32 0.03125, %v8382_v46  ;;  %v8398_v19 = vmul.f32 0.03125, %v8380_v16  ;;  %v11585_v9 = vpop.eup %11584  ;;  %v8460_v1 = vmul.f32 %v17187_v60, %v8440_v56 }
0x15fd   : > { %v11587_v52 = vpop.eup %11586  ;;  %v17227_v45 = vadd.f32 %v17191_v44, %v8457_v0  ;;  %v8438_v41 = vmul.f32 %v11585_v9, %v17135_v15 }
0x15fe   : > { %v8415_v33 = vadd.f32 1e-05, %v8399_v29  ;;  %v8414_v62 = vadd.f32 1e-05, %v8398_v19  ;;  %v17231_v17 = vadd.f32 %v17191_v44, %v8460_v1  ;;  %v8443_v48 = vmul.f32 %v11587_v52, %v17138_v47 }
0x15ff   : > { %v8384_v30 = vpop.xlane.xlu1 %8383  ;;  %8493 = vst [vmem:[#allocation2 + $0x50] sm:$0xff] %v17227_v45  ;;  %v8458_v55 = vmul.f32 %v17187_v60, %v8438_v41 }
0x1600   : > { %11596 = vrsqrt.f32 %v8415_v33  ;;  %v8400_v34 = vmul.f32 0.03125, %v8384_v30  ;;  %8496 = vst [vmem:[#allocation2 + $0x48] sm:$0xff] %v17231_v17  ;;  %v8463_v8 = vmul.f32 %v17187_v60, %v8443_v48 }
0x1601   : > { %11598 = vrsqrt.f32 %v8414_v62  ;;  %v11589_v15 = vpop.eup %11588  ;;  %v17239_v28 = vadd.f32 %v17191_v44, %v8458_v55 }
0x1602   : > { %v8416_v5 = vadd.f32 1e-05, %v8400_v34  ;;  %v11591_v3 = vpop.eup %11590  ;;  %v17242_v47 = vadd.f32 %v17191_v44, %v8463_v8  ;;  %v8441_v7 = vmul.f32 %v11589_v15, %v17147_v49 }
0x1603   : > { %8494 = vst [vmem:[#allocation2 + $0x68] sm:$0xff] %v17239_v28  ;;  %v8444_v4 = vmul.f32 %v11591_v3, %v17150_v6 }
0x1604   : > { %11600 = vrsqrt.f32 %v8416_v5  ;;  %8499 = vst [vmem:[#allocation2 + $0x10] sm:$0xff] %v17242_v47  ;;  %v8461_v53 = vmul.f32 %v17187_v60, %v8441_v7  ;;  %v11593_v27 = vpop.eup %11592 }
0x1605   : > { %v8464_v39 = vmul.f32 %v17187_v60, %v8444_v4  ;;  %v8442_v10 = vmul.f32 %v11593_v27, %v17158_v54 }
0x1606   : > { %v8481_v14 = vadd.f32 %v17191_v44, %v8461_v53 }
0x1607   : > { %v17253_v42 = vadd.f32 %v17191_v44, %v8464_v39  ;;  %v8462_v13 = vmul.f32 %v17187_v60, %v8442_v10 }
0x1608   : > { %8497 = vst [vmem:[#allocation2 + $0x40] sm:$0xff] %v8481_v14 }
0x1609   : > { %v11595_v49 = vpop.eup %11594  ;;  %8500 = vst [vmem:[#allocation2 + $0x38] sm:$0xff] %v17253_v42  ;;  %v8482_v50 = vadd.f32 %v17191_v44, %v8462_v13 }
0x160a   : > { %v8445_v6 = vmul.f32 %v11595_v49, %v17164_v22 }
0x160b   : > { %8498 = vst [vmem:[#allocation2 + $0x20] sm:$0xff] %v8482_v50 }
0x160c   : > { %v8465_v37 = vmul.f32 %v17187_v60, %v8445_v6 }
0x160d   : > { %v11597_v26 = vpop.eup %11596 }
0x160e   : > { %v11599_v12 = vpop.eup %11598  ;;  %v17261_v54 = vadd.f32 %v17191_v44, %v8465_v37  ;;  %v8447_v20 = vmul.f32 %v11597_v26, %v17171_v21 }
0x160f   : > { %v8446_v58 = vmul.f32 %v11599_v12, %v17174_v25 }
0x1610   : > { %8501 = vst [vmem:[#allocation2 + $0x60] sm:$0xff] %v17261_v54  ;;  %v8467_v40 = vmul.f32 %v17187_v60, %v8447_v20 }
0x1611   : > { %v11601_v24 = vpop.eup %11600  ;;  %v8466_v22 = vmul.f32 %v17187_v60, %v8446_v58 }
0x1612   : > { %v17269_v43 = vadd.f32 %v17191_v44, %v8467_v40  ;;  %v8448_v36 = vmul.f32 %v11601_v24, %v17182_v63 }
0x1613   : > { %v17273_v32 = vadd.f32 %v17191_v44, %v8466_v22 }
0x1614   : > { %8503 = vst [vmem:[#allocation2 + $0x78] sm:$0xff] %v17269_v43  ;;  %v8468_v21 = vmul.f32 %v17187_v60, %v8448_v36  ;;  %8508 = sbr.rel (%p9802_p0) target bundleno = 6202 (0x183a), region = 184 }
0x1615   : > { %8502 = vst [vmem:[#allocation2 + $0x70] sm:$0xff] %v17273_v32 }
0x1616   : > { %v17279_v25 = vadd.f32 %v17191_v44, %v8468_v21 }
0x1618   : > { %8504 = vst [vmem:[#allocation2 + $0x28] sm:$0xff] %v17279_v25 }
0x1619   : > { %8511 = vadd.xlane.f32.xlu0 %v17203_v31  ;;  %8527 = vadd.xlane.f32.xlu1 %v8481_v14  ;;  %v11652_v63 = vld [vmem:[#allocation23 + $0x74] ss:$8 sps:$4 sm:$0xff]   ;;  %v18464_v56 = vld [vmem:[#allocation53_spill] sm:$0xff]  ;;  %v11654_v49 = vld [vmem:[#allocation23 + $0x70] ss:$8 sps:$4 sm:$0xff]  }
0x161a   : > { %8879 = vmatprep.subr.bf16.mxu0 %v11652_v63  ;;  %10369 = vmatprep.subr.bf16.mxu1 %v11652_v63  ;;  %v11655_v12 = vld [vmem:[#allocation23 + $0x64] ss:$8 sps:$4 sm:$0xff]  }
0x161b   : > { %8880 = vmatpush1.bf16.msra.mxu0 %v11654_v49  ;;  %10377 = vmatpush1.bf16.msra.mxu1 %v11654_v49 }
0x161c   : > { %8881 = vmatprep.subr.bf16.mxu0 %v11655_v12  ;;  %10370 = vmatprep.subr.bf16.mxu1 %v11655_v12 }
0x161d   : > { %8513 = vadd.xlane.f32.xlu0 %v17215_v35  ;;  %8529 = vadd.xlane.f32.xlu1 %v8482_v50 }
0x1621   : > { %8515 = vadd.xlane.f32.xlu0 %v17195_v18  ;;  %8517 = vadd.xlane.f32.xlu1 %v17207_v38 }
0x1625   : > { %8531 = vadd.xlane.f32.xlu0 %v17242_v47  ;;  %8533 = vadd.xlane.f32.xlu1 %v17253_v42 }
0x1629   : > { %8519 = vadd.xlane.f32.xlu0 %v17227_v45  ;;  %8521 = vadd.xlane.f32.xlu1 %v17239_v28 }
0x162d   : > { %8535 = vadd.xlane.f32.xlu0 %v17261_v54  ;;  %8537 = vadd.xlane.f32.xlu1 %v17273_v32 }
0x1631   : > { %8523 = vadd.xlane.f32.xlu0 %v17218_v57  ;;  %8525 = vadd.xlane.f32.xlu1 %v17231_v17 }
0x1635   : > { %8539 = vadd.xlane.f32.xlu0 %v17269_v43  ;;  %8541 = vadd.xlane.f32.xlu1 %v17279_v25 }
0x16a2   : > { %v8512_v60 = vpop.xlane.xlu0 %8511  ;;  %v8528_v44 = vpop.xlane.xlu1 %8527 }
0x16a3   : > { %v8543_v61 = vmul.f32 0.03125, %v8512_v60  ;;  %v8551_v23 = vmul.f32 0.03125, %v8528_v44 }
0x16a5   : > { %v8559_v51 = vsub.f32 %v17203_v31, %v8543_v61  ;;  %v8567_v11 = vsub.f32 %v8481_v14, %v8551_v23 }
0x16a6   : > { %v8514_v59 = vpop.xlane.xlu0 %8513  ;;  %v8530_v2 = vpop.xlane.xlu1 %8529 }
0x16a7   : > { %v17299_v46 = vmul.f32 %v18464_v56, %v8559_v51  ;;  %v17302_v16 = vmul.f32 %v18464_v56, %v8567_v11  ;;  %v8544_v0 = vmul.f32 0.03125, %v8514_v59  ;;  %v8552_v29 = vmul.f32 0.03125, %v8530_v2  ;;  %v11658_v51 = vld [vmem:[#allocation23 + $0x54] ss:$8 sps:$4 sm:$0xff]   ;;  %v11660_v2 = vld [vmem:[#allocation23 + $0x50] ss:$8 sps:$4 sm:$0xff]  }
0x16a9   : > { %v8560_v19 = vsub.f32 %v17215_v35, %v8544_v0  ;;  %v8568_v9 = vsub.f32 %v8482_v50, %v8552_v29  ;;  %v8591_v1 = vmul.f32 %v17299_v46, %v17299_v46  ;;  %v8599_v31 = vmul.f32 %v17302_v16, %v17302_v16 }
0x16aa   : > { %v8516_v52 = vpop.xlane.xlu0 %8515  ;;  %v8518_v41 = vpop.xlane.xlu1 %8517 }
0x16ab   : > { %v17310_v33 = vmul.f32 %v18464_v56, %v8560_v19  ;;  %v17313_v62 = vmul.f32 %v18464_v56, %v8568_v9  ;;  %v8545_v48 = vmul.f32 0.03125, %v8516_v52  ;;  %8607 = vadd.xlane.f32.xlu0 %v8591_v1  ;;  %v8546_v30 = vmul.f32 0.03125, %v8518_v41  ;;  %v11661_v41 = vld [vmem:[#allocation23 + $0x44] ss:$8 sps:$4 sm:$0xff]  }
0x16ad   : > { %v8561_v35 = vsub.f32 %v17195_v18, %v8545_v48  ;;  %v8562_v55 = vsub.f32 %v17207_v38, %v8546_v30  ;;  %v8592_v34 = vmul.f32 %v17310_v33, %v17310_v33  ;;  %v8600_v5 = vmul.f32 %v17313_v62, %v17313_v62  ;;  %v11663_v30 = vld [vmem:[#allocation23 + $0x40] ss:$8 sps:$4 sm:$0xff]  }
0x16ae   : > { %v8532_v8 = vpop.xlane.xlu0 %8531  ;;  %v8534_v15 = vpop.xlane.xlu1 %8533 }
0x16af   : > { %v17322_v3 = vmul.f32 %v18464_v56, %v8561_v35  ;;  %v17325_v7 = vmul.f32 %v18464_v56, %v8562_v55  ;;  %v8553_v4 = vmul.f32 0.03125, %v8532_v8  ;;  %8623 = vadd.xlane.f32.xlu0 %v8599_v31  ;;  %8609 = vadd.xlane.f32.xlu1 %v8592_v34  ;;  %v8554_v18 = vmul.f32 0.03125, %v8534_v15  ;;  %v11664_v8 = vld [vmem:[#allocation23 + $0x34] ss:$8 sps:$4 sm:$0xff]  }
0x16b1   : > { %v8569_v38 = vsub.f32 %v17242_v47, %v8553_v4  ;;  %v8570_v53 = vsub.f32 %v17253_v42, %v8554_v18  ;;  %v8593_v27 = vmul.f32 %v17322_v3, %v17322_v3  ;;  %v8594_v10 = vmul.f32 %v17325_v7, %v17325_v7  ;;  %v11667_v18 = vld [vmem:[#allocation23 + $0x24] ss:$8 sps:$4 sm:$0xff]  }
0x16b2   : > { %v8520_v39 = vpop.xlane.xlu0 %8519  ;;  %v8522_v14 = vpop.xlane.xlu1 %8521 }
0x16b3   : > { %v17334_v13 = vmul.f32 %v18464_v56, %v8569_v38  ;;  %v17337_v6 = vmul.f32 %v18464_v56, %v8570_v53  ;;  %v8547_v50 = vmul.f32 0.03125, %v8520_v39  ;;  %8625 = vadd.xlane.f32.xlu1 %v8600_v5  ;;  %8611 = vadd.xlane.f32.xlu0 %v8593_v27  ;;  %v8548_v47 = vmul.f32 0.03125, %v8522_v14  ;;  %v11669_v38 = vld [vmem:[#allocation23 + $0x20] ss:$8 sps:$4 sm:$0xff]   ;;  %v11670_v53 = vld [vmem:[#allocation23 + $0x14] ss:$8 sps:$4 sm:$0xff]  }
0x16b4   : > { %v11672_v27 = vld [vmem:[#allocation23 + $0x10] ss:$8 sps:$4 sm:$0xff]   ;;  %v11673_v39 = vld [vmem:[#allocation23 + $0x4] ss:$8 sps:$4 sm:$0xff]   ;;  %v11675_v14 = vld [vmem:[#allocation23] ss:$8 sps:$4 sm:$0xff]  }
0x16b5   : > { %v8563_v42 = vsub.f32 %v17227_v45, %v8547_v50  ;;  %v8564_v37 = vsub.f32 %v17239_v28, %v8548_v47  ;;  %v8601_v26 = vmul.f32 %v17334_v13, %v17334_v13  ;;  %v8602_v40 = vmul.f32 %v17337_v6, %v17337_v6  ;;  %v11657_v28 = vld [vmem:[#allocation23 + $0x60] ss:$8 sps:$4 sm:$0xff]  }
0x16b6   : > { %v8536_v20 = vpop.xlane.xlu0 %8535  ;;  %v8538_v58 = vpop.xlane.xlu1 %8537  ;;  %8882 = vmatpush1.bf16.msra.mxu0 %v11657_v28  ;;  %10378 = vmatpush1.bf16.msra.mxu1 %v11657_v28 }
0x16b7   : > { %v17346_v24 = vmul.f32 %v18464_v56, %v8563_v42  ;;  %v17349_v22 = vmul.f32 %v18464_v56, %v8564_v37  ;;  %v8555_v36 = vmul.f32 0.03125, %v8536_v20  ;;  %8613 = vadd.xlane.f32.xlu1 %v8594_v10  ;;  %8627 = vadd.xlane.f32.xlu0 %v8601_v26  ;;  %v8556_v45 = vmul.f32 0.03125, %v8538_v58 }
0x16b8   : > { %8883 = vmatprep.subr.bf16.mxu0 %v11658_v51  ;;  %10371 = vmatprep.subr.bf16.mxu1 %v11658_v51  ;;  %v12284_v10 = vmov 0  }
0x16b9   : > { %v8571_v21 = vsub.f32 %v17261_v54, %v8555_v36  ;;  %v8572_v63 = vsub.f32 %v17273_v32, %v8556_v45  ;;  %v8595_v60 = vmul.f32 %v17346_v24, %v17346_v24  ;;  %v8596_v23 = vmul.f32 %v17349_v22, %v17349_v22  ;;  %8911 = vmatprep.mubr.bf16.mxu0 %v12284_v10 }
0x16ba   : > { %v8524_v44 = vpop.xlane.xlu0 %8523  ;;  %v8526_v61 = vpop.xlane.xlu1 %8525  ;;  %8884 = vmatpush1.bf16.msra.mxu0 %v11660_v2  ;;  %10379 = vmatpush1.bf16.msra.mxu1 %v11660_v2 }
0x16bb   : > { %v17358_v11 = vmul.f32 %v18464_v56, %v8571_v21  ;;  %v17361_v59 = vmul.f32 %v18464_v56, %v8572_v63  ;;  %v8549_v54 = vmul.f32 0.03125, %v8524_v44  ;;  %8629 = vadd.xlane.f32.xlu1 %v8602_v40  ;;  %8615 = vadd.xlane.f32.xlu0 %v8595_v60  ;;  %v8550_v32 = vmul.f32 0.03125, %v8526_v61 }
0x16bc   : > { %8885 = vmatprep.subr.bf16.mxu0 %v11661_v41  ;;  %10372 = vmatprep.subr.bf16.mxu1 %v11661_v41 }
0x16bd   : > { %v8565_v0 = vsub.f32 %v17218_v57, %v8549_v54  ;;  %v8566_v29 = vsub.f32 %v17231_v17, %v8550_v32  ;;  %v8603_v19 = vmul.f32 %v17358_v11, %v17358_v11  ;;  %v8604_v52 = vmul.f32 %v17361_v59, %v17361_v59  ;;  %8951 = vmatprep.mubr.bf16.mxu1 %v12284_v10 }
0x16be   : > { %v8540_v9 = vpop.xlane.xlu0 %8539  ;;  %v8542_v1 = vpop.xlane.xlu1 %8541  ;;  %8886 = vmatpush1.bf16.msra.mxu0 %v11663_v30  ;;  %10380 = vmatpush1.bf16.msra.mxu1 %v11663_v30  ;;  %v17402_v30 = vld [vmem:[%s18466_s27] ss:$0 sm:$0xff] }
0x16bf   : > { %v17370_v31 = vmul.f32 %v18464_v56, %v8565_v0  ;;  %v17373_v48 = vmul.f32 %v18464_v56, %v8566_v29  ;;  %v8557_v57 = vmul.f32 0.03125, %v8540_v9  ;;  %8617 = vadd.xlane.f32.xlu1 %v8596_v23  ;;  %8631 = vadd.xlane.f32.xlu0 %v8603_v19  ;;  %v8558_v17 = vmul.f32 0.03125, %v8542_v1  ;;  %v17396_v9 = vld [vmem:[%s18465_s26] ss:$0 sm:$0xff] }
0x16c0   : > { %8887 = vmatprep.subr.bf16.mxu0 %v11664_v8  ;;  %10373 = vmatprep.subr.bf16.mxu1 %v11664_v8 }
0x16c1   : > { %v8573_v35 = vsub.f32 %v17269_v43, %v8557_v57  ;;  %v8574_v55 = vsub.f32 %v17279_v25, %v8558_v17  ;;  %v8597_v34 = vmul.f32 %v17370_v31, %v17370_v31  ;;  %v8598_v4 = vmul.f32 %v17373_v48, %v17373_v48  ;;  %v11666_v43 = vld [vmem:[#allocation23 + $0x30] ss:$8 sps:$4 sm:$0xff]  }
0x16c2   : > { %8888 = vmatpush1.bf16.msra.mxu0 %v11666_v43  ;;  %10381 = vmatpush1.bf16.msra.mxu1 %v11666_v43 }
0x16c3   : > { %v17380_v15 = vmul.f32 %v18464_v56, %v8573_v35  ;;  %v17383_v5 = vmul.f32 %v18464_v56, %v8574_v55  ;;  %8633 = vadd.xlane.f32.xlu1 %v8604_v52  ;;  %8619 = vadd.xlane.f32.xlu0 %v8597_v34 }
0x16c4   : > { %8889 = vmatprep.subr.bf16.mxu0 %v11667_v18  ;;  %10374 = vmatprep.subr.bf16.mxu1 %v11667_v18 }
0x16c5   : > { %v8605_v25 = vmul.f32 %v17380_v15, %v17380_v15  ;;  %v8606_v56 = vmul.f32 %v17383_v5, %v17383_v5 }
0x16c6   : > { %8890 = vmatpush1.bf16.msra.mxu0 %v11669_v38  ;;  %10382 = vmatpush1.bf16.msra.mxu1 %v11669_v38 }
0x16c7   : > { %8621 = vadd.xlane.f32.xlu1 %v8598_v4  ;;  %8635 = vadd.xlane.f32.xlu0 %v8605_v25 }
0x16c8   : > { %8891 = vmatprep.subr.bf16.mxu0 %v11670_v53  ;;  %10375 = vmatprep.subr.bf16.mxu1 %v11670_v53 }
0x16ca   : > { %8892 = vmatpush1.bf16.msra.mxu0 %v11672_v27  ;;  %10383 = vmatpush1.bf16.msra.mxu1 %v11672_v27 }
0x16cb   : > { %8637 = vadd.xlane.f32.xlu1 %v8606_v56  ;;  %8893 = vmatprep.subr.bf16.mxu0 %v11673_v39 }
0x16cc   : > { %10376 = vmatprep.subr.bf16.mxu1 %v11673_v39 }
0x16ce   : > { %8894 = vmatpush1.bf16.msra.mxu0 %v11675_v14  ;;  %10384 = vmatpush1.bf16.msra.mxu1 %v11675_v14 }
0x1734   : > { %v8608_v49 = vpop.xlane.xlu0 %8607 }
0x1735   : > { %v8639_v50 = vmul.f32 0.03125, %v8608_v49 }
0x1737   : > { %v8655_v47 = vadd.f32 1e-05, %v8639_v50 }
0x1738   : > { %v8610_v42 = vpop.xlane.xlu1 %8609  ;;  %v8624_v37 = vpop.xlane.xlu0 %8623 }
0x1739   : > { %11676 = vrsqrt.f32 %v8655_v47  ;;  %v8640_v26 = vmul.f32 0.03125, %v8610_v42  ;;  %v8647_v12 = vmul.f32 0.03125, %v8624_v37 }
0x173b   : > { %v8656_v20 = vadd.f32 1e-05, %v8640_v26  ;;  %v8663_v58 = vadd.f32 1e-05, %v8647_v12 }
0x173c   : > { %v8626_v40 = vpop.xlane.xlu1 %8625  ;;  %v8612_v36 = vpop.xlane.xlu0 %8611 }
0x173d   : > { %11678 = vrsqrt.f32 %v8656_v20  ;;  %v8648_v45 = vmul.f32 0.03125, %v8626_v40  ;;  %v8641_v28 = vmul.f32 0.03125, %v8612_v36 }
0x173e   : > { %11680 = vrsqrt.f32 %v8663_v58 }
0x173f   : > { %v8664_v21 = vadd.f32 1e-05, %v8648_v45  ;;  %v8657_v63 = vadd.f32 1e-05, %v8641_v28 }
0x1740   : > { %v8614_v60 = vpop.xlane.xlu1 %8613  ;;  %v8628_v44 = vpop.xlane.xlu0 %8627 }
0x1741   : > { %11682 = vrsqrt.f32 %v8664_v21  ;;  %v8642_v61 = vmul.f32 0.03125, %v8614_v60  ;;  %v8649_v23 = vmul.f32 0.03125, %v8628_v44 }
0x1742   : > { %11684 = vrsqrt.f32 %v8657_v63 }
0x1743   : > { %v8658_v51 = vadd.f32 1e-05, %v8642_v61  ;;  %v8665_v54 = vadd.f32 1e-05, %v8649_v23 }
0x1744   : > { %v8630_v32 = vpop.xlane.xlu1 %8629  ;;  %v8616_v2 = vpop.xlane.xlu0 %8615 }
0x1745   : > { %11686 = vrsqrt.f32 %v8658_v51  ;;  %v8650_v0 = vmul.f32 0.03125, %v8630_v32  ;;  %v8643_v29 = vmul.f32 0.03125, %v8616_v2 }
0x1746   : > { %v11677_v19 = vpop.eup %11676  ;;  %11688 = vrsqrt.f32 %v8665_v54 }
0x1747   : > { %v8666_v1 = vadd.f32 1e-05, %v8650_v0  ;;  %v8659_v52 = vadd.f32 1e-05, %v8643_v29  ;;  %v8687_v41 = vmul.f32 %v11677_v19, %v17299_v46 }
0x1748   : > { %v8618_v57 = vpop.xlane.xlu1 %8617  ;;  %v8632_v17 = vpop.xlane.xlu0 %8631 }
0x1749   : > { %11690 = vrsqrt.f32 %v8666_v1  ;;  %v8644_v35 = vmul.f32 0.03125, %v8618_v57  ;;  %v8651_v55 = vmul.f32 0.03125, %v8632_v17  ;;  %v8709_v34 = vmul.f32 %v17396_v9, %v8687_v41 }
0x174a   : > { %v11679_v8 = vpop.eup %11678  ;;  %11692 = vrsqrt.f32 %v8659_v52 }
0x174b   : > { %v11681_v4 = vpop.eup %11680  ;;  %v8660_v43 = vadd.f32 1e-05, %v8644_v35  ;;  %v8667_v25 = vadd.f32 1e-05, %v8651_v55  ;;  %v8688_v46 = vmul.f32 %v11679_v8, %v17310_v33  ;;  %v8731_v18 = vadd.f32 %v17402_v30, %v8709_v34 }
0x174c   : > { %v8634_v56 = vpop.xlane.xlu1 %8633  ;;  %v8620_v38 = vpop.xlane.xlu0 %8619  ;;  %v8695_v53 = vmul.f32 %v11681_v4, %v17302_v16 }
0x174d   : > { %11694 = vrsqrt.f32 %v8660_v43  ;;  %v8652_v27 = vmul.f32 0.03125, %v8634_v56  ;;  %v8645_v39 = vmul.f32 0.03125, %v8620_v38  ;;  %v8710_v14 = vmul.f32 %v17396_v9, %v8688_v46  ;;  %8747 = vst [vmem:[%s12833_s23] sm:$0xff] %v8731_v18 }
0x174e   : > { %v11683_v49 = vpop.eup %11682  ;;  %11696 = vrsqrt.f32 %v8667_v25  ;;  %v8717_v50 = vmul.f32 %v17396_v9, %v8695_v53 }
0x174f   : > { %v11685_v47 = vpop.eup %11684  ;;  %v8668_v42 = vadd.f32 1e-05, %v8652_v27  ;;  %v8661_v33 = vadd.f32 1e-05, %v8645_v39  ;;  %v8732_v37 = vadd.f32 %v17402_v30, %v8710_v14  ;;  %v8696_v26 = vmul.f32 %v11683_v49, %v17313_v62 }
0x1750   : > { %v8622_v16 = vpop.xlane.xlu1 %8621  ;;  %v8636_v12 = vpop.xlane.xlu0 %8635  ;;  %v8739_v20 = vadd.f32 %v17402_v30, %v8717_v50  ;;  %v8689_v58 = vmul.f32 %v11685_v47, %v17322_v3 }
0x1751   : > { %11698 = vrsqrt.f32 %v8668_v42  ;;  %v8646_v40 = vmul.f32 0.03125, %v8622_v16  ;;  %v8653_v36 = vmul.f32 0.03125, %v8636_v12  ;;  %8748 = vst [vmem:[%s12833_s23 + $0x8] sm:$0xff] %v8732_v37  ;;  %v8779_v45 = vpack.c.bf16 %v8732_v37, %v8731_v18 }
0x1752   : > { %v11687_v28 = vpop.eup %11686  ;;  %11700 = vrsqrt.f32 %v8661_v33  ;;  %v8718_v21 = vmul.f32 %v17396_v9, %v8696_v26  ;;  %8755 = vst [vmem:[%s12833_s23 + $0x40] sm:$0xff] %v8739_v20  ;;  %v8711_v63 = vmul.f32 %v17396_v9, %v8689_v58 }
0x1753   : > { %v11689_v62 = vpop.eup %11688  ;;  %v8662_v60 = vadd.f32 1e-05, %v8646_v40  ;;  %v8669_v44 = vadd.f32 1e-05, %v8653_v36  ;;  %8912 = vmatmul.mubr.bf16.vlgmr.msra.gmra.mxu0 %v8779_v45  ;;  %v8690_v3 = vmul.f32 %v11687_v28, %v17325_v7  ;;  %v18468_v28 = vld [vmem:[#allocation70_spill] sm:$0xff] }
0x1754   : > { %v8638_v61 = vpop.xlane.xlu1 %8637  ;;  %v8740_v23 = vadd.f32 %v17402_v30, %v8718_v21  ;;  %8921 = vmatprep.mubr.bf16.mxu0 %v12284_v10  ;;  %v8733_v51 = vadd.f32 %v17402_v30, %v8711_v63  ;;  %v8697_v54 = vmul.f32 %v11689_v62, %v17334_v13  ;;  %v18469_v21 = vsub.s32 0, %v18468_v28 }
0x1755   : > { %11702 = vrsqrt.f32 %v8662_v60  ;;  %v8654_v32 = vmul.f32 0.03125, %v8638_v61  ;;  %v8712_v2 = vmul.f32 %v17396_v9, %v8690_v3 }
0x1756   : > { %v11691_v0 = vpop.eup %11690  ;;  %11704 = vrsqrt.f32 %v8669_v44  ;;  %8756 = vst [vmem:[%s12833_s23 + $0x48] sm:$0xff] %v8740_v23  ;;  %v8783_v29 = vpack.c.bf16 %v8740_v23, %v8739_v20  ;;  %8749 = vst [vmem:[%s12833_s23 + $0x10] sm:$0xff] %v8733_v51  ;;  %v8719_v7 = vmul.f32 %v17396_v9, %v8697_v54 }
0x1757   : > { %v11693_v19 = vpop.eup %11692  ;;  %v8670_v1 = vadd.f32 1e-05, %v8654_v32  ;;  %v8734_v52 = vadd.f32 %v17402_v30, %v8712_v2  ;;  %v8698_v41 = vmul.f32 %v11691_v0, %v17337_v6 }
0x1758   : > { %8952 = vmatmul.mubr.bf16.vlgmr.msra.gmra.mxu1 %v8783_v29  ;;  %v8741_v13 = vadd.f32 %v17402_v30, %v8719_v7  ;;  %v8691_v57 = vmul.f32 %v11693_v19, %v17346_v24 }
0x1759   : > { %11706 = vrsqrt.f32 %v8670_v1  ;;  %8750 = vst [vmem:[%s12833_s23 + $0x18] sm:$0xff] %v8734_v52  ;;  %v8780_v17 = vpack.c.bf16 %v8734_v52, %v8733_v51  ;;  %8961 = vmatprep.mubr.bf16.mxu1 %v12284_v10  ;;  %v8720_v35 = vmul.f32 %v17396_v9, %v8698_v41 }
0x175a   : > { %v11695_v55 = vpop.eup %11694  ;;  %8757 = vst [vmem:[%s12833_s23 + $0x50] sm:$0xff] %v8741_v13  ;;  %v8713_v34 = vmul.f32 %v17396_v9, %v8691_v57 }
0x175b   : > { %v11697_v8 = vpop.eup %11696  ;;  %8922 = vmatmul.mubr.bf16.gmra.mxu0 %v8780_v17  ;;  %v8742_v6 = vadd.f32 %v17402_v30, %v8720_v35  ;;  %v8692_v4 = vmul.f32 %v11695_v55, %v17349_v22 }
0x175c   : > { %8931 = vmatprep.mubr.bf16.mxu0 %v12284_v10  ;;  %v8735_v24 = vadd.f32 %v17402_v30, %v8713_v34  ;;  %v8699_v43 = vmul.f32 %v11697_v8, %v17358_v11 }
0x175d   : > { %8758 = vst [vmem:[%s12833_s23 + $0x58] sm:$0xff] %v8742_v6  ;;  %v8784_v25 = vpack.c.bf16 %v8742_v6, %v8741_v13  ;;  %v8714_v46 = vmul.f32 %v17396_v9, %v8692_v4 }
0x175e   : > { %v11699_v18 = vpop.eup %11698  ;;  %8751 = vst [vmem:[%s12833_s23 + $0x20] sm:$0xff] %v8735_v24  ;;  %v8721_v56 = vmul.f32 %v17396_v9, %v8699_v43 }
0x175f   : > { %v11701_v38 = vpop.eup %11700  ;;  %v8736_v53 = vadd.f32 %v17402_v30, %v8714_v46  ;;  %v8700_v22 = vmul.f32 %v11699_v18, %v17361_v59 }
0x1760   : > { %8962 = vmatmul.mubr.bf16.gmra.mxu1 %v8784_v25  ;;  %v8743_v27 = vadd.f32 %v17402_v30, %v8721_v56  ;;  %v8693_v11 = vmul.f32 %v11701_v38, %v17370_v31 }
0x1761   : > { %8752 = vst [vmem:[%s12833_s23 + $0x28] sm:$0xff] %v8736_v53  ;;  %v8781_v39 = vpack.c.bf16 %v8736_v53, %v8735_v24  ;;  %8971 = vmatprep.mubr.bf16.mxu1 %v12284_v10  ;;  %v8722_v14 = vmul.f32 %v17396_v9, %v8700_v22 }
0x1762   : > { %v11703_v49 = vpop.eup %11702  ;;  %8759 = vst [vmem:[%s12833_s23 + $0x60] sm:$0xff] %v8743_v27  ;;  %v8715_v50 = vmul.f32 %v17396_v9, %v8693_v11 }
0x1763   : > { %v11705_v47 = vpop.eup %11704  ;;  %8932 = vmatmul.mubr.bf16.gmra.mxu0 %v8781_v39  ;;  %v8744_v59 = vadd.f32 %v17402_v30, %v8722_v14  ;;  %v8694_v42 = vmul.f32 %v11703_v49, %v17373_v48 }
0x1764   : > { %8941 = vmatprep.mubr.bf16.mxu0 %v12284_v10  ;;  %v8737_v31 = vadd.f32 %v17402_v30, %v8715_v50  ;;  %v8701_v33 = vmul.f32 %v11705_v47, %v17380_v15 }
0x1765   : > { %8760 = vst [vmem:[%s12833_s23 + $0x68] sm:$0xff] %v8744_v59  ;;  %v8785_v37 = vpack.c.bf16 %v8744_v59, %v8743_v27  ;;  %v8716_v26 = vmul.f32 %v17396_v9, %v8694_v42 }
0x1766   : > { %v11707_v16 = vpop.eup %11706  ;;  %8753 = vst [vmem:[%s12833_s23 + $0x30] sm:$0xff] %v8737_v31  ;;  %v8723_v12 = vmul.f32 %v17396_v9, %v8701_v33 }
0x1767   : > { %v8738_v20 = vadd.f32 %v17402_v30, %v8716_v26  ;;  %v8702_v48 = vmul.f32 %v11707_v16, %v17383_v5  ;;  %v8787_v5 = vld [vmem:[%s18467_s6] sm:$0x3] }
0x1768   : > { %8972 = vmatmul.mubr.bf16.gmra.mxu1 %v8785_v37  ;;  %v8745_v58 = vadd.f32 %v17402_v30, %v8723_v12  ;;  %v17478_v63 = vrot.slane %v8787_v5, %v18469_v21 }
0x1769   : > { %8754 = vst [vmem:[%s12833_s23 + $0x38] sm:$0xff] %v8738_v20  ;;  %v8782_v40 = vpack.c.bf16 %v8738_v20, %v8737_v31  ;;  %8981 = vmatprep.mubr.bf16.mxu1 %v12284_v10  ;;  %v8724_v15 = vmul.f32 %v17396_v9, %v8702_v48  ;;  %v18470_v10 = vsub.s32 1, %v18468_v28 }
0x176a   : > { %8761 = vst [vmem:[%s12833_s23 + $0x70] sm:$0xff] %v8745_v58 }
0x176b   : > { %8942 = vmatmul.mubr.bf16.gmra.mxu0 %v8782_v40  ;;  %v8746_v36 = vadd.f32 %v17402_v30, %v8724_v15  ;;  %v17482_v9 = vrot.slane %v8787_v5, %v18470_v10 }
0x176d   : > { %8762 = vst [vmem:[%s12833_s23 + $0x78] sm:$0xff] %v8746_v36  ;;  %v8786_v45 = vpack.c.bf16 %v8746_v36, %v8745_v58 }
0x1770   : > { %8982 = vmatmul.mubr.bf16.gmra.mxu1 %v8786_v45 }
0x1813   : > { %v8913_v62 = vpop.f32.mrf.mxu0 }
0x1814   : > { %v8914_v30 = vadd.f32 %v8913_v62, %v17478_v63 }
0x1815   : > { %v8915_v60 = vpop.f32.mrf.mxu0 }
0x1816   : > { %8992 = vst [vmem:[%s12835_s10] sm:$0xff] %v8914_v30  ;;  %v8916_v44 = vadd.f32 %v8915_v60, %v17482_v9 }
0x1817   : > { %v8917_v3 = vpop.f32.mrf.mxu0 }
0x1818   : > { %8993 = vst [vmem:[%s12835_s10 + $0x8] sm:$0xff] %v8916_v44  ;;  %v8918_v61 = vadd.f32 %v8917_v3, %v17478_v63  ;;  %v8953_v23 = vpop.f32.mrf.mxu1 }
0x1819   : > { %v8954_v51 = vadd.f32 %v8953_v23, %v17478_v63  ;;  %v8919_v54 = vpop.f32.mrf.mxu0 }
0x181a   : > { %8994 = vst [vmem:[%s12835_s10 + $0x10] sm:$0xff] %v8918_v61  ;;  %v8920_v32 = vadd.f32 %v8919_v54, %v17482_v9  ;;  %v8955_v2 = vpop.f32.mrf.mxu1 }
0x181b   : > { %9008 = vst [vmem:[%s12835_s10 + $0x80] sm:$0xff] %v8954_v51  ;;  %v8956_v0 = vadd.f32 %v8955_v2, %v17482_v9  ;;  %v8923_v29 = vpop.f32.mrf.mxu0 }
0x181c   : > { %8995 = vst [vmem:[%s12835_s10 + $0x18] sm:$0xff] %v8920_v32  ;;  %v8924_v7 = vadd.f32 %v8923_v29, %v17478_v63  ;;  %v8957_v19 = vpop.f32.mrf.mxu1 }
0x181d   : > { %9009 = vst [vmem:[%s12835_s10 + $0x88] sm:$0xff] %v8956_v0  ;;  %v8958_v1 = vadd.f32 %v8957_v19, %v17478_v63  ;;  %v8925_v52 = vpop.f32.mrf.mxu0 }
0x181e   : > { %8996 = vst [vmem:[%s12835_s10 + $0x20] sm:$0xff] %v8924_v7  ;;  %v8926_v41 = vadd.f32 %v8925_v52, %v17482_v9  ;;  %v8959_v13 = vpop.f32.mrf.mxu1 }
0x181f   : > { %9010 = vst [vmem:[%s12835_s10 + $0x90] sm:$0xff] %v8958_v1  ;;  %v8960_v57 = vadd.f32 %v8959_v13, %v17482_v9  ;;  %v8927_v17 = vpop.f32.mrf.mxu0 }
0x1820   : > { %8997 = vst [vmem:[%s12835_s10 + $0x28] sm:$0xff] %v8926_v41  ;;  %v8928_v35 = vadd.f32 %v8927_v17, %v17478_v63  ;;  %v8963_v55 = vpop.f32.mrf.mxu1 }
0x1821   : > { %9011 = vst [vmem:[%s12835_s10 + $0x98] sm:$0xff] %v8960_v57  ;;  %v8964_v34 = vadd.f32 %v8963_v55, %v17478_v63  ;;  %v8929_v8 = vpop.f32.mrf.mxu0 }
0x1822   : > { %8998 = vst [vmem:[%s12835_s10 + $0x30] sm:$0xff] %v8928_v35  ;;  %v8930_v6 = vadd.f32 %v8929_v8, %v17482_v9  ;;  %v8965_v4 = vpop.f32.mrf.mxu1 }
0x1823   : > { %9012 = vst [vmem:[%s12835_s10 + $0xa0] sm:$0xff] %v8964_v34  ;;  %v8966_v24 = vadd.f32 %v8965_v4, %v17482_v9  ;;  %v8933_v43 = vpop.f32.mrf.mxu0 }
0x1824   : > { %8999 = vst [vmem:[%s12835_s10 + $0x38] sm:$0xff] %v8930_v6  ;;  %v8934_v25 = vadd.f32 %v8933_v43, %v17478_v63  ;;  %v8967_v46 = vpop.f32.mrf.mxu1 }
0x1825   : > { %9013 = vst [vmem:[%s12835_s10 + $0xa8] sm:$0xff] %v8966_v24  ;;  %v8968_v18 = vadd.f32 %v8967_v46, %v17478_v63  ;;  %v8935_v56 = vpop.f32.mrf.mxu0 }
0x1826   : > { %9000 = vst [vmem:[%s12835_s10 + $0x40] sm:$0xff] %v8934_v25  ;;  %v8936_v38 = vadd.f32 %v8935_v56, %v17482_v9  ;;  %v8969_v53 = vpop.f32.mrf.mxu1 }
0x1827   : > { %9014 = vst [vmem:[%s12835_s10 + $0xb0] sm:$0xff] %v8968_v18  ;;  %v8970_v22 = vadd.f32 %v8969_v53, %v17482_v9  ;;  %v8937_v27 = vpop.f32.mrf.mxu0 }
0x1828   : > { %9001 = vst [vmem:[%s12835_s10 + $0x48] sm:$0xff] %v8936_v38  ;;  %v8938_v11 = vadd.f32 %v8937_v27, %v17478_v63  ;;  %v8973_v39 = vpop.f32.mrf.mxu1 }
0x1829   : > { %9015 = vst [vmem:[%s12835_s10 + $0xb8] sm:$0xff] %v8970_v22  ;;  %v8974_v14 = vadd.f32 %v8973_v39, %v17478_v63  ;;  %v8939_v49 = vpop.f32.mrf.mxu0 }
0x182a   : > { %9002 = vst [vmem:[%s12835_s10 + $0x50] sm:$0xff] %v8938_v11  ;;  %v8940_v50 = vadd.f32 %v8939_v49, %v17482_v9  ;;  %v8975_v47 = vpop.f32.mrf.mxu1 }
0x182b   : > { %9016 = vst [vmem:[%s12835_s10 + $0xc0] sm:$0xff] %v8974_v14  ;;  %v8976_v59 = vadd.f32 %v8975_v47, %v17482_v9  ;;  %v8943_v42 = vpop.f32.mrf.mxu0 }
0x182c   : > { %9003 = vst [vmem:[%s12835_s10 + $0x58] sm:$0xff] %v8940_v50  ;;  %v8944_v31 = vadd.f32 %v8943_v42, %v17478_v63  ;;  %v8977_v33 = vpop.f32.mrf.mxu1 }
0x182d   : > { %9017 = vst [vmem:[%s12835_s10 + $0xc8] sm:$0xff] %v8976_v59  ;;  %v8978_v37 = vadd.f32 %v8977_v33, %v17478_v63  ;;  %v8945_v26 = vpop.f32.mrf.mxu0 }
0x182e   : > { %9004 = vst [vmem:[%s12835_s10 + $0x60] sm:$0xff] %v8944_v31  ;;  %v8946_v16 = vadd.f32 %v8945_v26, %v17482_v9  ;;  %v8979_v12 = vpop.f32.mrf.mxu1 }
0x182f   : > { %9018 = vst [vmem:[%s12835_s10 + $0xd0] sm:$0xff] %v8978_v37  ;;  %v8980_v20 = vadd.f32 %v8979_v12, %v17482_v9  ;;  %v8947_v48 = vpop.f32.mrf.mxu0 }
0x1830   : > { %9005 = vst [vmem:[%s12835_s10 + $0x68] sm:$0xff] %v8946_v16  ;;  %v8948_v58 = vadd.f32 %v8947_v48, %v17478_v63  ;;  %v8983_v40 = vpop.f32.mrf.mxu1 }
0x1831   : > { %9019 = vst [vmem:[%s12835_s10 + $0xd8] sm:$0xff] %v8980_v20  ;;  %v8984_v15 = vadd.f32 %v8983_v40, %v17478_v63  ;;  %v8949_v36 = vpop.f32.mrf.mxu0 }
0x1832   : > { %9006 = vst [vmem:[%s12835_s10 + $0x70] sm:$0xff] %v8948_v58  ;;  %v8950_v45 = vadd.f32 %v8949_v36, %v17482_v9  ;;  %v8985_v5 = vpop.f32.mrf.mxu1 }
0x1833   : > { %9020 = vst [vmem:[%s12835_s10 + $0xe0] sm:$0xff] %v8984_v15  ;;  %v8986_v28 = vadd.f32 %v8985_v5, %v17482_v9 }
0x1834   : > { %9007 = vst [vmem:[%s12835_s10 + $0x78] sm:$0xff] %v8950_v45  ;;  %v8987_v21 = vpop.f32.mrf.mxu1 }
0x1835   : > { %9021 = vst [vmem:[%s12835_s10 + $0xe8] sm:$0xff] %v8986_v28  ;;  %v8988_v10 = vadd.f32 %v8987_v21, %v17478_v63 }
0x1836   : > { %v8989_v62 = vpop.f32.mrf.mxu1 }
0x1837   : > { %9022 = vst [vmem:[%s12835_s10 + $0xf0] sm:$0xff] %v8988_v10  ;;  %v8990_v30 = vadd.f32 %v8989_v62, %v17482_v9 }
0x1839   : > { %9023 = vst [vmem:[%s12835_s10 + $0xf8] sm:$0xff] %v8990_v30 }
0x183a PF: > { %s18471_s1 = sld [smem:[#allocation41_spill]]  ;;  %s9043_s9 = sshll.u32 %s12833_s23, 4  ;;  %s17555_s9 = int_to_ptr.vmem [resolvable:$true] %s9043_s9 }
0x183b   : > { %s18472_s18 = sld [smem:[#allocation46_spill]]  ;;  %s9025_s21 = scalar_lea.sflag [#allocation5], %s12751_s0 }
0x183c   : > { %s18473_s5 = sld [smem:[#allocation162_spill]]  ;;  %s12080_s20 = scalar_lea.vmem %s17555_s9, 2048 }
0x183d   : > { %p12081_p8 = scmp.ne.s32.totalorder %s17555_s9, %s12080_s20  ;;  %s12285_s28 = smov [#allocation24]  }
0x183e   : > { %s12084_s15 = sshll.u32 %s12285_s28, 4  ;;  %s12085_s15 = int_to_ptr.vmem [resolvable:$false] %s12084_s15 }
0x183f   : > { %s12086_s30 = scalar_lea.vmem %s12085_s15, 4096  ;;  %p12087_p6 = scmp.lt.s32.totalorder %s17555_s9, %s12085_s15 }
0x1840   : > { %s9839_s12 = sshll.u32 %s18471_s1, 11  ;;  %p12088_p4 = scmp.lt.s32.totalorder %s12086_s30, %s12080_s20 }
0x1841   : > { %p18474_p9 = scmp.ne.s32.totalorder %s18472_s18, 0 }
0x1842   : > { %s17552_s22 = scalar_lea.hbm %s18473_s5, %s9839_s12  ;;  %p12089_p11 = por %p12088_p4, %p12087_p6 }
0x1843   : > { %p12082_p7 = pnand %p12081_p8, %p18474_p9 }
0x1845   : > { %p12083_p5 = pneg %p12082_p7 }
0x1847   : > { %p12090_p10 = pnand %p12089_p11, %p12083_p5 }
0x1849   : > { %12093 = shalt.err (!%p12090_p10)
}
0x184a   : > { %s12094_s23 = scalar_lea.hbm %s17552_s22, 2048  ;;  %s12098_s25 = scalar_lea.hbm %s18473_s5, 4096 }
0x184b   : > { %p12095_p2 = scmp.ne.s32.totalorder %s17552_s22, %s12094_s23  ;;  %p12099_p1 = scmp.lt.s32.totalorder %s17552_s22, %s18473_s5 }
0x184c   : > { %p12100_p12 = scmp.lt.s32.totalorder %s12098_s25, %s12094_s23 }
0x184d   : > { %p12096_p3 = pnand %p12095_p2, %p18474_p9 }
0x184e   : > { %p12101_p0 = por %p12100_p12, %p12099_p1 }
0x184f   : > { %p12097_p13 = pneg %p12096_p3 }
0x1851   : > { %p12102_p8 = pnand %p12101_p0, %p12097_p13 }
0x1853   : > { %12105 = shalt.err (!%p12102_p8)
}
0x1854   : > { %s12286_s14 = smov 128   ;;  %s12287_s27 = smov 8  }
0x1855   : > { %10434 = dma.vmem_to_hbm [thread:$0]  (%p18474_p9), %s17555_s9, 2048, %s17552_s22, %s9025_s21, %s12286_s14, %s12286_s14, %s12287_s27  }
0x1856   : > { %s9840_s29 = sshll.u32 %s18471_s1, 12  ;;  %s9059_s8 = sshll.u32 %s12835_s10, 4  ;;  %s17587_s8 = int_to_ptr.vmem [resolvable:$true] %s9059_s8 }
0x1857   : > { %s18475_s13 = sld [smem:[#allocation163_spill]]  ;;  %s9030_s20 = scalar_lea.sflag [#allocation26], %s12751_s0 }
0x1858   : > { %s12106_s28 = scalar_lea.vmem %s17587_s8, 4096  ;;  %s12288_s15 = smov [#allocation25]  }
0x1859   : > { %p12107_p7 = scmp.ne.s32.totalorder %s17587_s8, %s12106_s28  ;;  %s12110_s22 = sshll.u32 %s12288_s15, 4  ;;  %s12111_s22 = int_to_ptr.vmem [resolvable:$false] %s12110_s22 }
0x185a   : > { %s12112_s10 = scalar_lea.vmem %s12111_s22, 8192  ;;  %p12113_p4 = scmp.lt.s32.totalorder %s17587_s8, %s12111_s22 }
0x185b   : > { %p12108_p5 = pnand %p12107_p7, %p18474_p9  ;;  %p12114_p11 = scmp.lt.s32.totalorder %s12112_s10, %s12106_s28 }
0x185d   : > { %s17585_s24 = scalar_lea.hbm %s18475_s13, %s9840_s29  ;;  %p12109_p6 = pneg %p12108_p5 }
0x185e   : > { %p12115_p10 = por %p12114_p11, %p12113_p4 }
0x1860   : > { %p12116_p2 = pnand %p12115_p10, %p12109_p6 }
0x1862   : > { %12119 = shalt.err (!%p12116_p2)
}
0x1863   : > { %s12120_s1 = scalar_lea.hbm %s17585_s24, 4096  ;;  %s12124_s30 = scalar_lea.hbm %s18475_s13, 8192 }
0x1864   : > { %p12121_p3 = scmp.ne.s32.totalorder %s17585_s24, %s12120_s1  ;;  %p12125_p12 = scmp.lt.s32.totalorder %s17585_s24, %s18475_s13 }
0x1865   : > { %p12126_p0 = scmp.lt.s32.totalorder %s12124_s30, %s12120_s1 }
0x1866   : > { %p12122_p13 = pnand %p12121_p3, %p18474_p9 }
0x1867   : > { %p12127_p8 = por %p12126_p0, %p12125_p12 }
0x1868   : > { %p12123_p1 = pneg %p12122_p13 }
0x186a   : > { %p12128_p7 = pnand %p12127_p8, %p12123_p1 }
0x186c   : > { %12131 = shalt.err (!%p12128_p7)
}
0x186d   : > { %s12289_s19 = smov 256   ;;  %s12290_s25 = smov 16  }
0x186e   : > { %10435 = dma.vmem_to_hbm [thread:$0]  (%p18474_p9), %s17587_s8, 4096, %s17585_s24, %s9030_s20, %s12289_s19, %s12289_s19, %s12290_s25  }
0x186f PF: > { %s18476_s26 = sld [smem:[#allocation38_spill]]  ;;  %p10510_p5 = scmp.ge.s32.totalorder %s12258_s2, 2 }
0x1870   : > { %s18477_s3 = sld [smem:[#allocation47_spill]] }
0x1875   : > { %s9074_s14 = sand.u32 1, %s18476_s26  }
0x1876   : > { %p18478_p6 = scmp.ne.s32.totalorder %s18477_s3, 0  ;;  %s9075_s27 = scalar_lea.sflag [#allocation5], %s9074_s14 }
0x1878   : > { %p10483_p4 = pnand %p10510_p5, %p18478_p6 }
0x187a   : > { %p10484_p11 = pneg %p10483_p4 }
0x187c   : > { %12209 = dma.done.wait (%p10484_p11), %s9075_s27, 2048  }
0x187d   : > { %12211 = vsyncadd (%p10484_p11), %s9075_s27, 4294965248  ;;  %s9084_s29 = scalar_lea.sflag [#allocation26], %s9074_s14 }
0x187e   : > { %12213 = dma.done.wait (%p10484_p11), %s9084_s29, 4096  }
0x187f   : > { %12215 = vsyncadd (%p10484_p11), %s9084_s29, 4294963200  ;;  %s51_s2 = sadd.s32 1, %s12258_s2   ;;  %s18479_s27 = sld [smem:[#allocation37_spill]] }
0x1880   : > { %p48_p10 = scmp.ge.s32.totalorder %s51_s2, 6   ;;  %s18480_s28 = sld [smem:[#allocation39_spill]] }
0x1881   : > { %s18481_s0 = sld [smem:[#allocation52_spill]]  ;;  %s18486_s3 = smov %s12226_s7 }
0x1882   : > { %s18482_s29 = sld [smem:[#allocation42_spill]]  ;;  %s18487_s7 = smov %s12584_s16 }
0x1883   : > { %s18483_s18 = sld [smem:[#allocation43_spill]]  ;;  %s18488_s8 = smov %s12238_s4 }
0x1884   : > { %s18484_s9 = sld [smem:[#allocation49_spill]] }
0x1885   : > { %s18485_s30 = sld [smem:[#allocation51_spill]]  ;;  %50 = sbr.rel (!%p48_p10) target bundleno = 44 (0x2c), region = 290 }
0x1887   : > { %s18489_s4 = smov %s18481_s0 }
0x1889   : > { %s18490_s0 = smov %s18483_s18 }
0x188a   :  { %9089 = vsyncpa [#allocation4], 1 }
0x188b   :  { %9091 = vsyncpa [#allocation4 + $0x1], 1 }
0x188c   :  { %9092 = vsyncpa [#allocation7], 1 }
0x188d   :  { %9093 = vsyncpa [#allocation13], 1 }
0x188e   :  { %9094 = vsyncpa [#allocation16], 1 }
0x188f   :  { %9095 = vsyncpa [#allocation19], 1 }
0x1890   :  { %9096 = vsyncpa [#allocation22], 1 }
0x1891   :  { %9097 = vsyncpa [#allocation5], 1 }
0x1892   :  { %9099 = vsyncpa [#allocation5 + $0x1], 1 }
0x1893   :  { %9100 = vsyncpa [#allocation26], 1 }
0x1894   :  { %9102 = vsyncpa [#allocation26 + $0x1], 1 }

</bundles_post_ra>
